<compile_context>
chip_gen: v5e
topology: v5e:2x2
jax: 0.10.0
libtpu: 0.0.40
codegen_flags: <defaults>
</compile_context>

<pallas_src>
import functools

import jax
import jax.numpy as jnp
from jax import lax
from jax.experimental import pallas as pl
from jax.experimental.pallas import tpu as pltpu

_EPS = 1e-5


# --------------------------------------------------------------------------
# in-kernel helpers
# --------------------------------------------------------------------------
def _fill_halo(pad_ref, interior, ps):
    """Write `interior` (tn,H,W,C) into pad_ref's center; zero only the halo strips."""
    tn, Hp, Wp, C = pad_ref.shape
    H, W = Hp - 2 * ps, Wp - 2 * ps
    if ps > 0:
        pad_ref[:, :ps, :, :] = jnp.zeros((tn, ps, Wp, C), pad_ref.dtype)
        pad_ref[:, H + ps:, :, :] = jnp.zeros((tn, ps, Wp, C), pad_ref.dtype)
        pad_ref[:, :, :ps, :] = jnp.zeros((tn, Hp, ps, C), pad_ref.dtype)
        pad_ref[:, :, W + ps:, :] = jnp.zeros((tn, Hp, ps, C), pad_ref.dtype)
    pad_ref[:, ps:H + ps, ps:W + ps, :] = interior.astype(pad_ref.dtype)


def _conv_taps(pad_ref, w_ref, ks, H, W, mm_dtype):
    """ks*ks tap-accumulated MXU matmuls (no im2col slab).

    pad_ref: (tn, H+2p, W+2p, Cin) f32 VMEM scratch (halo already filled)
    w_ref:   (ks*ks, Cin, Co) weights in mm_dtype (tap-major)
    returns  (tn*H*W, Co) f32 accumulator.
    """
    tn, _, _, Cin = pad_ref.shape
    Co = w_ref.shape[-1]
    rows = tn * H * W
    acc = jnp.zeros((rows, Co), jnp.float32)
    for t in range(ks * ks):      # static unroll: LLO sees the whole chain
        kh, kw = divmod(t, ks)
        tap = pad_ref[:, kh:kh + H, kw:kw + W, :].reshape(rows, Cin)
        acc += jnp.dot(tap.astype(mm_dtype), w_ref[t],
                       preferred_element_type=jnp.float32)
    return acc


def _tile_stats(v):
    """Per-channel sum / sum-of-squares of v (rows, C) -> (1, 2, C) f32."""
    s = jnp.sum(v, axis=0, keepdims=True)
    sq = jnp.sum(v * v, axis=0, keepdims=True)
    return jnp.concatenate([s, sq], axis=0)[None]


# --------------------------------------------------------------------------
# kernels
# --------------------------------------------------------------------------
def _conv1x_kernel(ks, ps, mm_dtype,
                   x_ref, w_ref, b_ref,       # inputs
                   y_ref, st_ref,             # outputs
                   pad_ref):                  # scratch
    """conv_ks(x) with the 1x1 shortcut folded in as extra output columns."""
    _, H, W, _ = x_ref.shape
    _fill_halo(pad_ref, x_ref[...], ps)
    acc = _conv_taps(pad_ref, w_ref, ks, H, W, mm_dtype) + b_ref[...]
    y_ref[...] = acc.reshape(y_ref.shape).astype(y_ref.dtype)   # one dense store
    st_ref[...] = _tile_stats(acc)                              # f32 raw stats


def _conv2_kernel(mm_dtype,
                  y1sc_ref, scale1_ref, shift1_ref, w2_ref, b2_ref,  # inputs
                  y2_ref, st_ref,                                    # outputs
                  pad_ref):                                          # scratch
    """BN1 (precomputed scale/shift) + ReLU on the conv1 half, then 3x3 conv."""
    _, H, W, _ = y1sc_ref.shape
    Cout = y2_ref.shape[-1]
    s1 = scale1_ref[...].reshape(1, 1, 1, Cout)
    h1 = shift1_ref[...].reshape(1, 1, 1, Cout)
    y1 = y1sc_ref[...][..., :Cout].astype(jnp.float32)   # conv1 half of fused block
    a = jnp.maximum(y1 * s1 + h1, 0.0)                   # f32 VPU math (v5e-friendly)
    _fill_halo(pad_ref, a, 1)
    acc = _conv_taps(pad_ref, w2_ref, 3, H, W, mm_dtype) + b2_ref[...]
    y2_ref[...] = acc.reshape(y2_ref.shape).astype(y2_ref.dtype)
    st_ref[...] = _tile_stats(acc)


def _bn_add_kernel(y2_ref, y1sc_ref, scale2_ref, shift2_ref, scalex_ref, shiftx_ref,
                   out_ref):
    """BN2 + ReLU on the main path, BNx on the shortcut half, residual add."""
    Cout = y2_ref.shape[-1]
    s2 = scale2_ref[...].reshape(1, 1, 1, Cout)
    h2 = shift2_ref[...].reshape(1, 1, 1, Cout)
    sx = scalex_ref[...].reshape(1, 1, 1, Cout)
    hx = shiftx_ref[...].reshape(1, 1, 1, Cout)
    main = jnp.maximum(y2_ref[...].astype(jnp.float32) * s2 + h2, 0.0)
    short = y1sc_ref[...][..., Cout:].astype(jnp.float32) * sx + hx
    out_ref[...] = (main + short).astype(out_ref.dtype)


# --------------------------------------------------------------------------
# wrapper helpers
# --------------------------------------------------------------------------
def _finalize_bn(stats, gamma, beta, count):
    """(n_tiles, 2, C) per-tile sum / sumsq -> BN (scale, shift), each (1, C) f32."""
    sums = jnp.sum(stats[:, 0, :], axis=0)
    sqs = jnp.sum(stats[:, 1, :], axis=0)
    mean = sums / count
    var = jnp.maximum(sqs / count - mean * mean, 0.0)   # guard E[x^2]-E[x]^2 cancellation
    inv = lax.rsqrt(var + _EPS)
    scale = (gamma * inv).reshape(1, -1).astype(jnp.float32)
    shift = (beta - gamma * mean * inv).reshape(1, -1).astype(jnp.float32)
    return scale, shift


def _pick_vmem_limit():
    """Generation-dependent scoped-VMEM budget (leave headroom for Mosaic)."""
    cap = 64 * 1024 * 1024                          # v7x per-TC capacity as fallback
    try:
        cap = int(getattr(pltpu.get_tpu_info(), "vmem_capacity_bytes", cap))
    except Exception:
        pass
    return int(min(cap - 16 * 1024 * 1024, 100 * 1024 * 1024))


def _choose_tile_n(N, H, W, Cin, Cout, ps, vmem_limit):
    """Largest divisor of N whose per-grid-step working set fits ~1/4 of the
    VMEM budget, keeping >= 2 grid steps when N > 1 (both v7x TensorCores)."""
    hw = H * W
    p1 = hw * (4 * Cin + 2 * 2 * Cout + 4 * 2 * Cout) \
        + 4 * (H + 2 * ps) * (W + 2 * ps) * Cin
    p2 = hw * (2 * 2 * Cout + 2 * Cout + 4 * Cout) + 4 * (H + 2) * (W + 2) * Cout
    p3 = hw * (2 * Cout + 2 * 2 * Cout + 4 * Cout)
    per_n = max(p1, p2, p3)
    budget = vmem_limit // 4
    best = 1
    for t in range(1, N + 1):
        if N % t or t * per_n > budget:
            continue
        if N > 1 and N // t < 2:
            continue
        best = t
    return best


# --------------------------------------------------------------------------
# wrapper
# --------------------------------------------------------------------------
def resblock_pallas(x_nchw, params, *, ks, ss, ps, tile_n=None,
                    compute_dtype=jnp.bfloat16):
    """x_nchw: (N, Cin, H, W) float32 -> (N, Cout, H, W) float32.

    compute_dtype controls the MXU operand dtype, the weight storage dtype and
    the inter-pass activation (HBM) dtype.  Accumulation, BN statistics and
    all VPU elementwise math stay float32.
    """
    assert ss == 1, "residual add requires stride 1"
    N, Cin, H, W = x_nchw.shape
    assert ks == 2 * ps + 1, "first conv must preserve spatial dims"

    (w1, b1, g1, be1, w2, b2, g2, be2, wx, bx, gx, bex) = params
    Cout = w1.shape[0]
    f32 = jnp.float32
    cdt = compute_dtype

    # NCHW -> NHWC (channels on the lane axis inside the kernels).
    x = jnp.transpose(x_nchw, (0, 2, 3, 1)).astype(f32)

    # conv1 weights in tap-major form (ks*ks, Cin, 2*Cout); the 1x1 shortcut
    # weights are folded in as Cout extra output columns on the center tap.
    w1_taps = jnp.transpose(w1, (2, 3, 1, 0)).reshape(ks * ks, Cin, Cout).astype(f32)
    wx_flat = jnp.transpose(wx[:, :, 0, 0], (1, 0)).astype(f32)        # (Cin, Cout)
    center = ps * ks + ps
    w1x = jnp.zeros((ks * ks, Cin, 2 * Cout), f32)
    w1x = w1x.at[:, :, :Cout].set(w1_taps)
    w1x = w1x.at[center, :, Cout:].set(wx_flat)
    w1x = w1x.astype(cdt)
    b1x = jnp.concatenate([b1, bx]).reshape(1, 2 * Cout).astype(f32)

    w2_taps = jnp.transpose(w2, (2, 3, 1, 0)).reshape(9, Cout, Cout).astype(cdt)
    b2r = b2.reshape(1, Cout).astype(f32)

    vmem_limit = _pick_vmem_limit()
    if tile_n is None:
        tile_n = _choose_tile_n(N, H, W, Cin, Cout, ps, vmem_limit)
    assert N % tile_n == 0
    n_tiles = N // tile_n
    grid = (n_tiles,)
    cparams = pltpu.CompilerParams(
        dimension_semantics=("parallel",),        # batch tiles are independent
        vmem_limit_bytes=vmem_limit)

    def act_spec(c):
        return pl.BlockSpec((tile_n, H, W, c), lambda i: (i, 0, 0, 0))

    def full_spec(shape):
        nd = len(shape)
        return pl.BlockSpec(shape, lambda i: (0,) * nd)

    def stats_spec(c):
        return pl.BlockSpec((1, 2, c), lambda i: (i, 0, 0))

    # ---- pass 1: conv_ks(x) + folded 1x1 shortcut -> one fused output -------
    y1sc, st1 = pl.pallas_call(
        functools.partial(_conv1x_kernel, ks, ps, cdt),
        grid_spec=pltpu.PrefetchScalarGridSpec(
            num_scalar_prefetch=0, grid=grid,
            in_specs=[act_spec(Cin),
                      full_spec((ks * ks, Cin, 2 * Cout)),
                      full_spec((1, 2 * Cout))],
            out_specs=(act_spec(2 * Cout), stats_spec(2 * Cout)),
            scratch_shapes=[pltpu.VMEM((tile_n, H + 2 * ps, W + 2 * ps, Cin), f32)]),
        out_shape=(jax.ShapeDtypeStruct((N, H, W, 2 * Cout), cdt),
                   jax.ShapeDtypeStruct((n_tiles, 2, 2 * Cout), f32)),
        compiler_params=cparams,
    )(x, w1x, b1x)

    cnt = float(N * H * W)
    scale1, shift1 = _finalize_bn(st1[:, :, :Cout], g1.astype(f32), be1.astype(f32), cnt)
    scalex, shiftx = _finalize_bn(st1[:, :, Cout:], gx.astype(f32), bex.astype(f32), cnt)

    # ---- pass 2: BN1 + ReLU + conv3x3 + raw per-tile stats -------------------
    y2, st2 = pl.pallas_call(
        functools.partial(_conv2_kernel, cdt),
        grid_spec=pltpu.PrefetchScalarGridSpec(
            num_scalar_prefetch=0, grid=grid,
            in_specs=[act_spec(2 * Cout),
                      full_spec((1, Cout)), full_spec((1, Cout)),
                      full_spec((9, Cout, Cout)),
                      full_spec((1, Cout))],
            out_specs=(act_spec(Cout), stats_spec(Cout)),
            scratch_shapes=[pltpu.VMEM((tile_n, H + 2, W + 2, Cout), f32)]),
        out_shape=(jax.ShapeDtypeStruct((N, H, W, Cout), cdt),
                   jax.ShapeDtypeStruct((n_tiles, 2, Cout), f32)),
        compiler_params=cparams,
    )(y1sc, scale1, shift1, w2_taps, b2r)

    scale2, shift2 = _finalize_bn(st2, g2.astype(f32), be2.astype(f32), cnt)

    # ---- pass 3: BN2 + ReLU + BNx(shortcut) + residual add -------------------
    out_nhwc = pl.pallas_call(
        _bn_add_kernel,
        grid_spec=pltpu.PrefetchScalarGridSpec(
            num_scalar_prefetch=0, grid=grid,
            in_specs=[act_spec(Cout), act_spec(2 * Cout),
                      full_spec((1, Cout)), full_spec((1, Cout)),
                      full_spec((1, Cout)), full_spec((1, Cout))],
            out_specs=act_spec(Cout)),
        out_shape=jax.ShapeDtypeStruct((N, H, W, Cout), f32),
        compiler_params=cparams,
    )(y2, y1sc, scale2, shift2, scalex, shiftx)

    return jnp.transpose(out_nhwc, (0, 3, 1, 2))   # back to NCHW


# ----------------------------- pure-JAX reference -----------------------------
def _conv_ref(x, w, b, stride, pad):
    y = lax.conv_general_dilated(
        x, w, (stride, stride), [(pad, pad), (pad, pad)],
        dimension_numbers=("NCHW", "OIHW", "NCHW"))
    return y + b[None, :, None, None]


def _bn_ref(y, g, be):
    mu = jnp.mean(y, axis=(0, 2, 3), keepdims=True)
    var = jnp.mean((y - mu) ** 2, axis=(0, 2, 3), keepdims=True)
    return g[None, :, None, None] * (y - mu) * lax.rsqrt(var + _EPS) + \
        be[None, :, None, None]


def resblock_ref(x, params, *, ks, ss, ps):
    (w1, b1, g1, be1, w2, b2, g2, be2, wx, bx, gx, bex) = params
    y = jnp.maximum(_bn_ref(_conv_ref(x, w1, b1, ss, ps), g1, be1), 0.0)
    y = jnp.maximum(_bn_ref(_conv_ref(y, w2, b2, 1, 1), g2, be2), 0.0)
    xt = _bn_ref(_conv_ref(x, wx, bx, 1, 0), gx, bex)
    return y + xt


# ----------------------------------- main -----------------------------------
if __name__ == "__main__":
    N, Cin, Cout, H, W = 2, 4, 8, 16, 16
    ks, ss, ps = 3, 1, 1

    key = jax.random.PRNGKey(0)
    keys = jax.random.split(key, 16)

    def init(k, shape, scale=0.1):
        return scale * jax.random.normal(k, shape, dtype=jnp.float32)

    # Deterministic synthetic parameters (shapes from ResBlock.__init__).
    w1 = init(keys[0], (Cout, Cin, ks, ks))
    b1 = init(keys[1], (Cout,))
    g1 = 1.0 + init(keys[2], (Cout,))
    be1 = init(keys[3], (Cout,))
    w2 = init(keys[4], (Cout, Cout, 3, 3))
    b2 = init(keys[5], (Cout,))
    g2 = 1.0 + init(keys[6], (Cout,))
    be2 = init(keys[7], (Cout,))
    wx = init(keys[8], (Cout, Cin, 1, 1))
    bx = init(keys[9], (Cout,))
    gx = 1.0 + init(keys[10], (Cout,))
    bex = init(keys[11], (Cout,))
    params = (w1, b1, g1, be1, w2, b2, g2, be2, wx, bx, gx, bex)

    x = jax.random.normal(keys[12], (N, Cin, H, W), dtype=jnp.float32)

    ref = jax.block_until_ready(resblock_ref(x, params, ks=ks, ss=ss, ps=ps))

    # Exact-path sanity check (f32 MXU operands + f32 intermediates).
    run_f32 = jax.jit(functools.partial(resblock_pallas, ks=ks, ss=ss, ps=ps,
                                        compute_dtype=jnp.float32))
    out_f32 = jax.block_until_ready(run_f32(x, params))
    assert out_f32.shape == (N, Cout, H, W)
    assert jnp.allclose(out_f32, ref, rtol=1e-4, atol=1e-4), \
        f"f32 path: max abs err = {jnp.max(jnp.abs(out_f32 - ref))}"

    # Default fast path: bf16 MXU operands + bf16 inter-pass activations,
    # f32 accumulation / BN stats / elementwise math (looser tolerance).
    run = jax.jit(functools.partial(resblock_pallas, ks=ks, ss=ss, ps=ps))
    out = jax.block_until_ready(run(x, params))
    assert out.shape == (N, Cout, H, W)
    assert jnp.allclose(out, ref, rtol=5e-2, atol=5e-2), \
        f"bf16 path: max abs err = {jnp.max(jnp.abs(out - ref))}"

    print("KERNEL_OK")
</pallas_src>

<mosaic_0001>
module attributes {stable_mosaic.version = 11 : i64} {
  func.func @_conv2_kernel(%arg0: i32, %arg1: memref<1x16x16x16xf32, #tpu.memory_space<vmem>>, %arg2: memref<1x8xf32, #tpu.memory_space<vmem>>, %arg3: memref<1x8xf32, #tpu.memory_space<vmem>>, %arg4: memref<9x8x8xf32, #tpu.memory_space<vmem>>, %arg5: memref<1x8xf32, #tpu.memory_space<vmem>>, %arg6: memref<1x16x16x8xf32, #tpu.memory_space<vmem>>, %arg7: memref<1x2x8xf32, #tpu.memory_space<vmem>>, %arg8: memref<1x18x18x8xf32, #tpu.memory_space<vmem>>) attributes {dimension_semantics = [#tpu.dimension_semantics<parallel>], iteration_bounds = array<i64: 2>, scalar_prefetch = 0 : i64, scratch_operands = 1 : i64, tpu.core_type = #tpu.core_type<tc>, window_params = [{transform_indices = @transform_0, window_bounds = array<i64: 1, 16, 16, 16>}, {pipeline_mode = #tpu.pipeline_mode<synchronous>, transform_indices = @transform_1, window_bounds = array<i64: 1, 8>}, {pipeline_mode = #tpu.pipeline_mode<synchronous>, transform_indices = @transform_2, window_bounds = array<i64: 1, 8>}, {pipeline_mode = #tpu.pipeline_mode<synchronous>, transform_indices = @transform_3, window_bounds = array<i64: 9, 8, 8>}, {pipeline_mode = #tpu.pipeline_mode<synchronous>, transform_indices = @transform_4, window_bounds = array<i64: 1, 8>}, {transform_indices = @transform_5, window_bounds = array<i64: 1, 16, 16, 8>}, {transform_indices = @transform_6, window_bounds = array<i64: 1, 2, 8>}]} {
    %c0 = arith.constant 0 : index
    %c0_0 = arith.constant 0 : index
    %0 = vector.load %arg2[%c0, %c0_0] : memref<1x8xf32, #tpu.memory_space<vmem>>, vector<1x8xf32>
    %1 = vector.shape_cast %0 : vector<1x8xf32> to vector<1x1x1x8xf32>
    %c0_1 = arith.constant 0 : index
    %c0_2 = arith.constant 0 : index
    %2 = vector.load %arg3[%c0_1, %c0_2] : memref<1x8xf32, #tpu.memory_space<vmem>>, vector<1x8xf32>
    %3 = vector.shape_cast %2 : vector<1x8xf32> to vector<1x1x1x8xf32>
    %c0_3 = arith.constant 0 : index
    %c0_4 = arith.constant 0 : index
    %c0_5 = arith.constant 0 : index
    %c0_6 = arith.constant 0 : index
    %4 = vector.load %arg1[%c0_3, %c0_4, %c0_5, %c0_6] : memref<1x16x16x16xf32, #tpu.memory_space<vmem>>, vector<1x16x16x16xf32>
    %5 = vector.extract_strided_slice %4 {offsets = [0, 0, 0, 0], sizes = [1, 16, 16, 8], strides = [1, 1, 1, 1]} : vector<1x16x16x16xf32> to vector<1x16x16x8xf32>
    %6 = vector.broadcast %1 : vector<1x1x1x8xf32> to vector<1x16x16x8xf32>
    %7 = arith.mulf %5, %6 : vector<1x16x16x8xf32>
    %8 = vector.broadcast %3 : vector<1x1x1x8xf32> to vector<1x16x16x8xf32>
    %9 = arith.addf %7, %8 : vector<1x16x16x8xf32>
    %cst = arith.constant 0.000000e+00 : f32
    %10 = vector.broadcast %cst : f32 to vector<1x16x16x8xf32>
    %11 = arith.maximumf %9, %10 : vector<1x16x16x8xf32>
    %cst_7 = arith.constant 0.000000e+00 : f32
    %12 = vector.broadcast %cst_7 : f32 to vector<1x1x18x8xf32>
    %c0_8 = arith.constant 0 : index
    %c0_9 = arith.constant 0 : index
    %c0_10 = arith.constant 0 : index
    %c0_11 = arith.constant 0 : index
    %13 = vector.load %arg8[%c0_8, %c0_9, %c0_10, %c0_11] : memref<1x18x18x8xf32, #tpu.memory_space<vmem>>, vector<1x1x18x8xf32>
    tpu.vector_store %arg8[%c0_8, %c0_9, %c0_10, %c0_11], %12 {strides = array<i32>} : memref<1x18x18x8xf32, #tpu.memory_space<vmem>>, vector<1x1x18x8xf32>,
    %cst_12 = arith.constant 0.000000e+00 : f32
    %14 = vector.broadcast %cst_12 : f32 to vector<1x1x18x8xf32>
    %c0_13 = arith.constant 0 : index
    %c17 = arith.constant 17 : index
    %c0_14 = arith.constant 0 : index
    %c0_15 = arith.constant 0 : index
    %15 = vector.load %arg8[%c0_13, %c17, %c0_14, %c0_15] : memref<1x18x18x8xf32, #tpu.memory_space<vmem>>, vector<1x1x18x8xf32>
    tpu.vector_store %arg8[%c0_13, %c17, %c0_14, %c0_15], %14 {strides = array<i32>} : memref<1x18x18x8xf32, #tpu.memory_space<vmem>>, vector<1x1x18x8xf32>,
    %cst_16 = arith.constant 0.000000e+00 : f32
    %16 = vector.broadcast %cst_16 : f32 to vector<1x18x1x8xf32>
    %c0_17 = arith.constant 0 : index
    %c0_18 = arith.constant 0 : index
    %c0_19 = arith.constant 0 : index
    %c0_20 = arith.constant 0 : index
    %17 = vector.load %arg8[%c0_17, %c0_18, %c0_19, %c0_20] : memref<1x18x18x8xf32, #tpu.memory_space<vmem>>, vector<1x18x1x8xf32>
    tpu.vector_store %arg8[%c0_17, %c0_18, %c0_19, %c0_20], %16 {strides = array<i32>} : memref<1x18x18x8xf32, #tpu.memory_space<vmem>>, vector<1x18x1x8xf32>,
    %cst_21 = arith.constant 0.000000e+00 : f32
    %18 = vector.broadcast %cst_21 : f32 to vector<1x18x1x8xf32>
    %c0_22 = arith.constant 0 : index
    %c0_23 = arith.constant 0 : index
    %c17_24 = arith.constant 17 : index
    %c0_25 = arith.constant 0 : index
    %19 = vector.load %arg8[%c0_22, %c0_23, %c17_24, %c0_25] : memref<1x18x18x8xf32, #tpu.memory_space<vmem>>, vector<1x18x1x8xf32>
    tpu.vector_store %arg8[%c0_22, %c0_23, %c17_24, %c0_25], %18 {strides = array<i32>} : memref<1x18x18x8xf32, #tpu.memory_space<vmem>>, vector<1x18x1x8xf32>,
    %c0_26 = arith.constant 0 : index
    %c1 = arith.constant 1 : index
    %c1_27 = arith.constant 1 : index
    %c0_28 = arith.constant 0 : index
    %20 = vector.load %arg8[%c0_26, %c1, %c1_27, %c0_28] : memref<1x18x18x8xf32, #tpu.memory_space<vmem>>, vector<1x16x16x8xf32>
    tpu.vector_store %arg8[%c0_26, %c1, %c1_27, %c0_28], %11 {strides = array<i32>} : memref<1x18x18x8xf32, #tpu.memory_space<vmem>>, vector<1x16x16x8xf32>,
    %cst_29 = arith.constant 0.000000e+00 : f32
    %21 = vector.broadcast %cst_29 : f32 to vector<256x8xf32>
    %c0_30 = arith.constant 0 : index
    %c0_31 = arith.constant 0 : index
    %c0_32 = arith.constant 0 : index
    %c0_33 = arith.constant 0 : index
    %22 = vector.load %arg8[%c0_30, %c0_31, %c0_32, %c0_33] : memref<1x18x18x8xf32, #tpu.memory_space<vmem>>, vector<1x16x16x8xf32>
    %23 = vector.shape_cast %22 : vector<1x16x16x8xf32> to vector<256x8xf32>
    %c0_34 = arith.constant 0 : index
    %c0_35 = arith.constant 0 : index
    %c0_36 = arith.constant 0 : index
    %24 = vector.load %arg4[%c0_34, %c0_35, %c0_36] : memref<9x8x8xf32, #tpu.memory_space<vmem>>, vector<1x8x8xf32>
    %25 = vector.shape_cast %24 : vector<1x8x8xf32> to vector<8x8xf32>
    %cst_37 = arith.constant dense<0.000000e+00> : vector<256x8xf32>
    %26 = tpu.matmul %23, %25, %cst_37 {dimension_numbers = #tpu.dot_dimension_numbers<[1], [0], [0], [1], [0, 0, 1, 1], [], []>} : vector<256x8xf32>, vector<8x8xf32>, vector<256x8xf32> -> vector<256x8xf32>
    %27 = arith.addf %21, %26 : vector<256x8xf32>
    %c0_38 = arith.constant 0 : index
    %c0_39 = arith.constant 0 : index
    %c1_40 = arith.constant 1 : index
    %c0_41 = arith.constant 0 : index
    %28 = vector.load %arg8[%c0_38, %c0_39, %c1_40, %c0_41] : memref<1x18x18x8xf32, #tpu.memory_space<vmem>>, vector<1x16x16x8xf32>
    %29 = vector.shape_cast %28 : vector<1x16x16x8xf32> to vector<256x8xf32>
    %c1_42 = arith.constant 1 : index
    %c0_43 = arith.constant 0 : index
    %c0_44 = arith.constant 0 : index
    %30 = vector.load %arg4[%c1_42, %c0_43, %c0_44] : memref<9x8x8xf32, #tpu.memory_space<vmem>>, vector<1x8x8xf32>
    %31 = vector.shape_cast %30 : vector<1x8x8xf32> to vector<8x8xf32>
    %cst_45 = arith.constant dense<0.000000e+00> : vector<256x8xf32>
    %32 = tpu.matmul %29, %31, %cst_45 {dimension_numbers = #tpu.dot_dimension_numbers<[1], [0], [0], [1], [0, 0, 1, 1], [], []>} : vector<256x8xf32>, vector<8x8xf32>, vector<256x8xf32> -> vector<256x8xf32>
    %33 = arith.addf %27, %32 : vector<256x8xf32>
    %c0_46 = arith.constant 0 : index
    %c0_47 = arith.constant 0 : index
    %c2 = arith.constant 2 : index
    %c0_48 = arith.constant 0 : index
    %34 = vector.load %arg8[%c0_46, %c0_47, %c2, %c0_48] : memref<1x18x18x8xf32, #tpu.memory_space<vmem>>, vector<1x16x16x8xf32>
    %35 = vector.shape_cast %34 : vector<1x16x16x8xf32> to vector<256x8xf32>
    %c2_49 = arith.constant 2 : index
    %c0_50 = arith.constant 0 : index
    %c0_51 = arith.constant 0 : index
    %36 = vector.load %arg4[%c2_49, %c0_50, %c0_51] : memref<9x8x8xf32, #tpu.memory_space<vmem>>, vector<1x8x8xf32>
    %37 = vector.shape_cast %36 : vector<1x8x8xf32> to vector<8x8xf32>
    %cst_52 = arith.constant dense<0.000000e+00> : vector<256x8xf32>
    %38 = tpu.matmul %35, %37, %cst_52 {dimension_numbers = #tpu.dot_dimension_numbers<[1], [0], [0], [1], [0, 0, 1, 1], [], []>} : vector<256x8xf32>, vector<8x8xf32>, vector<256x8xf32> -> vector<256x8xf32>
    %39 = arith.addf %33, %38 : vector<256x8xf32>
    %c0_53 = arith.constant 0 : index
    %c1_54 = arith.constant 1 : index
    %c0_55 = arith.constant 0 : index
    %c0_56 = arith.constant 0 : index
    %40 = vector.load %arg8[%c0_53, %c1_54, %c0_55, %c0_56] : memref<1x18x18x8xf32, #tpu.memory_space<vmem>>, vector<1x16x16x8xf32>
    %41 = vector.shape_cast %40 : vector<1x16x16x8xf32> to vector<256x8xf32>
    %c3 = arith.constant 3 : index
    %c0_57 = arith.constant 0 : index
    %c0_58 = arith.constant 0 : index
    %42 = vector.load %arg4[%c3, %c0_57, %c0_58] : memref<9x8x8xf32, #tpu.memory_space<vmem>>, vector<1x8x8xf32>
    %43 = vector.shape_cast %42 : vector<1x8x8xf32> to vector<8x8xf32>
    %cst_59 = arith.constant dense<0.000000e+00> : vector<256x8xf32>
    %44 = tpu.matmul %41, %43, %cst_59 {dimension_numbers = #tpu.dot_dimension_numbers<[1], [0], [0], [1], [0, 0, 1, 1], [], []>} : vector<256x8xf32>, vector<8x8xf32>, vector<256x8xf32> -> vector<256x8xf32>
    %45 = arith.addf %39, %44 : vector<256x8xf32>
    %c0_60 = arith.constant 0 : index
    %c1_61 = arith.constant 1 : index
    %c1_62 = arith.constant 1 : index
    %c0_63 = arith.constant 0 : index
    %46 = vector.load %arg8[%c0_60, %c1_61, %c1_62, %c0_63] : memref<1x18x18x8xf32, #tpu.memory_space<vmem>>, vector<1x16x16x8xf32>
    %47 = vector.shape_cast %46 : vector<1x16x16x8xf32> to vector<256x8xf32>
    %c4 = arith.constant 4 : index
    %c0_64 = arith.constant 0 : index
    %c0_65 = arith.constant 0 : index
    %48 = vector.load %arg4[%c4, %c0_64, %c0_65] : memref<9x8x8xf32, #tpu.memory_space<vmem>>, vector<1x8x8xf32>
    %49 = vector.shape_cast %48 : vector<1x8x8xf32> to vector<8x8xf32>
    %cst_66 = arith.constant dense<0.000000e+00> : vector<256x8xf32>
    %50 = tpu.matmul %47, %49, %cst_66 {dimension_numbers = #tpu.dot_dimension_numbers<[1], [0], [0], [1], [0, 0, 1, 1], [], []>} : vector<256x8xf32>, vector<8x8xf32>, vector<256x8xf32> -> vector<256x8xf32>
    %51 = arith.addf %45, %50 : vector<256x8xf32>
    %c0_67 = arith.constant 0 : index
    %c1_68 = arith.constant 1 : index
    %c2_69 = arith.constant 2 : index
    %c0_70 = arith.constant 0 : index
    %52 = vector.load %arg8[%c0_67, %c1_68, %c2_69, %c0_70] : memref<1x18x18x8xf32, #tpu.memory_space<vmem>>, vector<1x16x16x8xf32>
    %53 = vector.shape_cast %52 : vector<1x16x16x8xf32> to vector<256x8xf32>
    %c5 = arith.constant 5 : index
    %c0_71 = arith.constant 0 : index
    %c0_72 = arith.constant 0 : index
    %54 = vector.load %arg4[%c5, %c0_71, %c0_72] : memref<9x8x8xf32, #tpu.memory_space<vmem>>, vector<1x8x8xf32>
    %55 = vector.shape_cast %54 : vector<1x8x8xf32> to vector<8x8xf32>
    %cst_73 = arith.constant dense<0.000000e+00> : vector<256x8xf32>
    %56 = tpu.matmul %53, %55, %cst_73 {dimension_numbers = #tpu.dot_dimension_numbers<[1], [0], [0], [1], [0, 0, 1, 1], [], []>} : vector<256x8xf32>, vector<8x8xf32>, vector<256x8xf32> -> vector<256x8xf32>
    %57 = arith.addf %51, %56 : vector<256x8xf32>
    %c0_74 = arith.constant 0 : index
    %c2_75 = arith.constant 2 : index
    %c0_76 = arith.constant 0 : index
    %c0_77 = arith.constant 0 : index
    %58 = vector.load %arg8[%c0_74, %c2_75, %c0_76, %c0_77] : memref<1x18x18x8xf32, #tpu.memory_space<vmem>>, vector<1x16x16x8xf32>
    %59 = vector.shape_cast %58 : vector<1x16x16x8xf32> to vector<256x8xf32>
    %c6 = arith.constant 6 : index
    %c0_78 = arith.constant 0 : index
    %c0_79 = arith.constant 0 : index
    %60 = vector.load %arg4[%c6, %c0_78, %c0_79] : memref<9x8x8xf32, #tpu.memory_space<vmem>>, vector<1x8x8xf32>
    %61 = vector.shape_cast %60 : vector<1x8x8xf32> to vector<8x8xf32>
    %cst_80 = arith.constant dense<0.000000e+00> : vector<256x8xf32>
    %62 = tpu.matmul %59, %61, %cst_80 {dimension_numbers = #tpu.dot_dimension_numbers<[1], [0], [0], [1], [0, 0, 1, 1], [], []>} : vector<256x8xf32>, vector<8x8xf32>, vector<256x8xf32> -> vector<256x8xf32>
    %63 = arith.addf %57, %62 : vector<256x8xf32>
    %c0_81 = arith.constant 0 : index
    %c2_82 = arith.constant 2 : index
    %c1_83 = arith.constant 1 : index
    %c0_84 = arith.constant 0 : index
    %64 = vector.load %arg8[%c0_81, %c2_82, %c1_83, %c0_84] : memref<1x18x18x8xf32, #tpu.memory_space<vmem>>, vector<1x16x16x8xf32>
    %65 = vector.shape_cast %64 : vector<1x16x16x8xf32> to vector<256x8xf32>
    %c7 = arith.constant 7 : index
    %c0_85 = arith.constant 0 : index
    %c0_86 = arith.constant 0 : index
    %66 = vector.load %arg4[%c7, %c0_85, %c0_86] : memref<9x8x8xf32, #tpu.memory_space<vmem>>, vector<1x8x8xf32>
    %67 = vector.shape_cast %66 : vector<1x8x8xf32> to vector<8x8xf32>
    %cst_87 = arith.constant dense<0.000000e+00> : vector<256x8xf32>
    %68 = tpu.matmul %65, %67, %cst_87 {dimension_numbers = #tpu.dot_dimension_numbers<[1], [0], [0], [1], [0, 0, 1, 1], [], []>} : vector<256x8xf32>, vector<8x8xf32>, vector<256x8xf32> -> vector<256x8xf32>
    %69 = arith.addf %63, %68 : vector<256x8xf32>
    %c0_88 = arith.constant 0 : index
    %c2_89 = arith.constant 2 : index
    %c2_90 = arith.constant 2 : index
    %c0_91 = arith.constant 0 : index
    %70 = vector.load %arg8[%c0_88, %c2_89, %c2_90, %c0_91] : memref<1x18x18x8xf32, #tpu.memory_space<vmem>>, vector<1x16x16x8xf32>
    %71 = vector.shape_cast %70 : vector<1x16x16x8xf32> to vector<256x8xf32>
    %c8 = arith.constant 8 : index
    %c0_92 = arith.constant 0 : index
    %c0_93 = arith.constant 0 : index
    %72 = vector.load %arg4[%c8, %c0_92, %c0_93] : memref<9x8x8xf32, #tpu.memory_space<vmem>>, vector<1x8x8xf32>
    %73 = vector.shape_cast %72 : vector<1x8x8xf32> to vector<8x8xf32>
    %cst_94 = arith.constant dense<0.000000e+00> : vector<256x8xf32>
    %74 = tpu.matmul %71, %73, %cst_94 {dimension_numbers = #tpu.dot_dimension_numbers<[1], [0], [0], [1], [0, 0, 1, 1], [], []>} : vector<256x8xf32>, vector<8x8xf32>, vector<256x8xf32> -> vector<256x8xf32>
    %75 = arith.addf %69, %74 : vector<256x8xf32>
    %c0_95 = arith.constant 0 : index
    %c0_96 = arith.constant 0 : index
    %76 = vector.load %arg5[%c0_95, %c0_96] : memref<1x8xf32, #tpu.memory_space<vmem>>, vector<1x8xf32>
    %77 = vector.broadcast %76 : vector<1x8xf32> to vector<256x8xf32>
    %78 = arith.addf %75, %77 : vector<256x8xf32>
    %79 = vector.shape_cast %78 : vector<256x8xf32> to vector<1x16x16x8xf32>
    %c0_97 = arith.constant 0 : index
    %c0_98 = arith.constant 0 : index
    %c0_99 = arith.constant 0 : index
    %c0_100 = arith.constant 0 : index
    %80 = vector.load %arg6[%c0_97, %c0_98, %c0_99, %c0_100] : memref<1x16x16x8xf32, #tpu.memory_space<vmem>>, vector<1x16x16x8xf32>
    tpu.vector_store %arg6[%c0_97, %c0_98, %c0_99, %c0_100], %79 {strides = array<i32>} : memref<1x16x16x8xf32, #tpu.memory_space<vmem>>, vector<1x16x16x8xf32>,
    %cst_101 = arith.constant dense<0.000000e+00> : vector<8xf32>
    %81 = vector.multi_reduction <add>, %78, %cst_101 [0] : vector<256x8xf32> to vector<8xf32>
    %82 = vector.shape_cast %81 : vector<8xf32> to vector<1x8xf32>
    %83 = arith.mulf %78, %78 : vector<256x8xf32>
    %cst_102 = arith.constant dense<0.000000e+00> : vector<8xf32>
    %84 = vector.multi_reduction <add>, %83, %cst_102 [0] : vector<256x8xf32> to vector<8xf32>
    %85 = vector.shape_cast %84 : vector<8xf32> to vector<1x8xf32>
    %86 = tpu.concatenate %82, %85 in 0 : vector<1x8xf32>, vector<1x8xf32> -> vector<2x8xf32>
    %87 = vector.shape_cast %86 : vector<2x8xf32> to vector<1x2x8xf32>
    %c0_103 = arith.constant 0 : index
    %c0_104 = arith.constant 0 : index
    %c0_105 = arith.constant 0 : index
    %88 = vector.load %arg7[%c0_103, %c0_104, %c0_105] : memref<1x2x8xf32, #tpu.memory_space<vmem>>, vector<1x2x8xf32>
    tpu.vector_store %arg7[%c0_103, %c0_104, %c0_105], %87 {strides = array<i32>} : memref<1x2x8xf32, #tpu.memory_space<vmem>>, vector<1x2x8xf32>,
    return
  }
  func.func @transform_0(%arg0: i32) -> (i32, i32, i32, i32) {
    %c0_i32 = arith.constant 0 : i32
    %c0_i32_0 = arith.constant 0 : i32
    %c0_i32_1 = arith.constant 0 : i32
    %c0_i32_2 = arith.constant 0 : i32
    return %arg0, %c0_i32, %c0_i32_0, %c0_i32_1 : i32, i32, i32, i32
  }
  func.func @transform_1(%arg0: i32) -> (i32, i32) {
    %c0_i32 = arith.constant 0 : i32
    %c0_i32_0 = arith.constant 0 : i32
    %c0_i32_1 = arith.constant 0 : i32
    return %c0_i32, %c0_i32_0 : i32, i32
  }
  func.func @transform_2(%arg0: i32) -> (i32, i32) {
    %c0_i32 = arith.constant 0 : i32
    %c0_i32_0 = arith.constant 0 : i32
    %c0_i32_1 = arith.constant 0 : i32
    return %c0_i32, %c0_i32_0 : i32, i32
  }
  func.func @transform_3(%arg0: i32) -> (i32, i32, i32) {
    %c0_i32 = arith.constant 0 : i32
    %c0_i32_0 = arith.constant 0 : i32
    %c0_i32_1 = arith.constant 0 : i32
    %c0_i32_2 = arith.constant 0 : i32
    return %c0_i32, %c0_i32_0, %c0_i32_1 : i32, i32, i32
  }
  func.func @transform_4(%arg0: i32) -> (i32, i32) {
    %c0_i32 = arith.constant 0 : i32
    %c0_i32_0 = arith.constant 0 : i32
    %c0_i32_1 = arith.constant 0 : i32
    return %c0_i32, %c0_i32_0 : i32, i32
  }
  func.func @transform_5(%arg0: i32) -> (i32, i32, i32, i32) {
    %c0_i32 = arith.constant 0 : i32
    %c0_i32_0 = arith.constant 0 : i32
    %c0_i32_1 = arith.constant 0 : i32
    %c0_i32_2 = arith.constant 0 : i32
    return %arg0, %c0_i32, %c0_i32_0, %c0_i32_1 : i32, i32, i32, i32
  }
  func.func @transform_6(%arg0: i32) -> (i32, i32, i32) {
    %c0_i32 = arith.constant 0 : i32
    %c0_i32_0 = arith.constant 0 : i32
    %c0_i32_1 = arith.constant 0 : i32
    return %arg0, %c0_i32, %c0_i32_0 : i32, i32, i32
  }
}

module attributes {stable_mosaic.version = 11 : i64} {
  func.func @_conv1x_kernel(%arg0: i32, %arg1: memref<1x16x16x4xf32, #tpu.memory_space<vmem>>, %arg2: memref<9x4x16xf32, #tpu.memory_space<vmem>>, %arg3: memref<1x16xf32, #tpu.memory_space<vmem>>, %arg4: memref<1x16x16x16xf32, #tpu.memory_space<vmem>>, %arg5: memref<1x2x16xf32, #tpu.memory_space<vmem>>, %arg6: memref<1x18x18x4xf32, #tpu.memory_space<vmem>>) attributes {dimension_semantics = [#tpu.dimension_semantics<parallel>], iteration_bounds = array<i64: 2>, scalar_prefetch = 0 : i64, scratch_operands = 1 : i64, tpu.core_type = #tpu.core_type<tc>, window_params = [{transform_indices = @transform_0, window_bounds = array<i64: 1, 16, 16, 4>}, {pipeline_mode = #tpu.pipeline_mode<synchronous>, transform_indices = @transform_1, window_bounds = array<i64: 9, 4, 16>}, {pipeline_mode = #tpu.pipeline_mode<synchronous>, transform_indices = @transform_2, window_bounds = array<i64: 1, 16>}, {transform_indices = @transform_3, window_bounds = array<i64: 1, 16, 16, 16>}, {transform_indices = @transform_4, window_bounds = array<i64: 1, 2, 16>}]} {
    %c0 = arith.constant 0 : index
    %c0_0 = arith.constant 0 : index
    %c0_1 = arith.constant 0 : index
    %c0_2 = arith.constant 0 : index
    %0 = vector.load %arg1[%c0, %c0_0, %c0_1, %c0_2] : memref<1x16x16x4xf32, #tpu.memory_space<vmem>>, vector<1x16x16x4xf32>
    %cst = arith.constant 0.000000e+00 : f32
    %1 = vector.broadcast %cst : f32 to vector<1x1x18x4xf32>
    %c0_3 = arith.constant 0 : index
    %c0_4 = arith.constant 0 : index
    %c0_5 = arith.constant 0 : index
    %c0_6 = arith.constant 0 : index
    %2 = vector.load %arg6[%c0_3, %c0_4, %c0_5, %c0_6] : memref<1x18x18x4xf32, #tpu.memory_space<vmem>>, vector<1x1x18x4xf32>
    tpu.vector_store %arg6[%c0_3, %c0_4, %c0_5, %c0_6], %1 {strides = array<i32>} : memref<1x18x18x4xf32, #tpu.memory_space<vmem>>, vector<1x1x18x4xf32>,
    %cst_7 = arith.constant 0.000000e+00 : f32
    %3 = vector.broadcast %cst_7 : f32 to vector<1x1x18x4xf32>
    %c0_8 = arith.constant 0 : index
    %c17 = arith.constant 17 : index
    %c0_9 = arith.constant 0 : index
    %c0_10 = arith.constant 0 : index
    %4 = vector.load %arg6[%c0_8, %c17, %c0_9, %c0_10] : memref<1x18x18x4xf32, #tpu.memory_space<vmem>>, vector<1x1x18x4xf32>
    tpu.vector_store %arg6[%c0_8, %c17, %c0_9, %c0_10], %3 {strides = array<i32>} : memref<1x18x18x4xf32, #tpu.memory_space<vmem>>, vector<1x1x18x4xf32>,
    %cst_11 = arith.constant 0.000000e+00 : f32
    %5 = vector.broadcast %cst_11 : f32 to vector<1x18x1x4xf32>
    %c0_12 = arith.constant 0 : index
    %c0_13 = arith.constant 0 : index
    %c0_14 = arith.constant 0 : index
    %c0_15 = arith.constant 0 : index
    %6 = vector.load %arg6[%c0_12, %c0_13, %c0_14, %c0_15] : memref<1x18x18x4xf32, #tpu.memory_space<vmem>>, vector<1x18x1x4xf32>
    tpu.vector_store %arg6[%c0_12, %c0_13, %c0_14, %c0_15], %5 {strides = array<i32>} : memref<1x18x18x4xf32, #tpu.memory_space<vmem>>, vector<1x18x1x4xf32>,
    %cst_16 = arith.constant 0.000000e+00 : f32
    %7 = vector.broadcast %cst_16 : f32 to vector<1x18x1x4xf32>
    %c0_17 = arith.constant 0 : index
    %c0_18 = arith.constant 0 : index
    %c17_19 = arith.constant 17 : index
    %c0_20 = arith.constant 0 : index
    %8 = vector.load %arg6[%c0_17, %c0_18, %c17_19, %c0_20] : memref<1x18x18x4xf32, #tpu.memory_space<vmem>>, vector<1x18x1x4xf32>
    tpu.vector_store %arg6[%c0_17, %c0_18, %c17_19, %c0_20], %7 {strides = array<i32>} : memref<1x18x18x4xf32, #tpu.memory_space<vmem>>, vector<1x18x1x4xf32>,
    %c0_21 = arith.constant 0 : index
    %c1 = arith.constant 1 : index
    %c1_22 = arith.constant 1 : index
    %c0_23 = arith.constant 0 : index
    %9 = vector.load %arg6[%c0_21, %c1, %c1_22, %c0_23] : memref<1x18x18x4xf32, #tpu.memory_space<vmem>>, vector<1x16x16x4xf32>
    tpu.vector_store %arg6[%c0_21, %c1, %c1_22, %c0_23], %0 {strides = array<i32>} : memref<1x18x18x4xf32, #tpu.memory_space<vmem>>, vector<1x16x16x4xf32>,
    %cst_24 = arith.constant 0.000000e+00 : f32
    %10 = vector.broadcast %cst_24 : f32 to vector<256x16xf32>
    %c0_25 = arith.constant 0 : index
    %c0_26 = arith.constant 0 : index
    %c0_27 = arith.constant 0 : index
    %c0_28 = arith.constant 0 : index
    %11 = vector.load %arg6[%c0_25, %c0_26, %c0_27, %c0_28] : memref<1x18x18x4xf32, #tpu.memory_space<vmem>>, vector<1x16x16x4xf32>
    %12 = vector.shape_cast %11 : vector<1x16x16x4xf32> to vector<256x4xf32>
    %c0_29 = arith.constant 0 : index
    %c0_30 = arith.constant 0 : index
    %c0_31 = arith.constant 0 : index
    %13 = vector.load %arg2[%c0_29, %c0_30, %c0_31] : memref<9x4x16xf32, #tpu.memory_space<vmem>>, vector<1x4x16xf32>
    %14 = vector.shape_cast %13 : vector<1x4x16xf32> to vector<4x16xf32>
    %cst_32 = arith.constant dense<0.000000e+00> : vector<256x16xf32>
    %15 = tpu.matmul %12, %14, %cst_32 {dimension_numbers = #tpu.dot_dimension_numbers<[1], [0], [0], [1], [0, 0, 1, 1], [], []>} : vector<256x4xf32>, vector<4x16xf32>, vector<256x16xf32> -> vector<256x16xf32>
    %16 = arith.addf %10, %15 : vector<256x16xf32>
    %c0_33 = arith.constant 0 : index
    %c0_34 = arith.constant 0 : index
    %c1_35 = arith.constant 1 : index
    %c0_36 = arith.constant 0 : index
    %17 = vector.load %arg6[%c0_33, %c0_34, %c1_35, %c0_36] : memref<1x18x18x4xf32, #tpu.memory_space<vmem>>, vector<1x16x16x4xf32>
    %18 = vector.shape_cast %17 : vector<1x16x16x4xf32> to vector<256x4xf32>
    %c1_37 = arith.constant 1 : index
    %c0_38 = arith.constant 0 : index
    %c0_39 = arith.constant 0 : index
    %19 = vector.load %arg2[%c1_37, %c0_38, %c0_39] : memref<9x4x16xf32, #tpu.memory_space<vmem>>, vector<1x4x16xf32>
    %20 = vector.shape_cast %19 : vector<1x4x16xf32> to vector<4x16xf32>
    %cst_40 = arith.constant dense<0.000000e+00> : vector<256x16xf32>
    %21 = tpu.matmul %18, %20, %cst_40 {dimension_numbers = #tpu.dot_dimension_numbers<[1], [0], [0], [1], [0, 0, 1, 1], [], []>} : vector<256x4xf32>, vector<4x16xf32>, vector<256x16xf32> -> vector<256x16xf32>
    %22 = arith.addf %16, %21 : vector<256x16xf32>
    %c0_41 = arith.constant 0 : index
    %c0_42 = arith.constant 0 : index
    %c2 = arith.constant 2 : index
    %c0_43 = arith.constant 0 : index
    %23 = vector.load %arg6[%c0_41, %c0_42, %c2, %c0_43] : memref<1x18x18x4xf32, #tpu.memory_space<vmem>>, vector<1x16x16x4xf32>
    %24 = vector.shape_cast %23 : vector<1x16x16x4xf32> to vector<256x4xf32>
    %c2_44 = arith.constant 2 : index
    %c0_45 = arith.constant 0 : index
    %c0_46 = arith.constant 0 : index
    %25 = vector.load %arg2[%c2_44, %c0_45, %c0_46] : memref<9x4x16xf32, #tpu.memory_space<vmem>>, vector<1x4x16xf32>
    %26 = vector.shape_cast %25 : vector<1x4x16xf32> to vector<4x16xf32>
    %cst_47 = arith.constant dense<0.000000e+00> : vector<256x16xf32>
    %27 = tpu.matmul %24, %26, %cst_47 {dimension_numbers = #tpu.dot_dimension_numbers<[1], [0], [0], [1], [0, 0, 1, 1], [], []>} : vector<256x4xf32>, vector<4x16xf32>, vector<256x16xf32> -> vector<256x16xf32>
    %28 = arith.addf %22, %27 : vector<256x16xf32>
    %c0_48 = arith.constant 0 : index
    %c1_49 = arith.constant 1 : index
    %c0_50 = arith.constant 0 : index
    %c0_51 = arith.constant 0 : index
    %29 = vector.load %arg6[%c0_48, %c1_49, %c0_50, %c0_51] : memref<1x18x18x4xf32, #tpu.memory_space<vmem>>, vector<1x16x16x4xf32>
    %30 = vector.shape_cast %29 : vector<1x16x16x4xf32> to vector<256x4xf32>
    %c3 = arith.constant 3 : index
    %c0_52 = arith.constant 0 : index
    %c0_53 = arith.constant 0 : index
    %31 = vector.load %arg2[%c3, %c0_52, %c0_53] : memref<9x4x16xf32, #tpu.memory_space<vmem>>, vector<1x4x16xf32>
    %32 = vector.shape_cast %31 : vector<1x4x16xf32> to vector<4x16xf32>
    %cst_54 = arith.constant dense<0.000000e+00> : vector<256x16xf32>
    %33 = tpu.matmul %30, %32, %cst_54 {dimension_numbers = #tpu.dot_dimension_numbers<[1], [0], [0], [1], [0, 0, 1, 1], [], []>} : vector<256x4xf32>, vector<4x16xf32>, vector<256x16xf32> -> vector<256x16xf32>
    %34 = arith.addf %28, %33 : vector<256x16xf32>
    %c0_55 = arith.constant 0 : index
    %c1_56 = arith.constant 1 : index
    %c1_57 = arith.constant 1 : index
    %c0_58 = arith.constant 0 : index
    %35 = vector.load %arg6[%c0_55, %c1_56, %c1_57, %c0_58] : memref<1x18x18x4xf32, #tpu.memory_space<vmem>>, vector<1x16x16x4xf32>
    %36 = vector.shape_cast %35 : vector<1x16x16x4xf32> to vector<256x4xf32>
    %c4 = arith.constant 4 : index
    %c0_59 = arith.constant 0 : index
    %c0_60 = arith.constant 0 : index
    %37 = vector.load %arg2[%c4, %c0_59, %c0_60] : memref<9x4x16xf32, #tpu.memory_space<vmem>>, vector<1x4x16xf32>
    %38 = vector.shape_cast %37 : vector<1x4x16xf32> to vector<4x16xf32>
    %cst_61 = arith.constant dense<0.000000e+00> : vector<256x16xf32>
    %39 = tpu.matmul %36, %38, %cst_61 {dimension_numbers = #tpu.dot_dimension_numbers<[1], [0], [0], [1], [0, 0, 1, 1], [], []>} : vector<256x4xf32>, vector<4x16xf32>, vector<256x16xf32> -> vector<256x16xf32>
    %40 = arith.addf %34, %39 : vector<256x16xf32>
    %c0_62 = arith.constant 0 : index
    %c1_63 = arith.constant 1 : index
    %c2_64 = arith.constant 2 : index
    %c0_65 = arith.constant 0 : index
    %41 = vector.load %arg6[%c0_62, %c1_63, %c2_64, %c0_65] : memref<1x18x18x4xf32, #tpu.memory_space<vmem>>, vector<1x16x16x4xf32>
    %42 = vector.shape_cast %41 : vector<1x16x16x4xf32> to vector<256x4xf32>
    %c5 = arith.constant 5 : index
    %c0_66 = arith.constant 0 : index
    %c0_67 = arith.constant 0 : index
    %43 = vector.load %arg2[%c5, %c0_66, %c0_67] : memref<9x4x16xf32, #tpu.memory_space<vmem>>, vector<1x4x16xf32>
    %44 = vector.shape_cast %43 : vector<1x4x16xf32> to vector<4x16xf32>
    %cst_68 = arith.constant dense<0.000000e+00> : vector<256x16xf32>
    %45 = tpu.matmul %42, %44, %cst_68 {dimension_numbers = #tpu.dot_dimension_numbers<[1], [0], [0], [1], [0, 0, 1, 1], [], []>} : vector<256x4xf32>, vector<4x16xf32>, vector<256x16xf32> -> vector<256x16xf32>
    %46 = arith.addf %40, %45 : vector<256x16xf32>
    %c0_69 = arith.constant 0 : index
    %c2_70 = arith.constant 2 : index
    %c0_71 = arith.constant 0 : index
    %c0_72 = arith.constant 0 : index
    %47 = vector.load %arg6[%c0_69, %c2_70, %c0_71, %c0_72] : memref<1x18x18x4xf32, #tpu.memory_space<vmem>>, vector<1x16x16x4xf32>
    %48 = vector.shape_cast %47 : vector<1x16x16x4xf32> to vector<256x4xf32>
    %c6 = arith.constant 6 : index
    %c0_73 = arith.constant 0 : index
    %c0_74 = arith.constant 0 : index
    %49 = vector.load %arg2[%c6, %c0_73, %c0_74] : memref<9x4x16xf32, #tpu.memory_space<vmem>>, vector<1x4x16xf32>
    %50 = vector.shape_cast %49 : vector<1x4x16xf32> to vector<4x16xf32>
    %cst_75 = arith.constant dense<0.000000e+00> : vector<256x16xf32>
    %51 = tpu.matmul %48, %50, %cst_75 {dimension_numbers = #tpu.dot_dimension_numbers<[1], [0], [0], [1], [0, 0, 1, 1], [], []>} : vector<256x4xf32>, vector<4x16xf32>, vector<256x16xf32> -> vector<256x16xf32>
    %52 = arith.addf %46, %51 : vector<256x16xf32>
    %c0_76 = arith.constant 0 : index
    %c2_77 = arith.constant 2 : index
    %c1_78 = arith.constant 1 : index
    %c0_79 = arith.constant 0 : index
    %53 = vector.load %arg6[%c0_76, %c2_77, %c1_78, %c0_79] : memref<1x18x18x4xf32, #tpu.memory_space<vmem>>, vector<1x16x16x4xf32>
    %54 = vector.shape_cast %53 : vector<1x16x16x4xf32> to vector<256x4xf32>
    %c7 = arith.constant 7 : index
    %c0_80 = arith.constant 0 : index
    %c0_81 = arith.constant 0 : index
    %55 = vector.load %arg2[%c7, %c0_80, %c0_81] : memref<9x4x16xf32, #tpu.memory_space<vmem>>, vector<1x4x16xf32>
    %56 = vector.shape_cast %55 : vector<1x4x16xf32> to vector<4x16xf32>
    %cst_82 = arith.constant dense<0.000000e+00> : vector<256x16xf32>
    %57 = tpu.matmul %54, %56, %cst_82 {dimension_numbers = #tpu.dot_dimension_numbers<[1], [0], [0], [1], [0, 0, 1, 1], [], []>} : vector<256x4xf32>, vector<4x16xf32>, vector<256x16xf32> -> vector<256x16xf32>
    %58 = arith.addf %52, %57 : vector<256x16xf32>
    %c0_83 = arith.constant 0 : index
    %c2_84 = arith.constant 2 : index
    %c2_85 = arith.constant 2 : index
    %c0_86 = arith.constant 0 : index
    %59 = vector.load %arg6[%c0_83, %c2_84, %c2_85, %c0_86] : memref<1x18x18x4xf32, #tpu.memory_space<vmem>>, vector<1x16x16x4xf32>
    %60 = vector.shape_cast %59 : vector<1x16x16x4xf32> to vector<256x4xf32>
    %c8 = arith.constant 8 : index
    %c0_87 = arith.constant 0 : index
    %c0_88 = arith.constant 0 : index
    %61 = vector.load %arg2[%c8, %c0_87, %c0_88] : memref<9x4x16xf32, #tpu.memory_space<vmem>>, vector<1x4x16xf32>
    %62 = vector.shape_cast %61 : vector<1x4x16xf32> to vector<4x16xf32>
    %cst_89 = arith.constant dense<0.000000e+00> : vector<256x16xf32>
    %63 = tpu.matmul %60, %62, %cst_89 {dimension_numbers = #tpu.dot_dimension_numbers<[1], [0], [0], [1], [0, 0, 1, 1], [], []>} : vector<256x4xf32>, vector<4x16xf32>, vector<256x16xf32> -> vector<256x16xf32>
    %64 = arith.addf %58, %63 : vector<256x16xf32>
    %c0_90 = arith.constant 0 : index
    %c0_91 = arith.constant 0 : index
    %65 = vector.load %arg3[%c0_90, %c0_91] : memref<1x16xf32, #tpu.memory_space<vmem>>, vector<1x16xf32>
    %66 = vector.broadcast %65 : vector<1x16xf32> to vector<256x16xf32>
    %67 = arith.addf %64, %66 : vector<256x16xf32>
    %68 = vector.shape_cast %67 : vector<256x16xf32> to vector<1x16x16x16xf32>
    %c0_92 = arith.constant 0 : index
    %c0_93 = arith.constant 0 : index
    %c0_94 = arith.constant 0 : index
    %c0_95 = arith.constant 0 : index
    %69 = vector.load %arg4[%c0_92, %c0_93, %c0_94, %c0_95] : memref<1x16x16x16xf32, #tpu.memory_space<vmem>>, vector<1x16x16x16xf32>
    tpu.vector_store %arg4[%c0_92, %c0_93, %c0_94, %c0_95], %68 {strides = array<i32>} : memref<1x16x16x16xf32, #tpu.memory_space<vmem>>, vector<1x16x16x16xf32>,
    %cst_96 = arith.constant dense<0.000000e+00> : vector<16xf32>
    %70 = vector.multi_reduction <add>, %67, %cst_96 [0] : vector<256x16xf32> to vector<16xf32>
    %71 = vector.shape_cast %70 : vector<16xf32> to vector<1x16xf32>
    %72 = arith.mulf %67, %67 : vector<256x16xf32>
    %cst_97 = arith.constant dense<0.000000e+00> : vector<16xf32>
    %73 = vector.multi_reduction <add>, %72, %cst_97 [0] : vector<256x16xf32> to vector<16xf32>
    %74 = vector.shape_cast %73 : vector<16xf32> to vector<1x16xf32>
    %75 = tpu.concatenate %71, %74 in 0 : vector<1x16xf32>, vector<1x16xf32> -> vector<2x16xf32>
    %76 = vector.shape_cast %75 : vector<2x16xf32> to vector<1x2x16xf32>
    %c0_98 = arith.constant 0 : index
    %c0_99 = arith.constant 0 : index
    %c0_100 = arith.constant 0 : index
    %77 = vector.load %arg5[%c0_98, %c0_99, %c0_100] : memref<1x2x16xf32, #tpu.memory_space<vmem>>, vector<1x2x16xf32>
    tpu.vector_store %arg5[%c0_98, %c0_99, %c0_100], %76 {strides = array<i32>} : memref<1x2x16xf32, #tpu.memory_space<vmem>>, vector<1x2x16xf32>,
    return
  }
  func.func @transform_0(%arg0: i32) -> (i32, i32, i32, i32) {
    %c0_i32 = arith.constant 0 : i32
    %c0_i32_0 = arith.constant 0 : i32
    %c0_i32_1 = arith.constant 0 : i32
    %c0_i32_2 = arith.constant 0 : i32
    return %arg0, %c0_i32, %c0_i32_0, %c0_i32_1 : i32, i32, i32, i32
  }
  func.func @transform_1(%arg0: i32) -> (i32, i32, i32) {
    %c0_i32 = arith.constant 0 : i32
    %c0_i32_0 = arith.constant 0 : i32
    %c0_i32_1 = arith.constant 0 : i32
    %c0_i32_2 = arith.constant 0 : i32
    return %c0_i32, %c0_i32_0, %c0_i32_1 : i32, i32, i32
  }
  func.func @transform_2(%arg0: i32) -> (i32, i32) {
    %c0_i32 = arith.constant 0 : i32
    %c0_i32_0 = arith.constant 0 : i32
    %c0_i32_1 = arith.constant 0 : i32
    return %c0_i32, %c0_i32_0 : i32, i32
  }
  func.func @transform_3(%arg0: i32) -> (i32, i32, i32, i32) {
    %c0_i32 = arith.constant 0 : i32
    %c0_i32_0 = arith.constant 0 : i32
    %c0_i32_1 = arith.constant 0 : i32
    %c0_i32_2 = arith.constant 0 : i32
    return %arg0, %c0_i32, %c0_i32_0, %c0_i32_1 : i32, i32, i32, i32
  }
  func.func @transform_4(%arg0: i32) -> (i32, i32, i32) {
    %c0_i32 = arith.constant 0 : i32
    %c0_i32_0 = arith.constant 0 : i32
    %c0_i32_1 = arith.constant 0 : i32
    return %arg0, %c0_i32, %c0_i32_0 : i32, i32, i32
  }
}

module attributes {stable_mosaic.version = 11 : i64} {
  func.func @_bn_add_kernel(%arg0: i32, %arg1: memref<1x16x16x8xf32, #tpu.memory_space<vmem>>, %arg2: memref<1x16x16x16xf32, #tpu.memory_space<vmem>>, %arg3: memref<1x8xf32, #tpu.memory_space<vmem>>, %arg4: memref<1x8xf32, #tpu.memory_space<vmem>>, %arg5: memref<1x8xf32, #tpu.memory_space<vmem>>, %arg6: memref<1x8xf32, #tpu.memory_space<vmem>>, %arg7: memref<1x16x16x8xf32, #tpu.memory_space<vmem>>) attributes {dimension_semantics = [#tpu.dimension_semantics<parallel>], iteration_bounds = array<i64: 2>, scalar_prefetch = 0 : i64, scratch_operands = 0 : i64, tpu.core_type = #tpu.core_type<tc>, window_params = [{transform_indices = @transform_0, window_bounds = array<i64: 1, 16, 16, 8>}, {transform_indices = @transform_1, window_bounds = array<i64: 1, 16, 16, 16>}, {pipeline_mode = #tpu.pipeline_mode<synchronous>, transform_indices = @transform_2, window_bounds = array<i64: 1, 8>}, {pipeline_mode = #tpu.pipeline_mode<synchronous>, transform_indices = @transform_3, window_bounds = array<i64: 1, 8>}, {pipeline_mode = #tpu.pipeline_mode<synchronous>, transform_indices = @transform_4, window_bounds = array<i64: 1, 8>}, {pipeline_mode = #tpu.pipeline_mode<synchronous>, transform_indices = @transform_5, window_bounds = array<i64: 1, 8>}, {transform_indices = @transform_6, window_bounds = array<i64: 1, 16, 16, 8>}]} {
    %c0 = arith.constant 0 : index
    %c0_0 = arith.constant 0 : index
    %0 = vector.load %arg3[%c0, %c0_0] : memref<1x8xf32, #tpu.memory_space<vmem>>, vector<1x8xf32>
    %1 = vector.shape_cast %0 : vector<1x8xf32> to vector<1x1x1x8xf32>
    %c0_1 = arith.constant 0 : index
    %c0_2 = arith.constant 0 : index
    %2 = vector.load %arg4[%c0_1, %c0_2] : memref<1x8xf32, #tpu.memory_space<vmem>>, vector<1x8xf32>
    %3 = vector.shape_cast %2 : vector<1x8xf32> to vector<1x1x1x8xf32>
    %c0_3 = arith.constant 0 : index
    %c0_4 = arith.constant 0 : index
    %4 = vector.load %arg5[%c0_3, %c0_4] : memref<1x8xf32, #tpu.memory_space<vmem>>, vector<1x8xf32>
    %5 = vector.shape_cast %4 : vector<1x8xf32> to vector<1x1x1x8xf32>
    %c0_5 = arith.constant 0 : index
    %c0_6 = arith.constant 0 : index
    %6 = vector.load %arg6[%c0_5, %c0_6] : memref<1x8xf32, #tpu.memory_space<vmem>>, vector<1x8xf32>
    %7 = vector.shape_cast %6 : vector<1x8xf32> to vector<1x1x1x8xf32>
    %c0_7 = arith.constant 0 : index
    %c0_8 = arith.constant 0 : index
    %c0_9 = arith.constant 0 : index
    %c0_10 = arith.constant 0 : index
    %8 = vector.load %arg1[%c0_7, %c0_8, %c0_9, %c0_10] : memref<1x16x16x8xf32, #tpu.memory_space<vmem>>, vector<1x16x16x8xf32>
    %9 = vector.broadcast %1 : vector<1x1x1x8xf32> to vector<1x16x16x8xf32>
    %10 = arith.mulf %8, %9 : vector<1x16x16x8xf32>
    %11 = vector.broadcast %3 : vector<1x1x1x8xf32> to vector<1x16x16x8xf32>
    %12 = arith.addf %10, %11 : vector<1x16x16x8xf32>
    %cst = arith.constant 0.000000e+00 : f32
    %13 = vector.broadcast %cst : f32 to vector<1x16x16x8xf32>
    %14 = arith.maximumf %12, %13 : vector<1x16x16x8xf32>
    %c0_11 = arith.constant 0 : index
    %c0_12 = arith.constant 0 : index
    %c0_13 = arith.constant 0 : index
    %c0_14 = arith.constant 0 : index
    %15 = vector.load %arg2[%c0_11, %c0_12, %c0_13, %c0_14] : memref<1x16x16x16xf32, #tpu.memory_space<vmem>>, vector<1x16x16x16xf32>
    %16 = vector.extract_strided_slice %15 {offsets = [0, 0, 0, 8], sizes = [1, 16, 16, 8], strides = [1, 1, 1, 1]} : vector<1x16x16x16xf32> to vector<1x16x16x8xf32>
    %17 = vector.broadcast %5 : vector<1x1x1x8xf32> to vector<1x16x16x8xf32>
    %18 = arith.mulf %16, %17 : vector<1x16x16x8xf32>
    %19 = vector.broadcast %7 : vector<1x1x1x8xf32> to vector<1x16x16x8xf32>
    %20 = arith.addf %18, %19 : vector<1x16x16x8xf32>
    %21 = arith.addf %14, %20 : vector<1x16x16x8xf32>
    %c0_15 = arith.constant 0 : index
    %c0_16 = arith.constant 0 : index
    %c0_17 = arith.constant 0 : index
    %c0_18 = arith.constant 0 : index
    %22 = vector.load %arg7[%c0_15, %c0_16, %c0_17, %c0_18] : memref<1x16x16x8xf32, #tpu.memory_space<vmem>>, vector<1x16x16x8xf32>
    tpu.vector_store %arg7[%c0_15, %c0_16, %c0_17, %c0_18], %21 {strides = array<i32>} : memref<1x16x16x8xf32, #tpu.memory_space<vmem>>, vector<1x16x16x8xf32>,
    return
  }
  func.func @transform_0(%arg0: i32) -> (i32, i32, i32, i32) {
    %c0_i32 = arith.constant 0 : i32
    %c0_i32_0 = arith.constant 0 : i32
    %c0_i32_1 = arith.constant 0 : i32
    %c0_i32_2 = arith.constant 0 : i32
    return %arg0, %c0_i32, %c0_i32_0, %c0_i32_1 : i32, i32, i32, i32
  }
  func.func @transform_1(%arg0: i32) -> (i32, i32, i32, i32) {
    %c0_i32 = arith.constant 0 : i32
    %c0_i32_0 = arith.constant 0 : i32
    %c0_i32_1 = arith.constant 0 : i32
    %c0_i32_2 = arith.constant 0 : i32
    return %arg0, %c0_i32, %c0_i32_0, %c0_i32_1 : i32, i32, i32, i32
  }
  func.func @transform_2(%arg0: i32) -> (i32, i32) {
    %c0_i32 = arith.constant 0 : i32
    %c0_i32_0 = arith.constant 0 : i32
    %c0_i32_1 = arith.constant 0 : i32
    return %c0_i32, %c0_i32_0 : i32, i32
  }
  func.func @transform_3(%arg0: i32) -> (i32, i32) {
    %c0_i32 = arith.constant 0 : i32
    %c0_i32_0 = arith.constant 0 : i32
    %c0_i32_1 = arith.constant 0 : i32
    return %c0_i32, %c0_i32_0 : i32, i32
  }
  func.func @transform_4(%arg0: i32) -> (i32, i32) {
    %c0_i32 = arith.constant 0 : i32
    %c0_i32_0 = arith.constant 0 : i32
    %c0_i32_1 = arith.constant 0 : i32
    return %c0_i32, %c0_i32_0 : i32, i32
  }
  func.func @transform_5(%arg0: i32) -> (i32, i32) {
    %c0_i32 = arith.constant 0 : i32
    %c0_i32_0 = arith.constant 0 : i32
    %c0_i32_1 = arith.constant 0 : i32
    return %c0_i32, %c0_i32_0 : i32, i32
  }
  func.func @transform_6(%arg0: i32) -> (i32, i32, i32, i32) {
    %c0_i32 = arith.constant 0 : i32
    %c0_i32_0 = arith.constant 0 : i32
    %c0_i32_1 = arith.constant 0 : i32
    %c0_i32_2 = arith.constant 0 : i32
    return %arg0, %c0_i32, %c0_i32_0, %c0_i32_1 : i32, i32, i32, i32
  }
}

</mosaic_0001>

<bundles_post_ra>
// kernel: resblock_pallas.5
= control target key start
LH: loop header
LB: loop body
LE: loop exit
PB: predicated region body
PF: predicated region fallthrough
CT: control target
= control target key end

     0   :  { %s851_s21 = smov 0   ;;  %s1214_s0 = inlined_call_operand.vmem [shape: f32[2,16,16,8], index: 0, kind: input, shape index: {}]   ;;  %s1215_s1 = inlined_call_operand.vmem [shape: f32[2,16,16,16], index: 1, kind: input, shape index: {}]   ;;  %s1216_s2 = inlined_call_operand.vmem [shape: f32[1,8], index: 2, kind: input, shape index: {}]   ;;  %s1217_s3 = inlined_call_operand.vmem [shape: f32[1,8], index: 3, kind: input, shape index: {}]   ;;  %s1218_s4 = inlined_call_operand.vmem [shape: f32[1,8], index: 4, kind: input, shape index: {}]   ;;  %s1219_s5 = inlined_call_operand.vmem [shape: f32[1,8], index: 5, kind: input, shape index: {}]   ;;  %s1220_s6 = inlined_call_operand.vmem [shape: f32[2,16,16,8], index: 6, kind: output, shape index: {}]  }
   0x1 LB: > { %s776_s22 = sadd.s32 4294967295, %s812_s21   ;;  %p780_p0 = scmp.ge.s32.totalorder %s812_s21, 1  ;;  %s812_s21 = sphi %s851_s21, %s16_s21  }
   0x2   : > { %p222_p1 = scmp.lt.s32.totalorder %s812_s21, 3 }
   0x4   : > { %p223_p2 = pnand %p780_p0, %p222_p1 }
   0x5   : > { %s814_s25 = smov (!%p223_p2), 8   ;;  %p257_p3 = scmp.lt.s32.totalorder (!%p223_p2), %s776_s22, 1 }
   0x6   : > { %226 = sbr.rel (%p223_p2) target bundleno = 336 (0x150), region = 44  ;;  %s815_s8 = smov (!%p223_p2), 120  }
   0xb   : > { %v802_v0 = vld [vmem:[%s1218_s4] ss:$0 sm:$0xff]  ;;  %s1222_s22 = smov (!%p257_p3, %s776_s22), 1  ;;  %vm676_vm0 = vcmask 64512  }
   0xc   : > { %444 = vrot.lane.b32.xlu0 %v802_v0, %s814_s25  ;;  %v803_v1 = vld [vmem:[%s1219_s5] ss:$0 sm:$0xff]  ;;  %s865_s28 = sshll.u32 %s1222_s22, 8 }
   0xd   : > { %s871_s7 = scalar_lea.vmem %s1215_s1, %s865_s28  ;;  %s1027_s11 = scalar_lea.vmem %s1214_s0, %s865_s28 }
   0xe   : > { %v414_v3 = vld [vmem:[%s871_s7 + $0x20] sm:$0xff]  ;;  %v412_v4 = vld [vmem:[%s871_s7 + $0x10] sm:$0xff]  ;;  %v433_v8 = vld [vmem:[%s871_s7 + $0xb8] sm:$0xff]  ;;  %s1054_s18 = scalar_lea.vmem %s1220_s6, %s865_s28 }
   0xf   : > { %v410_v5 = vld [vmem:[%s871_s7] sm:$0xff]  ;;  %v441_v9 = vld [vmem:[%s871_s7 + $0xf8] sm:$0xff]  ;;  %v436_v11 = vld [vmem:[%s871_s7 + $0xd0] sm:$0xff] }
  0x10   : > { %v438_v6 = vld [vmem:[%s871_s7 + $0xe0] sm:$0xff]  ;;  %v437_v10 = vld [vmem:[%s871_s7 + $0xd8] sm:$0xff]  ;;  %v440_v12 = vld [vmem:[%s871_s7 + $0xf0] sm:$0xff] }
  0x11   : > { %v434_v7 = vld [vmem:[%s871_s7 + $0xc0] sm:$0xff]  ;;  %v439_v13 = vld [vmem:[%s871_s7 + $0xe8] sm:$0xff]  ;;  %v417_v29 = vld [vmem:[%s871_s7 + $0x38] sm:$0xff] }
  0x12   : > { %v413_v30 = vld [vmem:[%s871_s7 + $0x18] sm:$0xff]  ;;  %v411_v31 = vld [vmem:[%s871_s7 + $0x8] sm:$0xff]  ;;  %v420_v38 = vld [vmem:[%s871_s7 + $0x50] sm:$0xff] }
  0x13   : > { %v416_v39 = vld [vmem:[%s871_s7 + $0x30] sm:$0xff]  ;;  %v415_v40 = vld [vmem:[%s871_s7 + $0x28] sm:$0xff]  ;;  %v418_v49 = vld [vmem:[%s871_s7 + $0x40] sm:$0xff] }
  0x14   : > { %481 = vrot.lane.b32.xlu0 %v803_v1, %s814_s25  ;;  %v423_v47 = vld [vmem:[%s871_s7 + $0x68] sm:$0xff]  ;;  %v426_v56 = vld [vmem:[%s871_s7 + $0x80] sm:$0xff]  ;;  %v421_v58 = vld [vmem:[%s871_s7 + $0x58] sm:$0xff] }
  0x15   : > { %v419_v48 = vld [vmem:[%s871_s7 + $0x48] sm:$0xff]  ;;  %v422_v57 = vld [vmem:[%s871_s7 + $0x60] sm:$0xff]  ;;  %v429_v1 = vld [vmem:[%s871_s7 + $0x98] sm:$0xff] }
  0x7e   : > { %v873_v2 = vpop.permute.xlu0 %444 }
  0x7f   : > { %v451_v14 = vmul.f32 %v873_v2, %v414_v3  ;;  %v449_v15 = vmul.f32 %v873_v2, %v412_v4  ;;  %v447_v16 = vmul.f32 %v873_v2, %v410_v5  ;;  %v890_v17 = vmul.f32 %v873_v2, %v438_v6  ;;  %v425_v3 = vld [vmem:[%s871_s7 + $0x78] sm:$0xff]  ;;  %v424_v4 = vld [vmem:[%s871_s7 + $0x70] sm:$0xff] }
  0x80   : > { %v893_v18 = vmul.f32 %v873_v2, %v434_v7  ;;  %v896_v19 = vmul.f32 %v873_v2, %v433_v8  ;;  %v899_v20 = vmul.f32 %v873_v2, %v441_v9  ;;  %v904_v22 = vmul.f32 %v873_v2, %v437_v10 }
  0x81   : > { %v907_v23 = vmul.f32 %v873_v2, %v436_v11  ;;  %v910_v24 = vmul.f32 %v873_v2, %v440_v12  ;;  %v913_v25 = vmul.f32 %v873_v2, %v439_v13  ;;  %v454_v32 = vmul.f32 %v873_v2, %v417_v29  ;;  %v432_v11 = vld [vmem:[%s871_s7 + $0xb0] sm:$0xff]  ;;  %v427_v13 = vld [vmem:[%s871_s7 + $0x88] sm:$0xff] }
  0x82   : > { %v450_v33 = vmul.f32 %v873_v2, %v413_v30  ;;  %v448_v34 = vmul.f32 %v873_v2, %v411_v31  ;;  %v457_v41 = vmul.f32 %v873_v2, %v420_v38  ;;  %v453_v42 = vmul.f32 %v873_v2, %v416_v39  ;;  %v428_v12 = vld [vmem:[%s871_s7 + $0x90] sm:$0xff]  ;;  %v435_v29 = vld [vmem:[%s871_s7 + $0xc8] sm:$0xff]  ;;  %v430_v31 = vld [vmem:[%s871_s7 + $0xa0] sm:$0xff] }
  0x83   : > { %v452_v43 = vmul.f32 %v873_v2, %v415_v40  ;;  %v460_v50 = vmul.f32 %v873_v2, %v423_v47  ;;  %v456_v51 = vmul.f32 %v873_v2, %v419_v48  ;;  %v455_v52 = vmul.f32 %v873_v2, %v418_v49  ;;  %v431_v30 = vld [vmem:[%s871_s7 + $0xa8] sm:$0xff]  ;;  %v282_v47 = vld [vmem:[%s1027_s11 + $0x30] sm:$0xff] }
  0x84   : > { %v463_v59 = vmul.f32 %v873_v2, %v426_v56  ;;  %v459_v60 = vmul.f32 %v873_v2, %v422_v57  ;;  %v458_v61 = vmul.f32 %v873_v2, %v421_v58  ;;  %v466_v5 = vmul.f32 %v873_v2, %v429_v1  ;;  %v283_v1 = vld [vmem:[%s1027_s11 + $0x38] sm:$0xff] }
  0x85   : > { %v462_v6 = vmul.f32 %v873_v2, %v425_v3  ;;  %v461_v7 = vmul.f32 %v873_v2, %v424_v4  ;;  %v288_v3 = vld [vmem:[%s1027_s11 + $0x60] sm:$0xff]  ;;  %v277_v4 = vld [vmem:[%s1027_s11 + $0x8] sm:$0xff] }
  0x86   : > { %v901_v21 = vpop.permute.xlu0 %481 }
  0x87   : > { %v488_v26 = vadd.f32 %v901_v21, %v451_v14  ;;  %v486_v27 = vadd.f32 %v901_v21, %v449_v15  ;;  %v484_v28 = vadd.f32 %v901_v21, %v447_v16  ;;  %v491_v35 = vadd.f32 %v901_v21, %v454_v32 }
  0x88   : > { %v487_v36 = vadd.f32 %v901_v21, %v450_v33  ;;  %v485_v37 = vadd.f32 %v901_v21, %v448_v34  ;;  %v494_v44 = vadd.f32 %v901_v21, %v457_v41  ;;  %v490_v45 = vadd.f32 %v901_v21, %v453_v42 }
  0x89   : > { %556 = vrot.lane.b32.xlu0 %v488_v26, %s815_s8  ;;  %552 = vrot.lane.b32.xlu2 %v486_v27, %s815_s8  ;;  %v489_v46 = vadd.f32 %v901_v21, %v452_v43  ;;  %v497_v53 = vadd.f32 %v901_v21, %v460_v50  ;;  %v493_v54 = vadd.f32 %v901_v21, %v456_v51 }
  0x8a   : > { %548 = vrot.lane.b32.xlu1 %v484_v28, %s815_s8  ;;  %v492_v55 = vadd.f32 %v901_v21, %v455_v52  ;;  %v500_v62 = vadd.f32 %v901_v21, %v463_v59  ;;  %v496_v63 = vadd.f32 %v901_v21, %v459_v60  ;;  %v495_v0 = vadd.f32 %v901_v21, %v458_v61 }
  0x8b   : > { %v503_v8 = vadd.f32 %v901_v21, %v466_v5  ;;  %v499_v9 = vadd.f32 %v901_v21, %v462_v6  ;;  %v498_v10 = vadd.f32 %v901_v21, %v461_v7  ;;  %v469_v14 = vmul.f32 %v873_v2, %v432_v11 }
  0x8c   : > { %v465_v15 = vmul.f32 %v873_v2, %v428_v12  ;;  %v464_v16 = vmul.f32 %v873_v2, %v427_v13  ;;  %v472_v32 = vmul.f32 %v873_v2, %v435_v29  ;;  %v468_v33 = vmul.f32 %v873_v2, %v431_v30  ;;  %v286_v29 = vld [vmem:[%s1027_s11 + $0x50] sm:$0xff]  ;;  %v291_v30 = vld [vmem:[%s1027_s11 + $0x78] sm:$0xff] }
  0x8d   : > { %v506_v26 = vadd.f32 %v901_v21, %v469_v14  ;;  %v467_v34 = vmul.f32 %v873_v2, %v430_v31  ;;  %v512_v38 = vadd.f32 %v901_v21, %v890_v17  ;;  %v508_v39 = vadd.f32 %v901_v21, %v893_v18  ;;  %v1032_v18 = vld [vmem:[%s1216_s2] ss:$0 sm:$0xff]  ;;  %v281_v31 = vld [vmem:[%s1027_s11 + $0x28] sm:$0xff] }
  0x8e   : > { %v502_v27 = vadd.f32 %v901_v21, %v465_v15  ;;  %v501_v28 = vadd.f32 %v901_v21, %v464_v16  ;;  %v507_v2 = vadd.f32 %v901_v21, %v896_v19  ;;  %v515_v40 = vadd.f32 %v901_v21, %v899_v20  ;;  %v278_v19 = vld [vmem:[%s1027_s11 + $0x10] sm:$0xff] }
  0x8f   : > { %v511_v41 = vadd.f32 %v901_v21, %v904_v22  ;;  %v510_v17 = vadd.f32 %v901_v21, %v907_v23  ;;  %v514_v20 = vadd.f32 %v901_v21, %v910_v24  ;;  %v513_v22 = vadd.f32 %v901_v21, %v913_v25  ;;  %v1042_v23 = vld [vmem:[%s1217_s3] ss:$0 sm:$0xff] }
  0x90   : > { %v313_v42 = vmul.f32 %v1032_v18, %v278_v19  ;;  %v317_v49 = vmul.f32 %v1032_v18, %v282_v47  ;;  %v318_v7 = vmul.f32 %v1032_v18, %v283_v1 }
  0x91   : > { %562 = vrot.lane.b32.xlu0 %v491_v35, %s815_s8  ;;  %554 = vrot.lane.b32.xlu2 %v487_v36, %s815_s8  ;;  %v509_v35 = vadd.f32 %v901_v21, %v472_v32  ;;  %v505_v36 = vadd.f32 %v901_v21, %v468_v33 }
  0x92   : > { %550 = vrot.lane.b32.xlu1 %v485_v37, %s815_s8  ;;  %v504_v37 = vadd.f32 %v901_v21, %v467_v34  ;;  %v348_v43 = vadd.f32 %v1042_v23, %v313_v42  ;;  %v352_v52 = vadd.f32 %v1042_v23, %v317_v49  ;;  %v353_v16 = vadd.f32 %v1042_v23, %v318_v7  ;;  %v289_v42 = vld [vmem:[%s1027_s11 + $0x68] sm:$0xff] }
  0x93   : > { %v321_v34 = vmul.f32 %v1032_v18, %v286_v29 }
  0x94   : > { %v380_v24 = vmax.f32 %v348_v43, 0.0  ;;  %v384_v56 = vmax.f32 %v352_v52, 0.0  ;;  %v385_v32 = vmax.f32 %v353_v16, 0.0  ;;  %v294_v43 = vld [vmem:[%s1027_s11 + $0x90] sm:$0xff] }
  0x99   : > { %568 = vrot.lane.b32.xlu0 %v494_v44, %s815_s8  ;;  %560 = vrot.lane.b32.xlu2 %v490_v45, %s815_s8  ;;  %v279_v44 = vld [vmem:[%s1027_s11 + $0x18] sm:$0xff] }
  0x9a   : > { %558 = vrot.lane.b32.xlu1 %v489_v46, %s815_s8  ;;  %v314_v45 = vmul.f32 %v1032_v18, %v279_v44  ;;  %v284_v44 = vld [vmem:[%s1027_s11 + $0x40] sm:$0xff] }
  0x9b   : > { %v319_v47 = vmul.f32 %v1032_v18, %v284_v44 }
  0x9c   : > { %v349_v46 = vadd.f32 %v1042_v23, %v314_v45 }
  0x9e   : > { %v381_v48 = vmax.f32 %v349_v46, 0.0 }
  0xa1   : > { %574 = vrot.lane.b32.xlu0 %v497_v53, %s815_s8  ;;  %566 = vrot.lane.b32.xlu2 %v493_v54, %s815_s8  ;;  %v280_v53 = vld [vmem:[%s1027_s11 + $0x20] sm:$0xff]  ;;  %v285_v54 = vld [vmem:[%s1027_s11 + $0x48] sm:$0xff] }
  0xa2   : > { %564 = vrot.lane.b32.xlu1 %v492_v55, %s815_s8  ;;  %v276_v55 = vld [vmem:[%s1027_s11] sm:$0xff]  ;;  %v315_v57 = vmul.f32 %v1032_v18, %v280_v53  ;;  %v320_v58 = vmul.f32 %v1032_v18, %v285_v54 }
  0xa3   : > { %v311_v59 = vmul.f32 %v1032_v18, %v276_v55 }
  0xa9   : > { %580 = vrot.lane.b32.xlu0 %v500_v62, %s815_s8  ;;  %572 = vrot.lane.b32.xlu2 %v496_v63, %s815_s8  ;;  %v350_v62 = vadd.f32 %v1042_v23, %v315_v57  ;;  %v355_v63 = vadd.f32 %v1042_v23, %v320_v58  ;;  %v292_v57 = vld [vmem:[%s1027_s11 + $0x80] sm:$0xff]  ;;  %v297_v58 = vld [vmem:[%s1027_s11 + $0xa8] sm:$0xff] }
  0xaa   : > { %570 = vrot.lane.b32.xlu1 %v495_v0, %s815_s8  ;;  %v346_v0 = vadd.f32 %v1042_v23, %v311_v59  ;;  %v287_v59 = vld [vmem:[%s1027_s11 + $0x58] sm:$0xff] }
  0xab   : > { %v382_v5 = vmax.f32 %v350_v62, 0.0  ;;  %v387_v6 = vmax.f32 %v355_v63, 0.0  ;;  %v327_v62 = vmul.f32 %v1032_v18, %v292_v57  ;;  %v332_v63 = vmul.f32 %v1032_v18, %v297_v58 }
  0xac   : > { %v322_v1 = vmul.f32 %v1032_v18, %v287_v59 }
  0xb1   : > { %586 = vrot.lane.b32.xlu0 %v503_v8, %s815_s8  ;;  %578 = vrot.lane.b32.xlu2 %v499_v9, %s815_s8  ;;  %v323_v8 = vmul.f32 %v1032_v18, %v288_v3  ;;  %v378_v9 = vmax.f32 %v346_v0, 0.0 }
  0xb2   : > { %576 = vrot.lane.b32.xlu1 %v498_v10, %s815_s8  ;;  %v312_v10 = vmul.f32 %v1032_v18, %v277_v4 }
  0xb9   : > { %592 = vrot.lane.b32.xlu0 %v506_v26, %s815_s8  ;;  %584 = vrot.lane.b32.xlu2 %v502_v27, %s815_s8  ;;  %v358_v26 = vadd.f32 %v1042_v23, %v323_v8  ;;  %v362_v8 = vadd.f32 %v1042_v23, %v327_v62 }
  0xba   : > { %582 = vrot.lane.b32.xlu1 %v501_v28, %s815_s8  ;;  %v347_v28 = vadd.f32 %v1042_v23, %v312_v10 }
  0xbb   : > { %v390_v33 = vmax.f32 %v358_v26, 0.0 }
  0xc1   : > { %598 = vrot.lane.b32.xlu0 %v509_v35, %s815_s8  ;;  %590 = vrot.lane.b32.xlu2 %v505_v36, %s815_s8  ;;  %v326_v35 = vmul.f32 %v1032_v18, %v291_v30  ;;  %v379_v36 = vmax.f32 %v347_v28, 0.0 }
  0xc2   : > { %588 = vrot.lane.b32.xlu1 %v504_v37, %s815_s8  ;;  %v316_v37 = vmul.f32 %v1032_v18, %v281_v31 }
  0xc3   : > { %v361_v19 = vadd.f32 %v1042_v23, %v326_v35 }
  0xc5   : > { %v393_v45 = vmax.f32 %v361_v19, 0.0 }
  0xc9   : > { %604 = vrot.lane.b32.xlu0 %v512_v38, %s815_s8  ;;  %596 = vrot.lane.b32.xlu2 %v508_v39, %s815_s8 }
  0xca   : > { %594 = vrot.lane.b32.xlu1 %v507_v2, %s815_s8 }
  0xd1   : > { %610 = vrot.lane.b32.xlu0 %v515_v40, %s815_s8  ;;  %602 = vrot.lane.b32.xlu2 %v511_v41, %s815_s8 }
  0xd2   : > { %600 = vrot.lane.b32.xlu1 %v510_v17, %s815_s8  ;;  %v356_v17 = vadd.f32 %v1042_v23, %v321_v34 }
  0xd9   : > { %608 = vrot.lane.b32.xlu2 %v514_v20, %s815_s8 }
  0xda   : > { %606 = vrot.lane.b32.xlu1 %v513_v22, %s815_s8  ;;  %v351_v22 = vadd.f32 %v1042_v23, %v316_v37 }
  0xdc   : > { %v383_v46 = vmax.f32 %v351_v22, 0.0 }
  0xe3   : > { %v553_v21 = vpop.permute.xlu2 %552 }
  0xe4   : > { %v646_v25 = vadd.f32 %v553_v21, %v380_v24  ;;  %v388_v24 = vmax.f32 %v356_v17, 0.0  ;;  %v324_v21 = vmul.f32 %v1032_v18, %v289_v42 }
  0xe6   : > { %679 = vst.msk [vmem:[%s1054_s18 + $0x10] sm:$0xff] %vm676_vm0, %v646_v25  ;;  %v329_v25 = vmul.f32 %v1032_v18, %v294_v43  ;;  %v359_v53 = vadd.f32 %v1042_v23, %v324_v21 }
  0xe8   : > { %v364_v54 = vadd.f32 %v1042_v23, %v329_v25 }
  0xeb   : > { %v555_v50 = vpop.permute.xlu2 %554 }
  0xec   : > { %v647_v51 = vadd.f32 %v555_v50, %v381_v48 }
  0xee   : > { %680 = vst.msk [vmem:[%s1054_s18 + $0x18] sm:$0xff] %vm676_vm0, %v647_v51 }
  0xf3   : > { %v561_v60 = vpop.permute.xlu2 %560 }
  0xf4   : > { %v650_v61 = vadd.f32 %v561_v60, %v384_v56  ;;  %v354_v56 = vadd.f32 %v1042_v23, %v319_v47  ;;  %v391_v60 = vmax.f32 %v359_v53, 0.0 }
  0xf6   : > { %683 = vst.msk [vmem:[%s1054_s18 + $0x30] sm:$0xff] %vm676_vm0, %v650_v61  ;;  %v396_v61 = vmax.f32 %v364_v54, 0.0  ;;  %v386_v0 = vmax.f32 %v354_v56, 0.0 }
  0xfb   : > { %v557_v11 = vpop.permute.xlu0 %556  ;;  %v567_v12 = vpop.permute.xlu2 %566 }
  0xfc   : > { %v648_v13 = vadd.f32 %v557_v11, %v382_v5  ;;  %v653_v14 = vadd.f32 %v567_v12, %v387_v6  ;;  %v549_v15 = vpop.permute.xlu1 %548  ;;  %v357_v11 = vadd.f32 %v1042_v23, %v322_v1  ;;  %v295_v12 = vld [vmem:[%s1027_s11 + $0x98] sm:$0xff] }
  0xfd   : > { %v644_v27 = vadd.f32 %v549_v15, %v378_v9  ;;  %v367_v9 = vadd.f32 %v1042_v23, %v332_v63  ;;  %v394_v15 = vmax.f32 %v362_v8, 0.0  ;;  %v330_v26 = vmul.f32 %v1032_v18, %v295_v12 }
  0xfe   : > { %681 = vst.msk [vmem:[%s1054_s18 + $0x20] sm:$0xff] %vm676_vm0, %v648_v13  ;;  %v300_v13 = vld [vmem:[%s1027_s11 + $0xc0] sm:$0xff]  ;;  %v389_v28 = vmax.f32 %v357_v11, 0.0 }
  0xff   : > { %686 = vst.msk [vmem:[%s1054_s18 + $0x48] sm:$0xff] %vm676_vm0, %v653_v14  ;;  %v290_v14 = vld [vmem:[%s1027_s11 + $0x70] sm:$0xff]  ;;  %v399_v16 = vmax.f32 %v367_v9, 0.0  ;;  %v365_v35 = vadd.f32 %v1042_v23, %v330_v26 }
 0x100   : > { %677 = vst.msk [vmem:[%s1054_s18] sm:$0xff] %vm676_vm0, %v644_v27  ;;  %v335_v27 = vmul.f32 %v1032_v18, %v300_v13  ;;  %v325_v29 = vmul.f32 %v1032_v18, %v290_v14 }
 0x103   : > { %v563_v38 = vpop.permute.xlu0 %562  ;;  %v573_v39 = vpop.permute.xlu2 %572 }
 0x104   : > { %v651_v2 = vadd.f32 %v563_v38, %v385_v32  ;;  %v656_v40 = vadd.f32 %v573_v39, %v390_v33  ;;  %v551_v41 = vpop.permute.xlu1 %550  ;;  %v360_v38 = vadd.f32 %v1042_v23, %v325_v29  ;;  %v298_v39 = vld [vmem:[%s1027_s11 + $0xb0] sm:$0xff] }
 0x105   : > { %v645_v20 = vadd.f32 %v551_v41, %v379_v36  ;;  %v370_v36 = vadd.f32 %v1042_v23, %v335_v27  ;;  %v397_v41 = vmax.f32 %v365_v35, 0.0  ;;  %v333_v19 = vmul.f32 %v1032_v18, %v298_v39  ;;  %v302_v29 = vld [vmem:[%s1027_s11 + $0xd0] sm:$0xff] }
 0x106   : > { %684 = vst.msk [vmem:[%s1054_s18 + $0x38] sm:$0xff] %vm676_vm0, %v651_v2  ;;  %v303_v2 = vld [vmem:[%s1027_s11 + $0xd8] sm:$0xff]  ;;  %v392_v22 = vmax.f32 %v360_v38, 0.0 }
 0x107   : > { %689 = vst.msk [vmem:[%s1054_s18 + $0x60] sm:$0xff] %vm676_vm0, %v656_v40  ;;  %v293_v40 = vld [vmem:[%s1027_s11 + $0x88] sm:$0xff]  ;;  %v402_v17 = vmax.f32 %v370_v36, 0.0  ;;  %v368_v25 = vadd.f32 %v1042_v23, %v333_v19 }
 0x108   : > { %678 = vst.msk [vmem:[%s1054_s18 + $0x8] sm:$0xff] %vm676_vm0, %v645_v20  ;;  %v338_v20 = vmul.f32 %v1032_v18, %v303_v2  ;;  %v328_v42 = vmul.f32 %v1032_v18, %v293_v40  ;;  %v305_v2 = vld [vmem:[%s1027_s11 + $0xe8] sm:$0xff] }
 0x10b   : > { %v569_v48 = vpop.permute.xlu0 %568  ;;  %v579_v49 = vpop.permute.xlu2 %578 }
 0x10c   : > { %v654_v50 = vadd.f32 %v569_v48, %v388_v24  ;;  %v659_v51 = vadd.f32 %v579_v49, %v393_v45  ;;  %v559_v52 = vpop.permute.xlu1 %558  ;;  %v363_v48 = vadd.f32 %v1042_v23, %v328_v42  ;;  %v301_v49 = vld [vmem:[%s1027_s11 + $0xc8] sm:$0xff] }
 0x10d   : > { %v649_v55 = vadd.f32 %v559_v52, %v383_v46  ;;  %v373_v46 = vadd.f32 %v1042_v23, %v338_v20  ;;  %v400_v52 = vmax.f32 %v368_v25, 0.0  ;;  %v336_v54 = vmul.f32 %v1032_v18, %v301_v49 }
 0x10e   : > { %687 = vst.msk [vmem:[%s1054_s18 + $0x50] sm:$0xff] %vm676_vm0, %v654_v50  ;;  %v306_v50 = vld [vmem:[%s1027_s11 + $0xf0] sm:$0xff]  ;;  %v395_v56 = vmax.f32 %v363_v48, 0.0 }
 0x10f   : > { %692 = vst.msk [vmem:[%s1054_s18 + $0x78] sm:$0xff] %vm676_vm0, %v659_v51  ;;  %v296_v51 = vld [vmem:[%s1027_s11 + $0xa0] sm:$0xff]  ;;  %v405_v53 = vmax.f32 %v373_v46, 0.0  ;;  %v371_v63 = vadd.f32 %v1042_v23, %v336_v54 }
 0x110   : > { %682 = vst.msk [vmem:[%s1054_s18 + $0x28] sm:$0xff] %vm676_vm0, %v649_v55  ;;  %v341_v55 = vmul.f32 %v1032_v18, %v306_v50  ;;  %v331_v57 = vmul.f32 %v1032_v18, %v296_v51 }
 0x113   : > { %v575_v3 = vpop.permute.xlu0 %574  ;;  %v585_v4 = vpop.permute.xlu2 %584 }
 0x114   : > { %v657_v5 = vadd.f32 %v575_v3, %v391_v60  ;;  %v662_v6 = vadd.f32 %v585_v4, %v396_v61  ;;  %v565_v7 = vpop.permute.xlu1 %564  ;;  %v366_v3 = vadd.f32 %v1042_v23, %v331_v57  ;;  %v304_v4 = vld [vmem:[%s1027_s11 + $0xe0] sm:$0xff] }
 0x115   : > { %v652_v10 = vadd.f32 %v565_v7, %v386_v0  ;;  %v376_v0 = vadd.f32 %v1042_v23, %v341_v55  ;;  %v339_v8 = vmul.f32 %v1032_v18, %v304_v4 }
 0x116   : > { %690 = vst.msk [vmem:[%s1054_s18 + $0x68] sm:$0xff] %vm676_vm0, %v657_v5  ;;  %v299_v5 = vld [vmem:[%s1027_s11 + $0xb8] sm:$0xff]  ;;  %v398_v9 = vmax.f32 %v366_v3, 0.0 }
 0x117   : > { %695 = vst.msk [vmem:[%s1054_s18 + $0x90] sm:$0xff] %vm676_vm0, %v662_v6  ;;  %v403_v6 = vmax.f32 %v371_v63, 0.0  ;;  %v408_v7 = vmax.f32 %v376_v0, 0.0 }
 0x118   : > { %685 = vst.msk [vmem:[%s1054_s18 + $0x40] sm:$0xff] %vm676_vm0, %v652_v10  ;;  %v334_v10 = vmul.f32 %v1032_v18, %v299_v5 }
 0x11a   : > { %v369_v27 = vadd.f32 %v1042_v23, %v334_v10 }
 0x11b   : > { %v581_v30 = vpop.permute.xlu0 %580  ;;  %v591_v31 = vpop.permute.xlu2 %590 }
 0x11c   : > { %v660_v32 = vadd.f32 %v581_v30, %v394_v15  ;;  %v665_v33 = vadd.f32 %v591_v31, %v399_v16  ;;  %v571_v34 = vpop.permute.xlu1 %570  ;;  %v374_v16 = vadd.f32 %v1042_v23, %v339_v8 }
 0x11d   : > { %v655_v37 = vadd.f32 %v571_v34, %v389_v28  ;;  %v307_v28 = vld [vmem:[%s1027_s11 + $0xf8] sm:$0xff] }
 0x11e   : > { %693 = vst.msk [vmem:[%s1054_s18 + $0x80] sm:$0xff] %vm676_vm0, %v660_v32  ;;  %v406_v30 = vmax.f32 %v374_v16, 0.0  ;;  %v342_v31 = vmul.f32 %v1032_v18, %v307_v28  ;;  %v401_v32 = vmax.f32 %v369_v27, 0.0 }
 0x11f   : > { %698 = vst.msk [vmem:[%s1054_s18 + $0xa8] sm:$0xff] %vm676_vm0, %v665_v33  ;;  %v337_v33 = vmul.f32 %v1032_v18, %v302_v29 }
 0x120   : > { %688 = vst.msk [vmem:[%s1054_s18 + $0x58] sm:$0xff] %vm676_vm0, %v655_v37  ;;  %v377_v37 = vadd.f32 %v1042_v23, %v342_v31 }
 0x121   : > { %v372_v39 = vadd.f32 %v1042_v23, %v337_v33 }
 0x122   : > { %v409_v40 = vmax.f32 %v377_v37, 0.0 }
 0x123   : > { %v587_v43 = vpop.permute.xlu0 %586  ;;  %v597_v44 = vpop.permute.xlu2 %596 }
 0x124   : > { %v663_v24 = vadd.f32 %v587_v43, %v397_v41  ;;  %v668_v45 = vadd.f32 %v597_v44, %v402_v17  ;;  %v577_v21 = vpop.permute.xlu1 %576  ;;  %v404_v41 = vmax.f32 %v372_v39, 0.0  ;;  %v340_v17 = vmul.f32 %v1032_v18, %v305_v2 }
 0x125   : > { %v658_v47 = vadd.f32 %v577_v21, %v392_v22 }
 0x126   : > { %696 = vst.msk [vmem:[%s1054_s18 + $0x98] sm:$0xff] %vm676_vm0, %v663_v24  ;;  %v375_v43 = vadd.f32 %v1042_v23, %v340_v17 }
 0x127   : > { %701 = vst.msk [vmem:[%s1054_s18 + $0xc0] sm:$0xff] %vm676_vm0, %v668_v45 }
 0x128   : > { %691 = vst.msk [vmem:[%s1054_s18 + $0x70] sm:$0xff] %vm676_vm0, %v658_v47  ;;  %v407_v44 = vmax.f32 %v375_v43, 0.0 }
 0x12b   : > { %v593_v58 = vpop.permute.xlu0 %592  ;;  %v603_v59 = vpop.permute.xlu2 %602 }
 0x12c   : > { %v666_v60 = vadd.f32 %v593_v58, %v400_v52  ;;  %v671_v61 = vadd.f32 %v603_v59, %v405_v53  ;;  %v583_v62 = vpop.permute.xlu1 %582 }
 0x12d   : > { %v661_v1 = vadd.f32 %v583_v62, %v395_v56 }
 0x12e   : > { %699 = vst.msk [vmem:[%s1054_s18 + $0xb0] sm:$0xff] %vm676_vm0, %v666_v60 }
 0x12f   : > { %704 = vst.msk [vmem:[%s1054_s18 + $0xd8] sm:$0xff] %vm676_vm0, %v671_v61 }
 0x130   : > { %694 = vst.msk [vmem:[%s1054_s18 + $0x88] sm:$0xff] %vm676_vm0, %v661_v1 }
 0x133   : > { %v599_v11 = vpop.permute.xlu0 %598  ;;  %v609_v12 = vpop.permute.xlu2 %608 }
 0x134   : > { %v669_v13 = vadd.f32 %v599_v11, %v403_v6  ;;  %v674_v14 = vadd.f32 %v609_v12, %v408_v7  ;;  %v589_v15 = vpop.permute.xlu1 %588 }
 0x135   : > { %v664_v26 = vadd.f32 %v589_v15, %v398_v9 }
 0x136   : > { %702 = vst.msk [vmem:[%s1054_s18 + $0xc8] sm:$0xff] %vm676_vm0, %v669_v13 }
 0x137   : > { %707 = vst.msk [vmem:[%s1054_s18 + $0xf0] sm:$0xff] %vm676_vm0, %v674_v14 }
 0x138   : > { %697 = vst.msk [vmem:[%s1054_s18 + $0xa0] sm:$0xff] %vm676_vm0, %v664_v26 }
 0x13b   : > { %v605_v34 = vpop.permute.xlu0 %604 }
 0x13c   : > { %v672_v35 = vadd.f32 %v605_v34, %v406_v30  ;;  %v595_v36 = vpop.permute.xlu1 %594 }
 0x13d   : > { %v667_v38 = vadd.f32 %v595_v36, %v401_v32 }
 0x13e   : > { %705 = vst.msk [vmem:[%s1054_s18 + $0xe0] sm:$0xff] %vm676_vm0, %v672_v35 }
 0x13f   : > { %700 = vst.msk [vmem:[%s1054_s18 + $0xb8] sm:$0xff] %vm676_vm0, %v667_v38 }
 0x143   : > { %v611_v19 = vpop.permute.xlu0 %610 }
 0x144   : > { %v675_v20 = vadd.f32 %v611_v19, %v409_v40  ;;  %v601_v22 = vpop.permute.xlu1 %600 }
 0x145   : > { %v670_v42 = vadd.f32 %v601_v22, %v404_v41 }
 0x146   : > { %708 = vst.msk [vmem:[%s1054_s18 + $0xf8] sm:$0xff] %vm676_vm0, %v675_v20 }
 0x147   : > { %703 = vst.msk [vmem:[%s1054_s18 + $0xd0] sm:$0xff] %vm676_vm0, %v670_v42 }
 0x14c   : > { %v607_v24 = vpop.permute.xlu1 %606 }
 0x14d   : > { %v673_v45 = vadd.f32 %v607_v24, %v407_v44 }
 0x14f   : > { %706 = vst.msk [vmem:[%s1054_s18 + $0xe8] sm:$0xff] %vm676_vm0, %v673_v45 }
 0x150 PF: > { %s16_s21 = sadd.s32 1, %s812_s21  }
 0x151   : > { %p13_p4 = scmp.ge.s32.totalorder %s16_s21, 4  }
 0x153   :  { %15 = sbr.rel (!%p13_p4) target bundleno = 1 (0x1), region = 77 }

// kernel: resblock_pallas.3
= control target key start
LH: loop header
LB: loop body
LE: loop exit
PB: predicated region body
PF: predicated region fallthrough
CT: control target
= control target key end

     0   :  { %s3455_s15 = smov 0   ;;  %s4759_s0 = inlined_call_operand.vmem [shape: f32[2,16,16,4], index: 0, kind: input, shape index: {}]   ;;  %s4760_s1 = inlined_call_operand.vmem [shape: f32[9,4,16], index: 1, kind: input, shape index: {}]   ;;  %s4761_s2 = inlined_call_operand.vmem [shape: f32[1,16], index: 2, kind: input, shape index: {}]   ;;  %s4762_s3 = inlined_call_operand.vmem [shape: f32[2,16,16,16], index: 3, kind: output, shape index: {0}]   ;;  %s4763_s4 = inlined_call_operand.vmem [shape: f32[2,2,16], index: 4, kind: output, shape index: {1}]  }
   0x1 LB: > { %s3088_s16 = sadd.s32 4294967295, %s3427_s15   ;;  %p3092_p0 = scmp.ge.s32.totalorder %s3427_s15, 1  ;;  %s3427_s15 = sphi %s3455_s15, %s15_s15  }
   0x2   : > { %p165_p1 = scmp.lt.s32.totalorder %s3427_s15, 3 }
   0x4   : > { %p166_p2 = pnand %p3092_p0, %p165_p1 }
   0x6   : > { %169 = sbr.rel (%p166_p2) target bundleno = 754 (0x2f2), region = 32 }
   0xb   : > { %v3098_v0 = vld [vmem:[%s4760_s1 + $0x4] sm:$0xf]  ;;  %vm483_vm0 = vcmask 1043456   ;;  %p195_p3 = scmp.lt.s32.totalorder %s3088_s16, 1  ;;  %vm241_vm1 = vcmask 31744   ;;  %v3429_v4 = vmov 0.0  }
   0xc   : > { %3407 = vmatpush.msk.msra.mxu1 %vm483_vm0, %v3098_v0  ;;  %3408 = vmatpush.msk.msra.mxu2 %vm483_vm0, %v3098_v0  ;;  %v3165_v1 = vld [vmem:[%s4760_s1 + $0x8] sm:$0xf]  ;;  %v3199_v2 = vld [vmem:[%s4760_s1 + $0xc] sm:$0xf]  ;;  %v352_v3 = vld [vmem:[%s4760_s1] sm:$0xf] }
   0xd   : > { %s4892_s16 = smov (!%p195_p3, %s3088_s16), 1  ;;  %3409 = vmatpush.msk.msra.mxu3 %vm483_vm0, %v3098_v0  ;;  %242 = vst.msk [vmem:[#allocation2] sm:$0xff] %vm241_vm1, %v3429_v4  ;;  %v3233_v5 = vld [vmem:[%s4760_s1 + $0x10] sm:$0xf]  ;;  %vm244_vm2 = vcmask 25600   ;;  %3099 = vmatpush.msk.msra.mxu0 %vm483_vm0, %v3098_v0  ;;  %vm250_vm3 = vcmask 24576  }
   0xe   : > { %3166 = vmatpush.msk.msrb.mxu2 %vm483_vm0, %v3165_v1  ;;  %3132 = vmatpush.msk.msrb.mxu1 %vm483_vm0, %v352_v3  ;;  %243 = vst.msk [vmem:[#allocation2 + $0x8] sm:$0xff] %vm241_vm1, %v3429_v4  ;;  %s3405_s27 = sshll.u32 %s4892_s16, 8  ;;  %v3301_v56 = vld [vmem:[%s4760_s1 + $0x18] sm:$0xf]  ;;  %v3335_v58 = vld [vmem:[%s4760_s1 + $0x1c] sm:$0xf] }
   0xf   : > { %3200 = vmatpush.msk.msrb.mxu3 %vm483_vm0, %v3199_v2  ;;  %247 = vst.msk [vmem:[#allocation2 + $0x198] sm:$0xff] %vm241_vm1, %v3429_v4  ;;  %s3499_s30 = scalar_lea.vmem %s4759_s0, %s3405_s27  ;;  %3234 = vmatpush.msk.msrb.mxu0 %vm483_vm0, %v3233_v5  ;;  %v3267_v59 = vld [vmem:[%s4760_s1 + $0x14] sm:$0xf]  ;;  %v3369_v0 = vld [vmem:[%s4760_s1 + $0x20] sm:$0xf]  ;;  %s4456_s19 = scalar_lea.vmem %s4762_s3, %s3405_s27  ;;  %vm2795_vm4 = vcmask 130048  }
  0x10   : > { %248 = vst.msk [vmem:[#allocation2 + $0x1a0] sm:$0xff] %vm241_vm1, %v3429_v4  ;;  %v215_v6 = vld [vmem:[%s3499_s30 + $0x30] sm:$0xff]  ;;  %v216_v9 = vld [vmem:[%s3499_s30 + $0x38] sm:$0xff]  ;;  %v217_v13 = vld [vmem:[%s3499_s30 + $0x40] sm:$0xff]  ;;  %s3097_s22 = sshll.u32 %s4892_s16, 1  ;;  %vm2998_vm5 = vcmask 1040384  }
  0x11   : > { %v223_v7 = vld [vmem:[%s3499_s30 + $0x70] sm:$0xff]  ;;  %245 = vst.msk [vmem:[#allocation2 + $0x10] sm:$0x3] %vm244_vm2, %v3429_v4  ;;  %v224_v10 = vld [vmem:[%s3499_s30 + $0x78] sm:$0xff]  ;;  %v225_v14 = vld [vmem:[%s3499_s30 + $0x80] sm:$0xff]  ;;  %s208_s25 = scalar_lea.vmem %s4763_s4, %s3097_s22  ;;  %vm3000_vm6 = vcmask 123904  }
  0x12   : > { %v231_v8 = vld [vmem:[%s3499_s30 + $0xb0] sm:$0xff]  ;;  %294 = vst.msk [vmem:[#allocation2 + $0x61] sm:$0xff] %vm241_vm1, %v215_v6  ;;  %v232_v11 = vld [vmem:[%s3499_s30 + $0xb8] sm:$0xff]  ;;  %v233_v15 = vld [vmem:[%s3499_s30 + $0xc0] sm:$0xff] }
  0x13   : > { %302 = vst.msk [vmem:[#allocation2 + $0xc1] sm:$0xff] %vm241_vm1, %v223_v7  ;;  %v218_v17 = vld [vmem:[%s3499_s30 + $0x48] sm:$0xff]  ;;  %v209_v22 = vld [vmem:[%s3499_s30] sm:$0xff]  ;;  %v219_v24 = vld [vmem:[%s3499_s30 + $0x50] sm:$0xff] }
  0x14   : > { %310 = vst.msk [vmem:[#allocation2 + $0x121] sm:$0xff] %vm241_vm1, %v231_v8  ;;  %v226_v19 = vld [vmem:[%s3499_s30 + $0x88] sm:$0xff]  ;;  %v227_v25 = vld [vmem:[%s3499_s30 + $0x90] sm:$0xff]  ;;  %v220_v31 = vld [vmem:[%s3499_s30 + $0x58] sm:$0xff] }
  0x15   : > { %295 = vst.msk [vmem:[#allocation2 + $0x69] sm:$0xff] %vm241_vm1, %v216_v9  ;;  %v353_v12 = vld [vmem:[#allocation2 + $0x1] sm:$0xff]  ;;  %v235_v29 = vld [vmem:[%s3499_s30 + $0xd0] sm:$0xff]  ;;  %v228_v32 = vld [vmem:[%s3499_s30 + $0x98] sm:$0xff] }
  0x16   : > { %303 = vst.msk [vmem:[#allocation2 + $0xc9] sm:$0xff] %vm241_vm1, %v224_v10  ;;  %3100 = vmatmul.msk.f32.vlgmr.msra.gmra.mxu0 %vm241_vm1, %v353_v12  ;;  %v234_v23 = vld [vmem:[%s3499_s30 + $0xc8] sm:$0xff]  ;;  %v211_v33 = vld [vmem:[%s3499_s30 + $0x10] sm:$0xff]  ;;  %v236_v34 = vld [vmem:[%s3499_s30 + $0xd8] sm:$0xff] }
  0x17   : > { %311 = vst.msk [vmem:[#allocation2 + $0x129] sm:$0xff] %vm241_vm1, %v232_v11  ;;  %v210_v27 = vld [vmem:[%s3499_s30 + $0x8] sm:$0xff]  ;;  %v221_v36 = vld [vmem:[%s3499_s30 + $0x60] sm:$0xff]  ;;  %v212_v39 = vld [vmem:[%s3499_s30 + $0x18] sm:$0xff]  ;;  %3370 = vmatpush.msk.msra.mxu0 %vm483_vm0, %v3369_v0 }
  0x18   : > { %296 = vst.msk [vmem:[#allocation2 + $0x79] sm:$0xff] %vm241_vm1, %v217_v13  ;;  %v354_v21 = vld [vmem:[#allocation2 + $0x9] sm:$0xff]  ;;  %v229_v37 = vld [vmem:[%s3499_s30 + $0xa0] sm:$0xff] }
  0x19   : > { %v3523_v16 = vld [vmem:[#allocation2 + $0x61] sm:$0xff]  ;;  %304 = vst.msk [vmem:[#allocation2 + $0xd9] sm:$0xff] %vm241_vm1, %v225_v14 }
  0x1a   : > { %3108 = vmatmul.msk.f32.vlgmr.msra.gmra.mxu1 %vm241_vm1, %v3523_v16  ;;  %v3529_v18 = vld [vmem:[#allocation2 + $0xc1] sm:$0xff]  ;;  %249 = vst.msk [vmem:[#allocation2 + $0x1a8] sm:$0x3] %vm244_vm2, %v3429_v4 }
  0x1b   : > { %3116 = vmatmul.msk.f32.vlgmr.msra.gmra.mxu2 %vm241_vm1, %v3529_v18  ;;  %v3536_v20 = vld [vmem:[#allocation2 + $0x121] sm:$0xff]  ;;  %312 = vst.msk [vmem:[#allocation2 + $0x139] sm:$0xff] %vm241_vm1, %v233_v15  ;;  %3268 = vmatpush.msk.msra.mxu1 %vm483_vm0, %v3267_v59 }
  0x1c   : > { %3124 = vmatmul.msk.f32.vlgmr.msra.gmra.mxu3 %vm241_vm1, %v3536_v20  ;;  %297 = vst.msk [vmem:[#allocation2 + $0x81] sm:$0xff] %vm241_vm1, %v218_v17  ;;  %v3549_v26 = vld [vmem:[#allocation2 + $0x69] sm:$0xff]  ;;  %v237_v41 = vld [vmem:[%s3499_s30 + $0xe0] sm:$0xff]  ;;  %3302 = vmatpush.msk.msra.mxu2 %vm483_vm0, %v3301_v56 }
  0x1d   : > { %305 = vst.msk [vmem:[#allocation2 + $0xe1] sm:$0xff] %vm241_vm1, %v226_v19  ;;  %v3553_v28 = vld [vmem:[#allocation2 + $0xc9] sm:$0xff]  ;;  %v213_v46 = vld [vmem:[%s3499_s30 + $0x20] sm:$0xff]  ;;  %3336 = vmatpush.msk.msra.mxu3 %vm483_vm0, %v3335_v58 }
  0x1e   : > { %3101 = vmatmul.msk.f32.gmra.mxu0 %vm241_vm1, %v354_v21  ;;  %288 = vst.msk [vmem:[#allocation2 + $0x19] sm:$0xff] %vm241_vm1, %v209_v22  ;;  %v3557_v30 = vld [vmem:[#allocation2 + $0x129] sm:$0xff] }
  0x1f   : > { %313 = vst.msk [vmem:[#allocation2 + $0x141] sm:$0xff] %vm241_vm1, %v234_v23  ;;  %v3581_v38 = vld [vmem:[#allocation2 + $0x79] sm:$0xff]  ;;  %v222_v43 = vld [vmem:[%s3499_s30 + $0x68] sm:$0xff] }
  0x20   : > { %298 = vst.msk [vmem:[#allocation2 + $0x91] sm:$0xff] %vm241_vm1, %v219_v24  ;;  %v3585_v40 = vld [vmem:[#allocation2 + $0xd9] sm:$0xff]  ;;  %v230_v44 = vld [vmem:[%s3499_s30 + $0xa8] sm:$0xff] }
  0x21   : > { %306 = vst.msk [vmem:[#allocation2 + $0xf1] sm:$0xff] %vm241_vm1, %v227_v25  ;;  %v238_v47 = vld [vmem:[%s3499_s30 + $0xe8] sm:$0xff] }
  0x22   : > { %3109 = vmatmul.msk.f32.gmra.mxu1 %vm241_vm1, %v3549_v26  ;;  %289 = vst.msk [vmem:[#allocation2 + $0x21] sm:$0xff] %vm241_vm1, %v210_v27  ;;  %v3589_v42 = vld [vmem:[#allocation2 + $0x139] sm:$0xff]  ;;  %v214_v7 = vld [vmem:[%s3499_s30 + $0x28] sm:$0xff] }
  0x23   : > { %3117 = vmatmul.msk.f32.gmra.mxu2 %vm241_vm1, %v3553_v28  ;;  %314 = vst.msk [vmem:[#allocation2 + $0x151] sm:$0xff] %vm241_vm1, %v235_v29  ;;  %v3611_v48 = vld [vmem:[#allocation2 + $0x81] sm:$0xff] }
  0x24   : > { %3125 = vmatmul.msk.f32.gmra.mxu3 %vm241_vm1, %v3557_v30  ;;  %299 = vst.msk [vmem:[#allocation2 + $0x99] sm:$0xff] %vm241_vm1, %v220_v31  ;;  %v3614_v49 = vld [vmem:[#allocation2 + $0xe1] sm:$0xff] }
  0x25   : > { %v3573_v35 = vld [vmem:[#allocation2 + $0x19] sm:$0xff]  ;;  %307 = vst.msk [vmem:[#allocation2 + $0xf9] sm:$0xff] %vm241_vm1, %v228_v32  ;;  %v812_v9 = vld [vmem:[#allocation2 + $0x2] sm:$0xff] }
  0x26   : > { %3102 = vmatmul.msk.f32.gmra.mxu0 %vm241_vm1, %v3573_v35  ;;  %290 = vst.msk [vmem:[#allocation2 + $0x31] sm:$0xff] %vm241_vm1, %v211_v33  ;;  %v3616_v50 = vld [vmem:[#allocation2 + $0x141] sm:$0xff] }
  0x27   : > { %315 = vst.msk [vmem:[#allocation2 + $0x159] sm:$0xff] %vm241_vm1, %v236_v34  ;;  %v3636_v52 = vld [vmem:[#allocation2 + $0x91] sm:$0xff]  ;;  %v321_v12 = vld [vmem:[#allocation2 + $0x8] sm:$0xff] }
  0x28   : > { %300 = vst.msk [vmem:[#allocation2 + $0xa9] sm:$0xff] %vm241_vm1, %v221_v36  ;;  %v3640_v53 = vld [vmem:[#allocation2 + $0xf1] sm:$0xff]  ;;  %v3846_v31 = vld [vmem:[#allocation2 + $0x68] sm:$0xff] }
  0x29   : > { %308 = vst.msk [vmem:[#allocation2 + $0x109] sm:$0xff] %vm241_vm1, %v229_v37  ;;  %v3599_v45 = vld [vmem:[#allocation2 + $0x21] sm:$0xff] }
  0x2a   : > { %3110 = vmatmul.msk.f32.gmra.mxu1 %vm241_vm1, %v3581_v38  ;;  %291 = vst.msk [vmem:[#allocation2 + $0x39] sm:$0xff] %vm241_vm1, %v212_v39  ;;  %v3644_v54 = vld [vmem:[#allocation2 + $0x151] sm:$0xff]  ;;  %v1091_v14 = vld [vmem:[#allocation2 + $0x20] sm:$0xff] }
  0x2b   : > { %3118 = vmatmul.msk.f32.gmra.mxu2 %vm241_vm1, %v3585_v40  ;;  %316 = vst.msk [vmem:[#allocation2 + $0x169] sm:$0xff] %vm241_vm1, %v237_v41  ;;  %v3668_v57 = vld [vmem:[#allocation2 + $0x99] sm:$0xff]  ;;  %v3860_v34 = vld [vmem:[#allocation2 + $0x62] sm:$0xff] }
  0x2c   : > { %3126 = vmatmul.msk.f32.gmra.mxu3 %vm241_vm1, %v3589_v42  ;;  %301 = vst.msk [vmem:[#allocation2 + $0xb1] sm:$0xff] %vm241_vm1, %v222_v43  ;;  %v3682_v60 = vld [vmem:[#allocation2 + $0xf9] sm:$0xff] }
  0x2d   : > { %309 = vst.msk [vmem:[#allocation2 + $0x111] sm:$0xff] %vm241_vm1, %v230_v44  ;;  %v3622_v51 = vld [vmem:[#allocation2 + $0x31] sm:$0xff]  ;;  %v3882_v43 = vld [vmem:[#allocation2 + $0x80] sm:$0xff] }
  0x2e   : > { %3103 = vmatmul.msk.f32.gmra.mxu0 %vm241_vm1, %v3599_v45  ;;  %292 = vst.msk [vmem:[#allocation2 + $0x49] sm:$0xff] %vm241_vm1, %v213_v46  ;;  %v3688_v61 = vld [vmem:[#allocation2 + $0x159] sm:$0xff] }
  0x2f   : > { %317 = vst.msk [vmem:[#allocation2 + $0x171] sm:$0xff] %vm241_vm1, %v238_v47  ;;  %v3712_v63 = vld [vmem:[#allocation2 + $0xa9] sm:$0xff]  ;;  %v3898_v46 = vld [vmem:[#allocation2 + $0x7a] sm:$0xff] }
  0x30   : > { %251 = vst.msk [vmem:[#allocation2] sm:$0x1] %vm250_vm3, %v3429_v4  ;;  %v3719_v1 = vld [vmem:[#allocation2 + $0x109] sm:$0xff]  ;;  %v3920_v0 = vld [vmem:[#allocation2 + $0x98] sm:$0xff] }
  0x31   : > { %252 = vst.msk [vmem:[#allocation2 + $0x18] sm:$0x1] %vm250_vm3, %v3429_v4  ;;  %v3654_v55 = vld [vmem:[#allocation2 + $0x39] sm:$0xff] }
  0x32   : > { %3111 = vmatmul.msk.f32.gmra.mxu1 %vm241_vm1, %v3611_v48  ;;  %253 = vst.msk [vmem:[#allocation2 + $0x30] sm:$0x1] %vm250_vm3, %v3429_v4  ;;  %v3724_v2 = vld [vmem:[#allocation2 + $0x169] sm:$0xff]  ;;  %v3799_v19 = vld [vmem:[#allocation2 + $0x38] sm:$0xff] }
  0x33   : > { %3119 = vmatmul.msk.f32.gmra.mxu2 %vm241_vm1, %v3614_v49  ;;  %254 = vst.msk [vmem:[#allocation2 + $0x48] sm:$0x1] %vm250_vm3, %v3429_v4  ;;  %v3744_v3 = vld [vmem:[#allocation2 + $0xb1] sm:$0xff] }
  0x34   : > { %3127 = vmatmul.msk.f32.gmra.mxu3 %vm241_vm1, %v3616_v50  ;;  %255 = vst.msk [vmem:[#allocation2 + $0x60] sm:$0x1] %vm250_vm3, %v3429_v4  ;;  %v3748_v5 = vld [vmem:[#allocation2 + $0x111] sm:$0xff] }
  0x35   : > { %256 = vst.msk [vmem:[#allocation2 + $0x78] sm:$0x1] %vm250_vm3, %v3429_v4  ;;  %v3698_v62 = vld [vmem:[#allocation2 + $0x49] sm:$0xff]  ;;  %v3808_v21 = vld [vmem:[#allocation2 + $0x32] sm:$0xff] }
  0x36   : > { %3104 = vmatmul.msk.f32.gmra.mxu0 %vm241_vm1, %v3622_v51  ;;  %257 = vst.msk [vmem:[#allocation2 + $0x90] sm:$0x1] %vm250_vm3, %v3429_v4  ;;  %v3752_v6 = vld [vmem:[#allocation2 + $0x171] sm:$0xff] }
  0x37   : > { %258 = vst.msk [vmem:[#allocation2 + $0xa8] sm:$0x1] %vm250_vm3, %v3429_v4  ;;  %v320_v8 = vld [vmem:[#allocation2] sm:$0xff] }
  0x38   : > { %259 = vst.msk [vmem:[#allocation2 + $0xc0] sm:$0x1] %vm250_vm3, %v3429_v4  ;;  %v1090_v10 = vld [vmem:[#allocation2 + $0x18] sm:$0xff] }
  0x39   : > { %260 = vst.msk [vmem:[#allocation2 + $0xd8] sm:$0x1] %vm250_vm3, %v3429_v4  ;;  %v3788_v15 = vld [vmem:[#allocation2 + $0x30] sm:$0xff] }
  0x3a   : > { %3112 = vmatmul.msk.f32.gmra.mxu1 %vm241_vm1, %v3636_v52  ;;  %261 = vst.msk [vmem:[#allocation2 + $0xf0] sm:$0x1] %vm250_vm3, %v3429_v4  ;;  %v3810_v22 = vld [vmem:[#allocation2 + $0x48] sm:$0xff] }
  0x3b   : > { %3120 = vmatmul.msk.f32.gmra.mxu2 %vm241_vm1, %v3640_v53  ;;  %262 = vst.msk [vmem:[#allocation2 + $0x108] sm:$0x1] %vm250_vm3, %v3429_v4  ;;  %v3834_v27 = vld [vmem:[#allocation2 + $0x60] sm:$0xff] }
  0x3c   : > { %3128 = vmatmul.msk.f32.gmra.mxu3 %vm241_vm1, %v3644_v54  ;;  %263 = vst.msk [vmem:[#allocation2 + $0x120] sm:$0x1] %vm250_vm3, %v3429_v4 }
  0x3d   : > { %264 = vst.msk [vmem:[#allocation2 + $0x138] sm:$0x1] %vm250_vm3, %v3429_v4  ;;  %v3900_v47 = vld [vmem:[#allocation2 + $0x90] sm:$0xff] }
  0x3e   : > { %3105 = vmatmul.msk.f32.gmra.mxu0 %vm241_vm1, %v3654_v55  ;;  %265 = vst.msk [vmem:[#allocation2 + $0x150] sm:$0x1] %vm250_vm3, %v3429_v4 }
  0x3f   : > { %266 = vst.msk [vmem:[#allocation2 + $0x168] sm:$0x1] %vm250_vm3, %v3429_v4 }
  0x40   : > { %267 = vst.msk [vmem:[#allocation2 + $0x180] sm:$0x1] %vm250_vm3, %v3429_v4 }
  0x41   : > { %268 = vst.msk [vmem:[#allocation2 + $0x198] sm:$0x1] %vm250_vm3, %v3429_v4 }
  0x42   : > { %3113 = vmatmul.msk.f32.gmra.mxu1 %vm241_vm1, %v3668_v57  ;;  %269 = vst.msk [vmem:[#allocation2 + $0x11] sm:$0x1] %vm250_vm3, %v3429_v4 }
  0x43   : > { %3121 = vmatmul.msk.f32.gmra.mxu2 %vm241_vm1, %v3682_v60  ;;  %270 = vst.msk [vmem:[#allocation2 + $0x29] sm:$0x1] %vm250_vm3, %v3429_v4 }
  0x44   : > { %3129 = vmatmul.msk.f32.gmra.mxu3 %vm241_vm1, %v3688_v61  ;;  %271 = vst.msk [vmem:[#allocation2 + $0x41] sm:$0x1] %vm250_vm3, %v3429_v4 }
  0x45   : > { %272 = vst.msk [vmem:[#allocation2 + $0x59] sm:$0x1] %vm250_vm3, %v3429_v4 }
  0x46   : > { %3106 = vmatmul.msk.f32.gmra.mxu0 %vm241_vm1, %v3698_v62  ;;  %273 = vst.msk [vmem:[#allocation2 + $0x71] sm:$0x1] %vm250_vm3, %v3429_v4 }
  0x47   : > { %274 = vst.msk [vmem:[#allocation2 + $0x89] sm:$0x1] %vm250_vm3, %v3429_v4 }
  0x48   : > { %275 = vst.msk [vmem:[#allocation2 + $0xa1] sm:$0x1] %vm250_vm3, %v3429_v4 }
  0x49   : > { %276 = vst.msk [vmem:[#allocation2 + $0xb9] sm:$0x1] %vm250_vm3, %v3429_v4  ;;  %v813_v13 = vld [vmem:[#allocation2 + $0xa] sm:$0xff] }
  0x4a   : > { %3114 = vmatmul.msk.f32.gmra.mxu1 %vm241_vm1, %v3712_v63  ;;  %277 = vst.msk [vmem:[#allocation2 + $0xd1] sm:$0x1] %vm250_vm3, %v3429_v4  ;;  %v3797_v17 = vld [vmem:[#allocation2 + $0x22] sm:$0xff] }
  0x4b   : > { %3122 = vmatmul.msk.f32.gmra.mxu2 %vm241_vm1, %v3719_v1  ;;  %278 = vst.msk [vmem:[#allocation2 + $0xe9] sm:$0x1] %vm250_vm3, %v3429_v4  ;;  %v3820_v23 = vld [vmem:[#allocation2 + $0x3a] sm:$0xff] }
  0x4c   : > { %3130 = vmatmul.msk.f32.gmra.mxu3 %vm241_vm1, %v3724_v2  ;;  %279 = vst.msk [vmem:[#allocation2 + $0x101] sm:$0x1] %vm250_vm3, %v3429_v4 }
  0x4d   : > { %280 = vst.msk [vmem:[#allocation2 + $0x119] sm:$0x1] %vm250_vm3, %v3429_v4  ;;  %v3878_v39 = vld [vmem:[#allocation2 + $0x6a] sm:$0xff] }
  0x4e   : > { %281 = vst.msk [vmem:[#allocation2 + $0x131] sm:$0x1] %vm250_vm3, %v3429_v4  ;;  %v3918_v59 = vld [vmem:[#allocation2 + $0x82] sm:$0xff] }
  0x4f   : > { %282 = vst.msk [vmem:[#allocation2 + $0x149] sm:$0x1] %vm250_vm3, %v3429_v4 }
  0x50   : > { %283 = vst.msk [vmem:[#allocation2 + $0x161] sm:$0x1] %vm250_vm3, %v3429_v4 }
  0x51   : > { %284 = vst.msk [vmem:[#allocation2 + $0x179] sm:$0x1] %vm250_vm3, %v3429_v4 }
  0x52   : > { %3115 = vmatmul.msk.f32.gmra.mxu1 %vm241_vm1, %v3744_v3  ;;  %285 = vst.msk [vmem:[#allocation2 + $0x191] sm:$0x1] %vm250_vm3, %v3429_v4 }
  0x53   : > { %3123 = vmatmul.msk.f32.gmra.mxu2 %vm241_vm1, %v3748_v5  ;;  %286 = vst.msk [vmem:[#allocation2 + $0x1a9] sm:$0x1] %vm250_vm3, %v3429_v4  ;;  %v3786_v4 = vld [vmem:[#allocation2 + $0x1a] sm:$0xff] }
  0x54   : > { %3131 = vmatmul.msk.f32.gmra.mxu3 %vm241_vm1, %v3752_v6  ;;  %293 = vst.msk [vmem:[#allocation2 + $0x51] sm:$0xff] %vm241_vm1, %v214_v7 }
  0x55   : > { %4789 = vst [vmem:[#allocation3_spill] sm:$0xff] %v3860_v34 }
  0x56   : > { %4792 = vst [vmem:[#allocation6_spill] sm:$0xff] %v3878_v39 }
  0x57   : > { %4793 = vst [vmem:[#allocation7_spill] sm:$0xff] %v3882_v43 }
  0x58   : > { %4795 = vst [vmem:[#allocation9_spill] sm:$0xff] %v3898_v46 }
  0x59   : > { %4796 = vst [vmem:[#allocation10_spill] sm:$0xff] %v3900_v47 }
  0x5a   : > { %3133 = vmatmul.msk.f32.vlgmr.msrb.gmra.mxu1 %vm241_vm1, %v320_v8  ;;  %4798 = vst [vmem:[#allocation12_spill] sm:$0xff] %v3918_v59 }
  0x5b   : > { %3167 = vmatmul.msk.f32.vlgmr.msrb.gmra.mxu2 %vm241_vm1, %v812_v9  ;;  %v3777_v11 = vld [vmem:[#allocation2 + $0x51] sm:$0xff]  ;;  %4799 = vst [vmem:[#allocation13_spill] sm:$0xff] %v3920_v0 }
  0x5c   : > { %3201 = vmatmul.msk.f32.vlgmr.msrb.gmra.mxu3 %vm241_vm1, %v1090_v10  ;;  %3107 = vmatmul.msk.f32.gmra.mxu0 %vm241_vm1, %v3777_v11  ;;  %v3822_v24 = vld [vmem:[#allocation2 + $0x50] sm:$0xff] }
  0x5d   : > { %v3832_v25 = vld [vmem:[#allocation2 + $0x4a] sm:$0xff]  ;;  %v3844_v29 = vld [vmem:[#allocation2 + $0x52] sm:$0xff] }
  0x62   : > { %3134 = vmatmul.msk.f32.gmra.mxu1 %vm241_vm1, %v321_v12  ;;  %v3940_v12 = vld [vmem:[#allocation2 + $0xa8] sm:$0xff] }
  0x63   : > { %3168 = vmatmul.msk.f32.gmra.mxu2 %vm241_vm1, %v813_v13  ;;  %4802 = vst [vmem:[#allocation16_spill] sm:$0xff] %v3940_v12 }
  0x64   : > { %3202 = vmatmul.msk.f32.gmra.mxu3 %vm241_vm1, %v1091_v14  ;;  %3235 = vmatmul.msk.f32.vlgmr.msrb.gmra.mxu0 %vm241_vm1, %v3573_v35  ;;  %v3862_v35 = vld [vmem:[#allocation2 + $0x78] sm:$0xff] }
  0x65   : > { %4790 = vst [vmem:[#allocation4_spill] sm:$0xff] %v3862_v35 }
  0x6a   : > { %3135 = vmatmul.msk.f32.gmra.mxu1 %vm241_vm1, %v1090_v10  ;;  %v3938_v10 = vld [vmem:[#allocation2 + $0x92] sm:$0xff] }
  0x6b   : > { %3169 = vmatmul.msk.f32.gmra.mxu2 %vm241_vm1, %v3786_v4  ;;  %4801 = vst [vmem:[#allocation15_spill] sm:$0xff] %v3938_v10 }
  0x6c   : > { %3203 = vmatmul.msk.f32.gmra.mxu3 %vm241_vm1, %v3788_v15  ;;  %3236 = vmatmul.msk.f32.gmra.mxu0 %vm241_vm1, %v3599_v45 }
  0x72   : > { %3136 = vmatmul.msk.f32.gmra.mxu1 %vm241_vm1, %v1091_v14 }
  0x73   : > { %3170 = vmatmul.msk.f32.gmra.mxu2 %vm241_vm1, %v3797_v17 }
  0x74   : > { %3204 = vmatmul.msk.f32.gmra.mxu3 %vm241_vm1, %v3799_v19  ;;  %3237 = vmatmul.msk.f32.gmra.mxu0 %vm241_vm1, %v3622_v51 }
  0x7a   : > { %3137 = vmatmul.msk.f32.gmra.mxu1 %vm241_vm1, %v3788_v15 }
  0x7b   : > { %3171 = vmatmul.msk.f32.gmra.mxu2 %vm241_vm1, %v3808_v21 }
  0x7c   : > { %3205 = vmatmul.msk.f32.gmra.mxu3 %vm241_vm1, %v3810_v22  ;;  %3238 = vmatmul.msk.f32.gmra.mxu0 %vm241_vm1, %v3654_v55 }
  0x82   : > { %3138 = vmatmul.msk.f32.gmra.mxu1 %vm241_vm1, %v3799_v19 }
  0x83   : > { %3172 = vmatmul.msk.f32.gmra.mxu2 %vm241_vm1, %v3820_v23 }
  0x84   : > { %3206 = vmatmul.msk.f32.gmra.mxu3 %vm241_vm1, %v3822_v24  ;;  %3239 = vmatmul.msk.f32.gmra.mxu0 %vm241_vm1, %v3698_v62 }
  0x8a   : > { %3139 = vmatmul.msk.f32.gmra.mxu1 %vm241_vm1, %v3810_v22 }
  0x8b   : > { %3173 = vmatmul.msk.f32.gmra.mxu2 %vm241_vm1, %v3832_v25 }
  0x8c   : > { %3207 = vmatmul.msk.f32.gmra.mxu3 %vm241_vm1, %v3834_v27  ;;  %3240 = vmatmul.msk.f32.gmra.mxu0 %vm241_vm1, %v3777_v11 }
  0x92   : > { %3140 = vmatmul.msk.f32.gmra.mxu1 %vm241_vm1, %v3822_v24 }
  0x93   : > { %3174 = vmatmul.msk.f32.gmra.mxu2 %vm241_vm1, %v3844_v29  ;;  %v3854_v32 = vpop.f32.mrf.mxu0 }
  0x94   : > { %3208 = vmatmul.msk.f32.gmra.mxu3 %vm241_vm1, %v3846_v31  ;;  %3241 = vmatmul.msk.f32.gmra.mxu0 %vm241_vm1, %v3523_v16 }
  0x97   : > { %v3858_v33 = vpop.f32.mrf.mxu1 }
  0x9a   : > { %3141 = vmatmul.msk.f32.gmra.mxu1 %vm241_vm1, %v3834_v27 }
  0x9b   : > { %3175 = vmatmul.msk.f32.gmra.mxu2 %vm241_vm1, %v3860_v34  ;;  %v3880_v41 = vpop.f32.mrf.mxu0  ;;  %v4033_v34 = vld [vmem:[#allocation2 + $0xe0] sm:$0xff] }
  0x9c   : > { %3209 = vmatmul.msk.f32.gmra.mxu3 %vm241_vm1, %v3862_v35  ;;  %3242 = vmatmul.msk.f32.gmra.mxu0 %vm241_vm1, %v3549_v26 }
  0x9e   : > { %v3870_v36 = vpop.f32.mrf.mxu2 }
  0x9f   : > { %v3874_v16 = vpop.f32.mrf.mxu1  ;;  %v3876_v37 = vpop.f32.mrf.mxu3 }
  0xa0   : > { %4791 = vst [vmem:[#allocation5_spill] sm:$0xff] %v3876_v37  ;;  %v3978_v37 = vld [vmem:[#allocation2 + $0xaa] sm:$0xff] }
  0xa1   : > { %4807 = vst [vmem:[#allocation21_spill] sm:$0xff] %v3978_v37 }
  0xa2   : > { %3142 = vmatmul.msk.f32.gmra.mxu1 %vm241_vm1, %v3846_v31 }
  0xa3   : > { %3176 = vmatmul.msk.f32.gmra.mxu2 %vm241_vm1, %v3878_v39  ;;  %v3904_v51 = vpop.f32.mrf.mxu0  ;;  %v4016_v39 = vld [vmem:[#allocation2 + $0xd8] sm:$0xff] }
  0xa4   : > { %3210 = vmatmul.msk.f32.gmra.mxu3 %vm241_vm1, %v3882_v43  ;;  %3243 = vmatmul.msk.f32.gmra.mxu0 %vm241_vm1, %v3581_v38 }
  0xa6   : > { %v3890_v26 = vpop.f32.mrf.mxu2 }
  0xa7   : > { %v3894_v44 = vpop.f32.mrf.mxu1  ;;  %v3896_v45 = vpop.f32.mrf.mxu3 }
  0xa8   : > { %4794 = vst [vmem:[#allocation8_spill] sm:$0xff] %v3896_v45  ;;  %v3960_v45 = vld [vmem:[#allocation2 + $0xb0] sm:$0xff] }
  0xa9   : > { %4805 = vst [vmem:[#allocation19_spill] sm:$0xff] %v3960_v45 }
  0xaa   : > { %3143 = vmatmul.msk.f32.gmra.mxu1 %vm241_vm1, %v3862_v35  ;;  %v4029_v35 = vld [vmem:[#allocation2 + $0xca] sm:$0xff] }
  0xab   : > { %3177 = vmatmul.msk.f32.gmra.mxu2 %vm241_vm1, %v3898_v46  ;;  %v3928_v7 = vpop.f32.mrf.mxu0  ;;  %v3998_v46 = vld [vmem:[#allocation2 + $0xc8] sm:$0xff] }
  0xac   : > { %3211 = vmatmul.msk.f32.gmra.mxu3 %vm241_vm1, %v3900_v47  ;;  %3244 = vmatmul.msk.f32.gmra.mxu0 %vm241_vm1, %v3611_v48 }
  0xae   : > { %v3910_v38 = vpop.f32.mrf.mxu2 }
  0xaf   : > { %v3914_v56 = vpop.f32.mrf.mxu1  ;;  %v3916_v58 = vpop.f32.mrf.mxu3 }
  0xb0   : > { %4797 = vst [vmem:[#allocation11_spill] sm:$0xff] %v3916_v58  ;;  %v3958_v58 = vld [vmem:[#allocation2 + $0x9a] sm:$0xff] }
  0xb1   : > { %4804 = vst [vmem:[#allocation18_spill] sm:$0xff] %v3958_v58 }
  0xb2   : > { %3144 = vmatmul.msk.f32.gmra.mxu1 %vm241_vm1, %v3882_v43  ;;  %v4014_v43 = vld [vmem:[#allocation2 + $0xc2] sm:$0xff] }
  0xb3   : > { %3178 = vmatmul.msk.f32.gmra.mxu2 %vm241_vm1, %v3918_v59  ;;  %4814 = vst [vmem:[#allocation28_spill] sm:$0xff] %v4014_v43 }
  0xb4   : > { %3212 = vmatmul.msk.f32.gmra.mxu3 %vm241_vm1, %v3920_v0  ;;  %3245 = vmatmul.msk.f32.gmra.mxu0 %vm241_vm1, %v3636_v52  ;;  %v3950_v52 = vpop.f32.mrf.mxu0 }
  0xb6   : > { %v3930_v48 = vpop.f32.mrf.mxu2 }
  0xb7   : > { %v3934_v8 = vpop.f32.mrf.mxu1  ;;  %v3936_v9 = vpop.f32.mrf.mxu3 }
  0xb8   : > { %4800 = vst [vmem:[#allocation14_spill] sm:$0xff] %v3936_v9 }
  0xba   : > { %3145 = vmatmul.msk.f32.gmra.mxu1 %vm241_vm1, %v3900_v47  ;;  %v3996_v47 = vld [vmem:[#allocation2 + $0xb2] sm:$0xff] }
  0xbb   : > { %3179 = vmatmul.msk.f32.gmra.mxu2 %vm241_vm1, %v3938_v10  ;;  %4811 = vst [vmem:[#allocation25_spill] sm:$0xff] %v3996_v47 }
  0xbc   : > { %3213 = vmatmul.msk.f32.gmra.mxu3 %vm241_vm1, %v3940_v12  ;;  %3246 = vmatmul.msk.f32.gmra.mxu0 %vm241_vm1, %v3668_v57  ;;  %v3976_v59 = vpop.f32.mrf.mxu0 }
  0xbe   : > { %v3948_v13 = vpop.f32.mrf.mxu2 }
  0xbf   : > { %v3954_v14 = vpop.f32.mrf.mxu1  ;;  %v3956_v9 = vpop.f32.mrf.mxu3 }
  0xc0   : > { %4803 = vst [vmem:[#allocation17_spill] sm:$0xff] %v3956_v9 }
  0xc2   : > { %3146 = vmatmul.msk.f32.gmra.mxu1 %vm241_vm1, %v3920_v0  ;;  %v3980_v0 = vld [vmem:[#allocation2 + $0xc0] sm:$0xff] }
  0xc3   : > { %3180 = vmatmul.msk.f32.gmra.mxu2 %vm241_vm1, %v3958_v58  ;;  %4808 = vst [vmem:[#allocation22_spill] sm:$0xff] %v3980_v0 }
  0xc4   : > { %3214 = vmatmul.msk.f32.gmra.mxu3 %vm241_vm1, %v3960_v45  ;;  %3247 = vmatmul.msk.f32.gmra.mxu0 %vm241_vm1, %v3712_v63 }
  0xc6   : > { %v3968_v10 = vpop.f32.mrf.mxu2 }
  0xc7   : > { %v3972_v57 = vpop.f32.mrf.mxu1  ;;  %v3974_v9 = vpop.f32.mrf.mxu3 }
  0xc8   : > { %4806 = vst [vmem:[#allocation20_spill] sm:$0xff] %v3974_v9 }
  0xca   : > { %3147 = vmatmul.msk.f32.gmra.mxu1 %vm241_vm1, %v3940_v12  ;;  %v4000_v12 = vpop.f32.mrf.mxu0 }
  0xcb   : > { %3181 = vmatmul.msk.f32.gmra.mxu2 %vm241_vm1, %v3978_v37 }
  0xcc   : > { %3215 = vmatmul.msk.f32.gmra.mxu3 %vm241_vm1, %v3980_v0  ;;  %3248 = vmatmul.msk.f32.gmra.mxu0 %vm241_vm1, %v3744_v3 }
  0xce   : > { %v3988_v63 = vpop.f32.mrf.mxu2 }
  0xcf   : > { %4809 = vst [vmem:[#allocation23_spill] sm:$0xff] %v3988_v63  ;;  %v3992_v9 = vpop.f32.mrf.mxu1  ;;  %v3994_v58 = vpop.f32.mrf.mxu3 }
  0xd0   : > { %4810 = vst [vmem:[#allocation24_spill] sm:$0xff] %v3994_v58 }
  0xd2   : > { %3148 = vmatmul.msk.f32.gmra.mxu1 %vm241_vm1, %v3960_v45 }
  0xd3   : > { %3182 = vmatmul.msk.f32.gmra.mxu2 %vm241_vm1, %v3996_v47 }
  0xd4   : > { %3216 = vmatmul.msk.f32.gmra.mxu3 %vm241_vm1, %v3998_v46  ;;  %3249 = vmatmul.msk.f32.gmra.mxu0 %vm241_vm1, %v3529_v18 }
  0xd6   : > { %v4008_v3 = vpop.f32.mrf.mxu2 }
  0xd7   : > { %4812 = vst [vmem:[#allocation26_spill] sm:$0xff] %v4008_v3  ;;  %v4012_v58 = vpop.f32.mrf.mxu3  ;;  %v716_v37 = vpop.f32.mrf.mxu1 }
  0xd8   : > { %4813 = vst [vmem:[#allocation27_spill] sm:$0xff] %v4012_v58  ;;  %v717_v18 = vadd.f32 %v716_v37, %v3854_v32 }
  0xd9   : > { %v4022_v47 = vpop.f32.mrf.mxu0 }
  0xda   : > { %3149 = vmatmul.msk.f32.gmra.mxu1 %vm241_vm1, %v3980_v0 }
  0xdb   : > { %3183 = vmatmul.msk.f32.gmra.mxu2 %vm241_vm1, %v4014_v43  ;;  %v4050_v43 = vld [vmem:[#allocation2 + $0xf0] sm:$0xff] }
  0xdc   : > { %3217 = vmatmul.msk.f32.gmra.mxu3 %vm241_vm1, %v4016_v39  ;;  %3250 = vmatmul.msk.f32.gmra.mxu0 %vm241_vm1, %v3553_v28 }
  0xde   : > { %v962_v45 = vpop.f32.mrf.mxu2 }
  0xdf   : > { %v1058_v58 = vadd.f32 %v962_v45, %v717_v18  ;;  %v719_v3 = vpop.f32.mrf.mxu1  ;;  %v1240_v63 = vpop.f32.mrf.mxu3  ;;  %v4046_v18 = vld [vmem:[#allocation2 + $0xda] sm:$0xff] }
  0xe0   : > { %v720_v28 = vadd.f32 %v719_v3, %v3880_v41 }
  0xe1   : > { %v4031_v0 = vadd.f32 %v1240_v63, %v1058_v58  ;;  %v4039_v32 = vpop.f32.mrf.mxu0 }
  0xe2   : > { %3150 = vmatmul.msk.f32.gmra.mxu1 %vm241_vm1, %v3998_v46  ;;  %4816 = vst [vmem:[#allocation30_spill] sm:$0xff] %v4039_v32  ;;  %v4067_v32 = vld [vmem:[#allocation2 + $0xf8] sm:$0xff] }
  0xe3   : > { %4815 = vst [vmem:[#allocation29_spill] sm:$0xff] %v4031_v0  ;;  %3184 = vmatmul.msk.f32.gmra.mxu2 %vm241_vm1, %v4029_v35 }
  0xe4   : > { %3218 = vmatmul.msk.f32.gmra.mxu3 %vm241_vm1, %v4033_v34  ;;  %3251 = vmatmul.msk.f32.gmra.mxu0 %vm241_vm1, %v3585_v40 }
  0xe6   : > { %v965_v37 = vpop.f32.mrf.mxu2 }
  0xe7   : > { %v1059_v45 = vadd.f32 %v965_v37, %v720_v28  ;;  %v722_v58 = vpop.f32.mrf.mxu1  ;;  %v1243_v63 = vpop.f32.mrf.mxu3 }
  0xe8   : > { %v723_v40 = vadd.f32 %v722_v58, %v3904_v51 }
  0xe9   : > { %v4048_v0 = vadd.f32 %v1243_v63, %v1059_v45  ;;  %v4056_v41 = vpop.f32.mrf.mxu0  ;;  %v4063_v63 = vld [vmem:[#allocation2 + $0xe2] sm:$0xff] }
  0xea   : > { %3151 = vmatmul.msk.f32.gmra.mxu1 %vm241_vm1, %v4016_v39  ;;  %4818 = vst [vmem:[#allocation32_spill] sm:$0xff] %v4056_v41  ;;  %v4084_v41 = vld [vmem:[#allocation2 + $0x108] sm:$0xff] }
  0xeb   : > { %4817 = vst [vmem:[#allocation31_spill] sm:$0xff] %v4048_v0  ;;  %3185 = vmatmul.msk.f32.gmra.mxu2 %vm241_vm1, %v4046_v18 }
  0xec   : > { %3219 = vmatmul.msk.f32.gmra.mxu3 %vm241_vm1, %v4050_v43  ;;  %3252 = vmatmul.msk.f32.gmra.mxu0 %vm241_vm1, %v3614_v49 }
  0xee   : > { %v968_v3 = vpop.f32.mrf.mxu2 }
  0xef   : > { %v1060_v28 = vadd.f32 %v968_v3, %v723_v40  ;;  %v725_v37 = vpop.f32.mrf.mxu1  ;;  %v1246_v45 = vpop.f32.mrf.mxu3 }
  0xf0   : > { %v726_v49 = vadd.f32 %v725_v37, %v3928_v7 }
  0xf1   : > { %v4065_v0 = vadd.f32 %v1246_v45, %v1060_v28  ;;  %v4073_v51 = vpop.f32.mrf.mxu0  ;;  %v4080_v45 = vld [vmem:[#allocation2 + $0xf2] sm:$0xff] }
  0xf2   : > { %3152 = vmatmul.msk.f32.gmra.mxu1 %vm241_vm1, %v4033_v34  ;;  %4820 = vst [vmem:[#allocation34_spill] sm:$0xff] %v4073_v51  ;;  %v4101_v51 = vld [vmem:[#allocation2 + $0x110] sm:$0xff] }
  0xf3   : > { %4819 = vst [vmem:[#allocation33_spill] sm:$0xff] %v4065_v0  ;;  %3186 = vmatmul.msk.f32.gmra.mxu2 %vm241_vm1, %v4063_v63 }
  0xf4   : > { %3220 = vmatmul.msk.f32.gmra.mxu3 %vm241_vm1, %v4067_v32  ;;  %3253 = vmatmul.msk.f32.gmra.mxu0 %vm241_vm1, %v3640_v53 }
  0xf6   : > { %v971_v58 = vpop.f32.mrf.mxu2 }
  0xf7   : > { %v1061_v40 = vadd.f32 %v971_v58, %v726_v49  ;;  %v728_v3 = vpop.f32.mrf.mxu1  ;;  %v1249_v28 = vpop.f32.mrf.mxu3 }
  0xf8   : > { %v729_v53 = vadd.f32 %v728_v3, %v3950_v52 }
  0xf9   : > { %v4082_v0 = vadd.f32 %v1249_v28, %v1061_v40  ;;  %v4090_v7 = vpop.f32.mrf.mxu0  ;;  %v4097_v28 = vld [vmem:[#allocation2 + $0xfa] sm:$0xff] }
  0xfa   : > { %3153 = vmatmul.msk.f32.gmra.mxu1 %vm241_vm1, %v4050_v43  ;;  %4822 = vst [vmem:[#allocation36_spill] sm:$0xff] %v4090_v7  ;;  %v4118_v7 = vld [vmem:[#allocation2 + $0x120] sm:$0xff] }
  0xfb   : > { %4821 = vst [vmem:[#allocation35_spill] sm:$0xff] %v4082_v0  ;;  %3187 = vmatmul.msk.f32.gmra.mxu2 %vm241_vm1, %v4080_v45 }
  0xfc   : > { %3221 = vmatmul.msk.f32.gmra.mxu3 %vm241_vm1, %v4084_v41  ;;  %3254 = vmatmul.msk.f32.gmra.mxu0 %vm241_vm1, %v3682_v60 }
  0xfe   : > { %v974_v37 = vpop.f32.mrf.mxu2 }
  0xff   : > { %v1062_v49 = vadd.f32 %v974_v37, %v729_v53  ;;  %v731_v58 = vpop.f32.mrf.mxu1  ;;  %v1252_v40 = vpop.f32.mrf.mxu3 }
 0x100   : > { %v732_v60 = vadd.f32 %v731_v58, %v3976_v59 }
 0x101   : > { %v4099_v0 = vadd.f32 %v1252_v40, %v1062_v49  ;;  %v4107_v52 = vpop.f32.mrf.mxu0  ;;  %v4114_v40 = vld [vmem:[#allocation2 + $0x10a] sm:$0xff] }
 0x102   : > { %3154 = vmatmul.msk.f32.gmra.mxu1 %vm241_vm1, %v4067_v32  ;;  %4824 = vst [vmem:[#allocation38_spill] sm:$0xff] %v4107_v52  ;;  %v1113_v52 = vld [vmem:[#allocation2 + $0x128] sm:$0xff] }
 0x103   : > { %4823 = vst [vmem:[#allocation37_spill] sm:$0xff] %v4099_v0  ;;  %3188 = vmatmul.msk.f32.gmra.mxu2 %vm241_vm1, %v4097_v28 }
 0x104   : > { %3222 = vmatmul.msk.f32.gmra.mxu3 %vm241_vm1, %v4101_v51  ;;  %3255 = vmatmul.msk.f32.gmra.mxu0 %vm241_vm1, %v3719_v1 }
 0x106   : > { %v977_v3 = vpop.f32.mrf.mxu2 }
 0x107   : > { %v1063_v53 = vadd.f32 %v977_v3, %v732_v60  ;;  %v734_v37 = vpop.f32.mrf.mxu1  ;;  %v1255_v49 = vpop.f32.mrf.mxu3 }
 0x108   : > { %v735_v1 = vadd.f32 %v734_v37, %v4000_v12 }
 0x109   : > { %v4116_v0 = vadd.f32 %v1255_v49, %v1063_v53  ;;  %v4124_v59 = vpop.f32.mrf.mxu0  ;;  %v4131_v49 = vld [vmem:[#allocation2 + $0x112] sm:$0xff] }
 0x10a   : > { %3155 = vmatmul.msk.f32.gmra.mxu1 %vm241_vm1, %v4084_v41  ;;  %4826 = vst [vmem:[#allocation40_spill] sm:$0xff] %v4124_v59 }
 0x10b   : > { %4825 = vst [vmem:[#allocation39_spill] sm:$0xff] %v4116_v0  ;;  %3189 = vmatmul.msk.f32.gmra.mxu2 %vm241_vm1, %v4114_v40 }
 0x10c   : > { %3223 = vmatmul.msk.f32.gmra.mxu3 %vm241_vm1, %v4118_v7  ;;  %3256 = vmatmul.msk.f32.gmra.mxu0 %vm241_vm1, %v3748_v5 }
 0x10e   : > { %v980_v58 = vpop.f32.mrf.mxu2 }
 0x10f   : > { %v1064_v60 = vadd.f32 %v980_v58, %v735_v1  ;;  %v737_v3 = vpop.f32.mrf.mxu1  ;;  %v1258_v53 = vpop.f32.mrf.mxu3 }
 0x110   : > { %v738_v5 = vadd.f32 %v737_v3, %v4022_v47 }
 0x111   : > { %v4133_v0 = vadd.f32 %v1258_v53, %v1064_v60  ;;  %v4139_v59 = vpop.f32.mrf.mxu0  ;;  %v4145_v60 = vld [vmem:[#allocation2 + $0x122] sm:$0xff] }
 0x112   : > { %3156 = vmatmul.msk.f32.gmra.mxu1 %vm241_vm1, %v4101_v51  ;;  %4828 = vst [vmem:[#allocation42_spill] sm:$0xff] %v4139_v59 }
 0x113   : > { %4827 = vst [vmem:[#allocation41_spill] sm:$0xff] %v4133_v0  ;;  %3190 = vmatmul.msk.f32.gmra.mxu2 %vm241_vm1, %v4131_v49  ;;  %v1114_v0 = vld [vmem:[#allocation2 + $0x138] sm:$0xff] }
 0x114   : > { %3224 = vmatmul.msk.f32.gmra.mxu3 %vm241_vm1, %v1113_v52  ;;  %3257 = vmatmul.msk.f32.gmra.mxu0 %vm241_vm1, %v3536_v20 }
 0x116   : > { %v983_v12 = vpop.f32.mrf.mxu2 }
 0x117   : > { %v1065_v37 = vadd.f32 %v983_v12, %v738_v5  ;;  %v740_v1 = vpop.f32.mrf.mxu1  ;;  %v1261_v58 = vpop.f32.mrf.mxu3 }
 0x118   : > { %v741_v20 = vadd.f32 %v740_v1, %v3858_v33 }
 0x119   : > { %v4147_v53 = vadd.f32 %v1261_v58, %v1065_v37  ;;  %v4153_v59 = vpop.f32.mrf.mxu0  ;;  %v837_v37 = vld [vmem:[#allocation2 + $0x12a] sm:$0xff] }
 0x11a   : > { %3157 = vmatmul.msk.f32.gmra.mxu1 %vm241_vm1, %v4118_v7  ;;  %4830 = vst [vmem:[#allocation44_spill] sm:$0xff] %v4153_v59 }
 0x11b   : > { %4829 = vst [vmem:[#allocation43_spill] sm:$0xff] %v4147_v53  ;;  %3191 = vmatmul.msk.f32.gmra.mxu2 %vm241_vm1, %v4145_v60  ;;  %v1115_v53 = vld [vmem:[#allocation2 + $0x140] sm:$0xff] }
 0x11c   : > { %3225 = vmatmul.msk.f32.gmra.mxu3 %vm241_vm1, %v1114_v0  ;;  %3258 = vmatmul.msk.f32.gmra.mxu0 %vm241_vm1, %v3557_v30  ;;  %v239_v30 = vld [vmem:[%s3499_s30 + $0xf0] sm:$0xff] }
 0x11d   : > { %318 = vst.msk [vmem:[#allocation2 + $0x181] sm:$0xff] %vm241_vm1, %v239_v30 }
 0x11e   : > { %v986_v47 = vpop.f32.mrf.mxu2 }
 0x11f   : > { %v1066_v3 = vadd.f32 %v986_v47, %v741_v20  ;;  %v743_v5 = vpop.f32.mrf.mxu1  ;;  %v1264_v12 = vpop.f32.mrf.mxu3 }
 0x120   : > { %v744_v33 = vadd.f32 %v743_v5, %v3874_v16 }
 0x121   : > { %v4159_v58 = vadd.f32 %v1264_v12, %v1066_v3  ;;  %v4163_v59 = vpop.f32.mrf.mxu0 }
 0x122   : > { %3158 = vmatmul.msk.f32.gmra.mxu1 %vm241_vm1, %v1113_v52  ;;  %v838_v52 = vld [vmem:[#allocation2 + $0x13a] sm:$0xff] }
 0x123   : > { %3192 = vmatmul.msk.f32.gmra.mxu2 %vm241_vm1, %v837_v37  ;;  %v1116_v37 = vld [vmem:[#allocation2 + $0x150] sm:$0xff] }
 0x124   : > { %3226 = vmatmul.msk.f32.gmra.mxu3 %vm241_vm1, %v1115_v53  ;;  %3259 = vmatmul.msk.f32.gmra.mxu0 %vm241_vm1, %v3589_v42 }
 0x126   : > { %v989_v1 = vpop.f32.mrf.mxu2 }
 0x127   : > { %v1067_v20 = vadd.f32 %v989_v1, %v744_v33  ;;  %v746_v47 = vpop.f32.mrf.mxu1  ;;  %v1267_v3 = vpop.f32.mrf.mxu3  ;;  %v240_v33 = vld [vmem:[%s3499_s30 + $0xf8] sm:$0xff] }
 0x128   : > { %v747_v5 = vadd.f32 %v746_v47, %v3894_v44  ;;  %319 = vst.msk [vmem:[#allocation2 + $0x189] sm:$0xff] %vm241_vm1, %v240_v33  ;;  %v840_v33 = vld [vmem:[#allocation2 + $0x152] sm:$0xff] }
 0x129   : > { %v4171_v12 = vadd.f32 %v1267_v3, %v1067_v20  ;;  %v4175_v16 = vpop.f32.mrf.mxu0  ;;  %v839_v3 = vld [vmem:[#allocation2 + $0x142] sm:$0xff] }
 0x12a   : > { %3159 = vmatmul.msk.f32.gmra.mxu1 %vm241_vm1, %v1114_v0  ;;  %4831 = vst [vmem:[#allocation45_spill] sm:$0xff] %v4175_v16 }
 0x12b   : > { %3193 = vmatmul.msk.f32.gmra.mxu2 %vm241_vm1, %v838_v52  ;;  %v1117_v52 = vld [vmem:[#allocation2 + $0x158] sm:$0xff] }
 0x12c   : > { %3227 = vmatmul.msk.f32.gmra.mxu3 %vm241_vm1, %v1116_v37  ;;  %3260 = vmatmul.msk.f32.gmra.mxu0 %vm241_vm1, %v3616_v50 }
 0x12e   : > { %v992_v42 = vpop.f32.mrf.mxu2 }
 0x12f   : > { %v1068_v1 = vadd.f32 %v992_v42, %v747_v5  ;;  %v749_v30 = vpop.f32.mrf.mxu1  ;;  %v1270_v20 = vpop.f32.mrf.mxu3 }
 0x130   : > { %v750_v44 = vadd.f32 %v749_v30, %v3914_v56 }
 0x131   : > { %v4183_v0 = vadd.f32 %v1270_v20, %v1068_v1  ;;  %v4187_v16 = vpop.f32.mrf.mxu0  ;;  %v1118_v20 = vld [vmem:[#allocation2 + $0x168] sm:$0xff] }
 0x132   : > { %3160 = vmatmul.msk.f32.gmra.mxu1 %vm241_vm1, %v1115_v53 }
 0x133   : > { %3194 = vmatmul.msk.f32.gmra.mxu2 %vm241_vm1, %v839_v3 }
 0x134   : > { %3228 = vmatmul.msk.f32.gmra.mxu3 %vm241_vm1, %v1117_v52  ;;  %3261 = vmatmul.msk.f32.gmra.mxu0 %vm241_vm1, %v3644_v54 }
 0x136   : > { %v995_v50 = vpop.f32.mrf.mxu2 }
 0x137   : > { %v1069_v47 = vadd.f32 %v995_v50, %v750_v44  ;;  %v752_v5 = vpop.f32.mrf.mxu1  ;;  %v1273_v42 = vpop.f32.mrf.mxu3  ;;  %v841_v50 = vld [vmem:[#allocation2 + $0x15a] sm:$0xff] }
 0x138   : > { %v753_v56 = vadd.f32 %v752_v5, %v3934_v8 }
 0x139   : > { %v4193_v1 = vadd.f32 %v1273_v42, %v1069_v47  ;;  %v4197_v53 = vpop.f32.mrf.mxu0  ;;  %v1119_v42 = vld [vmem:[#allocation2 + $0x170] sm:$0xff] }
 0x13a   : > { %3161 = vmatmul.msk.f32.gmra.mxu1 %vm241_vm1, %v1116_v37 }
 0x13b   : > { %3195 = vmatmul.msk.f32.gmra.mxu2 %vm241_vm1, %v840_v33 }
 0x13c   : > { %3229 = vmatmul.msk.f32.gmra.mxu3 %vm241_vm1, %v1118_v20  ;;  %3262 = vmatmul.msk.f32.gmra.mxu0 %vm241_vm1, %v3688_v61 }
 0x13e   : > { %v998_v30 = vpop.f32.mrf.mxu2 }
 0x13f   : > { %v1070_v54 = vadd.f32 %v998_v30, %v753_v56  ;;  %v755_v3 = vpop.f32.mrf.mxu1  ;;  %v1276_v44 = vpop.f32.mrf.mxu3  ;;  %v842_v30 = vld [vmem:[#allocation2 + $0x16a] sm:$0xff] }
 0x140   : > { %v756_v8 = vadd.f32 %v755_v3, %v3954_v14 }
 0x141   : > { %v4203_v47 = vadd.f32 %v1276_v44, %v1070_v54  ;;  %v4207_v37 = vpop.f32.mrf.mxu0  ;;  %v1120_v44 = vld [vmem:[#allocation2 + $0x180] sm:$0xff] }
 0x142   : > { %3162 = vmatmul.msk.f32.gmra.mxu1 %vm241_vm1, %v1117_v52 }
 0x143   : > { %3196 = vmatmul.msk.f32.gmra.mxu2 %vm241_vm1, %v841_v50 }
 0x144   : > { %3230 = vmatmul.msk.f32.gmra.mxu3 %vm241_vm1, %v1119_v42  ;;  %3263 = vmatmul.msk.f32.gmra.mxu0 %vm241_vm1, %v3724_v2 }
 0x146   : > { %v1001_v5 = vpop.f32.mrf.mxu2 }
 0x147   : > { %v1071_v61 = vadd.f32 %v1001_v5, %v756_v8  ;;  %v758_v33 = vpop.f32.mrf.mxu1  ;;  %v1279_v56 = vpop.f32.mrf.mxu3  ;;  %v843_v5 = vld [vmem:[#allocation2 + $0x172] sm:$0xff] }
 0x148   : > { %v759_v14 = vadd.f32 %v758_v33, %v3972_v57  ;;  %v1398_v57 = vld [vmem:[#allocation2 + $0x181] sm:$0xff] }
 0x149   : > { %v4213_v54 = vadd.f32 %v1279_v56, %v1071_v61  ;;  %v4217_v52 = vpop.f32.mrf.mxu0  ;;  %v1121_v56 = vld [vmem:[#allocation2 + $0x188] sm:$0xff] }
 0x14a   : > { %3163 = vmatmul.msk.f32.gmra.mxu1 %vm241_vm1, %v1118_v20 }
 0x14b   : > { %3197 = vmatmul.msk.f32.gmra.mxu2 %vm241_vm1, %v842_v30 }
 0x14c   : > { %3231 = vmatmul.msk.f32.gmra.mxu3 %vm241_vm1, %v1120_v44  ;;  %3264 = vmatmul.msk.f32.gmra.mxu0 %vm241_vm1, %v3752_v6 }
 0x14e   : > { %v1004_v3 = vpop.f32.mrf.mxu2 }
 0x14f   : > { %v1072_v2 = vadd.f32 %v1004_v3, %v759_v14  ;;  %v761_v50 = vpop.f32.mrf.mxu1  ;;  %v1282_v8 = vpop.f32.mrf.mxu3 }
 0x150   : > { %v762_v33 = vadd.f32 %v761_v50, %v3992_v9 }
 0x151   : > { %v4223_v61 = vadd.f32 %v1282_v8, %v1072_v2  ;;  %v4227_v20 = vpop.f32.mrf.mxu0  ;;  %v2203_v2 = vld [vmem:[#allocation2 + $0x31] sm:$0xff]  ;;  %v1399_v8 = vld [vmem:[#allocation2 + $0x189] sm:$0xff] }
 0x152   : > { %3164 = vmatmul.msk.f32.gmra.mxu1 %vm241_vm1, %v1119_v42 }
 0x153   : > { %3198 = vmatmul.msk.f32.gmra.mxu2 %vm241_vm1, %v843_v5 }
 0x154   : > { %3232 = vmatmul.msk.f32.gmra.mxu3 %vm241_vm1, %v1121_v56  ;;  %3265 = vmatmul.msk.f32.gmra.mxu0 %vm241_vm1, %v1398_v57 }
 0x156   : > { %v1007_v30 = vpop.f32.mrf.mxu2 }
 0x157   : > { %v1073_v6 = vadd.f32 %v1007_v30, %v762_v33  ;;  %v764_v44 = vpop.f32.mrf.mxu1  ;;  %v1285_v14 = vpop.f32.mrf.mxu3 }
 0x158   : > { %v765_v9 = vadd.f32 %v764_v44, %v3870_v36 }
 0x159   : > { %v4232_v3 = vadd.f32 %v1285_v14, %v1073_v6  ;;  %v4238_v42 = vpop.f32.mrf.mxu0 }
 0x15a   : > { %3269 = vmatmul.msk.f32.vlgmr.msra.gmra.mxu1 %vm241_vm1, %v3786_v4 }
 0x15b   : > { %3303 = vmatmul.msk.f32.vlgmr.msra.gmra.mxu2 %vm241_vm1, %v3788_v15 }
 0x15c   : > { %3337 = vmatmul.msk.f32.vlgmr.msra.gmra.mxu3 %vm241_vm1, %v2203_v2  ;;  %3266 = vmatmul.msk.f32.gmra.mxu0 %vm241_vm1, %v1399_v8 }
 0x15e   : > { %v1010_v50 = vpop.f32.mrf.mxu2 }
 0x15f   : > { %v1074_v5 = vadd.f32 %v1010_v50, %v765_v9  ;;  %v767_v56 = vpop.f32.mrf.mxu1  ;;  %v1288_v57 = vpop.f32.mrf.mxu3 }
 0x160   : > { %v768_v15 = vadd.f32 %v767_v56, %v3890_v26 }
 0x161   : > { %v4243_v33 = vadd.f32 %v1288_v57, %v1074_v5  ;;  %v4249_v4 = vpop.f32.mrf.mxu0 }
 0x162   : > { %3270 = vmatmul.msk.f32.gmra.mxu1 %vm241_vm1, %v3797_v17 }
 0x163   : > { %3304 = vmatmul.msk.f32.gmra.mxu2 %vm241_vm1, %v3799_v19 }
 0x164   : > { %3338 = vmatmul.msk.f32.gmra.mxu3 %vm241_vm1, %v3654_v55  ;;  %3371 = vmatmul.msk.f32.vlgmr.msra.gmra.mxu0 %vm241_vm1, %v3808_v21 }
 0x166   : > { %v1013_v36 = vpop.f32.mrf.mxu2 }
 0x167   : > { %v1075_v30 = vadd.f32 %v1013_v36, %v768_v15  ;;  %v770_v6 = vpop.f32.mrf.mxu1  ;;  %v1291_v44 = vpop.f32.mrf.mxu3 }
 0x168   : > { %v771_v55 = vadd.f32 %v770_v6, %v3910_v38  ;;  %v2208_v6 = vld [vmem:[#allocation2 + $0x69] sm:$0xff] }
 0x169   : > { %v4256_v14 = vadd.f32 %v1291_v44, %v1075_v30  ;;  %v4262_v17 = vpop.f32.mrf.mxu0  ;;  %v4832_v44 = vld [vmem:[#allocation3_spill] sm:$0xff] }
 0x16a   : > { %3271 = vmatmul.msk.f32.gmra.mxu1 %vm241_vm1, %v3808_v21 }
 0x16b   : > { %3305 = vmatmul.msk.f32.gmra.mxu2 %vm241_vm1, %v3810_v22 }
 0x16c   : > { %3339 = vmatmul.msk.f32.gmra.mxu3 %vm241_vm1, %v3698_v62  ;;  %3372 = vmatmul.msk.f32.gmra.mxu0 %vm241_vm1, %v3820_v23 }
 0x16e   : > { %v1016_v19 = vpop.f32.mrf.mxu2 }
 0x16f   : > { %v1076_v26 = vadd.f32 %v1016_v19, %v771_v55  ;;  %v773_v2 = vpop.f32.mrf.mxu1  ;;  %v1294_v8 = vpop.f32.mrf.mxu3 }
 0x170   : > { %v774_v62 = vadd.f32 %v773_v2, %v3930_v48 }
 0x171   : > { %v4269_v9 = vadd.f32 %v1294_v8, %v1076_v26  ;;  %v4275_v21 = vpop.f32.mrf.mxu0  ;;  %v2209_v8 = vld [vmem:[#allocation2 + $0x79] sm:$0xff] }
 0x172   : > { %3272 = vmatmul.msk.f32.gmra.mxu1 %vm241_vm1, %v3820_v23  ;;  %v2207_v23 = vld [vmem:[#allocation2 + $0x61] sm:$0xff] }
 0x173   : > { %3306 = vmatmul.msk.f32.gmra.mxu2 %vm241_vm1, %v3822_v24 }
 0x174   : > { %3340 = vmatmul.msk.f32.gmra.mxu3 %vm241_vm1, %v3777_v11  ;;  %3373 = vmatmul.msk.f32.gmra.mxu0 %vm241_vm1, %v3832_v25 }
 0x176   : > { %v1019_v22 = vpop.f32.mrf.mxu2 }
 0x177   : > { %v1077_v38 = vadd.f32 %v1019_v22, %v774_v62  ;;  %v776_v50 = vpop.f32.mrf.mxu1  ;;  %v1297_v5 = vpop.f32.mrf.mxu3 }
 0x178   : > { %v777_v11 = vadd.f32 %v776_v50, %v3948_v13 }
 0x179   : > { %v4282_v56 = vadd.f32 %v1297_v5, %v1077_v38  ;;  %v4288_v24 = vpop.f32.mrf.mxu0  ;;  %v4835_v38 = vld [vmem:[#allocation6_spill] sm:$0xff] }
 0x17a   : > { %3273 = vmatmul.msk.f32.gmra.mxu1 %vm241_vm1, %v3832_v25 }
 0x17b   : > { %3307 = vmatmul.msk.f32.gmra.mxu2 %vm241_vm1, %v3834_v27 }
 0x17c   : > { %3341 = vmatmul.msk.f32.gmra.mxu3 %vm241_vm1, %v2207_v23  ;;  %3374 = vmatmul.msk.f32.gmra.mxu0 %vm241_vm1, %v3844_v29 }
 0x17e   : > { %v1022_v48 = vpop.f32.mrf.mxu2 }
 0x17f   : > { %v1078_v57 = vadd.f32 %v1022_v48, %v777_v11  ;;  %v779_v15 = vpop.f32.mrf.mxu1  ;;  %v1300_v36 = vpop.f32.mrf.mxu3  ;;  %v2210_v48 = vld [vmem:[#allocation2 + $0x81] sm:$0xff] }
 0x180   : > { %v780_v27 = vadd.f32 %v779_v15, %v3968_v10  ;;  %v4834_v10 = vld [vmem:[#allocation23_spill] sm:$0xff] }
 0x181   : > { %v4294_v30 = vadd.f32 %v1300_v36, %v1078_v57  ;;  %v4300_v25 = vpop.f32.mrf.mxu0  ;;  %v4836_v57 = vld [vmem:[#allocation7_spill] sm:$0xff]  ;;  %v4837_v36 = vld [vmem:[#allocation26_spill] sm:$0xff] }
 0x182   : > { %3274 = vmatmul.msk.f32.gmra.mxu1 %vm241_vm1, %v3844_v29  ;;  %v4833_v29 = vld [vmem:[#allocation4_spill] sm:$0xff] }
 0x183   : > { %3308 = vmatmul.msk.f32.gmra.mxu2 %vm241_vm1, %v3846_v31 }
 0x184   : > { %3342 = vmatmul.msk.f32.gmra.mxu3 %vm241_vm1, %v2208_v6  ;;  %3375 = vmatmul.msk.f32.gmra.mxu0 %vm241_vm1, %v4832_v44 }
 0x186   : > { %v1025_v13 = vpop.f32.mrf.mxu2 }
 0x187   : > { %v1079_v55 = vadd.f32 %v1025_v13, %v780_v27  ;;  %v782_v19 = vpop.f32.mrf.mxu1  ;;  %v1303_v26 = vpop.f32.mrf.mxu3  ;;  %v4838_v13 = vld [vmem:[#allocation9_spill] sm:$0xff] }
 0x188   : > { %v783_v62 = vadd.f32 %v782_v19, %v4834_v10 }
 0x189   : > { %v4306_v2 = vadd.f32 %v1303_v26, %v1079_v55  ;;  %v4312_v31 = vpop.f32.mrf.mxu0 }
 0x18a   : > { %3275 = vmatmul.msk.f32.gmra.mxu1 %vm241_vm1, %v4832_v44 }
 0x18b   : > { %3309 = vmatmul.msk.f32.gmra.mxu2 %vm241_vm1, %v4833_v29  ;;  %v4839_v29 = vld [vmem:[#allocation10_spill] sm:$0xff] }
 0x18c   : > { %3343 = vmatmul.msk.f32.gmra.mxu3 %vm241_vm1, %v2209_v8  ;;  %3376 = vmatmul.msk.f32.gmra.mxu0 %vm241_vm1, %v4835_v38  ;;  %v2211_v8 = vld [vmem:[#allocation2 + $0x91] sm:$0xff] }
 0x18e   : > { %v1028_v22 = vpop.f32.mrf.mxu2 }
 0x18f   : > { %v1080_v50 = vadd.f32 %v1028_v22, %v783_v62  ;;  %v785_v5 = vpop.f32.mrf.mxu1  ;;  %v1306_v23 = vpop.f32.mrf.mxu3  ;;  %v4840_v62 = vld [vmem:[#allocation5_spill] sm:$0xff] }
 0x190   : > { %v786_v6 = vadd.f32 %v785_v5, %v4837_v36  ;;  %v2212_v36 = vld [vmem:[#allocation2 + $0x99] sm:$0xff] }
 0x191   : > { %v4318_v11 = vadd.f32 %v1306_v23, %v1080_v50  ;;  %v4324_v15 = vpop.f32.mrf.mxu0  ;;  %v4841_v50 = vld [vmem:[#allocation12_spill] sm:$0xff] }
 0x192   : > { %3276 = vmatmul.msk.f32.gmra.mxu1 %vm241_vm1, %v4835_v38 }
 0x193   : > { %3310 = vmatmul.msk.f32.gmra.mxu2 %vm241_vm1, %v4836_v57 }
 0x194   : > { %3344 = vmatmul.msk.f32.gmra.mxu3 %vm241_vm1, %v2210_v48  ;;  %3377 = vmatmul.msk.f32.gmra.mxu0 %vm241_vm1, %v4838_v13 }
 0x196   : > { %v1031_v27 = vpop.f32.mrf.mxu2 }
 0x197   : > { %v1081_v44 = vadd.f32 %v1031_v27, %v786_v6  ;;  %v788_v55 = vpop.f32.mrf.mxu1  ;;  %v1309_v19 = vpop.f32.mrf.mxu3  ;;  %v4842_v6 = vld [vmem:[#allocation13_spill] sm:$0xff] }
 0x198   : > { %v789_v22 = vadd.f32 %v788_v55, %v4840_v62 }
 0x199   : > { %v4330_v26 = vadd.f32 %v1309_v19, %v1081_v44  ;;  %v4336_v10 = vpop.f32.mrf.mxu0  ;;  %v4844_v19 = vld [vmem:[#allocation15_spill] sm:$0xff] }
 0x19a   : > { %3277 = vmatmul.msk.f32.gmra.mxu1 %vm241_vm1, %v4838_v13  ;;  %v4843_v13 = vld [vmem:[#allocation8_spill] sm:$0xff] }
 0x19b   : > { %3311 = vmatmul.msk.f32.gmra.mxu2 %vm241_vm1, %v4839_v29 }
 0x19c   : > { %3345 = vmatmul.msk.f32.gmra.mxu3 %vm241_vm1, %v2211_v8  ;;  %3378 = vmatmul.msk.f32.gmra.mxu0 %vm241_vm1, %v4841_v50 }
 0x19e   : > { %v1034_v38 = vpop.f32.mrf.mxu2 }
 0x19f   : > { %v1082_v5 = vadd.f32 %v1034_v38, %v789_v22  ;;  %v791_v23 = vpop.f32.mrf.mxu1  ;;  %v1312_v48 = vpop.f32.mrf.mxu3  ;;  %v2213_v38 = vld [vmem:[#allocation2 + $0xa9] sm:$0xff] }
 0x1a0   : > { %v792_v44 = vadd.f32 %v791_v23, %v4843_v13  ;;  %v4847_v23 = vld [vmem:[#allocation11_spill] sm:$0xff] }
 0x1a1   : > { %v4342_v57 = vadd.f32 %v1312_v48, %v1082_v5  ;;  %v4348_v27 = vpop.f32.mrf.mxu0 }
 0x1a2   : > { %3278 = vmatmul.msk.f32.gmra.mxu1 %vm241_vm1, %v4841_v50  ;;  %v4845_v50 = vld [vmem:[#allocation16_spill] sm:$0xff] }
 0x1a3   : > { %3312 = vmatmul.msk.f32.gmra.mxu2 %vm241_vm1, %v4842_v6  ;;  %v4848_v6 = vld [vmem:[#allocation18_spill] sm:$0xff] }
 0x1a4   : > { %3346 = vmatmul.msk.f32.gmra.mxu3 %vm241_vm1, %v2212_v36  ;;  %3379 = vmatmul.msk.f32.gmra.mxu0 %vm241_vm1, %v4844_v19 }
 0x1a6   : > { %v1037_v55 = vpop.f32.mrf.mxu2 }
 0x1a7   : > { %v1083_v8 = vadd.f32 %v1037_v55, %v792_v44  ;;  %v794_v29 = vpop.f32.mrf.mxu1  ;;  %v1315_v62 = vpop.f32.mrf.mxu3 }
 0x1a8   : > { %v795_v48 = vadd.f32 %v794_v29, %v4847_v23  ;;  %v4852_v29 = vld [vmem:[#allocation14_spill] sm:$0xff] }
 0x1a9   : > { %v4354_v22 = vadd.f32 %v1315_v62, %v1083_v8  ;;  %v4360_v5 = vpop.f32.mrf.mxu0  ;;  %v2214_v62 = vld [vmem:[#allocation2 + $0xb1] sm:$0xff] }
 0x1aa   : > { %3279 = vmatmul.msk.f32.gmra.mxu1 %vm241_vm1, %v4844_v19  ;;  %4846 = vst [vmem:[#allocation3_spill] sm:$0xff] %v4360_v5  ;;  %v4850_v19 = vld [vmem:[#allocation19_spill] sm:$0xff]  ;;  %v4853_v5 = vld [vmem:[#allocation21_spill] sm:$0xff] }
 0x1ab   : > { %3313 = vmatmul.msk.f32.gmra.mxu2 %vm241_vm1, %v4845_v50 }
 0x1ac   : > { %3347 = vmatmul.msk.f32.gmra.mxu3 %vm241_vm1, %v2213_v38  ;;  %3380 = vmatmul.msk.f32.gmra.mxu0 %vm241_vm1, %v4848_v6 }
 0x1ae   : > { %v1040_v36 = vpop.f32.mrf.mxu2 }
 0x1af   : > { %v1084_v13 = vadd.f32 %v1040_v36, %v795_v48  ;;  %v797_v44 = vpop.f32.mrf.mxu1  ;;  %v1318_v55 = vpop.f32.mrf.mxu3 }
 0x1b0   : > { %v798_v38 = vadd.f32 %v797_v44, %v4852_v29  ;;  %v4856_v44 = vld [vmem:[#allocation17_spill] sm:$0xff] }
 0x1b1   : > { %v4366_v8 = vadd.f32 %v1318_v55, %v1084_v13  ;;  %v4372_v50 = vpop.f32.mrf.mxu0 }
 0x1b2   : > { %3280 = vmatmul.msk.f32.gmra.mxu1 %vm241_vm1, %v4848_v6  ;;  %4851 = vst [vmem:[#allocation23_spill] sm:$0xff] %v4372_v50  ;;  %v4855_v6 = vld [vmem:[#allocation22_spill] sm:$0xff]  ;;  %v4857_v50 = vld [vmem:[#allocation25_spill] sm:$0xff] }
 0x1b3   : > { %4849 = vst [vmem:[#allocation4_spill] sm:$0xff] %v4366_v8  ;;  %3314 = vmatmul.msk.f32.gmra.mxu2 %vm241_vm1, %v4850_v19  ;;  %v2215_v8 = vld [vmem:[#allocation2 + $0xc1] sm:$0xff] }
 0x1b4   : > { %3348 = vmatmul.msk.f32.gmra.mxu3 %vm241_vm1, %v2214_v62  ;;  %3381 = vmatmul.msk.f32.gmra.mxu0 %vm241_vm1, %v4853_v5 }
 0x1b6   : > { %v1043_v23 = vpop.f32.mrf.mxu2 }
 0x1b7   : > { %v1085_v48 = vadd.f32 %v1043_v23, %v798_v38  ;;  %v800_v36 = vpop.f32.mrf.mxu1  ;;  %v1321_v13 = vpop.f32.mrf.mxu3 }
 0x1b8   : > { %v801_v62 = vadd.f32 %v800_v36, %v4856_v44  ;;  %v4860_v44 = vld [vmem:[#allocation28_spill] sm:$0xff] }
 0x1b9   : > { %v4378_v55 = vadd.f32 %v1321_v13, %v1085_v48  ;;  %v4384_v19 = vpop.f32.mrf.mxu0 }
 0x1ba   : > { %3281 = vmatmul.msk.f32.gmra.mxu1 %vm241_vm1, %v4853_v5 }
 0x1bb   : > { %4854 = vst [vmem:[#allocation6_spill] sm:$0xff] %v4378_v55  ;;  %3315 = vmatmul.msk.f32.gmra.mxu2 %vm241_vm1, %v4855_v6  ;;  %v2216_v55 = vld [vmem:[#allocation2 + $0xc9] sm:$0xff] }
 0x1bc   : > { %3349 = vmatmul.msk.f32.gmra.mxu3 %vm241_vm1, %v2215_v8  ;;  %3382 = vmatmul.msk.f32.gmra.mxu0 %vm241_vm1, %v4857_v50  ;;  %v4859_v8 = vld [vmem:[#allocation20_spill] sm:$0xff] }
 0x1be   : > { %v1046_v29 = vpop.f32.mrf.mxu2 }
 0x1bf   : > { %v1086_v38 = vadd.f32 %v1046_v29, %v801_v62  ;;  %v803_v23 = vpop.f32.mrf.mxu1  ;;  %v1324_v48 = vpop.f32.mrf.mxu3 }
 0x1c0   : > { %v804_v36 = vadd.f32 %v803_v23, %v4859_v8 }
 0x1c1   : > { %v4390_v13 = vadd.f32 %v1324_v48, %v1086_v38  ;;  %v4396_v5 = vpop.f32.mrf.mxu0 }
 0x1c2   : > { %3282 = vmatmul.msk.f32.gmra.mxu1 %vm241_vm1, %v4857_v50  ;;  %v4861_v50 = vld [vmem:[#allocation24_spill] sm:$0xff] }
 0x1c3   : > { %4858 = vst [vmem:[#allocation7_spill] sm:$0xff] %v4390_v13  ;;  %3316 = vmatmul.msk.f32.gmra.mxu2 %vm241_vm1, %v3998_v46  ;;  %v2217_v13 = vld [vmem:[#allocation2 + $0xd9] sm:$0xff] }
 0x1c4   : > { %3350 = vmatmul.msk.f32.gmra.mxu3 %vm241_vm1, %v2216_v55  ;;  %3383 = vmatmul.msk.f32.gmra.mxu0 %vm241_vm1, %v4860_v44 }
 0x1c6   : > { %v1049_v6 = vpop.f32.mrf.mxu2 }
 0x1c7   : > { %v1087_v62 = vadd.f32 %v1049_v6, %v804_v36  ;;  %v806_v29 = vpop.f32.mrf.mxu1  ;;  %v1327_v38 = vpop.f32.mrf.mxu3 }
 0x1c8   : > { %v807_v55 = vadd.f32 %v806_v29, %v4861_v50 }
 0x1c9   : > { %v4402_v48 = vadd.f32 %v1327_v38, %v1087_v62  ;;  %v4408_v46 = vpop.f32.mrf.mxu0  ;;  %v2218_v38 = vld [vmem:[#allocation2 + $0xe1] sm:$0xff] }
 0x1ca   : > { %3283 = vmatmul.msk.f32.gmra.mxu1 %vm241_vm1, %v4860_v44 }
 0x1cb   : > { %3317 = vmatmul.msk.f32.gmra.mxu2 %vm241_vm1, %v4016_v39 }
 0x1cc   : > { %3351 = vmatmul.msk.f32.gmra.mxu3 %vm241_vm1, %v2217_v13  ;;  %3384 = vmatmul.msk.f32.gmra.mxu0 %vm241_vm1, %v4029_v35  ;;  %v4863_v13 = vld [vmem:[#allocation27_spill] sm:$0xff] }
 0x1ce   : > { %v1052_v23 = vpop.f32.mrf.mxu2 }
 0x1cf   : > { %v1088_v8 = vadd.f32 %v1052_v23, %v807_v55  ;;  %v809_v36 = vpop.f32.mrf.mxu1  ;;  %v1330_v6 = vpop.f32.mrf.mxu3 }
 0x1d0   : > { %v810_v44 = vadd.f32 %v809_v36, %v4863_v13 }
 0x1d1   : > { %v4414_v62 = vadd.f32 %v1330_v6, %v1088_v8  ;;  %v4420_v39 = vpop.f32.mrf.mxu0  ;;  %v2219_v6 = vld [vmem:[#allocation2 + $0xf1] sm:$0xff] }
 0x1d2   : > { %3284 = vmatmul.msk.f32.gmra.mxu1 %vm241_vm1, %v4029_v35  ;;  %4862 = vst [vmem:[#allocation26_spill] sm:$0xff] %v4420_v39  ;;  %v4866_v35 = vld [vmem:[#allocation30_spill] sm:$0xff] }
 0x1d3   : > { %3318 = vmatmul.msk.f32.gmra.mxu2 %vm241_vm1, %v4033_v34  ;;  %v4865_v34 = vld [vmem:[#allocation29_spill] sm:$0xff] }
 0x1d4   : > { %3352 = vmatmul.msk.f32.gmra.mxu3 %vm241_vm1, %v2218_v38  ;;  %3385 = vmatmul.msk.f32.gmra.mxu0 %vm241_vm1, %v4046_v18  ;;  %v1614_v39 = vadd.f32 %v4866_v35, %v4865_v34  ;;  %v4868_v34 = vld [vmem:[#allocation31_spill] sm:$0xff] }
 0x1d6   : > { %v1055_v29 = vpop.f32.mrf.mxu2 }
 0x1d7   : > { %v1089_v50 = vadd.f32 %v1055_v29, %v810_v44  ;;  %v1333_v55 = vpop.f32.mrf.mxu3  ;;  %v1796_v23 = vpop.f32.mrf.mxu1 }
 0x1d8   : > { %v1892_v38 = vadd.f32 %v1796_v23, %v1614_v39  ;;  %v4446_v39 = vld [vmem:[%s4761_s2] ss:$0 sm:$0xff] }
 0x1d9   : > { %v4426_v8 = vadd.f32 %v1333_v55, %v1089_v50  ;;  %v4434_v36 = vpop.f32.mrf.mxu0  ;;  %v2220_v55 = vld [vmem:[#allocation2 + $0xf9] sm:$0xff] }
 0x1da   : > { %3285 = vmatmul.msk.f32.gmra.mxu1 %vm241_vm1, %v4046_v18  ;;  %4867 = vst [vmem:[#allocation10_spill] sm:$0xff] %v4434_v36 }
 0x1db   : > { %4864 = vst [vmem:[#allocation9_spill] sm:$0xff] %v4426_v8  ;;  %3319 = vmatmul.msk.f32.gmra.mxu2 %vm241_vm1, %v4050_v43  ;;  %v4869_v43 = vld [vmem:[#allocation32_spill] sm:$0xff] }
 0x1dc   : > { %3353 = vmatmul.msk.f32.gmra.mxu3 %vm241_vm1, %v2219_v6  ;;  %3386 = vmatmul.msk.f32.gmra.mxu0 %vm241_vm1, %v4063_v63  ;;  %v1615_v35 = vadd.f32 %v4869_v43, %v4868_v34  ;;  %v4871_v34 = vld [vmem:[#allocation34_spill] sm:$0xff] }
 0x1de   : > { %v2075_v13 = vpop.f32.mrf.mxu2 }
 0x1df   : > { %v2171_v44 = vadd.f32 %v2075_v13, %v1892_v38  ;;  %v1799_v29 = vpop.f32.mrf.mxu1  ;;  %v2353_v50 = vpop.f32.mrf.mxu3 }
 0x1e0   : > { %v1893_v6 = vadd.f32 %v1799_v29, %v1615_v35 }
 0x1e1   : > { %v2449_v18 = vadd.f32 %v2353_v50, %v2171_v44  ;;  %v2631_v23 = vpop.f32.mrf.mxu0 }
 0x1e2   : > { %3286 = vmatmul.msk.f32.gmra.mxu1 %vm241_vm1, %v4063_v63 }
 0x1e3   : > { %3320 = vmatmul.msk.f32.gmra.mxu2 %vm241_vm1, %v4067_v32  ;;  %v2727_v38 = vadd.f32 %v2631_v23, %v2449_v18  ;;  %v2221_v18 = vld [vmem:[#allocation2 + $0x109] sm:$0xff] }
 0x1e4   : > { %3354 = vmatmul.msk.f32.gmra.mxu3 %vm241_vm1, %v2220_v55  ;;  %3387 = vmatmul.msk.f32.gmra.mxu0 %vm241_vm1, %v4080_v45  ;;  %v4870_v55 = vld [vmem:[#allocation33_spill] sm:$0xff] }
 0x1e5   : > { %v2763_v13 = vadd.f32 %v4446_v39, %v2727_v38  ;;  %v1616_v43 = vadd.f32 %v4871_v34, %v4870_v55 }
 0x1e6   : > { %v2078_v63 = vpop.f32.mrf.mxu2 }
 0x1e7   : > { %v2172_v32 = vadd.f32 %v2078_v63, %v1893_v6  ;;  %v1802_v44 = vpop.f32.mrf.mxu1  ;;  %v2356_v50 = vpop.f32.mrf.mxu3  ;;  %2796 = vst.msk [vmem:[%s4456_s19] sm:$0xff] %vm2795_vm4, %v2763_v13  ;;  %v2897_v63 = vmul.f32 %v2763_v13, %v2763_v13  ;;  %v2828_v55 = vsel %vm2795_vm4, %v2763_v13, 0.0 }
 0x1e8   : > { %v1894_v23 = vadd.f32 %v1802_v44, %v1616_v43  ;;  %v2222_v44 = vld [vmem:[#allocation2 + $0x111] sm:$0xff] }
 0x1e9   : > { %v2450_v29 = vadd.f32 %v2356_v50, %v2172_v32  ;;  %v2634_v35 = vpop.f32.mrf.mxu0  ;;  %v4872_v43 = vld [vmem:[#allocation35_spill] sm:$0xff] }
 0x1ea   : > { %3287 = vmatmul.msk.f32.gmra.mxu1 %vm241_vm1, %v4080_v45 }
 0x1eb   : > { %3321 = vmatmul.msk.f32.gmra.mxu2 %vm241_vm1, %v4084_v41  ;;  %v2728_v6 = vadd.f32 %v2634_v35, %v2450_v29  ;;  %v4873_v35 = vld [vmem:[#allocation36_spill] sm:$0xff] }
 0x1ec   : > { %3355 = vmatmul.msk.f32.gmra.mxu3 %vm241_vm1, %v2221_v18  ;;  %3388 = vmatmul.msk.f32.gmra.mxu0 %vm241_vm1, %v4097_v28 }
 0x1ed   : > { %v2764_v32 = vadd.f32 %v4446_v39, %v2728_v6  ;;  %v1617_v6 = vadd.f32 %v4873_v35, %v4872_v43  ;;  %v2223_v35 = vld [vmem:[#allocation2 + $0x121] sm:$0xff] }
 0x1ee   : > { %v2081_v38 = vpop.f32.mrf.mxu2 }
 0x1ef   : > { %v2173_v50 = vadd.f32 %v2081_v38, %v1894_v23  ;;  %v1805_v45 = vpop.f32.mrf.mxu1  ;;  %v2359_v36 = vpop.f32.mrf.mxu3  ;;  %2797 = vst.msk [vmem:[%s4456_s19 + $0x8] sm:$0xff] %vm2795_vm4, %v2764_v32  ;;  %v2829_v41 = vsel %vm2795_vm4, %v2764_v32, 0.0  ;;  %v2898_v34 = vmul.f32 %v2764_v32, %v2764_v32  ;;  %v2929_v23 = vsel %vm2795_vm4, %v2897_v63, 0.0 }
 0x1f0   : > { %v2830_v29 = vadd.f32 %v2829_v41, %v2828_v55 }
 0x1f1   : > { %v2451_v18 = vadd.f32 %v2359_v36, %v2173_v50  ;;  %v2930_v38 = vsel %vm2795_vm4, %v2898_v34, 0.0  ;;  %v2637_v8 = vpop.f32.mrf.mxu0  ;;  %v1895_v36 = vadd.f32 %v1805_v45, %v1617_v6  ;;  %v4875_v45 = vld [vmem:[#allocation38_spill] sm:$0xff] }
 0x1f2   : > { %3288 = vmatmul.msk.f32.gmra.mxu1 %vm241_vm1, %v4097_v28  ;;  %v2931_v13 = vadd.f32 %v2930_v38, %v2929_v23 }
 0x1f3   : > { %3322 = vmatmul.msk.f32.gmra.mxu2 %vm241_vm1, %v4101_v51  ;;  %v2729_v32 = vadd.f32 %v2637_v8, %v2451_v18  ;;  %v4874_v8 = vld [vmem:[#allocation37_spill] sm:$0xff] }
 0x1f4   : > { %3356 = vmatmul.msk.f32.gmra.mxu3 %vm241_vm1, %v2222_v44  ;;  %3389 = vmatmul.msk.f32.gmra.mxu0 %vm241_vm1, %v4114_v40  ;;  %v1618_v18 = vadd.f32 %v4875_v45, %v4874_v8  ;;  %v4877_v8 = vld [vmem:[#allocation40_spill] sm:$0xff] }
 0x1f5   : > { %v2765_v28 = vadd.f32 %v4446_v39, %v2729_v32 }
 0x1f6   : > { %v2084_v50 = vpop.f32.mrf.mxu2 }
 0x1f7   : > { %v2174_v55 = vadd.f32 %v2084_v50, %v1895_v36  ;;  %v1808_v41 = vpop.f32.mrf.mxu1  ;;  %v2362_v63 = vpop.f32.mrf.mxu3  ;;  %2798 = vst.msk [vmem:[%s4456_s19 + $0x10] sm:$0xff] %vm2795_vm4, %v2765_v28  ;;  %v2831_v34 = vsel %vm2795_vm4, %v2765_v28, 0.0  ;;  %v2899_v51 = vmul.f32 %v2765_v28, %v2765_v28 }
 0x1f8   : > { %v2832_v23 = vadd.f32 %v2831_v34, %v2830_v29  ;;  %v1896_v36 = vadd.f32 %v1808_v41, %v1618_v18  ;;  %v1946_v34 = vld [vmem:[#allocation2 + $0x128] sm:$0xff] }
 0x1f9   : > { %v2452_v43 = vadd.f32 %v2362_v63, %v2174_v55  ;;  %v2932_v44 = vsel %vm2795_vm4, %v2899_v51, 0.0  ;;  %v2640_v38 = vpop.f32.mrf.mxu0  ;;  %v1667_v63 = vld [vmem:[#allocation2 + $0x112] sm:$0xff] }
 0x1fa   : > { %3289 = vmatmul.msk.f32.gmra.mxu1 %vm241_vm1, %v4114_v40  ;;  %v2933_v6 = vadd.f32 %v2932_v44, %v2931_v13 }
 0x1fb   : > { %3323 = vmatmul.msk.f32.gmra.mxu2 %vm241_vm1, %v4118_v7  ;;  %v2730_v32 = vadd.f32 %v2640_v38, %v2452_v43  ;;  %v4876_v43 = vld [vmem:[#allocation39_spill] sm:$0xff] }
 0x1fc   : > { %3357 = vmatmul.msk.f32.gmra.mxu3 %vm241_vm1, %v2223_v35  ;;  %3390 = vmatmul.msk.f32.gmra.mxu0 %vm241_vm1, %v4131_v49  ;;  %v2224_v35 = vld [vmem:[#allocation2 + $0x129] sm:$0xff]  ;;  %v1619_v45 = vadd.f32 %v4877_v8, %v4876_v43 }
 0x1fd   : > { %v2766_v29 = vadd.f32 %v4446_v39, %v2730_v32 }
 0x1fe   : > { %v2087_v50 = vpop.f32.mrf.mxu2 }
 0x1ff   : > { %v2175_v40 = vadd.f32 %v2087_v50, %v1896_v36  ;;  %v1811_v28 = vpop.f32.mrf.mxu1  ;;  %v2365_v55 = vpop.f32.mrf.mxu3  ;;  %2799 = vst.msk [vmem:[%s4456_s19 + $0x18] sm:$0xff] %vm2795_vm4, %v2766_v29  ;;  %v2833_v7 = vsel %vm2795_vm4, %v2766_v29, 0.0  ;;  %v2900_v13 = vmul.f32 %v2766_v29, %v2766_v29 }
 0x200   : > { %v2834_v41 = vadd.f32 %v2833_v7, %v2832_v23  ;;  %v1897_v38 = vadd.f32 %v1811_v28, %v1619_v45 }
 0x201   : > { %v2453_v51 = vadd.f32 %v2365_v55, %v2175_v40  ;;  %v2934_v49 = vsel %vm2795_vm4, %v2900_v13, 0.0  ;;  %v2643_v44 = vpop.f32.mrf.mxu0  ;;  %v1668_v55 = vld [vmem:[#allocation2 + $0x122] sm:$0xff]  ;;  %v2225_v13 = vld [vmem:[#allocation2 + $0x139] sm:$0xff] }
 0x202   : > { %3290 = vmatmul.msk.f32.gmra.mxu1 %vm241_vm1, %v1667_v63  ;;  %v2935_v18 = vadd.f32 %v2934_v49, %v2933_v6  ;;  %v1947_v63 = vld [vmem:[#allocation2 + $0x138] sm:$0xff]  ;;  %v2502_v49 = vld [vmem:[#allocation2 + $0x12a] sm:$0xff] }
 0x203   : > { %3324 = vmatmul.msk.f32.gmra.mxu2 %vm241_vm1, %v1946_v34  ;;  %v2731_v36 = vadd.f32 %v2643_v44, %v2453_v51  ;;  %v4878_v51 = vld [vmem:[#allocation41_spill] sm:$0xff] }
 0x204   : > { %3358 = vmatmul.msk.f32.gmra.mxu3 %vm241_vm1, %v2224_v35  ;;  %3391 = vmatmul.msk.f32.gmra.mxu0 %vm241_vm1, %v4145_v60  ;;  %v4879_v35 = vld [vmem:[#allocation42_spill] sm:$0xff] }
 0x205   : > { %v2767_v50 = vadd.f32 %v4446_v39, %v2731_v36  ;;  %v1620_v43 = vadd.f32 %v4879_v35, %v4878_v51 }
 0x206   : > { %v2090_v32 = vpop.f32.mrf.mxu2 }
 0x207   : > { %v2176_v23 = vadd.f32 %v2090_v32, %v1897_v38  ;;  %v1814_v29 = vpop.f32.mrf.mxu1  ;;  %v2368_v40 = vpop.f32.mrf.mxu3  ;;  %2800 = vst.msk [vmem:[%s4456_s19 + $0x20] sm:$0xff] %vm2795_vm4, %v2767_v50  ;;  %v2835_v6 = vsel %vm2795_vm4, %v2767_v50, 0.0  ;;  %v2901_v34 = vmul.f32 %v2767_v50, %v2767_v50 }
 0x208   : > { %v2836_v28 = vadd.f32 %v2835_v6, %v2834_v41  ;;  %v1898_v44 = vadd.f32 %v1814_v29, %v1620_v43  ;;  %v2226_v6 = vld [vmem:[#allocation2 + $0x141] sm:$0xff]  ;;  %v4880_v29 = vld [vmem:[#allocation43_spill] sm:$0xff] }
 0x209   : > { %v2454_v7 = vadd.f32 %v2368_v40, %v2176_v23  ;;  %v2936_v60 = vsel %vm2795_vm4, %v2901_v34, 0.0  ;;  %v2646_v45 = vpop.f32.mrf.mxu0  ;;  %v1948_v40 = vld [vmem:[#allocation2 + $0x140] sm:$0xff] }
 0x20a   : > { %3291 = vmatmul.msk.f32.gmra.mxu1 %vm241_vm1, %v1668_v55  ;;  %v2937_v8 = vadd.f32 %v2936_v60, %v2935_v18  ;;  %v2503_v60 = vld [vmem:[#allocation2 + $0x13a] sm:$0xff] }
 0x20b   : > { %3325 = vmatmul.msk.f32.gmra.mxu2 %vm241_vm1, %v1947_v63  ;;  %v2732_v38 = vadd.f32 %v2646_v45, %v2454_v7  ;;  %v4881_v7 = vld [vmem:[#allocation44_spill] sm:$0xff] }
 0x20c   : > { %3359 = vmatmul.msk.f32.gmra.mxu3 %vm241_vm1, %v2225_v13  ;;  %3392 = vmatmul.msk.f32.gmra.mxu0 %vm241_vm1, %v2502_v49  ;;  %v1621_v13 = vadd.f32 %v4881_v7, %v4880_v29  ;;  %v2504_v7 = vld [vmem:[#allocation2 + $0x142] sm:$0xff] }
 0x20d   : > { %v2768_v41 = vadd.f32 %v4446_v39, %v2732_v38 }
 0x20e   : > { %v2093_v36 = vpop.f32.mrf.mxu2 }
 0x20f   : > { %v2177_v32 = vadd.f32 %v2093_v36, %v1898_v44  ;;  %v1817_v50 = vpop.f32.mrf.mxu1  ;;  %v2371_v23 = vpop.f32.mrf.mxu3  ;;  %2801 = vst.msk [vmem:[%s4456_s19 + $0x28] sm:$0xff] %vm2795_vm4, %v2768_v41  ;;  %v2837_v55 = vsel %vm2795_vm4, %v2768_v41, 0.0  ;;  %v2902_v18 = vmul.f32 %v2768_v41, %v2768_v41 }
 0x210   : > { %v2838_v34 = vadd.f32 %v2837_v55, %v2836_v28  ;;  %v1899_v45 = vadd.f32 %v1817_v50, %v1621_v13  ;;  %v2227_v55 = vld [vmem:[#allocation2 + $0x151] sm:$0xff]  ;;  %v1622_v50 = vadd.f32 %v4163_v59, %v4159_v58 }
 0x211   : > { %v2455_v63 = vadd.f32 %v2371_v23, %v2177_v32  ;;  %v2938_v51 = vsel %vm2795_vm4, %v2902_v18, 0.0  ;;  %v2649_v43 = vpop.f32.mrf.mxu0  ;;  %v1949_v32 = vld [vmem:[#allocation2 + $0x150] sm:$0xff]  ;;  %v1950_v58 = vld [vmem:[#allocation2 + $0x158] sm:$0xff] }
 0x212   : > { %3292 = vmatmul.msk.f32.gmra.mxu1 %vm241_vm1, %v2502_v49  ;;  %v2939_v35 = vadd.f32 %v2938_v51, %v2937_v8 }
 0x213   : > { %3326 = vmatmul.msk.f32.gmra.mxu2 %vm241_vm1, %v1948_v40  ;;  %v2733_v44 = vadd.f32 %v2649_v43, %v2455_v63 }
 0x214   : > { %3360 = vmatmul.msk.f32.gmra.mxu3 %vm241_vm1, %v2226_v6  ;;  %3393 = vmatmul.msk.f32.gmra.mxu0 %vm241_vm1, %v2503_v60 }
 0x215   : > { %v2769_v28 = vadd.f32 %v4446_v39, %v2733_v44 }
 0x216   : > { %v2096_v38 = vpop.f32.mrf.mxu2 }
 0x217   : > { %v2178_v49 = vadd.f32 %v2096_v38, %v1899_v45  ;;  %v1820_v36 = vpop.f32.mrf.mxu1  ;;  %v2374_v41 = vpop.f32.mrf.mxu3  ;;  %2802 = vst.msk [vmem:[%s4456_s19 + $0x30] sm:$0xff] %vm2795_vm4, %v2769_v28  ;;  %v2839_v23 = vsel %vm2795_vm4, %v2769_v28, 0.0  ;;  %v2903_v8 = vmul.f32 %v2769_v28, %v2769_v28  ;;  %v2228_v28 = vld [vmem:[#allocation2 + $0x159] sm:$0xff] }
 0x218   : > { %v2840_v18 = vadd.f32 %v2839_v23, %v2838_v34  ;;  %v1900_v13 = vadd.f32 %v1820_v36, %v1622_v50  ;;  %v4882_v36 = vld [vmem:[#allocation45_spill] sm:$0xff] }
 0x219   : > { %v2456_v40 = vadd.f32 %v2374_v41, %v2178_v49  ;;  %v2940_v63 = vsel %vm2795_vm4, %v2903_v8, 0.0  ;;  %v2652_v29 = vpop.f32.mrf.mxu0  ;;  %v1623_v41 = vadd.f32 %v4882_v36, %v4171_v12 }
 0x21a   : > { %3293 = vmatmul.msk.f32.gmra.mxu1 %vm241_vm1, %v2503_v60  ;;  %v2941_v6 = vadd.f32 %v2940_v63, %v2939_v35 }
 0x21b   : > { %3327 = vmatmul.msk.f32.gmra.mxu2 %vm241_vm1, %v1949_v32  ;;  %v2734_v51 = vadd.f32 %v2652_v29, %v2456_v40  ;;  %v2505_v40 = vld [vmem:[#allocation2 + $0x152] sm:$0xff] }
 0x21c   : > { %3361 = vmatmul.msk.f32.gmra.mxu3 %vm241_vm1, %v2227_v55  ;;  %3394 = vmatmul.msk.f32.gmra.mxu0 %vm241_vm1, %v2504_v7 }
 0x21d   : > { %v2770_v34 = vadd.f32 %v4446_v39, %v2734_v51 }
 0x21e   : > { %v2099_v43 = vpop.f32.mrf.mxu2 }
 0x21f   : > { %v2179_v60 = vadd.f32 %v2099_v43, %v1900_v13  ;;  %v1823_v45 = vpop.f32.mrf.mxu1  ;;  %v2377_v59 = vpop.f32.mrf.mxu3  ;;  %2803 = vst.msk [vmem:[%s4456_s19 + $0x38] sm:$0xff] %vm2795_vm4, %v2770_v34  ;;  %v2841_v44 = vsel %vm2795_vm4, %v2770_v34, 0.0  ;;  %v2904_v35 = vmul.f32 %v2770_v34, %v2770_v34  ;;  %v1951_v13 = vld [vmem:[#allocation2 + $0x168] sm:$0xff] }
 0x220   : > { %v2842_v49 = vadd.f32 %v2841_v44, %v2840_v18  ;;  %v1901_v55 = vadd.f32 %v1823_v45, %v1623_v41  ;;  %v2229_v34 = vld [vmem:[#allocation2 + $0x169] sm:$0xff]  ;;  %v1624_v45 = vadd.f32 %v4187_v16, %v4183_v0 }
 0x221   : > { %v2457_v38 = vadd.f32 %v2377_v59, %v2179_v60  ;;  %v2942_v32 = vsel %vm2795_vm4, %v2904_v35, 0.0  ;;  %v2655_v8 = vpop.f32.mrf.mxu0  ;;  %v2506_v35 = vld [vmem:[#allocation2 + $0x15a] sm:$0xff]  ;;  %v1952_v0 = vld [vmem:[#allocation2 + $0x170] sm:$0xff] }
 0x222   : > { %3294 = vmatmul.msk.f32.gmra.mxu1 %vm241_vm1, %v2504_v7  ;;  %v2943_v23 = vadd.f32 %v2942_v32, %v2941_v6 }
 0x223   : > { %3328 = vmatmul.msk.f32.gmra.mxu2 %vm241_vm1, %v1950_v58  ;;  %v2735_v50 = vadd.f32 %v2655_v8, %v2457_v38 }
 0x224   : > { %3362 = vmatmul.msk.f32.gmra.mxu3 %vm241_vm1, %v2228_v28  ;;  %3395 = vmatmul.msk.f32.gmra.mxu0 %vm241_vm1, %v2505_v40 }
 0x225   : > { %v2771_v18 = vadd.f32 %v4446_v39, %v2735_v50 }
 0x226   : > { %v2102_v63 = vpop.f32.mrf.mxu2 }
 0x227   : > { %v2180_v29 = vadd.f32 %v2102_v63, %v1901_v55  ;;  %v1826_v7 = vpop.f32.mrf.mxu1  ;;  %v2380_v12 = vpop.f32.mrf.mxu3  ;;  %2804 = vst.msk [vmem:[%s4456_s19 + $0x40] sm:$0xff] %vm2795_vm4, %v2771_v18  ;;  %v2843_v51 = vsel %vm2795_vm4, %v2771_v18, 0.0  ;;  %v2905_v6 = vmul.f32 %v2771_v18, %v2771_v18  ;;  %v2230_v55 = vld [vmem:[#allocation2 + $0x171] sm:$0xff]  ;;  %v1625_v63 = vadd.f32 %v4197_v53, %v4193_v1  ;;  %v1953_v53 = vld [vmem:[#allocation2 + $0x180] sm:$0xff] }
 0x228   : > { %v2844_v60 = vadd.f32 %v2843_v51, %v2842_v49  ;;  %v1902_v38 = vadd.f32 %v1826_v7, %v1624_v45 }
 0x229   : > { %v2458_v43 = vadd.f32 %v2380_v12, %v2180_v29  ;;  %v2944_v59 = vsel %vm2795_vm4, %v2905_v6, 0.0  ;;  %v2658_v44 = vpop.f32.mrf.mxu0  ;;  %v2507_v12 = vld [vmem:[#allocation2 + $0x16a] sm:$0xff] }
 0x22a   : > { %3295 = vmatmul.msk.f32.gmra.mxu1 %vm241_vm1, %v2505_v40  ;;  %v2945_v58 = vadd.f32 %v2944_v59, %v2943_v23 }
 0x22b   : > { %3329 = vmatmul.msk.f32.gmra.mxu2 %vm241_vm1, %v1951_v13  ;;  %v2736_v28 = vadd.f32 %v2658_v44, %v2458_v43  ;;  %v2231_v44 = vld [vmem:[#allocation2 + $0x181] sm:$0xff] }
 0x22c   : > { %3363 = vmatmul.msk.f32.gmra.mxu3 %vm241_vm1, %v2229_v34  ;;  %3396 = vmatmul.msk.f32.gmra.mxu0 %vm241_vm1, %v2506_v35 }
 0x22d   : > { %v2772_v49 = vadd.f32 %v4446_v39, %v2736_v28 }
 0x22e   : > { %v2105_v36 = vpop.f32.mrf.mxu2 }
 0x22f   : > { %v2181_v41 = vadd.f32 %v2105_v36, %v1902_v38  ;;  %v1829_v32 = vpop.f32.mrf.mxu1  ;;  %v2383_v16 = vpop.f32.mrf.mxu3  ;;  %2805 = vst.msk [vmem:[%s4456_s19 + $0x48] sm:$0xff] %vm2795_vm4, %v2772_v49  ;;  %v2845_v8 = vsel %vm2795_vm4, %v2772_v49, 0.0  ;;  %v2906_v23 = vmul.f32 %v2772_v49, %v2772_v49  ;;  %v1626_v38 = vadd.f32 %v4207_v37, %v4203_v47  ;;  %v1954_v37 = vld [vmem:[#allocation2 + $0x188] sm:$0xff] }
 0x230   : > { %v2846_v50 = vadd.f32 %v2845_v8, %v2844_v60  ;;  %v1903_v13 = vadd.f32 %v1829_v32, %v1625_v63 }
 0x231   : > { %v2459_v40 = vadd.f32 %v2383_v16, %v2181_v41  ;;  %v2946_v18 = vsel %vm2795_vm4, %v2906_v23, 0.0  ;;  %v2661_v7 = vpop.f32.mrf.mxu0  ;;  %v2508_v41 = vld [vmem:[#allocation2 + $0x172] sm:$0xff] }
 0x232   : > { %3296 = vmatmul.msk.f32.gmra.mxu1 %vm241_vm1, %v2506_v35  ;;  %v2947_v29 = vadd.f32 %v2946_v18, %v2945_v58  ;;  %v2232_v18 = vld [vmem:[#allocation2 + $0x189] sm:$0xff] }
 0x233   : > { %3330 = vmatmul.msk.f32.gmra.mxu2 %vm241_vm1, %v1952_v0  ;;  %v2737_v51 = vadd.f32 %v2661_v7, %v2459_v40  ;;  %v1627_v7 = vadd.f32 %v4217_v52, %v4213_v54  ;;  %v1955_v52 = vld [vmem:[#allocation2 + $0x198] sm:$0xff] }
 0x234   : > { %3364 = vmatmul.msk.f32.gmra.mxu3 %vm241_vm1, %v2230_v55  ;;  %3397 = vmatmul.msk.f32.gmra.mxu0 %vm241_vm1, %v2507_v12 }
 0x235   : > { %v2773_v43 = vadd.f32 %v4446_v39, %v2737_v51 }
 0x236   : > { %v2108_v6 = vpop.f32.mrf.mxu2 }
 0x237   : > { %v2182_v34 = vadd.f32 %v2108_v6, %v1903_v13  ;;  %v1832_v60 = vpop.f32.mrf.mxu1  ;;  %v2386_v1 = vpop.f32.mrf.mxu3  ;;  %2806 = vst.msk [vmem:[%s4456_s19 + $0x50] sm:$0xff] %vm2795_vm4, %v2773_v43  ;;  %v2847_v45 = vsel %vm2795_vm4, %v2773_v43, 0.0  ;;  %v2907_v59 = vmul.f32 %v2773_v43, %v2773_v43  ;;  %v2509_v6 = vld [vmem:[#allocation2 + $0x182] sm:$0xff] }
 0x238   : > { %v2848_v35 = vadd.f32 %v2847_v45, %v2846_v50  ;;  %v1904_v32 = vadd.f32 %v1832_v60, %v1626_v38 }
 0x239   : > { %v2460_v58 = vadd.f32 %v2386_v1, %v2182_v34  ;;  %v2948_v28 = vsel %vm2795_vm4, %v2907_v59, 0.0  ;;  %v2664_v49 = vpop.f32.mrf.mxu0 }
 0x23a   : > { %3297 = vmatmul.msk.f32.gmra.mxu1 %vm241_vm1, %v2507_v12  ;;  %v2949_v36 = vadd.f32 %v2948_v28, %v2947_v29  ;;  %v1628_v28 = vadd.f32 %v4227_v20, %v4223_v61  ;;  %v1956_v20 = vld [vmem:[#allocation2 + $0x1a0] sm:$0xff] }
 0x23b   : > { %3331 = vmatmul.msk.f32.gmra.mxu2 %vm241_vm1, %v1953_v53  ;;  %v2738_v16 = vadd.f32 %v2664_v49, %v2460_v58 }
 0x23c   : > { %3365 = vmatmul.msk.f32.gmra.mxu3 %vm241_vm1, %v2231_v44  ;;  %3398 = vmatmul.msk.f32.gmra.mxu0 %vm241_vm1, %v2508_v41 }
 0x23d   : > { %v2774_v8 = vadd.f32 %v4446_v39, %v2738_v16 }
 0x23e   : > { %v2111_v0 = vpop.f32.mrf.mxu2 }
 0x23f   : > { %v2183_v23 = vadd.f32 %v2111_v0, %v1904_v32  ;;  %v1835_v40 = vpop.f32.mrf.mxu1  ;;  %v2389_v47 = vpop.f32.mrf.mxu3  ;;  %2807 = vst.msk [vmem:[%s4456_s19 + $0x58] sm:$0xff] %vm2795_vm4, %v2774_v8  ;;  %v2849_v55 = vsel %vm2795_vm4, %v2774_v8, 0.0  ;;  %v2908_v50 = vmul.f32 %v2774_v8, %v2774_v8  ;;  %v2510_v32 = vld [vmem:[#allocation2 + $0x18a] sm:$0xff] }
 0x240   : > { %v2850_v29 = vadd.f32 %v2849_v55, %v2848_v35  ;;  %v1905_v43 = vadd.f32 %v1835_v40, %v1627_v7  ;;  %v2233_v35 = vld [vmem:[#allocation2 + $0x199] sm:$0xff] }
 0x241   : > { %v2461_v63 = vadd.f32 %v2389_v47, %v2183_v23  ;;  %v2950_v12 = vsel %vm2795_vm4, %v2908_v50, 0.0  ;;  %v2667_v51 = vpop.f32.mrf.mxu0 }
 0x242   : > { %3298 = vmatmul.msk.f32.gmra.mxu1 %vm241_vm1, %v2508_v41  ;;  %v2951_v13 = vadd.f32 %v2950_v12, %v2949_v36 }
 0x243   : > { %3332 = vmatmul.msk.f32.gmra.mxu2 %vm241_vm1, %v1954_v37  ;;  %v2739_v34 = vadd.f32 %v2667_v51, %v2461_v63  ;;  %v2234_v63 = vld [vmem:[#allocation2 + $0x1a1] sm:$0xff] }
 0x244   : > { %3366 = vmatmul.msk.f32.gmra.mxu3 %vm241_vm1, %v2232_v18  ;;  %3399 = vmatmul.msk.f32.gmra.mxu0 %vm241_vm1, %v2509_v6  ;;  %v2511_v51 = vld [vmem:[#allocation2 + $0x19a] sm:$0xff] }
 0x245   : > { %v2775_v1 = vadd.f32 %v4446_v39, %v2739_v34 }
 0x246   : > { %v2114_v60 = vpop.f32.mrf.mxu2 }
 0x247   : > { %v2184_v53 = vadd.f32 %v2114_v60, %v1905_v43  ;;  %v1838_v45 = vpop.f32.mrf.mxu1  ;;  %v2392_v54 = vpop.f32.mrf.mxu3  ;;  %2808 = vst.msk [vmem:[%s4456_s19 + $0x60] sm:$0xff] %vm2795_vm4, %v2775_v1  ;;  %v2851_v59 = vsel %vm2795_vm4, %v2775_v1, 0.0  ;;  %v2909_v58 = vmul.f32 %v2775_v1, %v2775_v1 }
 0x248   : > { %v2852_v38 = vadd.f32 %v2851_v59, %v2850_v29  ;;  %v1906_v16 = vadd.f32 %v1838_v45, %v1628_v28  ;;  %v1629_v29 = vadd.f32 %v4238_v42, %v4232_v3  ;;  %v1630_v59 = vadd.f32 %v4249_v4, %v4243_v33 }
 0x249   : > { %v2462_v44 = vadd.f32 %v2392_v54, %v2184_v53  ;;  %v2952_v36 = vsel %vm2795_vm4, %v2909_v58, 0.0  ;;  %v2670_v41 = vpop.f32.mrf.mxu0 }
 0x24a   : > { %3299 = vmatmul.msk.f32.gmra.mxu1 %vm241_vm1, %v2509_v6  ;;  %v2953_v49 = vadd.f32 %v2952_v36, %v2951_v13 }
 0x24b   : > { %3333 = vmatmul.msk.f32.gmra.mxu2 %vm241_vm1, %v1955_v52  ;;  %v2740_v0 = vadd.f32 %v2670_v41, %v2462_v44 }
 0x24c   : > { %3367 = vmatmul.msk.f32.gmra.mxu3 %vm241_vm1, %v2233_v35  ;;  %3400 = vmatmul.msk.f32.gmra.mxu0 %vm241_vm1, %v2510_v32 }
 0x24d   : > { %v2776_v23 = vadd.f32 %v4446_v39, %v2740_v0 }
 0x24e   : > { %v2117_v8 = vpop.f32.mrf.mxu2 }
 0x24f   : > { %v2185_v40 = vadd.f32 %v2117_v8, %v1906_v16  ;;  %v1841_v47 = vpop.f32.mrf.mxu1  ;;  %v2395_v61 = vpop.f32.mrf.mxu3  ;;  %2809 = vst.msk [vmem:[%s4456_s19 + $0x68] sm:$0xff] %vm2795_vm4, %v2776_v23  ;;  %v2853_v37 = vsel %vm2795_vm4, %v2776_v23, 0.0  ;;  %v2910_v55 = vmul.f32 %v2776_v23, %v2776_v23 }
 0x250   : > { %v2854_v18 = vadd.f32 %v2853_v37, %v2852_v38  ;;  %v1907_v6 = vadd.f32 %v1841_v47, %v1629_v29  ;;  %v2512_v38 = vld [vmem:[#allocation2 + $0x1a2] sm:$0xff] }
 0x251   : > { %v2463_v50 = vadd.f32 %v2395_v61, %v2185_v40  ;;  %v2954_v7 = vsel %vm2795_vm4, %v2910_v55, 0.0  ;;  %v2673_v13 = vpop.f32.mrf.mxu0  ;;  %v1631_v40 = vadd.f32 %v4262_v17, %v4256_v14  ;;  %v1632_v17 = vadd.f32 %v4275_v21, %v4269_v9 }
 0x252   : > { %3300 = vmatmul.msk.f32.gmra.mxu1 %vm241_vm1, %v2510_v32  ;;  %v2955_v12 = vadd.f32 %v2954_v7, %v2953_v49  ;;  %v1633_v21 = vadd.f32 %v4288_v24, %v4282_v56  ;;  %v1634_v24 = vadd.f32 %v4300_v25, %v4294_v30  ;;  %v1635_v25 = vadd.f32 %v4312_v31, %v4306_v2 }
 0x253   : > { %3334 = vmatmul.msk.f32.gmra.mxu2 %vm241_vm1, %v1956_v20  ;;  %v2741_v43 = vadd.f32 %v2673_v13, %v2463_v50  ;;  %v1636_v31 = vadd.f32 %v4324_v15, %v4318_v11  ;;  %v1637_v15 = vadd.f32 %v4336_v10, %v4330_v26  ;;  %v1638_v10 = vadd.f32 %v4348_v27, %v4342_v57  ;;  %v4883_v27 = vld [vmem:[#allocation3_spill] sm:$0xff] }
 0x254   : > { %3368 = vmatmul.msk.f32.gmra.mxu3 %vm241_vm1, %v2234_v63  ;;  %3401 = vmatmul.msk.f32.gmra.mxu0 %vm241_vm1, %v2511_v51 }
 0x255   : > { %v2777_v60 = vadd.f32 %v4446_v39, %v2741_v43 }
 0x256   : > { %v2120_v34 = vpop.f32.mrf.mxu2 }
 0x257   : > { %v2186_v1 = vadd.f32 %v2120_v34, %v1907_v6  ;;  %v1844_v53 = vpop.f32.mrf.mxu1  ;;  %v2398_v45 = vpop.f32.mrf.mxu3  ;;  %2810 = vst.msk [vmem:[%s4456_s19 + $0x70] sm:$0xff] %vm2795_vm4, %v2777_v60  ;;  %v2855_v3 = vsel %vm2795_vm4, %v2777_v60, 0.0  ;;  %v2911_v42 = vmul.f32 %v2777_v60, %v2777_v60 }
 0x258   : > { %v2856_v52 = vadd.f32 %v2855_v3, %v2854_v18  ;;  %v1908_v28 = vadd.f32 %v1844_v53, %v1630_v59 }
 0x259   : > { %v2464_v54 = vadd.f32 %v2398_v45, %v2186_v1  ;;  %v2956_v58 = vsel %vm2795_vm4, %v2911_v42, 0.0  ;;  %v2676_v35 = vpop.f32.mrf.mxu0 }
 0x25a   : > { %v2957_v44 = vadd.f32 %v2956_v58, %v2955_v12 }
 0x25b   : > { %v2742_v36 = vadd.f32 %v2676_v35, %v2464_v54 }
 0x25c   : > { %3402 = vmatmul.msk.f32.gmra.mxu0 %vm241_vm1, %v2512_v38 }
 0x25d   : > { %v2778_v41 = vadd.f32 %v4446_v39, %v2742_v36 }
 0x25e   : > { %v2123_v49 = vpop.f32.mrf.mxu2 }
 0x25f   : > { %v2187_v32 = vadd.f32 %v2123_v49, %v1908_v28  ;;  %v1847_v16 = vpop.f32.mrf.mxu1  ;;  %v2401_v0 = vpop.f32.mrf.mxu3  ;;  %2811 = vst.msk [vmem:[%s4456_s19 + $0x78] sm:$0xff] %vm2795_vm4, %v2778_v41  ;;  %v2857_v33 = vsel %vm2795_vm4, %v2778_v41, 0.0  ;;  %v2912_v4 = vmul.f32 %v2778_v41, %v2778_v41 }
 0x260   : > { %v2858_v23 = vadd.f32 %v2857_v33, %v2856_v52  ;;  %v1909_v37 = vadd.f32 %v1847_v16, %v1631_v40 }
 0x261   : > { %v2465_v8 = vadd.f32 %v2401_v0, %v2187_v32  ;;  %v2958_v47 = vsel %vm2795_vm4, %v2912_v4, 0.0  ;;  %v2679_v20 = vpop.f32.mrf.mxu0 }
 0x262   : > { %v2959_v61 = vadd.f32 %v2958_v47, %v2957_v44 }
 0x263   : > { %v2743_v55 = vadd.f32 %v2679_v20, %v2465_v8 }
 0x265   : > { %v2779_v63 = vadd.f32 %v4446_v39, %v2743_v55 }
 0x266   : > { %v2126_v50 = vpop.f32.mrf.mxu2 }
 0x267   : > { %v2188_v18 = vadd.f32 %v2126_v50, %v1909_v37  ;;  %v1850_v29 = vpop.f32.mrf.mxu1  ;;  %v2404_v7 = vpop.f32.mrf.mxu3  ;;  %2812 = vst.msk [vmem:[%s4456_s19 + $0x80] sm:$0xff] %vm2795_vm4, %v2779_v63  ;;  %v2859_v12 = vsel %vm2795_vm4, %v2779_v63, 0.0  ;;  %v2913_v13 = vmul.f32 %v2779_v63, %v2779_v63 }
 0x268   : > { %v2860_v14 = vadd.f32 %v2859_v12, %v2858_v23  ;;  %v1910_v60 = vadd.f32 %v1850_v29, %v1632_v17 }
 0x269   : > { %v2466_v51 = vadd.f32 %v2404_v7, %v2188_v18  ;;  %v2960_v6 = vsel %vm2795_vm4, %v2913_v13, 0.0  ;;  %v2682_v34 = vpop.f32.mrf.mxu0 }
 0x26a   : > { %v2961_v43 = vadd.f32 %v2960_v6, %v2959_v61 }
 0x26b   : > { %v2744_v1 = vadd.f32 %v2682_v34, %v2466_v51 }
 0x26d   : > { %v2780_v45 = vadd.f32 %v4446_v39, %v2744_v1 }
 0x26e   : > { %v2129_v53 = vpop.f32.mrf.mxu2 }
 0x26f   : > { %v2189_v3 = vadd.f32 %v2129_v53, %v1910_v60  ;;  %v1853_v42 = vpop.f32.mrf.mxu1  ;;  %v2407_v54 = vpop.f32.mrf.mxu3  ;;  %2813 = vst.msk [vmem:[%s4456_s19 + $0x88] sm:$0xff] %vm2795_vm4, %v2780_v45  ;;  %v2861_v52 = vsel %vm2795_vm4, %v2780_v45, 0.0  ;;  %v2914_v59 = vmul.f32 %v2780_v45, %v2780_v45 }
 0x270   : > { %v2862_v9 = vadd.f32 %v2861_v52, %v2860_v14  ;;  %v1911_v28 = vadd.f32 %v1853_v42, %v1633_v21 }
 0x271   : > { %v2467_v58 = vadd.f32 %v2407_v54, %v2189_v3  ;;  %v2962_v44 = vsel %vm2795_vm4, %v2914_v59, 0.0  ;;  %v2685_v38 = vpop.f32.mrf.mxu0 }
 0x272   : > { %v2963_v35 = vadd.f32 %v2962_v44, %v2961_v43 }
 0x273   : > { %v2745_v36 = vadd.f32 %v2685_v38, %v2467_v58 }
 0x275   : > { %v2781_v41 = vadd.f32 %v4446_v39, %v2745_v36 }
 0x276   : > { %v2132_v49 = vpop.f32.mrf.mxu2 }
 0x277   : > { %v2190_v32 = vadd.f32 %v2132_v49, %v1911_v28  ;;  %v1856_v16 = vpop.f32.mrf.mxu1  ;;  %v2410_v0 = vpop.f32.mrf.mxu3  ;;  %2814 = vst.msk [vmem:[%s4456_s19 + $0x90] sm:$0xff] %vm2795_vm4, %v2781_v41  ;;  %v2863_v33 = vsel %vm2795_vm4, %v2781_v41, 0.0  ;;  %v2915_v4 = vmul.f32 %v2781_v41, %v2781_v41 }
 0x278   : > { %v2864_v56 = vadd.f32 %v2863_v33, %v2862_v9  ;;  %v1912_v61 = vadd.f32 %v1856_v16, %v1634_v24 }
 0x279   : > { %v2468_v8 = vadd.f32 %v2410_v0, %v2190_v32  ;;  %v2964_v23 = vsel %vm2795_vm4, %v2915_v4, 0.0  ;;  %v2688_v47 = vpop.f32.mrf.mxu0 }
 0x27a   : > { %v2965_v40 = vadd.f32 %v2964_v23, %v2963_v35 }
 0x27b   : > { %v2746_v20 = vadd.f32 %v2688_v47, %v2468_v8 }
 0x27d   : > { %v2782_v55 = vadd.f32 %v4446_v39, %v2746_v20 }
 0x27e   : > { %v2135_v37 = vpop.f32.mrf.mxu2 }
 0x27f   : > { %v2191_v50 = vadd.f32 %v2135_v37, %v1912_v61  ;;  %v1859_v63 = vpop.f32.mrf.mxu1  ;;  %v2413_v18 = vpop.f32.mrf.mxu3  ;;  %2815 = vst.msk [vmem:[%s4456_s19 + $0x98] sm:$0xff] %vm2795_vm4, %v2782_v55  ;;  %v2865_v29 = vsel %vm2795_vm4, %v2782_v55, 0.0  ;;  %v2916_v7 = vmul.f32 %v2782_v55, %v2782_v55 }
 0x280   : > { %v2866_v30 = vadd.f32 %v2865_v29, %v2864_v56  ;;  %v1913_v17 = vadd.f32 %v1859_v63, %v1635_v25 }
 0x281   : > { %v2469_v12 = vadd.f32 %v2413_v18, %v2191_v50  ;;  %v2966_v13 = vsel %vm2795_vm4, %v2916_v7, 0.0  ;;  %v2691_v14 = vpop.f32.mrf.mxu0 }
 0x282   : > { %v2967_v51 = vadd.f32 %v2966_v13, %v2965_v40 }
 0x283   : > { %v2747_v6 = vadd.f32 %v2691_v14, %v2469_v12 }
 0x285   : > { %v2783_v34 = vadd.f32 %v4446_v39, %v2747_v6 }
 0x286   : > { %v2138_v43 = vpop.f32.mrf.mxu2 }
 0x287   : > { %v2192_v60 = vadd.f32 %v2138_v43, %v1913_v17  ;;  %v1862_v1 = vpop.f32.mrf.mxu1  ;;  %v2416_v53 = vpop.f32.mrf.mxu3  ;;  %2816 = vst.msk [vmem:[%s4456_s19 + $0xa0] sm:$0xff] %vm2795_vm4, %v2783_v34  ;;  %v2867_v45 = vsel %vm2795_vm4, %v2783_v34, 0.0  ;;  %v2917_v3 = vmul.f32 %v2783_v34, %v2783_v34  ;;  %v1639_v17 = vadd.f32 %v4883_v27, %v4354_v22 }
 0x288   : > { %v2868_v2 = vadd.f32 %v2867_v45, %v2866_v30  ;;  %v1914_v58 = vadd.f32 %v1862_v1, %v1636_v31 }
 0x289   : > { %v2470_v42 = vadd.f32 %v2416_v53, %v2192_v60  ;;  %v2968_v54 = vsel %vm2795_vm4, %v2917_v3, 0.0  ;;  %v2694_v59 = vpop.f32.mrf.mxu0 }
 0x28a   : > { %v2969_v52 = vadd.f32 %v2968_v54, %v2967_v51 }
 0x28b   : > { %v2748_v9 = vadd.f32 %v2694_v59, %v2470_v42  ;;  %v4884_v59 = vld [vmem:[#allocation4_spill] sm:$0xff] }
 0x28d   : > { %v2784_v44 = vadd.f32 %v4446_v39, %v2748_v9 }
 0x28e   : > { %v2141_v21 = vpop.f32.mrf.mxu2 }
 0x28f   : > { %v2193_v35 = vadd.f32 %v2141_v21, %v1914_v58  ;;  %v1865_v38 = vpop.f32.mrf.mxu1  ;;  %v2419_v28 = vpop.f32.mrf.mxu3  ;;  %2817 = vst.msk [vmem:[%s4456_s19 + $0xa8] sm:$0xff] %vm2795_vm4, %v2784_v44  ;;  %v2869_v36 = vsel %vm2795_vm4, %v2784_v44, 0.0  ;;  %v2918_v49 = vmul.f32 %v2784_v44, %v2784_v44  ;;  %v4885_v58 = vld [vmem:[#allocation23_spill] sm:$0xff] }
 0x290   : > { %v2870_v11 = vadd.f32 %v2869_v36, %v2868_v2  ;;  %v1915_v33 = vadd.f32 %v1865_v38, %v1637_v15  ;;  %v1640_v9 = vadd.f32 %v4885_v58, %v4884_v59 }
 0x291   : > { %v2471_v41 = vadd.f32 %v2419_v28, %v2193_v35  ;;  %v2970_v32 = vsel %vm2795_vm4, %v2918_v49, 0.0  ;;  %v2697_v0 = vpop.f32.mrf.mxu0 }
 0x292   : > { %v2971_v16 = vadd.f32 %v2970_v32, %v2969_v52 }
 0x293   : > { %v2749_v4 = vadd.f32 %v2697_v0, %v2471_v41 }
 0x295   : > { %v2785_v56 = vadd.f32 %v4446_v39, %v2749_v4  ;;  %v4886_v4 = vld [vmem:[#allocation6_spill] sm:$0xff] }
 0x296   : > { %v2144_v8 = vpop.f32.mrf.mxu2 }
 0x297   : > { %v2194_v24 = vadd.f32 %v2144_v8, %v1915_v33  ;;  %v1868_v23 = vpop.f32.mrf.mxu1  ;;  %v2422_v40 = vpop.f32.mrf.mxu3  ;;  %2818 = vst.msk [vmem:[%s4456_s19 + $0xb0] sm:$0xff] %vm2795_vm4, %v2785_v56  ;;  %v2871_v47 = vsel %vm2795_vm4, %v2785_v56, 0.0  ;;  %v2919_v61 = vmul.f32 %v2785_v56, %v2785_v56  ;;  %v1641_v8 = vadd.f32 %v4384_v19, %v4886_v4  ;;  %v4889_v4 = vld [vmem:[#allocation9_spill] sm:$0xff] }
 0x298   : > { %v2872_v26 = vadd.f32 %v2871_v47, %v2870_v11  ;;  %v1916_v63 = vadd.f32 %v1868_v23, %v1638_v10 }
 0x299   : > { %v2472_v20 = vadd.f32 %v2422_v40, %v2194_v24  ;;  %v2972_v37 = vsel %vm2795_vm4, %v2919_v61, 0.0  ;;  %v2700_v50 = vpop.f32.mrf.mxu0  ;;  %v4712_v61 = vld [vmem:[%s4761_s2] ss:$0 sm:$0xff] }
 0x29a   : > { %v2973_v55 = vadd.f32 %v2972_v37, %v2971_v16 }
 0x29b   : > { %v2750_v18 = vadd.f32 %v2700_v50, %v2472_v20 }
 0x29d   : > { %v2786_v7 = vadd.f32 %v4446_v39, %v2750_v18  ;;  %v4887_v18 = vld [vmem:[#allocation7_spill] sm:$0xff] }
 0x29e   : > { %v2147_v29 = vpop.f32.mrf.mxu2 }
 0x29f   : > { %v2195_v12 = vadd.f32 %v2147_v29, %v1916_v63  ;;  %v1871_v30 = vpop.f32.mrf.mxu1  ;;  %v2425_v25 = vpop.f32.mrf.mxu3  ;;  %2819 = vst.msk [vmem:[%s4456_s19 + $0xb8] sm:$0xff] %vm2795_vm4, %v2786_v7  ;;  %v2873_v13 = vsel %vm2795_vm4, %v2786_v7, 0.0  ;;  %v2920_v51 = vmul.f32 %v2786_v7, %v2786_v7  ;;  %v1642_v29 = vadd.f32 %v4396_v5, %v4887_v18 }
 0x2a0   : > { %v2874_v57 = vadd.f32 %v2873_v13, %v2872_v26  ;;  %v1917_v60 = vadd.f32 %v1871_v30, %v1639_v17 }
 0x2a1   : > { %v2473_v14 = vadd.f32 %v2425_v25, %v2195_v12  ;;  %v2974_v6 = vsel %vm2795_vm4, %v2920_v51, 0.0  ;;  %v2703_v34 = vpop.f32.mrf.mxu0 }
 0x2a2   : > { %v2975_v43 = vadd.f32 %v2974_v6, %v2973_v55 }
 0x2a3   : > { %v2751_v1 = vadd.f32 %v2703_v34, %v2473_v14 }
 0x2a5   : > { %v2787_v45 = vadd.f32 %v4446_v39, %v2751_v1 }
 0x2a6   : > { %v2150_v53 = vpop.f32.mrf.mxu2 }
 0x2a7   : > { %v2196_v3 = vadd.f32 %v2150_v53, %v1917_v60  ;;  %v1874_v42 = vpop.f32.mrf.mxu1  ;;  %v2428_v2 = vpop.f32.mrf.mxu3  ;;  %2820 = vst.msk [vmem:[%s4456_s19 + $0xc0] sm:$0xff] %vm2795_vm4, %v2787_v45  ;;  %v2875_v31 = vsel %vm2795_vm4, %v2787_v45, 0.0  ;;  %v2921_v54 = vmul.f32 %v2787_v45, %v2787_v45  ;;  %v1643_v60 = vadd.f32 %v4408_v46, %v4402_v48  ;;  %v4888_v46 = vld [vmem:[#allocation26_spill] sm:$0xff] }
 0x2a8   : > { %v2876_v22 = vadd.f32 %v2875_v31, %v2874_v57  ;;  %v1918_v38 = vadd.f32 %v1874_v42, %v1640_v9 }
 0x2a9   : > { %v2474_v52 = vadd.f32 %v2428_v2, %v2196_v3  ;;  %v2976_v21 = vsel %vm2795_vm4, %v2921_v54, 0.0  ;;  %v2706_v35 = vpop.f32.mrf.mxu0 }
 0x2aa   : > { %v2977_v44 = vadd.f32 %v2976_v21, %v2975_v43  ;;  %v1644_v21 = vadd.f32 %v4888_v46, %v4414_v62 }
 0x2ab   : > { %v2752_v28 = vadd.f32 %v2706_v35, %v2474_v52 }
 0x2ad   : > { %v2788_v49 = vadd.f32 %v4446_v39, %v2752_v28 }
 0x2ae   : > { %v2153_v36 = vpop.f32.mrf.mxu2 }
 0x2af   : > { %v2197_v41 = vadd.f32 %v2153_v36, %v1918_v38  ;;  %v1877_v11 = vpop.f32.mrf.mxu1  ;;  %v2431_v15 = vpop.f32.mrf.mxu3  ;;  %2821 = vst.msk [vmem:[%s4456_s19 + $0xc8] sm:$0xff] %vm2795_vm4, %v2788_v49  ;;  %v2877_v32 = vsel %vm2795_vm4, %v2788_v49, 0.0  ;;  %v2922_v16 = vmul.f32 %v2788_v49, %v2788_v49 }
 0x2b0   : > { %v2878_v33 = vadd.f32 %v2877_v32, %v2876_v22  ;;  %v1919_v40 = vadd.f32 %v1877_v11, %v1641_v8  ;;  %v4890_v8 = vld [vmem:[#allocation10_spill] sm:$0xff] }
 0x2b1   : > { %v2475_v0 = vadd.f32 %v2431_v15, %v2197_v41  ;;  %v2978_v56 = vsel %vm2795_vm4, %v2922_v16, 0.0  ;;  %v2709_v23 = vpop.f32.mrf.mxu0 }
 0x2b2   : > { %v2979_v24 = vadd.f32 %v2978_v56, %v2977_v44  ;;  %v1645_v56 = vadd.f32 %v4890_v8, %v4889_v4 }
 0x2b3   : > { %v2753_v39 = vadd.f32 %v2709_v23, %v2475_v0 }
 0x2b5   : > { %v2789_v20 = vadd.f32 %v4712_v61, %v2753_v39 }
 0x2b6   : > { %v2156_v47 = vpop.f32.mrf.mxu2 }
 0x2b7   : > { %v2198_v26 = vadd.f32 %v2156_v47, %v1919_v40  ;;  %v1880_v10 = vpop.f32.mrf.mxu1  ;;  %v2434_v37 = vpop.f32.mrf.mxu3  ;;  %2822 = vst.msk [vmem:[%s4456_s19 + $0xd0] sm:$0xff] %vm2795_vm4, %v2789_v20  ;;  %v2879_v19 = vsel %vm2795_vm4, %v2789_v20, 0.0  ;;  %v2923_v55 = vmul.f32 %v2789_v20, %v2789_v20 }
 0x2b8   : > { %v2880_v63 = vadd.f32 %v2879_v19, %v2878_v33  ;;  %v1920_v25 = vadd.f32 %v1880_v10, %v1642_v29 }
 0x2b9   : > { %v2476_v50 = vadd.f32 %v2434_v37, %v2198_v26  ;;  %v2980_v7 = vsel %vm2795_vm4, %v2923_v55, 0.0  ;;  %v2712_v30 = vpop.f32.mrf.mxu0 }
 0x2ba   : > { %v2981_v12 = vadd.f32 %v2980_v7, %v2979_v24 }
 0x2bb   : > { %v2754_v13 = vadd.f32 %v2712_v30, %v2476_v50 }
 0x2bd   : > { %v2790_v14 = vadd.f32 %v4712_v61, %v2754_v13 }
 0x2be   : > { %v2159_v51 = vpop.f32.mrf.mxu2 }
 0x2bf   : > { %v2199_v57 = vadd.f32 %v2159_v51, %v1920_v25  ;;  %v1883_v27 = vpop.f32.mrf.mxu1  ;;  %v2437_v17 = vpop.f32.mrf.mxu3  ;;  %2823 = vst.msk [vmem:[%s4456_s19 + $0xd8] sm:$0xff] %vm2795_vm4, %v2790_v14  ;;  %v2881_v6 = vsel %vm2795_vm4, %v2790_v14, 0.0  ;;  %v2924_v43 = vmul.f32 %v2790_v14, %v2790_v14 }
 0x2c0   : > { %v2882_v5 = vadd.f32 %v2881_v6, %v2880_v63  ;;  %v1921_v3 = vadd.f32 %v1883_v27, %v1643_v60 }
 0x2c1   : > { %v2477_v34 = vadd.f32 %v2437_v17, %v2199_v57  ;;  %v2982_v1 = vsel %vm2795_vm4, %v2924_v43, 0.0  ;;  %v2715_v45 = vpop.f32.mrf.mxu0 }
 0x2c2   : > { %v2983_v53 = vadd.f32 %v2982_v1, %v2981_v12 }
 0x2c3   : > { %v2755_v42 = vadd.f32 %v2715_v45, %v2477_v34 }
 0x2c5   : > { %v2791_v31 = vadd.f32 %v4712_v61, %v2755_v42 }
 0x2c6   : > { %v2162_v2 = vpop.f32.mrf.mxu2 }
 0x2c7   : > { %v2200_v54 = vadd.f32 %v2162_v2, %v1921_v3  ;;  %v2440_v52 = vpop.f32.mrf.mxu3  ;;  %v1886_v22 = vpop.f32.mrf.mxu1  ;;  %2824 = vst.msk [vmem:[%s4456_s19 + $0xe0] sm:$0xff] %vm2795_vm4, %v2791_v31  ;;  %v2883_v59 = vsel %vm2795_vm4, %v2791_v31, 0.0  ;;  %v2925_v58 = vmul.f32 %v2791_v31, %v2791_v31 }
 0x2c8   : > { %v2884_v48 = vadd.f32 %v2883_v59, %v2882_v5  ;;  %v1922_v28 = vadd.f32 %v1886_v22, %v1644_v21 }
 0x2c9   : > { %v2478_v9 = vadd.f32 %v2440_v52, %v2200_v54  ;;  %v2984_v44 = vsel %vm2795_vm4, %v2925_v58, 0.0  ;;  %v2718_v38 = vpop.f32.mrf.mxu0 }
 0x2ca   : > { %v2985_v35 = vadd.f32 %v2984_v44, %v2983_v53 }
 0x2cb   : > { %v2756_v36 = vadd.f32 %v2718_v38, %v2478_v9 }
 0x2cd   : > { %v2792_v41 = vadd.f32 %v4712_v61, %v2756_v36 }
 0x2ce   : > { %v2165_v49 = vpop.f32.mrf.mxu2 }
 0x2cf   : > { %v2201_v11 = vadd.f32 %v2165_v49, %v1922_v28  ;;  %v2443_v15 = vpop.f32.mrf.mxu3  ;;  %2825 = vst.msk [vmem:[%s4456_s19 + $0xe8] sm:$0xff] %vm2795_vm4, %v2792_v41  ;;  %v2885_v32 = vsel %vm2795_vm4, %v2792_v41, 0.0  ;;  %v2926_v16 = vmul.f32 %v2792_v41, %v2792_v41  ;;  %v1889_v62 = vpop.f32.mrf.mxu1 }
 0x2d0   : > { %v2886_v33 = vadd.f32 %v2885_v32, %v2884_v48  ;;  %v1923_v39 = vadd.f32 %v1889_v62, %v1645_v56 }
 0x2d1   : > { %v2479_v0 = vadd.f32 %v2443_v15, %v2201_v11  ;;  %v2986_v24 = vsel %vm2795_vm4, %v2926_v16, 0.0  ;;  %v2721_v40 = vpop.f32.mrf.mxu0 }
 0x2d2   : > { %v2987_v23 = vadd.f32 %v2986_v24, %v2985_v35 }
 0x2d3   : > { %v2757_v47 = vadd.f32 %v2721_v40, %v2479_v0 }
 0x2d5   : > { %v2793_v26 = vadd.f32 %v4712_v61, %v2757_v47 }
 0x2d6   : > { %v2168_v20 = vpop.f32.mrf.mxu2 }
 0x2d7   : > { %v2202_v10 = vadd.f32 %v2168_v20, %v1923_v39  ;;  %v2446_v37 = vpop.f32.mrf.mxu3  ;;  %2826 = vst.msk [vmem:[%s4456_s19 + $0xf0] sm:$0xff] %vm2795_vm4, %v2793_v26  ;;  %v2887_v19 = vsel %vm2795_vm4, %v2793_v26, 0.0  ;;  %v2927_v55 = vmul.f32 %v2793_v26, %v2793_v26 }
 0x2d8   : > { %v2888_v63 = vadd.f32 %v2887_v19, %v2886_v33 }
 0x2d9   : > { %v2480_v50 = vadd.f32 %v2446_v37, %v2202_v10  ;;  %v2988_v18 = vsel %vm2795_vm4, %v2927_v55, 0.0  ;;  %v2724_v7 = vpop.f32.mrf.mxu0 }
 0x2da   : > { %v2989_v29 = vadd.f32 %v2988_v18, %v2987_v23 }
 0x2db   : > { %v2758_v12 = vadd.f32 %v2724_v7, %v2480_v50 }
 0x2dd   : > { %v2794_v30 = vadd.f32 %v4712_v61, %v2758_v12 }
 0x2df   : > { %2827 = vst.msk [vmem:[%s4456_s19 + $0xf8] sm:$0xff] %vm2795_vm4, %v2794_v30  ;;  %v2889_v25 = vsel %vm2795_vm4, %v2794_v30, 0.0  ;;  %v2928_v13 = vmul.f32 %v2794_v30, %v2794_v30 }
 0x2e0   : > { %v2890_v51 = vadd.f32 %v2889_v25, %v2888_v63 }
 0x2e1   : > { %v2990_v14 = vsel %vm2795_vm4, %v2928_v13, 0.0 }
 0x2e2   : > { %v2891_v57 = vrot.slane %v2890_v51, 4  ;;  %v2991_v27 = vadd.f32 %v2990_v14, %v2989_v29 }
 0x2e4   : > { %v2892_v17 = vadd.f32 %v2891_v57, %v2890_v51  ;;  %v2992_v6 = vrot.slane %v2991_v27, 4 }
 0x2e6   : > { %v2893_v43 = vrot.slane %v2892_v17, 2  ;;  %v2993_v34 = vadd.f32 %v2992_v6, %v2991_v27 }
 0x2e8   : > { %v2894_v5 = vadd.f32 %v2893_v43, %v2892_v17  ;;  %v2994_v60 = vrot.slane %v2993_v34, 2 }
 0x2ea   : > { %v2895_v1 = vrot.slane %v2894_v5, 1  ;;  %v2995_v53 = vadd.f32 %v2994_v60, %v2993_v34 }
 0x2ec   : > { %v2996_v61 = vrot.slane %v2995_v53, 1  ;;  %v2896_v45 = vadd.f32 %v2895_v1, %v2894_v5 }
 0x2ee   : > { %v2997_v3 = vadd.f32 %v2996_v61, %v2995_v53 }
 0x2f0   : > { %v2999_v42 = vsel %vm2998_vm5, %v2896_v45, %v2997_v3 }
 0x2f1   : > { %3001 = vst.msk [vmem:[%s208_s25] sm:$0x3] %vm3000_vm6, %v2999_v42 }
 0x2f2 PF: > { %s15_s15 = sadd.s32 1, %s3427_s15  }
 0x2f3   : > { %p12_p4 = scmp.ge.s32.totalorder %s15_s15, 4  }
 0x2f5   :  { %14 = sbr.rel (!%p12_p4) target bundleno = 1 (0x1), region = 85 }

// kernel: resblock_pallas.4
= control target key start
LH: loop header
LB: loop body
LE: loop exit
PB: predicated region body
PF: predicated region fallthrough
CT: control target
= control target key end

     0   :  { %s3588_s21 = smov 0   ;;  %s4945_s0 = inlined_call_operand.vmem [shape: f32[2,16,16,16], index: 0, kind: input, shape index: {}]   ;;  %s4946_s1 = inlined_call_operand.vmem [shape: f32[1,8], index: 1, kind: input, shape index: {}]   ;;  %s4947_s2 = inlined_call_operand.vmem [shape: f32[1,8], index: 2, kind: input, shape index: {}]   ;;  %s4948_s3 = inlined_call_operand.vmem [shape: f32[9,8,8], index: 3, kind: input, shape index: {}]   ;;  %s4949_s4 = inlined_call_operand.vmem [shape: f32[1,8], index: 4, kind: input, shape index: {}]   ;;  %s4950_s5 = inlined_call_operand.vmem [shape: f32[2,16,16,8], index: 5, kind: output, shape index: {0}]   ;;  %s4951_s6 = inlined_call_operand.vmem [shape: f32[2,2,8], index: 6, kind: output, shape index: {1}]  }
   0x1 LB: > { %s3216_s22 = sadd.s32 4294967295, %s3550_s21   ;;  %p3220_p0 = scmp.ge.s32.totalorder %s3550_s21, 1  ;;  %s3550_s21 = sphi %s3588_s21, %s17_s21  }
   0x2   : > { %p215_p1 = scmp.lt.s32.totalorder %s3550_s21, 3 }
   0x4   : > { %p216_p2 = pnand %p3220_p0, %p215_p1 }
   0x6   : > { %219 = sbr.rel (%p216_p2) target bundleno = 759 (0x2f7), region = 40 }
   0xb   : > { %v3226_v0 = vld [vmem:[%s4948_s3 + $0x8] sm:$0xff]  ;;  %p249_p3 = scmp.lt.s32.totalorder %s3216_s22, 1  ;;  %v3291_v1 = vld [vmem:[%s4948_s3 + $0x10] sm:$0xff]  ;;  %vm399_vm0 = vcmask 64512   ;;  %v3324_v2 = vld [vmem:[%s4948_s3 + $0x18] sm:$0xff]  ;;  %v3552_v6 = vmov 0.0  }
   0xc   : > { %3526 = vmatpush.msra.mxu1 %v3226_v0  ;;  %3527 = vmatpush.msra.mxu2 %v3226_v0  ;;  %v510_v3 = vld [vmem:[%s4948_s3] sm:$0xff]  ;;  %400 = vst.msk [vmem:[#allocation2] sm:$0xff] %vm399_vm0, %v3552_v6  ;;  %vm402_vm1 = vcmask 58368   ;;  %vm408_vm2 = vcmask 57344   ;;  %vm3127_vm3 = vcmask 1040384  }
   0xd   : > { %s5076_s22 = smov (!%p249_p3, %s3216_s22), 1  ;;  %3528 = vmatpush.msra.mxu3 %v3226_v0  ;;  %v3357_v4 = vld [vmem:[%s4948_s3 + $0x20] sm:$0xff]  ;;  %656 = vmatpush.msra.mxu0 %v3226_v0  ;;  %401 = vst.msk [vmem:[#allocation2 + $0x8] sm:$0xff] %vm399_vm0, %v3552_v6 }
   0xe   : > { %1108 = vmatpush.msrb.mxu2 %v3291_v1  ;;  %v3616_v5 = vld [vmem:[%s4946_s1] ss:$0 sm:$0xff]  ;;  %865 = vmatpush.msrb.mxu1 %v510_v3  ;;  %s3524_s11 = sshll.u32 %s5076_s22, 8  ;;  %405 = vst.msk [vmem:[#allocation2 + $0x198] sm:$0xff] %vm399_vm0, %v3552_v6 }
   0xf   : > { %1383 = vmatpush.msrb.mxu3 %v3324_v2  ;;  %s3628_s14 = scalar_lea.vmem %s4945_s0, %s3524_s11  ;;  %v3633_v7 = vld [vmem:[%s4947_s2] ss:$0 sm:$0xff]  ;;  %1658 = vmatpush.msrb.mxu0 %v3357_v4  ;;  %406 = vst.msk [vmem:[#allocation2 + $0x1a0] sm:$0xff] %vm399_vm0, %v3552_v6  ;;  %s4642_s12 = scalar_lea.vmem %s4950_s5, %s3524_s11 }
  0x10   : > { %v271_v8 = vld [vmem:[%s3628_s14 + $0x30] sm:$0xff]  ;;  %v272_v14 = vld [vmem:[%s3628_s14 + $0x38] sm:$0xff]  ;;  %403 = vst.msk [vmem:[#allocation2 + $0x10] sm:$0x3] %vm402_vm1, %v3552_v6  ;;  %v273_v20 = vld [vmem:[%s3628_s14 + $0x40] sm:$0xff] }
  0x11   : > { %v279_v9 = vld [vmem:[%s3628_s14 + $0x70] sm:$0xff]  ;;  %v306_v11 = vmul.f32 %v3616_v5, %v271_v8  ;;  %v280_v15 = vld [vmem:[%s3628_s14 + $0x78] sm:$0xff]  ;;  %v307_v17 = vmul.f32 %v3616_v5, %v272_v14  ;;  %v281_v21 = vld [vmem:[%s3628_s14 + $0x80] sm:$0xff]  ;;  %407 = vst.msk [vmem:[#allocation2 + $0x1a8] sm:$0x3] %vm402_vm1, %v3552_v6  ;;  %v308_v25 = vmul.f32 %v3616_v5, %v273_v20 }
  0x12   : > { %v287_v10 = vld [vmem:[%s3628_s14 + $0xb0] sm:$0xff]  ;;  %v314_v12 = vmul.f32 %v3616_v5, %v279_v9  ;;  %v288_v16 = vld [vmem:[%s3628_s14 + $0xb8] sm:$0xff]  ;;  %v315_v18 = vmul.f32 %v3616_v5, %v280_v15  ;;  %v289_v26 = vld [vmem:[%s3628_s14 + $0xc0] sm:$0xff]  ;;  %v316_v30 = vmul.f32 %v3616_v5, %v281_v21  ;;  %409 = vst.msk [vmem:[#allocation2] sm:$0x1] %vm408_vm2, %v3552_v6 }
  0x13   : > { %v322_v13 = vmul.f32 %v3616_v5, %v287_v10  ;;  %v323_v19 = vmul.f32 %v3616_v5, %v288_v16  ;;  %v341_v22 = vadd.f32 %v3633_v7, %v306_v11  ;;  %v342_v27 = vadd.f32 %v3633_v7, %v307_v17  ;;  %v274_v31 = vld [vmem:[%s3628_s14 + $0x48] sm:$0xff]  ;;  %v265_v33 = vld [vmem:[%s3628_s14] sm:$0xff]  ;;  %v275_v40 = vld [vmem:[%s3628_s14 + $0x50] sm:$0xff]  ;;  %410 = vst.msk [vmem:[#allocation2 + $0x18] sm:$0x1] %vm408_vm2, %v3552_v6 }
  0x14   : > { %v349_v23 = vadd.f32 %v3633_v7, %v314_v12  ;;  %v350_v28 = vadd.f32 %v3633_v7, %v315_v18  ;;  %v282_v32 = vld [vmem:[%s3628_s14 + $0x88] sm:$0xff]  ;;  %v343_v38 = vadd.f32 %v3633_v7, %v308_v25  ;;  %v351_v43 = vadd.f32 %v3633_v7, %v316_v30  ;;  %v283_v44 = vld [vmem:[%s3628_s14 + $0x90] sm:$0xff]  ;;  %v276_v62 = vld [vmem:[%s3628_s14 + $0x58] sm:$0xff]  ;;  %411 = vst.msk [vmem:[#allocation2 + $0x30] sm:$0x1] %vm408_vm2, %v3552_v6 }
  0x15   : > { %v357_v24 = vadd.f32 %v3633_v7, %v322_v13  ;;  %v358_v29 = vadd.f32 %v3633_v7, %v323_v19  ;;  %v373_v34 = vmax.f32 %v341_v22, 0.0  ;;  %v511_v37 = vld [vmem:[#allocation2 + $0x1] sm:$0xff]  ;;  %v374_v41 = vmax.f32 %v342_v27, 0.0  ;;  %v291_v61 = vld [vmem:[%s3628_s14 + $0xd0] sm:$0xff]  ;;  %v284_v63 = vld [vmem:[%s3628_s14 + $0x98] sm:$0xff] }
  0x16   : > { %v381_v35 = vmax.f32 %v349_v23, 0.0  ;;  %v290_v39 = vld [vmem:[%s3628_s14 + $0xc8] sm:$0xff]  ;;  %v382_v42 = vmax.f32 %v350_v28, 0.0  ;;  %3227 = vmatmul.msk.f32.vlgmr.msra.gmra.mxu0 %vm399_vm0, %v511_v37  ;;  %v324_v46 = vmul.f32 %v3616_v5, %v289_v26  ;;  %v309_v47 = vmul.f32 %v3616_v5, %v274_v31  ;;  %v267_v3 = vld [vmem:[%s3628_s14 + $0x10] sm:$0xff]  ;;  %v292_v10 = vld [vmem:[%s3628_s14 + $0xd8] sm:$0xff] }
  0x17   : > { %v389_v36 = vmax.f32 %v357_v24, 0.0  ;;  %452 = vst.msk [vmem:[#allocation2 + $0x61] sm:$0xff] %vm399_vm0, %v373_v34  ;;  %v390_v45 = vmax.f32 %v358_v29, 0.0  ;;  %v317_v48 = vmul.f32 %v3616_v5, %v282_v32  ;;  %v266_v49 = vld [vmem:[%s3628_s14 + $0x8] sm:$0xff]  ;;  %v375_v50 = vmax.f32 %v343_v38, 0.0  ;;  %v277_v28 = vld [vmem:[%s3628_s14 + $0x60] sm:$0xff] }
  0x18   : > { %460 = vst.msk [vmem:[#allocation2 + $0xc1] sm:$0xff] %vm399_vm0, %v381_v35  ;;  %v300_v51 = vmul.f32 %v3616_v5, %v265_v33  ;;  %v325_v52 = vmul.f32 %v3616_v5, %v290_v39  ;;  %v310_v53 = vmul.f32 %v3616_v5, %v275_v40  ;;  %v359_v54 = vadd.f32 %v3633_v7, %v324_v46  ;;  %v512_v0 = vld [vmem:[#allocation2 + $0x9] sm:$0xff]  ;;  %v285_v32 = vld [vmem:[%s3628_s14 + $0xa0] sm:$0xff] }
  0x19   : > { %468 = vst.msk [vmem:[#allocation2 + $0x121] sm:$0xff] %vm399_vm0, %v389_v36  ;;  %v344_v55 = vadd.f32 %v3633_v7, %v309_v47  ;;  %v352_v56 = vadd.f32 %v3633_v7, %v317_v48  ;;  %v318_v57 = vmul.f32 %v3616_v5, %v283_v44  ;;  %v383_v58 = vmax.f32 %v351_v43, 0.0  ;;  %v268_v36 = vld [vmem:[%s3628_s14 + $0x18] sm:$0xff]  ;;  %v293_v37 = vld [vmem:[%s3628_s14 + $0xe0] sm:$0xff] }
  0x1a   : > { %453 = vst.msk [vmem:[#allocation2 + $0x69] sm:$0xff] %vm399_vm0, %v374_v41  ;;  %v335_v59 = vadd.f32 %v3633_v7, %v300_v51  ;;  %v301_v60 = vmul.f32 %v3616_v5, %v266_v49  ;;  %v391_v1 = vmax.f32 %v359_v54, 0.0  ;;  %v360_v2 = vadd.f32 %v3633_v7, %v325_v52  ;;  %v278_v54 = vld [vmem:[%s3628_s14 + $0x68] sm:$0xff] }
  0x1b   : > { %461 = vst.msk [vmem:[#allocation2 + $0xc9] sm:$0xff] %vm399_vm0, %v382_v42  ;;  %v376_v4 = vmax.f32 %v344_v55, 0.0  ;;  %v384_v8 = vmax.f32 %v352_v56, 0.0  ;;  %v345_v9 = vadd.f32 %v3633_v7, %v310_v53  ;;  %v353_v11 = vadd.f32 %v3633_v7, %v318_v57  ;;  %v286_v55 = vld [vmem:[%s3628_s14 + $0xa8] sm:$0xff] }
  0x1c   : > { %469 = vst.msk [vmem:[#allocation2 + $0x129] sm:$0xff] %vm399_vm0, %v390_v45  ;;  %v326_v12 = vmul.f32 %v3616_v5, %v291_v61  ;;  %v311_v13 = vmul.f32 %v3616_v5, %v276_v62  ;;  %v319_v14 = vmul.f32 %v3616_v5, %v284_v63  ;;  %v367_v16 = vmax.f32 %v335_v59, 0.0  ;;  %v294_v61 = vld [vmem:[%s3628_s14 + $0xe8] sm:$0xff] }
  0x1d   : > { %454 = vst.msk [vmem:[#allocation2 + $0x79] sm:$0xff] %vm399_vm0, %v375_v50  ;;  %v336_v17 = vadd.f32 %v3633_v7, %v301_v60  ;;  %v302_v18 = vmul.f32 %v3616_v5, %v267_v3  ;;  %v392_v20 = vmax.f32 %v360_v2, 0.0  ;;  %v327_v22 = vmul.f32 %v3616_v5, %v292_v10  ;;  %v269_v60 = vld [vmem:[%s3628_s14 + $0x20] sm:$0xff] }
  0x1e   : > { %v3706_v15 = vld [vmem:[#allocation2 + $0x61] sm:$0xff]  ;;  %462 = vst.msk [vmem:[#allocation2 + $0xd9] sm:$0xff] %vm399_vm0, %v383_v58  ;;  %3228 = vmatmul.msk.f32.gmra.mxu0 %vm399_vm0, %v512_v0  ;;  %v361_v21 = vadd.f32 %v3633_v7, %v326_v12  ;;  %v377_v24 = vmax.f32 %v345_v9, 0.0  ;;  %v346_v25 = vadd.f32 %v3633_v7, %v311_v13  ;;  %v385_v26 = vmax.f32 %v353_v11, 0.0 }
  0x1f   : > { %3235 = vmatmul.msk.f32.vlgmr.msra.gmra.mxu1 %vm399_vm0, %v3706_v15  ;;  %v3714_v19 = vld [vmem:[#allocation2 + $0xc1] sm:$0xff]  ;;  %470 = vst.msk [vmem:[#allocation2 + $0x139] sm:$0xff] %vm399_vm0, %v391_v1  ;;  %v354_v27 = vadd.f32 %v3633_v7, %v319_v14  ;;  %v368_v29 = vmax.f32 %v336_v17, 0.0  ;;  %v337_v30 = vadd.f32 %v3633_v7, %v302_v18  ;;  %v312_v31 = vmul.f32 %v3616_v5, %v277_v28 }
  0x20   : > { %3243 = vmatmul.msk.f32.vlgmr.msra.gmra.mxu2 %vm399_vm0, %v3714_v19  ;;  %v535_v23 = vld [vmem:[#allocation2 + $0x121] sm:$0xff]  ;;  %455 = vst.msk [vmem:[#allocation2 + $0x81] sm:$0xff] %vm399_vm0, %v376_v4  ;;  %v393_v33 = vmax.f32 %v361_v21, 0.0  ;;  %v362_v34 = vadd.f32 %v3633_v7, %v327_v22  ;;  %v320_v35 = vmul.f32 %v3616_v5, %v285_v32  ;;  %v378_v39 = vmax.f32 %v346_v25, 0.0  ;;  %v3423_v25 = vld [vmem:[%s4948_s3 + $0x30] sm:$0xff] }
  0x21   : > { %3251 = vmatmul.msk.f32.vlgmr.msra.gmra.mxu3 %vm399_vm0, %v535_v23  ;;  %463 = vst.msk [vmem:[#allocation2 + $0xe1] sm:$0xff] %vm399_vm0, %v384_v8  ;;  %v3736_v38 = vld [vmem:[#allocation2 + $0x69] sm:$0xff]  ;;  %v347_v40 = vadd.f32 %v3633_v7, %v312_v31  ;;  %v303_v41 = vmul.f32 %v3616_v5, %v268_v36  ;;  %v328_v42 = vmul.f32 %v3616_v5, %v293_v37  ;;  %v386_v44 = vmax.f32 %v354_v27, 0.0  ;;  %v3456_v27 = vld [vmem:[%s4948_s3 + $0x38] sm:$0xff] }
  0x22   : > { %446 = vst.msk [vmem:[#allocation2 + $0x19] sm:$0xff] %vm399_vm0, %v367_v16  ;;  %v3742_v43 = vld [vmem:[#allocation2 + $0xc9] sm:$0xff]  ;;  %v355_v45 = vadd.f32 %v3633_v7, %v320_v35  ;;  %v369_v47 = vmax.f32 %v337_v30, 0.0  ;;  %v394_v49 = vmax.f32 %v362_v34, 0.0  ;;  %v313_v57 = vmul.f32 %v3616_v5, %v278_v54  ;;  %2209 = vmatpush.msra.mxu2 %v3423_v25  ;;  %2484 = vmatpush.msra.mxu3 %v3456_v27 }
  0x23   : > { %471 = vst.msk [vmem:[#allocation2 + $0x141] sm:$0xff] %vm399_vm0, %v392_v20  ;;  %v536_v46 = vld [vmem:[#allocation2 + $0x129] sm:$0xff]  ;;  %v338_v48 = vadd.f32 %v3633_v7, %v303_v41  ;;  %v363_v50 = vadd.f32 %v3633_v7, %v328_v42  ;;  %v379_v51 = vmax.f32 %v347_v40, 0.0  ;;  %v321_v58 = vmul.f32 %v3616_v5, %v286_v55  ;;  %v478_v42 = vld [vmem:[#allocation2] sm:$0xff] }
  0x24   : > { %456 = vst.msk [vmem:[#allocation2 + $0x91] sm:$0xff] %vm399_vm0, %v377_v24  ;;  %v387_v53 = vmax.f32 %v355_v45, 0.0  ;;  %v3769_v62 = vld [vmem:[#allocation2 + $0x79] sm:$0xff]  ;;  %v348_v63 = vadd.f32 %v3633_v7, %v313_v57  ;;  %v304_v1 = vmul.f32 %v3616_v5, %v269_v60  ;;  %v329_v2 = vmul.f32 %v3616_v5, %v294_v61  ;;  %v3390_v28 = vld [vmem:[%s4948_s3 + $0x28] sm:$0xff] }
  0x25   : > { %464 = vst.msk [vmem:[#allocation2 + $0xf1] sm:$0xff] %vm399_vm0, %v385_v26  ;;  %v370_v56 = vmax.f32 %v338_v48, 0.0  ;;  %v395_v59 = vmax.f32 %v363_v50, 0.0  ;;  %v356_v0 = vadd.f32 %v3633_v7, %v321_v58  ;;  %v3776_v3 = vld [vmem:[#allocation2 + $0xd9] sm:$0xff]  ;;  %1933 = vmatpush.msra.mxu1 %v3390_v28  ;;  %v270_v35 = vld [vmem:[%s3628_s14 + $0x28] sm:$0xff] }
  0x26   : > { %447 = vst.msk [vmem:[#allocation2 + $0x21] sm:$0xff] %vm399_vm0, %v368_v29  ;;  %v3779_v4 = vld [vmem:[#allocation2 + $0x139] sm:$0xff]  ;;  %v380_v8 = vmax.f32 %v348_v63, 0.0  ;;  %v339_v10 = vadd.f32 %v3633_v7, %v304_v1  ;;  %v364_v11 = vadd.f32 %v3633_v7, %v329_v2  ;;  %v305_v37 = vmul.f32 %v3616_v5, %v270_v35  ;;  %v4031_v60 = vld [vmem:[#allocation2 + $0x68] sm:$0xff] }
  0x27   : > { %3236 = vmatmul.msk.f32.gmra.mxu1 %vm399_vm0, %v3736_v38  ;;  %472 = vst.msk [vmem:[#allocation2 + $0x151] sm:$0xff] %vm399_vm0, %v393_v33  ;;  %v388_v9 = vmax.f32 %v356_v0, 0.0  ;;  %v3799_v16 = vld [vmem:[#allocation2 + $0x81] sm:$0xff] }
  0x28   : > { %3244 = vmatmul.msk.f32.gmra.mxu2 %vm399_vm0, %v3742_v43  ;;  %457 = vst.msk [vmem:[#allocation2 + $0x99] sm:$0xff] %vm399_vm0, %v378_v39  ;;  %v371_v13 = vmax.f32 %v339_v10, 0.0  ;;  %v396_v14 = vmax.f32 %v364_v11, 0.0  ;;  %v3801_v17 = vld [vmem:[#allocation2 + $0xe1] sm:$0xff]  ;;  %v340_v40 = vadd.f32 %v3633_v7, %v305_v37 }
  0x29   : > { %3252 = vmatmul.msk.f32.gmra.mxu3 %vm399_vm0, %v536_v46  ;;  %v3756_v52 = vld [vmem:[#allocation2 + $0x19] sm:$0xff]  ;;  %465 = vst.msk [vmem:[#allocation2 + $0xf9] sm:$0xff] %vm399_vm0, %v386_v44  ;;  %v963_v44 = vld [vmem:[#allocation2 + $0x2] sm:$0xff] }
  0x2a   : > { %3229 = vmatmul.msk.f32.gmra.mxu0 %vm399_vm0, %v3756_v52  ;;  %448 = vst.msk [vmem:[#allocation2 + $0x31] sm:$0xff] %vm399_vm0, %v369_v47  ;;  %v3803_v18 = vld [vmem:[#allocation2 + $0x141] sm:$0xff]  ;;  %v372_v7 = vmax.f32 %v340_v40, 0.0  ;;  %v1238_v45 = vld [vmem:[#allocation2 + $0x18] sm:$0xff] }
  0x2b   : > { %473 = vst.msk [vmem:[#allocation2 + $0x159] sm:$0xff] %vm399_vm0, %v394_v49  ;;  %v3823_v21 = vld [vmem:[#allocation2 + $0x91] sm:$0xff]  ;;  %v3489_v33 = vld [vmem:[%s4948_s3 + $0x40] sm:$0xff]  ;;  %v479_v47 = vld [vmem:[#allocation2 + $0x8] sm:$0xff] }
  0x2c   : > { %458 = vst.msk [vmem:[#allocation2 + $0xa9] sm:$0xff] %vm399_vm0, %v379_v51  ;;  %v3827_v22 = vld [vmem:[#allocation2 + $0xf1] sm:$0xff]  ;;  %2759 = vmatpush.msra.mxu0 %v3489_v33  ;;  %v4045_v0 = vld [vmem:[#allocation2 + $0x62] sm:$0xff] }
  0x2d   : > { %466 = vst.msk [vmem:[#allocation2 + $0x109] sm:$0xff] %vm399_vm0, %v387_v53  ;;  %v3786_v12 = vld [vmem:[#allocation2 + $0x21] sm:$0xff] }
  0x2e   : > { %449 = vst.msk [vmem:[#allocation2 + $0x39] sm:$0xff] %vm399_vm0, %v370_v56  ;;  %v3831_v23 = vld [vmem:[#allocation2 + $0x151] sm:$0xff]  ;;  %v1239_v49 = vld [vmem:[#allocation2 + $0x20] sm:$0xff] }
  0x2f   : > { %3237 = vmatmul.msk.f32.gmra.mxu1 %vm399_vm0, %v3769_v62  ;;  %474 = vst.msk [vmem:[#allocation2 + $0x169] sm:$0xff] %vm399_vm0, %v395_v59  ;;  %v3858_v26 = vld [vmem:[#allocation2 + $0x99] sm:$0xff] }
  0x30   : > { %3245 = vmatmul.msk.f32.gmra.mxu2 %vm399_vm0, %v3776_v3  ;;  %459 = vst.msk [vmem:[#allocation2 + $0xb1] sm:$0xff] %vm399_vm0, %v380_v8  ;;  %v3868_v29 = vld [vmem:[#allocation2 + $0xf9] sm:$0xff] }
  0x31   : > { %3253 = vmatmul.msk.f32.gmra.mxu3 %vm399_vm0, %v3779_v4  ;;  %467 = vst.msk [vmem:[#allocation2 + $0x111] sm:$0xff] %vm399_vm0, %v388_v9  ;;  %v3807_v20 = vld [vmem:[#allocation2 + $0x31] sm:$0xff]  ;;  %v4067_v11 = vld [vmem:[#allocation2 + $0x80] sm:$0xff] }
  0x32   : > { %3230 = vmatmul.msk.f32.gmra.mxu0 %vm399_vm0, %v3786_v12  ;;  %450 = vst.msk [vmem:[#allocation2 + $0x49] sm:$0xff] %vm399_vm0, %v371_v13  ;;  %v3872_v30 = vld [vmem:[#allocation2 + $0x159] sm:$0xff]  ;;  %v3973_v50 = vld [vmem:[#allocation2 + $0x30] sm:$0xff] }
  0x33   : > { %475 = vst.msk [vmem:[#allocation2 + $0x171] sm:$0xff] %vm399_vm0, %v396_v14  ;;  %v3896_v32 = vld [vmem:[#allocation2 + $0xa9] sm:$0xff]  ;;  %v4083_v14 = vld [vmem:[#allocation2 + $0x7a] sm:$0xff]  ;;  %v4123_v40 = vld [vmem:[#allocation2 + $0x92] sm:$0xff] }
  0x34   : > { %412 = vst.msk [vmem:[#allocation2 + $0x48] sm:$0x1] %vm408_vm2, %v3552_v6  ;;  %v3903_v34 = vld [vmem:[#allocation2 + $0x109] sm:$0xff] }
  0x35   : > { %413 = vst.msk [vmem:[#allocation2 + $0x60] sm:$0x1] %vm408_vm2, %v3552_v6  ;;  %v3837_v24 = vld [vmem:[#allocation2 + $0x39] sm:$0xff] }
  0x36   : > { %414 = vst.msk [vmem:[#allocation2 + $0x78] sm:$0x1] %vm408_vm2, %v3552_v6  ;;  %v3908_v36 = vld [vmem:[#allocation2 + $0x169] sm:$0xff]  ;;  %v3984_v53 = vld [vmem:[#allocation2 + $0x38] sm:$0xff] }
  0x37   : > { %3238 = vmatmul.msk.f32.gmra.mxu1 %vm399_vm0, %v3799_v16  ;;  %415 = vst.msk [vmem:[#allocation2 + $0x90] sm:$0x1] %vm408_vm2, %v3552_v6  ;;  %v3929_v39 = vld [vmem:[#allocation2 + $0xb1] sm:$0xff] }
  0x38   : > { %3246 = vmatmul.msk.f32.gmra.mxu2 %vm399_vm0, %v3801_v17  ;;  %416 = vst.msk [vmem:[#allocation2 + $0xa8] sm:$0x1] %vm408_vm2, %v3552_v6  ;;  %v3934_v5 = vld [vmem:[#allocation2 + $0x111] sm:$0xff] }
  0x39   : > { %3254 = vmatmul.msk.f32.gmra.mxu3 %vm399_vm0, %v3803_v18  ;;  %417 = vst.msk [vmem:[#allocation2 + $0xc0] sm:$0x1] %vm408_vm2, %v3552_v6  ;;  %v3878_v31 = vld [vmem:[#allocation2 + $0x49] sm:$0xff] }
  0x3a   : > { %3231 = vmatmul.msk.f32.gmra.mxu0 %vm399_vm0, %v3807_v20  ;;  %418 = vst.msk [vmem:[#allocation2 + $0xd8] sm:$0x1] %vm408_vm2, %v3552_v6  ;;  %v3938_v41 = vld [vmem:[#allocation2 + $0x171] sm:$0xff] }
  0x3b   : > { %419 = vst.msk [vmem:[#allocation2 + $0xf0] sm:$0x1] %vm408_vm2, %v3552_v6  ;;  %v3995_v54 = vld [vmem:[#allocation2 + $0x48] sm:$0xff] }
  0x3c   : > { %420 = vst.msk [vmem:[#allocation2 + $0x108] sm:$0x1] %vm408_vm2, %v3552_v6  ;;  %v4019_v58 = vld [vmem:[#allocation2 + $0x60] sm:$0xff] }
  0x3d   : > { %421 = vst.msk [vmem:[#allocation2 + $0x120] sm:$0x1] %vm408_vm2, %v3552_v6  ;;  %v4047_v1 = vld [vmem:[#allocation2 + $0x78] sm:$0xff] }
  0x3e   : > { %422 = vst.msk [vmem:[#allocation2 + $0x138] sm:$0x1] %vm408_vm2, %v3552_v6 }
  0x3f   : > { %3239 = vmatmul.msk.f32.gmra.mxu1 %vm399_vm0, %v3823_v21  ;;  %423 = vst.msk [vmem:[#allocation2 + $0x150] sm:$0x1] %vm408_vm2, %v3552_v6 }
  0x40   : > { %3247 = vmatmul.msk.f32.gmra.mxu2 %vm399_vm0, %v3827_v22  ;;  %424 = vst.msk [vmem:[#allocation2 + $0x168] sm:$0x1] %vm408_vm2, %v3552_v6 }
  0x41   : > { %3255 = vmatmul.msk.f32.gmra.mxu3 %vm399_vm0, %v3831_v23  ;;  %425 = vst.msk [vmem:[#allocation2 + $0x180] sm:$0x1] %vm408_vm2, %v3552_v6 }
  0x42   : > { %3232 = vmatmul.msk.f32.gmra.mxu0 %vm399_vm0, %v3837_v24  ;;  %426 = vst.msk [vmem:[#allocation2 + $0x198] sm:$0x1] %vm408_vm2, %v3552_v6 }
  0x43   : > { %427 = vst.msk [vmem:[#allocation2 + $0x11] sm:$0x1] %vm408_vm2, %v3552_v6 }
  0x44   : > { %428 = vst.msk [vmem:[#allocation2 + $0x29] sm:$0x1] %vm408_vm2, %v3552_v6 }
  0x45   : > { %429 = vst.msk [vmem:[#allocation2 + $0x41] sm:$0x1] %vm408_vm2, %v3552_v6 }
  0x46   : > { %430 = vst.msk [vmem:[#allocation2 + $0x59] sm:$0x1] %vm408_vm2, %v3552_v6 }
  0x47   : > { %3240 = vmatmul.msk.f32.gmra.mxu1 %vm399_vm0, %v3858_v26  ;;  %431 = vst.msk [vmem:[#allocation2 + $0x71] sm:$0x1] %vm408_vm2, %v3552_v6 }
  0x48   : > { %3248 = vmatmul.msk.f32.gmra.mxu2 %vm399_vm0, %v3868_v29  ;;  %432 = vst.msk [vmem:[#allocation2 + $0x89] sm:$0x1] %vm408_vm2, %v3552_v6 }
  0x49   : > { %3256 = vmatmul.msk.f32.gmra.mxu3 %vm399_vm0, %v3872_v30  ;;  %433 = vst.msk [vmem:[#allocation2 + $0xa1] sm:$0x1] %vm408_vm2, %v3552_v6 }
  0x4a   : > { %3233 = vmatmul.msk.f32.gmra.mxu0 %vm399_vm0, %v3878_v31  ;;  %434 = vst.msk [vmem:[#allocation2 + $0xb9] sm:$0x1] %vm408_vm2, %v3552_v6  ;;  %v964_v48 = vld [vmem:[#allocation2 + $0xa] sm:$0xff] }
  0x4b   : > { %435 = vst.msk [vmem:[#allocation2 + $0xd1] sm:$0x1] %vm408_vm2, %v3552_v6  ;;  %v3982_v51 = vld [vmem:[#allocation2 + $0x22] sm:$0xff] }
  0x4c   : > { %436 = vst.msk [vmem:[#allocation2 + $0xe9] sm:$0x1] %vm408_vm2, %v3552_v6  ;;  %v4005_v55 = vld [vmem:[#allocation2 + $0x3a] sm:$0xff] }
  0x4d   : > { %437 = vst.msk [vmem:[#allocation2 + $0x101] sm:$0x1] %vm408_vm2, %v3552_v6 }
  0x4e   : > { %438 = vst.msk [vmem:[#allocation2 + $0x119] sm:$0x1] %vm408_vm2, %v3552_v6  ;;  %v4063_v9 = vld [vmem:[#allocation2 + $0x6a] sm:$0xff] }
  0x4f   : > { %3241 = vmatmul.msk.f32.gmra.mxu1 %vm399_vm0, %v3896_v32  ;;  %439 = vst.msk [vmem:[#allocation2 + $0x131] sm:$0x1] %vm408_vm2, %v3552_v6  ;;  %v4103_v28 = vld [vmem:[#allocation2 + $0x82] sm:$0xff] }
  0x50   : > { %3249 = vmatmul.msk.f32.gmra.mxu2 %vm399_vm0, %v3903_v34  ;;  %440 = vst.msk [vmem:[#allocation2 + $0x149] sm:$0x1] %vm408_vm2, %v3552_v6 }
  0x51   : > { %3257 = vmatmul.msk.f32.gmra.mxu3 %vm399_vm0, %v3908_v36  ;;  %441 = vst.msk [vmem:[#allocation2 + $0x161] sm:$0x1] %vm408_vm2, %v3552_v6 }
  0x52   : > { %442 = vst.msk [vmem:[#allocation2 + $0x179] sm:$0x1] %vm408_vm2, %v3552_v6 }
  0x53   : > { %443 = vst.msk [vmem:[#allocation2 + $0x191] sm:$0x1] %vm408_vm2, %v3552_v6 }
  0x54   : > { %444 = vst.msk [vmem:[#allocation2 + $0x1a9] sm:$0x1] %vm408_vm2, %v3552_v6  ;;  %v3971_v6 = vld [vmem:[#allocation2 + $0x1a] sm:$0xff] }
  0x55   : > { %451 = vst.msk [vmem:[#allocation2 + $0x51] sm:$0xff] %vm399_vm0, %v372_v7  ;;  %v4125_v7 = vld [vmem:[#allocation2 + $0xa8] sm:$0xff] }
  0x56   : > { %4978 = vst [vmem:[#allocation4_spill] sm:$0xff] %v4067_v11 }
  0x57   : > { %3242 = vmatmul.msk.f32.gmra.mxu1 %vm399_vm0, %v3929_v39  ;;  %4980 = vst [vmem:[#allocation6_spill] sm:$0xff] %v4083_v14 }
  0x58   : > { %3250 = vmatmul.msk.f32.gmra.mxu2 %vm399_vm0, %v3934_v5  ;;  %4983 = vst [vmem:[#allocation9_spill] sm:$0xff] %v4103_v28 }
  0x59   : > { %3258 = vmatmul.msk.f32.gmra.mxu3 %vm399_vm0, %v3938_v41  ;;  %4986 = vst [vmem:[#allocation12_spill] sm:$0xff] %v4123_v40 }
  0x5a   : > { %4987 = vst [vmem:[#allocation13_spill] sm:$0xff] %v4125_v7 }
  0x5c   : > { %v3962_v46 = vld [vmem:[#allocation2 + $0x51] sm:$0xff] }
  0x5d   : > { %3234 = vmatmul.msk.f32.gmra.mxu0 %vm399_vm0, %v3962_v46  ;;  %v4007_v56 = vld [vmem:[#allocation2 + $0x50] sm:$0xff] }
  0x5e   : > { %v4017_v57 = vld [vmem:[#allocation2 + $0x4a] sm:$0xff]  ;;  %v4029_v59 = vld [vmem:[#allocation2 + $0x52] sm:$0xff] }
  0x5f   : > { %3259 = vmatmul.msk.f32.vlgmr.msrb.gmra.mxu1 %vm399_vm0, %v478_v42 }
  0x60   : > { %3292 = vmatmul.msk.f32.vlgmr.msrb.gmra.mxu2 %vm399_vm0, %v963_v44 }
  0x61   : > { %3325 = vmatmul.msk.f32.vlgmr.msrb.gmra.mxu3 %vm399_vm0, %v1238_v45 }
  0x65   : > { %3358 = vmatmul.msk.f32.vlgmr.msrb.gmra.mxu0 %vm399_vm0, %v3756_v52  ;;  %v3993_v52 = vld [vmem:[#allocation2 + $0x32] sm:$0xff] }
  0x67   : > { %3260 = vmatmul.msk.f32.gmra.mxu1 %vm399_vm0, %v479_v47  ;;  %v4143_v47 = vld [vmem:[#allocation2 + $0x9a] sm:$0xff] }
  0x68   : > { %3293 = vmatmul.msk.f32.gmra.mxu2 %vm399_vm0, %v964_v48  ;;  %4989 = vst [vmem:[#allocation15_spill] sm:$0xff] %v4143_v47  ;;  %v4145_v48 = vld [vmem:[#allocation2 + $0xb0] sm:$0xff] }
  0x69   : > { %3326 = vmatmul.msk.f32.gmra.mxu3 %vm399_vm0, %v1239_v49  ;;  %4990 = vst [vmem:[#allocation16_spill] sm:$0xff] %v4145_v48 }
  0x6d   : > { %3359 = vmatmul.msk.f32.gmra.mxu0 %vm399_vm0, %v3786_v12 }
  0x6f   : > { %3261 = vmatmul.msk.f32.gmra.mxu1 %vm399_vm0, %v1238_v45 }
  0x70   : > { %3294 = vmatmul.msk.f32.gmra.mxu2 %vm399_vm0, %v3971_v6 }
  0x71   : > { %3327 = vmatmul.msk.f32.gmra.mxu3 %vm399_vm0, %v3973_v50 }
  0x75   : > { %3360 = vmatmul.msk.f32.gmra.mxu0 %vm399_vm0, %v3807_v20  ;;  %v4085_v20 = vld [vmem:[#allocation2 + $0x90] sm:$0xff] }
  0x76   : > { %4981 = vst [vmem:[#allocation7_spill] sm:$0xff] %v4085_v20 }
  0x77   : > { %3262 = vmatmul.msk.f32.gmra.mxu1 %vm399_vm0, %v1239_v49 }
  0x78   : > { %3295 = vmatmul.msk.f32.gmra.mxu2 %vm399_vm0, %v3982_v51 }
  0x79   : > { %3328 = vmatmul.msk.f32.gmra.mxu3 %vm399_vm0, %v3984_v53 }
  0x7d   : > { %3361 = vmatmul.msk.f32.gmra.mxu0 %vm399_vm0, %v3837_v24 }
  0x7f   : > { %3263 = vmatmul.msk.f32.gmra.mxu1 %vm399_vm0, %v3973_v50 }
  0x80   : > { %3296 = vmatmul.msk.f32.gmra.mxu2 %vm399_vm0, %v3993_v52 }
  0x81   : > { %3329 = vmatmul.msk.f32.gmra.mxu3 %vm399_vm0, %v3995_v54 }
  0x85   : > { %3362 = vmatmul.msk.f32.gmra.mxu0 %vm399_vm0, %v3878_v31  ;;  %v4105_v31 = vld [vmem:[#allocation2 + $0x98] sm:$0xff] }
  0x86   : > { %4984 = vst [vmem:[#allocation10_spill] sm:$0xff] %v4105_v31 }
  0x87   : > { %3264 = vmatmul.msk.f32.gmra.mxu1 %vm399_vm0, %v3984_v53 }
  0x88   : > { %3297 = vmatmul.msk.f32.gmra.mxu2 %vm399_vm0, %v4005_v55 }
  0x89   : > { %3330 = vmatmul.msk.f32.gmra.mxu3 %vm399_vm0, %v4007_v56 }
  0x8d   : > { %3363 = vmatmul.msk.f32.gmra.mxu0 %vm399_vm0, %v3962_v46 }
  0x8f   : > { %3265 = vmatmul.msk.f32.gmra.mxu1 %vm399_vm0, %v3995_v54 }
  0x90   : > { %3298 = vmatmul.msk.f32.gmra.mxu2 %vm399_vm0, %v4017_v57 }
  0x91   : > { %3331 = vmatmul.msk.f32.gmra.mxu3 %vm399_vm0, %v4019_v58 }
  0x93   : > { %v4039_v61 = vpop.f32.mrf.mxu0 }
  0x95   : > { %3364 = vmatmul.msk.f32.gmra.mxu0 %vm399_vm0, %v3706_v15 }
  0x97   : > { %3266 = vmatmul.msk.f32.gmra.mxu1 %vm399_vm0, %v4007_v56 }
  0x98   : > { %3299 = vmatmul.msk.f32.gmra.mxu2 %vm399_vm0, %v4029_v59 }
  0x99   : > { %3332 = vmatmul.msk.f32.gmra.mxu3 %vm399_vm0, %v4031_v60 }
  0x9b   : > { %v4065_v10 = vpop.f32.mrf.mxu0 }
  0x9c   : > { %v4043_v63 = vpop.f32.mrf.mxu1 }
  0x9d   : > { %3365 = vmatmul.msk.f32.gmra.mxu0 %vm399_vm0, %v3736_v38 }
  0x9f   : > { %3267 = vmatmul.msk.f32.gmra.mxu1 %vm399_vm0, %v4019_v58 }
  0xa0   : > { %3300 = vmatmul.msk.f32.gmra.mxu2 %vm399_vm0, %v4045_v0 }
  0xa1   : > { %3333 = vmatmul.msk.f32.gmra.mxu3 %vm399_vm0, %v4047_v1 }
  0xa3   : > { %v4055_v2 = vpop.f32.mrf.mxu2 }
  0xa4   : > { %v4059_v15 = vpop.f32.mrf.mxu1  ;;  %v4061_v8 = vpop.f32.mrf.mxu3 }
  0xa5   : > { %4977 = vst [vmem:[#allocation3_spill] sm:$0xff] %v4061_v8  ;;  %3366 = vmatmul.msk.f32.gmra.mxu0 %vm399_vm0, %v3769_v62  ;;  %v4201_v8 = vld [vmem:[#allocation2 + $0xd8] sm:$0xff] }
  0xa7   : > { %3268 = vmatmul.msk.f32.gmra.mxu1 %vm399_vm0, %v4031_v60  ;;  %v4089_v24 = vpop.f32.mrf.mxu0 }
  0xa8   : > { %3301 = vmatmul.msk.f32.gmra.mxu2 %vm399_vm0, %v4063_v9 }
  0xa9   : > { %3334 = vmatmul.msk.f32.gmra.mxu3 %vm399_vm0, %v4067_v11 }
  0xab   : > { %v4075_v38 = vpop.f32.mrf.mxu2 }
  0xac   : > { %v4079_v12 = vpop.f32.mrf.mxu1  ;;  %v4081_v13 = vpop.f32.mrf.mxu3 }
  0xad   : > { %4979 = vst [vmem:[#allocation5_spill] sm:$0xff] %v4081_v13  ;;  %3367 = vmatmul.msk.f32.gmra.mxu0 %vm399_vm0, %v3799_v16  ;;  %v4181_v13 = vld [vmem:[#allocation2 + $0xb2] sm:$0xff] }
  0xae   : > { %4995 = vst [vmem:[#allocation21_spill] sm:$0xff] %v4181_v13 }
  0xaf   : > { %3269 = vmatmul.msk.f32.gmra.mxu1 %vm399_vm0, %v4047_v1  ;;  %v4113_v33 = vpop.f32.mrf.mxu0 }
  0xb0   : > { %3302 = vmatmul.msk.f32.gmra.mxu2 %vm399_vm0, %v4083_v14 }
  0xb1   : > { %3335 = vmatmul.msk.f32.gmra.mxu3 %vm399_vm0, %v4085_v20 }
  0xb3   : > { %v4095_v62 = vpop.f32.mrf.mxu2 }
  0xb4   : > { %v4099_v25 = vpop.f32.mrf.mxu1  ;;  %v4101_v27 = vpop.f32.mrf.mxu3 }
  0xb5   : > { %4982 = vst [vmem:[#allocation8_spill] sm:$0xff] %v4101_v27  ;;  %3368 = vmatmul.msk.f32.gmra.mxu0 %vm399_vm0, %v3823_v21  ;;  %v4163_v27 = vld [vmem:[#allocation2 + $0xaa] sm:$0xff] }
  0xb6   : > { %4992 = vst [vmem:[#allocation18_spill] sm:$0xff] %v4163_v27 }
  0xb7   : > { %3270 = vmatmul.msk.f32.gmra.mxu1 %vm399_vm0, %v4067_v11  ;;  %v4135_v21 = vpop.f32.mrf.mxu0  ;;  %v4218_v11 = vld [vmem:[#allocation2 + $0xe0] sm:$0xff] }
  0xb8   : > { %3303 = vmatmul.msk.f32.gmra.mxu2 %vm399_vm0, %v4103_v28  ;;  %v4199_v28 = vld [vmem:[#allocation2 + $0xc2] sm:$0xff] }
  0xb9   : > { %3336 = vmatmul.msk.f32.gmra.mxu3 %vm399_vm0, %v4105_v31  ;;  %4998 = vst [vmem:[#allocation24_spill] sm:$0xff] %v4199_v28 }
  0xbb   : > { %v4115_v16 = vpop.f32.mrf.mxu2 }
  0xbc   : > { %v4119_v35 = vpop.f32.mrf.mxu1  ;;  %v4121_v37 = vpop.f32.mrf.mxu3 }
  0xbd   : > { %4985 = vst [vmem:[#allocation11_spill] sm:$0xff] %v4121_v37  ;;  %3369 = vmatmul.msk.f32.gmra.mxu0 %vm399_vm0, %v3858_v26 }
  0xbf   : > { %3271 = vmatmul.msk.f32.gmra.mxu1 %vm399_vm0, %v4085_v20  ;;  %v4161_v37 = vpop.f32.mrf.mxu0 }
  0xc0   : > { %3304 = vmatmul.msk.f32.gmra.mxu2 %vm399_vm0, %v4123_v40  ;;  %v4165_v40 = vld [vmem:[#allocation2 + $0xc0] sm:$0xff] }
  0xc1   : > { %3337 = vmatmul.msk.f32.gmra.mxu3 %vm399_vm0, %v4125_v7  ;;  %4993 = vst [vmem:[#allocation19_spill] sm:$0xff] %v4165_v40 }
  0xc3   : > { %v4133_v42 = vpop.f32.mrf.mxu2 }
  0xc4   : > { %v4139_v44 = vpop.f32.mrf.mxu1  ;;  %v4141_v45 = vpop.f32.mrf.mxu3 }
  0xc5   : > { %4988 = vst [vmem:[#allocation14_spill] sm:$0xff] %v4141_v45  ;;  %3370 = vmatmul.msk.f32.gmra.mxu0 %vm399_vm0, %v3896_v32 }
  0xc7   : > { %3272 = vmatmul.msk.f32.gmra.mxu1 %vm399_vm0, %v4105_v31  ;;  %v4183_v31 = vld [vmem:[#allocation2 + $0xc8] sm:$0xff] }
  0xc8   : > { %3305 = vmatmul.msk.f32.gmra.mxu2 %vm399_vm0, %v4143_v47 }
  0xc9   : > { %3338 = vmatmul.msk.f32.gmra.mxu3 %vm399_vm0, %v4145_v48 }
  0xcb   : > { %v4153_v49 = vpop.f32.mrf.mxu2 }
  0xcc   : > { %v4157_v26 = vpop.f32.mrf.mxu1  ;;  %v4159_v45 = vpop.f32.mrf.mxu3 }
  0xcd   : > { %4991 = vst [vmem:[#allocation17_spill] sm:$0xff] %v4159_v45  ;;  %3371 = vmatmul.msk.f32.gmra.mxu0 %vm399_vm0, %v3929_v39 }
  0xcf   : > { %3273 = vmatmul.msk.f32.gmra.mxu1 %vm399_vm0, %v4125_v7  ;;  %v4185_v7 = vpop.f32.mrf.mxu0 }
  0xd0   : > { %3306 = vmatmul.msk.f32.gmra.mxu2 %vm399_vm0, %v4163_v27 }
  0xd1   : > { %3339 = vmatmul.msk.f32.gmra.mxu3 %vm399_vm0, %v4165_v40 }
  0xd3   : > { %v4173_v32 = vpop.f32.mrf.mxu2 }
  0xd4   : > { %v4177_v45 = vpop.f32.mrf.mxu1  ;;  %v4179_v47 = vpop.f32.mrf.mxu3 }
  0xd5   : > { %4994 = vst [vmem:[#allocation20_spill] sm:$0xff] %v4179_v47  ;;  %3372 = vmatmul.msk.f32.gmra.mxu0 %vm399_vm0, %v3714_v19 }
  0xd7   : > { %3274 = vmatmul.msk.f32.gmra.mxu1 %vm399_vm0, %v4145_v48 }
  0xd8   : > { %3307 = vmatmul.msk.f32.gmra.mxu2 %vm399_vm0, %v4181_v13 }
  0xd9   : > { %3340 = vmatmul.msk.f32.gmra.mxu3 %vm399_vm0, %v4183_v31 }
  0xda   : > { %v4207_v13 = vpop.f32.mrf.mxu0 }
  0xdb   : > { %v4193_v39 = vpop.f32.mrf.mxu2 }
  0xdc   : > { %4996 = vst [vmem:[#allocation22_spill] sm:$0xff] %v4193_v39  ;;  %v4197_v47 = vpop.f32.mrf.mxu3  ;;  %v867_v27 = vpop.f32.mrf.mxu1  ;;  %v4214_v39 = vld [vmem:[#allocation2 + $0xca] sm:$0xff] }
  0xdd   : > { %4997 = vst [vmem:[#allocation23_spill] sm:$0xff] %v4197_v47  ;;  %v868_v19 = vadd.f32 %v867_v27, %v4039_v61  ;;  %3373 = vmatmul.msk.f32.gmra.mxu0 %vm399_vm0, %v3742_v43 }
  0xdf   : > { %3275 = vmatmul.msk.f32.gmra.mxu1 %vm399_vm0, %v4165_v40 }
  0xe0   : > { %3308 = vmatmul.msk.f32.gmra.mxu2 %vm399_vm0, %v4199_v28  ;;  %v4235_v28 = vld [vmem:[#allocation2 + $0xf0] sm:$0xff] }
  0xe1   : > { %3341 = vmatmul.msk.f32.gmra.mxu3 %vm399_vm0, %v4201_v8 }
  0xe2   : > { %v4224_v61 = vpop.f32.mrf.mxu0 }
  0xe3   : > { %v1110_v48 = vpop.f32.mrf.mxu2  ;;  %5000 = vst [vmem:[#allocation26_spill] sm:$0xff] %v4224_v61  ;;  %v4252_v61 = vld [vmem:[#allocation2 + $0xf8] sm:$0xff] }
  0xe4   : > { %v1206_v47 = vadd.f32 %v1110_v48, %v868_v19  ;;  %v870_v20 = vpop.f32.mrf.mxu1  ;;  %v1385_v14 = vpop.f32.mrf.mxu3  ;;  %v4231_v19 = vld [vmem:[#allocation2 + $0xda] sm:$0xff] }
  0xe5   : > { %v871_v43 = vadd.f32 %v870_v20, %v4065_v10  ;;  %3374 = vmatmul.msk.f32.gmra.mxu0 %vm399_vm0, %v3776_v3 }
  0xe6   : > { %v4216_v40 = vadd.f32 %v1385_v14, %v1206_v47 }
  0xe7   : > { %3276 = vmatmul.msk.f32.gmra.mxu1 %vm399_vm0, %v4183_v31 }
  0xe8   : > { %4999 = vst [vmem:[#allocation25_spill] sm:$0xff] %v4216_v40  ;;  %3309 = vmatmul.msk.f32.gmra.mxu2 %vm399_vm0, %v4214_v39 }
  0xe9   : > { %3342 = vmatmul.msk.f32.gmra.mxu3 %vm399_vm0, %v4218_v11 }
  0xea   : > { %v4241_v10 = vpop.f32.mrf.mxu0 }
  0xeb   : > { %v1113_v27 = vpop.f32.mrf.mxu2  ;;  %5002 = vst [vmem:[#allocation28_spill] sm:$0xff] %v4241_v10  ;;  %v4269_v10 = vld [vmem:[#allocation2 + $0x108] sm:$0xff] }
  0xec   : > { %v1207_v14 = vadd.f32 %v1113_v27, %v871_v43  ;;  %v873_v47 = vpop.f32.mrf.mxu1  ;;  %v1388_v48 = vpop.f32.mrf.mxu3 }
  0xed   : > { %v874_v3 = vadd.f32 %v873_v47, %v4089_v24  ;;  %3375 = vmatmul.msk.f32.gmra.mxu0 %vm399_vm0, %v3801_v17 }
  0xee   : > { %v4233_v40 = vadd.f32 %v1388_v48, %v1207_v14  ;;  %v4248_v48 = vld [vmem:[#allocation2 + $0xe2] sm:$0xff] }
  0xef   : > { %3277 = vmatmul.msk.f32.gmra.mxu1 %vm399_vm0, %v4201_v8 }
  0xf0   : > { %5001 = vst [vmem:[#allocation27_spill] sm:$0xff] %v4233_v40  ;;  %3310 = vmatmul.msk.f32.gmra.mxu2 %vm399_vm0, %v4231_v19 }
  0xf1   : > { %3343 = vmatmul.msk.f32.gmra.mxu3 %vm399_vm0, %v4235_v28 }
  0xf2   : > { %v4258_v24 = vpop.f32.mrf.mxu0 }
  0xf3   : > { %v1116_v20 = vpop.f32.mrf.mxu2  ;;  %5004 = vst [vmem:[#allocation30_spill] sm:$0xff] %v4258_v24  ;;  %v4286_v24 = vld [vmem:[#allocation2 + $0x110] sm:$0xff] }
  0xf4   : > { %v1208_v43 = vadd.f32 %v1116_v20, %v874_v3  ;;  %v876_v27 = vpop.f32.mrf.mxu1  ;;  %v1391_v14 = vpop.f32.mrf.mxu3  ;;  %5008 = vst [vmem:[#allocation34_spill] sm:$0xff] %v4286_v24 }
  0xf5   : > { %v877_v17 = vadd.f32 %v876_v27, %v4113_v33  ;;  %3376 = vmatmul.msk.f32.gmra.mxu0 %vm399_vm0, %v3827_v22 }
  0xf6   : > { %v4250_v40 = vadd.f32 %v1391_v14, %v1208_v43  ;;  %v4265_v14 = vld [vmem:[#allocation2 + $0xf2] sm:$0xff] }
  0xf7   : > { %3278 = vmatmul.msk.f32.gmra.mxu1 %vm399_vm0, %v4218_v11 }
  0xf8   : > { %5003 = vst [vmem:[#allocation29_spill] sm:$0xff] %v4250_v40  ;;  %3311 = vmatmul.msk.f32.gmra.mxu2 %vm399_vm0, %v4248_v48 }
  0xf9   : > { %3344 = vmatmul.msk.f32.gmra.mxu3 %vm399_vm0, %v4252_v61 }
  0xfa   : > { %v4275_v33 = vpop.f32.mrf.mxu0 }
  0xfb   : > { %v1119_v47 = vpop.f32.mrf.mxu2  ;;  %5006 = vst [vmem:[#allocation32_spill] sm:$0xff] %v4275_v33  ;;  %v1260_v33 = vld [vmem:[#allocation2 + $0x120] sm:$0xff] }
  0xfc   : > { %v1209_v3 = vadd.f32 %v1119_v47, %v877_v17  ;;  %v879_v20 = vpop.f32.mrf.mxu1  ;;  %v1394_v43 = vpop.f32.mrf.mxu3 }
  0xfd   : > { %v880_v22 = vadd.f32 %v879_v20, %v4135_v21  ;;  %3377 = vmatmul.msk.f32.gmra.mxu0 %vm399_vm0, %v3868_v29 }
  0xfe   : > { %v4267_v40 = vadd.f32 %v1394_v43, %v1209_v3  ;;  %v4282_v43 = vld [vmem:[#allocation2 + $0xfa] sm:$0xff] }
  0xff   : > { %3279 = vmatmul.msk.f32.gmra.mxu1 %vm399_vm0, %v4235_v28 }
 0x100   : > { %5005 = vst [vmem:[#allocation31_spill] sm:$0xff] %v4267_v40  ;;  %3312 = vmatmul.msk.f32.gmra.mxu2 %vm399_vm0, %v4265_v14 }
 0x101   : > { %3345 = vmatmul.msk.f32.gmra.mxu3 %vm399_vm0, %v4269_v10 }
 0x102   : > { %v4292_v21 = vpop.f32.mrf.mxu0 }
 0x103   : > { %v1122_v27 = vpop.f32.mrf.mxu2  ;;  %5009 = vst [vmem:[#allocation35_spill] sm:$0xff] %v4292_v21 }
 0x104   : > { %v1210_v17 = vadd.f32 %v1122_v27, %v880_v22  ;;  %v882_v47 = vpop.f32.mrf.mxu1  ;;  %v1397_v3 = vpop.f32.mrf.mxu3 }
 0x105   : > { %v883_v29 = vadd.f32 %v882_v47, %v4161_v37  ;;  %3378 = vmatmul.msk.f32.gmra.mxu0 %vm399_vm0, %v3903_v34 }
 0x106   : > { %v4284_v40 = vadd.f32 %v1397_v3, %v1210_v17  ;;  %v4299_v3 = vld [vmem:[#allocation2 + $0x10a] sm:$0xff] }
 0x107   : > { %3280 = vmatmul.msk.f32.gmra.mxu1 %vm399_vm0, %v4252_v61  ;;  %5010 = vst [vmem:[#allocation36_spill] sm:$0xff] %v4299_v3 }
 0x108   : > { %5007 = vst [vmem:[#allocation33_spill] sm:$0xff] %v4284_v40  ;;  %3313 = vmatmul.msk.f32.gmra.mxu2 %vm399_vm0, %v4282_v43 }
 0x109   : > { %3346 = vmatmul.msk.f32.gmra.mxu3 %vm399_vm0, %v4286_v24 }
 0x10a   : > { %v4307_v21 = vpop.f32.mrf.mxu0 }
 0x10b   : > { %v1125_v20 = vpop.f32.mrf.mxu2  ;;  %5012 = vst [vmem:[#allocation38_spill] sm:$0xff] %v4307_v21 }
 0x10c   : > { %v1211_v22 = vadd.f32 %v1125_v20, %v883_v29  ;;  %v885_v27 = vpop.f32.mrf.mxu1  ;;  %v1400_v17 = vpop.f32.mrf.mxu3 }
 0x10d   : > { %v886_v34 = vadd.f32 %v885_v27, %v4185_v7  ;;  %3379 = vmatmul.msk.f32.gmra.mxu0 %vm399_vm0, %v3934_v5  ;;  %v4324_v7 = vld [vmem:[#allocation2 + $0x121] sm:$0xff] }
 0x10e   : > { %v4301_v40 = vadd.f32 %v1400_v17, %v1211_v22  ;;  %v4313_v22 = vld [vmem:[#allocation2 + $0x112] sm:$0xff]  ;;  %5016 = vst [vmem:[#allocation42_spill] sm:$0xff] %v4324_v7 }
 0x10f   : > { %3281 = vmatmul.msk.f32.gmra.mxu1 %vm399_vm0, %v4269_v10  ;;  %5013 = vst [vmem:[#allocation39_spill] sm:$0xff] %v4313_v22 }
 0x110   : > { %5011 = vst [vmem:[#allocation37_spill] sm:$0xff] %v4301_v40  ;;  %3314 = vmatmul.msk.f32.gmra.mxu2 %vm399_vm0, %v4299_v3  ;;  %v1261_v40 = vld [vmem:[#allocation2 + $0x128] sm:$0xff] }
 0x111   : > { %3347 = vmatmul.msk.f32.gmra.mxu3 %vm399_vm0, %v1260_v33 }
 0x112   : > { %v4321_v21 = vpop.f32.mrf.mxu0 }
 0x113   : > { %v1128_v37 = vpop.f32.mrf.mxu2  ;;  %5015 = vst [vmem:[#allocation41_spill] sm:$0xff] %v4321_v21 }
 0x114   : > { %v1212_v47 = vadd.f32 %v1128_v37, %v886_v34  ;;  %v888_v29 = vpop.f32.mrf.mxu1  ;;  %v1403_v20 = vpop.f32.mrf.mxu3 }
 0x115   : > { %v889_v5 = vadd.f32 %v888_v29, %v4207_v13  ;;  %3380 = vmatmul.msk.f32.gmra.mxu0 %vm399_vm0, %v4324_v7  ;;  %v4336_v13 = vld [vmem:[#allocation2 + $0x129] sm:$0xff] }
 0x116   : > { %v4315_v17 = vadd.f32 %v1403_v20, %v1212_v47  ;;  %v987_v20 = vld [vmem:[#allocation2 + $0x122] sm:$0xff]  ;;  %5019 = vst [vmem:[#allocation45_spill] sm:$0xff] %v4336_v13  ;;  %v295_v7 = vld [vmem:[%s3628_s14 + $0xf0] sm:$0xff] }
 0x117   : > { %3282 = vmatmul.msk.f32.gmra.mxu1 %vm399_vm0, %v4286_v24 }
 0x118   : > { %5014 = vst [vmem:[#allocation40_spill] sm:$0xff] %v4315_v17  ;;  %3315 = vmatmul.msk.f32.gmra.mxu2 %vm399_vm0, %v4313_v22  ;;  %v1262_v22 = vld [vmem:[#allocation2 + $0x138] sm:$0xff] }
 0x119   : > { %3348 = vmatmul.msk.f32.gmra.mxu3 %vm399_vm0, %v1261_v40 }
 0x11a   : > { %v4333_v21 = vpop.f32.mrf.mxu0 }
 0x11b   : > { %v1131_v27 = vpop.f32.mrf.mxu2  ;;  %5018 = vst [vmem:[#allocation44_spill] sm:$0xff] %v4333_v21  ;;  %v3541_v21 = vld [vmem:[%s4946_s1] ss:$0 sm:$0xff] }
 0x11c   : > { %v1213_v34 = vadd.f32 %v1131_v27, %v889_v5  ;;  %v891_v37 = vpop.f32.mrf.mxu1  ;;  %v1406_v47 = vpop.f32.mrf.mxu3  ;;  %v330_v3 = vmul.f32 %v3541_v21, %v295_v7 }
 0x11d   : > { %v892_v29 = vadd.f32 %v891_v37, %v4043_v63  ;;  %3381 = vmatmul.msk.f32.gmra.mxu0 %vm399_vm0, %v4336_v13  ;;  %v3542_v63 = vld [vmem:[%s4947_s2] ss:$0 sm:$0xff]  ;;  %v296_v13 = vld [vmem:[%s3628_s14 + $0xf8] sm:$0xff]  ;;  %s3225_s14 = sshll.u32 %s5076_s22, 1 }
 0x11e   : > { %v4329_v17 = vadd.f32 %v1406_v47, %v1213_v34  ;;  %v365_v37 = vadd.f32 %v3542_v63, %v330_v3  ;;  %v1264_v3 = vld [vmem:[#allocation2 + $0x150] sm:$0xff]  ;;  %s262_s17 = scalar_lea.vmem %s4951_s6, %s3225_s14 }
 0x11f   : > { %3283 = vmatmul.msk.f32.gmra.mxu1 %vm399_vm0, %v1260_v33 }
 0x120   : > { %5017 = vst [vmem:[#allocation43_spill] sm:$0xff] %v4329_v17  ;;  %3316 = vmatmul.msk.f32.gmra.mxu2 %vm399_vm0, %v987_v20  ;;  %v988_v17 = vld [vmem:[#allocation2 + $0x12a] sm:$0xff]  ;;  %v1263_v20 = vld [vmem:[#allocation2 + $0x140] sm:$0xff] }
 0x121   : > { %3349 = vmatmul.msk.f32.gmra.mxu3 %vm399_vm0, %v1262_v22 }
 0x123   : > { %v1134_v5 = vpop.f32.mrf.mxu2 }
 0x124   : > { %v1214_v27 = vadd.f32 %v1134_v5, %v892_v29  ;;  %v894_v34 = vpop.f32.mrf.mxu1  ;;  %v1409_v47 = vpop.f32.mrf.mxu3 }
 0x125   : > { %v4352_v29 = vpop.f32.mrf.mxu0  ;;  %v895_v5 = vadd.f32 %v894_v34, %v4059_v15  ;;  %3382 = vmatmul.msk.f32.gmra.mxu0 %vm399_vm0, %v3779_v4 }
 0x126   : > { %v4342_v33 = vadd.f32 %v1409_v47, %v1214_v27  ;;  %5021 = vst [vmem:[#allocation47_spill] sm:$0xff] %v4352_v29  ;;  %v397_v27 = vmax.f32 %v365_v37, 0.0  ;;  %v331_v29 = vmul.f32 %v3541_v21, %v296_v13  ;;  %v990_v21 = vld [vmem:[#allocation2 + $0x142] sm:$0xff]  ;;  %v1265_v13 = vld [vmem:[#allocation2 + $0x158] sm:$0xff] }
 0x127   : > { %3284 = vmatmul.msk.f32.gmra.mxu1 %vm399_vm0, %v1261_v40 }
 0x128   : > { %5020 = vst [vmem:[#allocation46_spill] sm:$0xff] %v4342_v33  ;;  %3317 = vmatmul.msk.f32.gmra.mxu2 %vm399_vm0, %v988_v17  ;;  %v989_v17 = vld [vmem:[#allocation2 + $0x13a] sm:$0xff]  ;;  %v366_v15 = vadd.f32 %v3542_v63, %v331_v29 }
 0x129   : > { %3350 = vmatmul.msk.f32.gmra.mxu3 %vm399_vm0, %v1263_v20  ;;  %476 = vst.msk [vmem:[#allocation2 + $0x181] sm:$0xff] %vm399_vm0, %v397_v27 }
 0x12a   : > { %v398_v37 = vmax.f32 %v366_v15, 0.0 }
 0x12b   : > { %v1137_v47 = vpop.f32.mrf.mxu2 }
 0x12c   : > { %v1215_v7 = vadd.f32 %v1137_v47, %v895_v5  ;;  %v897_v40 = vpop.f32.mrf.mxu1  ;;  %v1412_v33 = vpop.f32.mrf.mxu3  ;;  %477 = vst.msk [vmem:[#allocation2 + $0x189] sm:$0xff] %vm399_vm0, %v398_v37 }
 0x12d   : > { %v4364_v34 = vpop.f32.mrf.mxu0  ;;  %v898_v4 = vadd.f32 %v897_v40, %v4079_v12  ;;  %3383 = vmatmul.msk.f32.gmra.mxu0 %vm399_vm0, %v3803_v18 }
 0x12e   : > { %v4360_v24 = vadd.f32 %v1412_v33, %v1215_v7 }
 0x12f   : > { %3285 = vmatmul.msk.f32.gmra.mxu1 %vm399_vm0, %v1262_v22 }
 0x130   : > { %3318 = vmatmul.msk.f32.gmra.mxu2 %vm399_vm0, %v989_v17  ;;  %v991_v17 = vld [vmem:[#allocation2 + $0x152] sm:$0xff] }
 0x131   : > { %3351 = vmatmul.msk.f32.gmra.mxu3 %vm399_vm0, %v1264_v3 }
 0x133   : > { %v1140_v5 = vpop.f32.mrf.mxu2 }
 0x134   : > { %v1216_v33 = vadd.f32 %v1140_v5, %v898_v4  ;;  %v900_v27 = vpop.f32.mrf.mxu1  ;;  %v1415_v47 = vpop.f32.mrf.mxu3  ;;  %v1266_v4 = vld [vmem:[#allocation2 + $0x168] sm:$0xff] }
 0x135   : > { %v4375_v63 = vpop.f32.mrf.mxu0  ;;  %v901_v12 = vadd.f32 %v900_v27, %v4099_v25  ;;  %3384 = vmatmul.msk.f32.gmra.mxu0 %vm399_vm0, %v3831_v23  ;;  %v992_v27 = vld [vmem:[#allocation2 + $0x15a] sm:$0xff] }
 0x136   : > { %v4371_v22 = vadd.f32 %v1415_v47, %v1216_v33 }
 0x137   : > { %3286 = vmatmul.msk.f32.gmra.mxu1 %vm399_vm0, %v1263_v20 }
 0x138   : > { %3319 = vmatmul.msk.f32.gmra.mxu2 %vm399_vm0, %v990_v21  ;;  %v1267_v21 = vld [vmem:[#allocation2 + $0x170] sm:$0xff] }
 0x139   : > { %3352 = vmatmul.msk.f32.gmra.mxu3 %vm399_vm0, %v1265_v13 }
 0x13b   : > { %v1143_v18 = vpop.f32.mrf.mxu2 }
 0x13c   : > { %v1217_v29 = vadd.f32 %v1143_v18, %v901_v12  ;;  %v903_v7 = vpop.f32.mrf.mxu1  ;;  %v1418_v40 = vpop.f32.mrf.mxu3 }
 0x13d   : > { %v4385_v20 = vpop.f32.mrf.mxu0  ;;  %v904_v25 = vadd.f32 %v903_v7, %v4119_v35  ;;  %3385 = vmatmul.msk.f32.gmra.mxu0 %vm399_vm0, %v3872_v30  ;;  %v993_v7 = vld [vmem:[#allocation2 + $0x16a] sm:$0xff] }
 0x13e   : > { %v4381_v15 = vadd.f32 %v1418_v40, %v1217_v29 }
 0x13f   : > { %3287 = vmatmul.msk.f32.gmra.mxu1 %vm399_vm0, %v1264_v3 }
 0x140   : > { %3320 = vmatmul.msk.f32.gmra.mxu2 %vm399_vm0, %v991_v17  ;;  %v1268_v17 = vld [vmem:[#allocation2 + $0x180] sm:$0xff] }
 0x141   : > { %3353 = vmatmul.msk.f32.gmra.mxu3 %vm399_vm0, %v1266_v4 }
 0x143   : > { %v1146_v37 = vpop.f32.mrf.mxu2 }
 0x144   : > { %v1218_v23 = vadd.f32 %v1146_v37, %v904_v25  ;;  %v906_v5 = vpop.f32.mrf.mxu1  ;;  %v1421_v33 = vpop.f32.mrf.mxu3 }
 0x145   : > { %v4395_v3 = vpop.f32.mrf.mxu0  ;;  %v907_v35 = vadd.f32 %v906_v5, %v4139_v44  ;;  %3386 = vmatmul.msk.f32.gmra.mxu0 %vm399_vm0, %v3908_v36  ;;  %v994_v5 = vld [vmem:[#allocation2 + $0x172] sm:$0xff] }
 0x146   : > { %v4391_v47 = vadd.f32 %v1421_v33, %v1218_v23 }
 0x147   : > { %3288 = vmatmul.msk.f32.gmra.mxu1 %vm399_vm0, %v1265_v13 }
 0x148   : > { %3321 = vmatmul.msk.f32.gmra.mxu2 %vm399_vm0, %v992_v27  ;;  %v1269_v27 = vld [vmem:[#allocation2 + $0x188] sm:$0xff] }
 0x149   : > { %3354 = vmatmul.msk.f32.gmra.mxu3 %vm399_vm0, %v1267_v21 }
 0x14b   : > { %v1149_v12 = vpop.f32.mrf.mxu2 }
 0x14c   : > { %v1219_v30 = vadd.f32 %v1149_v12, %v907_v35  ;;  %v909_v18 = vpop.f32.mrf.mxu1  ;;  %v1424_v29 = vpop.f32.mrf.mxu3 }
 0x14d   : > { %v4405_v13 = vpop.f32.mrf.mxu0  ;;  %v910_v44 = vadd.f32 %v909_v18, %v4157_v26  ;;  %3387 = vmatmul.msk.f32.gmra.mxu0 %vm399_vm0, %v3938_v41  ;;  %v1543_v26 = vld [vmem:[#allocation2 + $0x181] sm:$0xff] }
 0x14e   : > { %v4401_v40 = vadd.f32 %v1424_v29, %v1219_v30 }
 0x14f   : > { %3289 = vmatmul.msk.f32.gmra.mxu1 %vm399_vm0, %v1266_v4 }
 0x150   : > { %3322 = vmatmul.msk.f32.gmra.mxu2 %vm399_vm0, %v993_v7  ;;  %v2339_v7 = vld [vmem:[#allocation2 + $0x31] sm:$0xff] }
 0x151   : > { %3355 = vmatmul.msk.f32.gmra.mxu3 %vm399_vm0, %v1268_v17  ;;  %v1544_v17 = vld [vmem:[#allocation2 + $0x189] sm:$0xff] }
 0x153   : > { %v1152_v25 = vpop.f32.mrf.mxu2 }
 0x154   : > { %v1220_v36 = vadd.f32 %v1152_v25, %v910_v44  ;;  %v912_v37 = vpop.f32.mrf.mxu1  ;;  %v1427_v23 = vpop.f32.mrf.mxu3 }
 0x155   : > { %v4415_v4 = vpop.f32.mrf.mxu0  ;;  %v913_v35 = vadd.f32 %v912_v37, %v4177_v45  ;;  %3388 = vmatmul.msk.f32.gmra.mxu0 %vm399_vm0, %v1543_v26 }
 0x156   : > { %v4411_v33 = vadd.f32 %v1427_v23, %v1220_v36 }
 0x157   : > { %3290 = vmatmul.msk.f32.gmra.mxu1 %vm399_vm0, %v1267_v21 }
 0x158   : > { %3323 = vmatmul.msk.f32.gmra.mxu2 %vm399_vm0, %v994_v5  ;;  %v2340_v5 = vld [vmem:[#allocation2 + $0x39] sm:$0xff] }
 0x159   : > { %3356 = vmatmul.msk.f32.gmra.mxu3 %vm399_vm0, %v1269_v27 }
 0x15b   : > { %v1155_v12 = vpop.f32.mrf.mxu2 }
 0x15c   : > { %v1221_v41 = vadd.f32 %v1155_v12, %v913_v35  ;;  %v915_v30 = vpop.f32.mrf.mxu1  ;;  %v1430_v18 = vpop.f32.mrf.mxu3 }
 0x15d   : > { %v4426_v21 = vpop.f32.mrf.mxu0  ;;  %v916_v45 = vadd.f32 %v915_v30, %v4055_v2  ;;  %3389 = vmatmul.msk.f32.gmra.mxu0 %vm399_vm0, %v1544_v17 }
 0x15e   : > { %v4420_v29 = vadd.f32 %v1430_v18, %v1221_v41  ;;  %v2341_v41 = vld [vmem:[#allocation2 + $0x49] sm:$0xff] }
 0x15f   : > { %3391 = vmatmul.msk.f32.vlgmr.msra.gmra.mxu1 %vm399_vm0, %v3971_v6 }
 0x160   : > { %3424 = vmatmul.msk.f32.vlgmr.msra.gmra.mxu2 %vm399_vm0, %v3973_v50 }
 0x161   : > { %3457 = vmatmul.msk.f32.vlgmr.msra.gmra.mxu3 %vm399_vm0, %v2339_v7 }
 0x163   : > { %v1158_v44 = vpop.f32.mrf.mxu2 }
 0x164   : > { %v1222_v25 = vadd.f32 %v1158_v44, %v916_v45  ;;  %v918_v36 = vpop.f32.mrf.mxu1  ;;  %v1433_v37 = vpop.f32.mrf.mxu3 }
 0x165   : > { %v4437_v6 = vpop.f32.mrf.mxu0  ;;  %v919_v50 = vadd.f32 %v918_v36, %v4075_v38  ;;  %3490 = vmatmul.msk.f32.vlgmr.msra.gmra.mxu0 %vm399_vm0, %v3993_v52 }
 0x166   : > { %v4431_v23 = vadd.f32 %v1433_v37, %v1222_v25 }
 0x167   : > { %3392 = vmatmul.msk.f32.gmra.mxu1 %vm399_vm0, %v3982_v51 }
 0x168   : > { %3425 = vmatmul.msk.f32.gmra.mxu2 %vm399_vm0, %v3984_v53 }
 0x169   : > { %3458 = vmatmul.msk.f32.gmra.mxu3 %vm399_vm0, %v2340_v5 }
 0x16b   : > { %v1161_v2 = vpop.f32.mrf.mxu2 }
 0x16c   : > { %v1223_v27 = vadd.f32 %v1161_v2, %v919_v50  ;;  %v921_v26 = vpop.f32.mrf.mxu1  ;;  %v1436_v35 = vpop.f32.mrf.mxu3 }
 0x16d   : > { %v4449_v51 = vpop.f32.mrf.mxu0  ;;  %v922_v53 = vadd.f32 %v921_v26, %v4095_v62  ;;  %3491 = vmatmul.msk.f32.gmra.mxu0 %vm399_vm0, %v4005_v55 }
 0x16e   : > { %v4443_v12 = vadd.f32 %v1436_v35, %v1223_v27  ;;  %v2344_v27 = vld [vmem:[#allocation2 + $0x69] sm:$0xff] }
 0x16f   : > { %3393 = vmatmul.msk.f32.gmra.mxu1 %vm399_vm0, %v3993_v52 }
 0x170   : > { %3426 = vmatmul.msk.f32.gmra.mxu2 %vm399_vm0, %v3995_v54 }
 0x171   : > { %3459 = vmatmul.msk.f32.gmra.mxu3 %vm399_vm0, %v2341_v41 }
 0x173   : > { %v1164_v38 = vpop.f32.mrf.mxu2 }
 0x174   : > { %v1224_v30 = vadd.f32 %v1164_v38, %v922_v53  ;;  %v924_v18 = vpop.f32.mrf.mxu1  ;;  %v1439_v7 = vpop.f32.mrf.mxu3  ;;  %v2345_v38 = vld [vmem:[#allocation2 + $0x79] sm:$0xff] }
 0x175   : > { %v4461_v52 = vpop.f32.mrf.mxu0  ;;  %v925_v54 = vadd.f32 %v924_v18, %v4115_v16  ;;  %3492 = vmatmul.msk.f32.gmra.mxu0 %vm399_vm0, %v4017_v57 }
 0x176   : > { %v4455_v17 = vadd.f32 %v1439_v7, %v1224_v30 }
 0x177   : > { %3394 = vmatmul.msk.f32.gmra.mxu1 %vm399_vm0, %v4005_v55  ;;  %v2343_v55 = vld [vmem:[#allocation2 + $0x61] sm:$0xff] }
 0x178   : > { %3427 = vmatmul.msk.f32.gmra.mxu2 %vm399_vm0, %v4007_v56 }
 0x179   : > { %3460 = vmatmul.msk.f32.gmra.mxu3 %vm399_vm0, %v3962_v46 }
 0x17b   : > { %v1167_v62 = vpop.f32.mrf.mxu2 }
 0x17c   : > { %v1225_v45 = vadd.f32 %v1167_v62, %v925_v54  ;;  %v927_v44 = vpop.f32.mrf.mxu1  ;;  %v1442_v25 = vpop.f32.mrf.mxu3  ;;  %v2346_v62 = vld [vmem:[#allocation2 + $0x81] sm:$0xff] }
 0x17d   : > { %v4474_v56 = vpop.f32.mrf.mxu0  ;;  %v928_v46 = vadd.f32 %v927_v44, %v4133_v42  ;;  %3493 = vmatmul.msk.f32.gmra.mxu0 %vm399_vm0, %v4029_v59 }
 0x17e   : > { %v4468_v36 = vadd.f32 %v1442_v25, %v1225_v45  ;;  %v5024_v25 = vld [vmem:[#allocation6_spill] sm:$0xff] }
 0x17f   : > { %3395 = vmatmul.msk.f32.gmra.mxu1 %vm399_vm0, %v4017_v57 }
 0x180   : > { %3428 = vmatmul.msk.f32.gmra.mxu2 %vm399_vm0, %v4019_v58 }
 0x181   : > { %3461 = vmatmul.msk.f32.gmra.mxu3 %vm399_vm0, %v2343_v55 }
 0x183   : > { %v1170_v16 = vpop.f32.mrf.mxu2 }
 0x184   : > { %v1226_v37 = vadd.f32 %v1170_v16, %v928_v46  ;;  %v930_v5 = vpop.f32.mrf.mxu1  ;;  %v1445_v50 = vpop.f32.mrf.mxu3 }
 0x185   : > { %v4486_v57 = vpop.f32.mrf.mxu0  ;;  %v931_v58 = vadd.f32 %v930_v5, %v4153_v49  ;;  %3494 = vmatmul.msk.f32.gmra.mxu0 %vm399_vm0, %v4045_v0  ;;  %v2347_v5 = vld [vmem:[#allocation2 + $0x91] sm:$0xff] }
 0x186   : > { %v4480_v2 = vadd.f32 %v1445_v50, %v1226_v37 }
 0x187   : > { %3396 = vmatmul.msk.f32.gmra.mxu1 %vm399_vm0, %v4029_v59 }
 0x188   : > { %3429 = vmatmul.msk.f32.gmra.mxu2 %vm399_vm0, %v4031_v60 }
 0x189   : > { %3462 = vmatmul.msk.f32.gmra.mxu3 %vm399_vm0, %v2344_v27  ;;  %v5026_v27 = vld [vmem:[#allocation3_spill] sm:$0xff] }
 0x18b   : > { %v1173_v42 = vpop.f32.mrf.mxu2 }
 0x18c   : > { %v1227_v26 = vadd.f32 %v1173_v42, %v931_v58  ;;  %v933_v35 = vpop.f32.mrf.mxu1  ;;  %v1448_v41 = vpop.f32.mrf.mxu3 }
 0x18d   : > { %v4498_v59 = vpop.f32.mrf.mxu0  ;;  %v934_v60 = vadd.f32 %v933_v35, %v4173_v32  ;;  %3495 = vmatmul.msk.f32.gmra.mxu0 %vm399_vm0, %v4063_v9  ;;  %v5023_v32 = vld [vmem:[#allocation22_spill] sm:$0xff] }
 0x18e   : > { %v4492_v53 = vadd.f32 %v1448_v41, %v1227_v26  ;;  %v5027_v26 = vld [vmem:[#allocation9_spill] sm:$0xff] }
 0x18f   : > { %3397 = vmatmul.msk.f32.gmra.mxu1 %vm399_vm0, %v4045_v0  ;;  %v5022_v0 = vld [vmem:[#allocation4_spill] sm:$0xff] }
 0x190   : > { %3430 = vmatmul.msk.f32.gmra.mxu2 %vm399_vm0, %v4047_v1 }
 0x191   : > { %3463 = vmatmul.msk.f32.gmra.mxu3 %vm399_vm0, %v2345_v38 }
 0x193   : > { %v1176_v49 = vpop.f32.mrf.mxu2 }
 0x194   : > { %v1228_v30 = vadd.f32 %v1176_v49, %v934_v60  ;;  %v936_v18 = vpop.f32.mrf.mxu1  ;;  %v1451_v7 = vpop.f32.mrf.mxu3  ;;  %v2348_v49 = vld [vmem:[#allocation2 + $0x99] sm:$0xff] }
 0x195   : > { %v4510_v1 = vpop.f32.mrf.mxu0  ;;  %v937_v45 = vadd.f32 %v936_v18, %v5023_v32  ;;  %3496 = vmatmul.msk.f32.gmra.mxu0 %vm399_vm0, %v5024_v25  ;;  %v5030_v32 = vld [vmem:[#allocation12_spill] sm:$0xff] }
 0x196   : > { %v4504_v54 = vadd.f32 %v1451_v7, %v1228_v30  ;;  %v5028_v30 = vld [vmem:[#allocation10_spill] sm:$0xff]  ;;  %v5029_v7 = vld [vmem:[#allocation5_spill] sm:$0xff] }
 0x197   : > { %3398 = vmatmul.msk.f32.gmra.mxu1 %vm399_vm0, %v4063_v9  ;;  %v5025_v9 = vld [vmem:[#allocation7_spill] sm:$0xff] }
 0x198   : > { %3431 = vmatmul.msk.f32.gmra.mxu2 %vm399_vm0, %v5022_v0 }
 0x199   : > { %3464 = vmatmul.msk.f32.gmra.mxu3 %vm399_vm0, %v2346_v62 }
 0x19b   : > { %v1179_v44 = vpop.f32.mrf.mxu2 }
 0x19c   : > { %v1229_v55 = vadd.f32 %v1179_v44, %v937_v45  ;;  %v939_v46 = vpop.f32.mrf.mxu1  ;;  %v1454_v16 = vpop.f32.mrf.mxu3 }
 0x19d   : > { %v4522_v50 = vpop.f32.mrf.mxu0  ;;  %v940_v58 = vadd.f32 %v939_v46, %v5026_v27  ;;  %3497 = vmatmul.msk.f32.gmra.mxu0 %vm399_vm0, %v5027_v26  ;;  %v2349_v46 = vld [vmem:[#allocation2 + $0xa9] sm:$0xff] }
 0x19e   : > { %v4516_v37 = vadd.f32 %v1454_v16, %v1229_v55  ;;  %v5031_v16 = vld [vmem:[#allocation13_spill] sm:$0xff] }
 0x19f   : > { %3399 = vmatmul.msk.f32.gmra.mxu1 %vm399_vm0, %v5024_v25 }
 0x1a0   : > { %3432 = vmatmul.msk.f32.gmra.mxu2 %vm399_vm0, %v5025_v9  ;;  %v5032_v9 = vld [vmem:[#allocation8_spill] sm:$0xff] }
 0x1a1   : > { %3465 = vmatmul.msk.f32.gmra.mxu3 %vm399_vm0, %v2347_v5 }
 0x1a3   : > { %v1182_v42 = vpop.f32.mrf.mxu2 }
 0x1a4   : > { %v1230_v35 = vadd.f32 %v1182_v42, %v940_v58  ;;  %v942_v41 = vpop.f32.mrf.mxu1  ;;  %v1457_v38 = vpop.f32.mrf.mxu3  ;;  %v5033_v42 = vld [vmem:[#allocation15_spill] sm:$0xff] }
 0x1a5   : > { %v4534_v18 = vpop.f32.mrf.mxu0  ;;  %v943_v62 = vadd.f32 %v942_v41, %v5029_v7  ;;  %3498 = vmatmul.msk.f32.gmra.mxu0 %vm399_vm0, %v5030_v32 }
 0x1a6   : > { %v4528_v60 = vadd.f32 %v1457_v38, %v1230_v35 }
 0x1a7   : > { %3400 = vmatmul.msk.f32.gmra.mxu1 %vm399_vm0, %v5027_v26 }
 0x1a8   : > { %3433 = vmatmul.msk.f32.gmra.mxu2 %vm399_vm0, %v5028_v30  ;;  %v5034_v30 = vld [vmem:[#allocation16_spill] sm:$0xff] }
 0x1a9   : > { %3466 = vmatmul.msk.f32.gmra.mxu3 %vm399_vm0, %v2348_v49  ;;  %v2350_v49 = vld [vmem:[#allocation2 + $0xb1] sm:$0xff] }
 0x1ab   : > { %v1185_v0 = vpop.f32.mrf.mxu2 }
 0x1ac   : > { %v1231_v45 = vadd.f32 %v1185_v0, %v943_v62  ;;  %v945_v44 = vpop.f32.mrf.mxu1  ;;  %v1460_v25 = vpop.f32.mrf.mxu3  ;;  %v5035_v62 = vld [vmem:[#allocation11_spill] sm:$0xff] }
 0x1ad   : > { %v4546_v5 = vpop.f32.mrf.mxu0  ;;  %v946_v27 = vadd.f32 %v945_v44, %v5032_v9  ;;  %3499 = vmatmul.msk.f32.gmra.mxu0 %vm399_vm0, %v5033_v42  ;;  %v2351_v9 = vld [vmem:[#allocation2 + $0xc1] sm:$0xff] }
 0x1ae   : > { %v4540_v55 = vadd.f32 %v1460_v25, %v1231_v45  ;;  %v5036_v45 = vld [vmem:[#allocation18_spill] sm:$0xff] }
 0x1af   : > { %3401 = vmatmul.msk.f32.gmra.mxu1 %vm399_vm0, %v5030_v32 }
 0x1b0   : > { %3434 = vmatmul.msk.f32.gmra.mxu2 %vm399_vm0, %v5031_v16 }
 0x1b1   : > { %3467 = vmatmul.msk.f32.gmra.mxu3 %vm399_vm0, %v2349_v46 }
 0x1b3   : > { %v1188_v58 = vpop.f32.mrf.mxu2 }
 0x1b4   : > { %v1232_v26 = vadd.f32 %v1188_v58, %v946_v27  ;;  %v948_v35 = vpop.f32.mrf.mxu1  ;;  %v1463_v41 = vpop.f32.mrf.mxu3  ;;  %v5037_v27 = vld [vmem:[#allocation19_spill] sm:$0xff] }
 0x1b5   : > { %v4558_v7 = vpop.f32.mrf.mxu0  ;;  %v949_v0 = vadd.f32 %v948_v35, %v5035_v62  ;;  %3500 = vmatmul.msk.f32.gmra.mxu0 %vm399_vm0, %v5036_v45 }
 0x1b6   : > { %v4552_v38 = vadd.f32 %v1463_v41, %v1232_v26  ;;  %v5039_v41 = vld [vmem:[#allocation21_spill] sm:$0xff] }
 0x1b7   : > { %3402 = vmatmul.msk.f32.gmra.mxu1 %vm399_vm0, %v5033_v42  ;;  %v5038_v42 = vld [vmem:[#allocation14_spill] sm:$0xff] }
 0x1b8   : > { %3435 = vmatmul.msk.f32.gmra.mxu2 %vm399_vm0, %v5034_v30 }
 0x1b9   : > { %3468 = vmatmul.msk.f32.gmra.mxu3 %vm399_vm0, %v2350_v49 }
 0x1bb   : > { %v1191_v32 = vpop.f32.mrf.mxu2 }
 0x1bc   : > { %v1233_v44 = vadd.f32 %v1191_v32, %v949_v0  ;;  %v951_v25 = vpop.f32.mrf.mxu1  ;;  %v1466_v46 = vpop.f32.mrf.mxu3  ;;  %v2352_v32 = vld [vmem:[#allocation2 + $0xc9] sm:$0xff] }
 0x1bd   : > { %v4570_v58 = vpop.f32.mrf.mxu0  ;;  %v952_v26 = vadd.f32 %v951_v25, %v5038_v42  ;;  %3501 = vmatmul.msk.f32.gmra.mxu0 %vm399_vm0, %v5039_v41 }
 0x1be   : > { %v4564_v16 = vadd.f32 %v1466_v46, %v1233_v44  ;;  %v5040_v44 = vld [vmem:[#allocation17_spill] sm:$0xff] }
 0x1bf   : > { %3403 = vmatmul.msk.f32.gmra.mxu1 %vm399_vm0, %v5036_v45 }
 0x1c0   : > { %3436 = vmatmul.msk.f32.gmra.mxu2 %vm399_vm0, %v5037_v27 }
 0x1c1   : > { %3469 = vmatmul.msk.f32.gmra.mxu3 %vm399_vm0, %v2351_v9  ;;  %v5041_v9 = vld [vmem:[#allocation24_spill] sm:$0xff] }
 0x1c3   : > { %v1194_v35 = vpop.f32.mrf.mxu2 }
 0x1c4   : > { %v1234_v49 = vadd.f32 %v1194_v35, %v952_v26  ;;  %v954_v30 = vpop.f32.mrf.mxu1  ;;  %v1469_v62 = vpop.f32.mrf.mxu3 }
 0x1c5   : > { %v4582_v45 = vpop.f32.mrf.mxu0  ;;  %v955_v25 = vadd.f32 %v954_v30, %v5040_v44  ;;  %3502 = vmatmul.msk.f32.gmra.mxu0 %vm399_vm0, %v5041_v9 }
 0x1c6   : > { %v4576_v0 = vadd.f32 %v1469_v62, %v1234_v49  ;;  %v2353_v49 = vld [vmem:[#allocation2 + $0xd9] sm:$0xff] }
 0x1c7   : > { %3404 = vmatmul.msk.f32.gmra.mxu1 %vm399_vm0, %v5039_v41  ;;  %v5042_v41 = vld [vmem:[#allocation20_spill] sm:$0xff] }
 0x1c8   : > { %3437 = vmatmul.msk.f32.gmra.mxu2 %vm399_vm0, %v4183_v31 }
 0x1c9   : > { %3470 = vmatmul.msk.f32.gmra.mxu3 %vm399_vm0, %v2352_v32 }
 0x1cb   : > { %v1197_v46 = vpop.f32.mrf.mxu2 }
 0x1cc   : > { %v1235_v27 = vadd.f32 %v1197_v46, %v955_v25  ;;  %v957_v42 = vpop.f32.mrf.mxu1  ;;  %v1472_v26 = vpop.f32.mrf.mxu3 }
 0x1cd   : > { %v4594_v31 = vpop.f32.mrf.mxu0  ;;  %v958_v30 = vadd.f32 %v957_v42, %v5042_v41  ;;  %3503 = vmatmul.msk.f32.gmra.mxu0 %vm399_vm0, %v4214_v39 }
 0x1ce   : > { %v4588_v35 = vadd.f32 %v1472_v26, %v1235_v27  ;;  %v2354_v27 = vld [vmem:[#allocation2 + $0xe1] sm:$0xff] }
 0x1cf   : > { %3405 = vmatmul.msk.f32.gmra.mxu1 %vm399_vm0, %v5041_v9  ;;  %v5045_v9 = vld [vmem:[#allocation23_spill] sm:$0xff] }
 0x1d0   : > { %3438 = vmatmul.msk.f32.gmra.mxu2 %vm399_vm0, %v4201_v8 }
 0x1d1   : > { %3471 = vmatmul.msk.f32.gmra.mxu3 %vm399_vm0, %v2353_v49 }
 0x1d3   : > { %v1200_v62 = vpop.f32.mrf.mxu2 }
 0x1d4   : > { %v1236_v32 = vadd.f32 %v1200_v62, %v958_v30  ;;  %v960_v44 = vpop.f32.mrf.mxu1  ;;  %v1475_v25 = vpop.f32.mrf.mxu3 }
 0x1d5   : > { %v4606_v8 = vpop.f32.mrf.mxu0  ;;  %v961_v42 = vadd.f32 %v960_v44, %v5045_v9  ;;  %3504 = vmatmul.msk.f32.gmra.mxu0 %vm399_vm0, %v4231_v19 }
 0x1d6   : > { %v4600_v46 = vadd.f32 %v1475_v25, %v1236_v32  ;;  %5044 = vst [vmem:[#allocation22_spill] sm:$0xff] %v4606_v8  ;;  %v2355_v32 = vld [vmem:[#allocation2 + $0xf1] sm:$0xff] }
 0x1d7   : > { %3406 = vmatmul.msk.f32.gmra.mxu1 %vm399_vm0, %v4214_v39  ;;  %v5048_v39 = vld [vmem:[#allocation26_spill] sm:$0xff] }
 0x1d8   : > { %5043 = vst [vmem:[#allocation4_spill] sm:$0xff] %v4600_v46  ;;  %3439 = vmatmul.msk.f32.gmra.mxu2 %vm399_vm0, %v4218_v11  ;;  %v5047_v11 = vld [vmem:[#allocation25_spill] sm:$0xff] }
 0x1d9   : > { %3472 = vmatmul.msk.f32.gmra.mxu3 %vm399_vm0, %v2354_v27  ;;  %v1756_v25 = vadd.f32 %v5048_v39, %v5047_v11  ;;  %v5050_v11 = vld [vmem:[#allocation27_spill] sm:$0xff] }
 0x1db   : > { %v1203_v26 = vpop.f32.mrf.mxu2 }
 0x1dc   : > { %v1237_v49 = vadd.f32 %v1203_v26, %v961_v42  ;;  %v1478_v41 = vpop.f32.mrf.mxu3  ;;  %v1935_v30 = vpop.f32.mrf.mxu1 }
 0x1dd   : > { %v4620_v44 = vpop.f32.mrf.mxu0  ;;  %v2031_v27 = vadd.f32 %v1935_v30, %v1756_v25  ;;  %3505 = vmatmul.msk.f32.gmra.mxu0 %vm399_vm0, %v4248_v48  ;;  %v4632_v30 = vld [vmem:[%s4949_s4] ss:$0 sm:$0xff] }
 0x1de   : > { %v4612_v62 = vadd.f32 %v1478_v41, %v1237_v49  ;;  %5049 = vst [vmem:[#allocation7_spill] sm:$0xff] %v4620_v44  ;;  %v2356_v41 = vld [vmem:[#allocation2 + $0xf9] sm:$0xff] }
 0x1df   : > { %3407 = vmatmul.msk.f32.gmra.mxu1 %vm399_vm0, %v4231_v19 }
 0x1e0   : > { %5046 = vst [vmem:[#allocation6_spill] sm:$0xff] %v4612_v62  ;;  %3440 = vmatmul.msk.f32.gmra.mxu2 %vm399_vm0, %v4235_v28  ;;  %v5051_v28 = vld [vmem:[#allocation28_spill] sm:$0xff] }
 0x1e1   : > { %3473 = vmatmul.msk.f32.gmra.mxu3 %vm399_vm0, %v2355_v32  ;;  %v1757_v39 = vadd.f32 %v5051_v28, %v5050_v11  ;;  %v5053_v11 = vld [vmem:[#allocation30_spill] sm:$0xff] }
 0x1e3   : > { %v2211_v9 = vpop.f32.mrf.mxu2 }
 0x1e4   : > { %v2307_v42 = vadd.f32 %v2211_v9, %v2031_v27  ;;  %v1938_v26 = vpop.f32.mrf.mxu1  ;;  %v2486_v49 = vpop.f32.mrf.mxu3 }
 0x1e5   : > { %v2761_v32 = vpop.f32.mrf.mxu0  ;;  %v2032_v25 = vadd.f32 %v1938_v26, %v1757_v39  ;;  %3506 = vmatmul.msk.f32.gmra.mxu0 %vm399_vm0, %v4265_v14 }
 0x1e6   : > { %v2582_v19 = vadd.f32 %v2486_v49, %v2307_v42 }
 0x1e7   : > { %3408 = vmatmul.msk.f32.gmra.mxu1 %vm399_vm0, %v4248_v48 }
 0x1e8   : > { %3441 = vmatmul.msk.f32.gmra.mxu2 %vm399_vm0, %v4252_v61  ;;  %v2857_v27 = vadd.f32 %v2761_v32, %v2582_v19  ;;  %v2357_v19 = vld [vmem:[#allocation2 + $0x109] sm:$0xff] }
 0x1e9   : > { %3474 = vmatmul.msk.f32.gmra.mxu3 %vm399_vm0, %v2356_v41  ;;  %v5052_v41 = vld [vmem:[#allocation29_spill] sm:$0xff] }
 0x1ea   : > { %v2893_v9 = vadd.f32 %v4632_v30, %v2857_v27  ;;  %v1758_v28 = vadd.f32 %v5053_v11, %v5052_v41 }
 0x1eb   : > { %v2214_v48 = vpop.f32.mrf.mxu2 }
 0x1ec   : > { %v2308_v42 = vadd.f32 %v2214_v48, %v2032_v25  ;;  %v1941_v61 = vpop.f32.mrf.mxu1  ;;  %v2489_v49 = vpop.f32.mrf.mxu3  ;;  %2925 = vst.msk [vmem:[%s4642_s12] sm:$0xff] %vm399_vm0, %v2893_v9  ;;  %v3026_v48 = vmul.f32 %v2893_v9, %v2893_v9  ;;  %v2957_v41 = vsel %vm399_vm0, %v2893_v9, 0.0  ;;  %v5056_v9 = vld [vmem:[#allocation34_spill] sm:$0xff] }
 0x1ed   : > { %v2764_v39 = vpop.f32.mrf.mxu0  ;;  %v2033_v32 = vadd.f32 %v1941_v61, %v1758_v28  ;;  %3507 = vmatmul.msk.f32.gmra.mxu0 %vm399_vm0, %v4282_v43  ;;  %v2358_v61 = vld [vmem:[#allocation2 + $0x111] sm:$0xff] }
 0x1ee   : > { %v2583_v26 = vadd.f32 %v2489_v49, %v2308_v42  ;;  %v5054_v28 = vld [vmem:[#allocation31_spill] sm:$0xff] }
 0x1ef   : > { %3409 = vmatmul.msk.f32.gmra.mxu1 %vm399_vm0, %v4265_v14 }
 0x1f0   : > { %3442 = vmatmul.msk.f32.gmra.mxu2 %vm399_vm0, %v4269_v10  ;;  %v2858_v25 = vadd.f32 %v2764_v39, %v2583_v26  ;;  %v5055_v39 = vld [vmem:[#allocation32_spill] sm:$0xff] }
 0x1f1   : > { %3475 = vmatmul.msk.f32.gmra.mxu3 %vm399_vm0, %v2357_v19 }
 0x1f2   : > { %v2894_v42 = vadd.f32 %v4632_v30, %v2858_v25  ;;  %v1759_v25 = vadd.f32 %v5055_v39, %v5054_v28  ;;  %v1808_v39 = vld [vmem:[#allocation2 + $0x10a] sm:$0xff] }
 0x1f3   : > { %v2217_v27 = vpop.f32.mrf.mxu2 }
 0x1f4   : > { %v2309_v49 = vadd.f32 %v2217_v27, %v2033_v32  ;;  %v1944_v14 = vpop.f32.mrf.mxu1  ;;  %v2492_v44 = vpop.f32.mrf.mxu3  ;;  %2926 = vst.msk [vmem:[%s4642_s12 + $0x8] sm:$0xff] %vm399_vm0, %v2894_v42  ;;  %v2958_v10 = vsel %vm399_vm0, %v2894_v42, 0.0  ;;  %v3027_v11 = vmul.f32 %v2894_v42, %v2894_v42  ;;  %v3058_v32 = vsel %vm399_vm0, %v3026_v48, 0.0 }
 0x1f5   : > { %v2959_v26 = vadd.f32 %v2958_v10, %v2957_v41  ;;  %v2767_v8 = vpop.f32.mrf.mxu0  ;;  %v5057_v41 = vld [vmem:[#allocation36_spill] sm:$0xff] }
 0x1f6   : > { %v2584_v19 = vadd.f32 %v2492_v44, %v2309_v49  ;;  %v3059_v27 = vsel %vm399_vm0, %v3027_v11, 0.0  ;;  %v2034_v44 = vadd.f32 %v1944_v14, %v1759_v25  ;;  %3508 = vmatmul.msk.f32.gmra.mxu0 %vm399_vm0, %v5057_v41  ;;  %v2084_v11 = vld [vmem:[#allocation2 + $0x120] sm:$0xff]  ;;  %v5059_v14 = vld [vmem:[#allocation35_spill] sm:$0xff] }
 0x1f7   : > { %3410 = vmatmul.msk.f32.gmra.mxu1 %vm399_vm0, %v4282_v43  ;;  %v3060_v62 = vadd.f32 %v3059_v27, %v3058_v32 }
 0x1f8   : > { %3443 = vmatmul.msk.f32.gmra.mxu2 %vm399_vm0, %v5056_v9  ;;  %v2859_v42 = vadd.f32 %v2767_v8, %v2584_v19  ;;  %v5058_v8 = vld [vmem:[#allocation33_spill] sm:$0xff] }
 0x1f9   : > { %3476 = vmatmul.msk.f32.gmra.mxu3 %vm399_vm0, %v2358_v61  ;;  %v1760_v19 = vadd.f32 %v5059_v14, %v5058_v8  ;;  %v1809_v8 = vld [vmem:[#allocation2 + $0x112] sm:$0xff] }
 0x1fa   : > { %v2895_v43 = vadd.f32 %v4632_v30, %v2859_v42 }
 0x1fb   : > { %v2220_v49 = vpop.f32.mrf.mxu2 }
 0x1fc   : > { %v2310_v10 = vadd.f32 %v2220_v49, %v2034_v44  ;;  %v1947_v48 = vpop.f32.mrf.mxu1  ;;  %v2495_v28 = vpop.f32.mrf.mxu3  ;;  %2927 = vst.msk [vmem:[%s4642_s12 + $0x10] sm:$0xff] %vm399_vm0, %v2895_v43  ;;  %v2960_v32 = vsel %vm399_vm0, %v2895_v43, 0.0  ;;  %v3028_v27 = vmul.f32 %v2895_v43, %v2895_v43  ;;  %v5060_v49 = vld [vmem:[#allocation42_spill] sm:$0xff] }
 0x1fd   : > { %v2961_v61 = vadd.f32 %v2960_v32, %v2959_v26  ;;  %v2770_v42 = vpop.f32.mrf.mxu0  ;;  %v2035_v41 = vadd.f32 %v1947_v48, %v1760_v19  ;;  %v5062_v48 = vld [vmem:[#allocation37_spill] sm:$0xff] }
 0x1fe   : > { %v2585_v9 = vadd.f32 %v2495_v28, %v2310_v10  ;;  %v3061_v25 = vsel %vm399_vm0, %v3028_v27, 0.0  ;;  %v5061_v10 = vld [vmem:[#allocation39_spill] sm:$0xff]  ;;  %v2085_v27 = vld [vmem:[#allocation2 + $0x128] sm:$0xff] }
 0x1ff   : > { %3411 = vmatmul.msk.f32.gmra.mxu1 %vm399_vm0, %v1808_v39  ;;  %v3062_v44 = vadd.f32 %v3061_v25, %v3060_v62  ;;  %3509 = vmatmul.msk.f32.gmra.mxu0 %vm399_vm0, %v5061_v10 }
 0x200   : > { %3444 = vmatmul.msk.f32.gmra.mxu2 %vm399_vm0, %v2084_v11  ;;  %v2860_v46 = vadd.f32 %v2770_v42, %v2585_v9  ;;  %v5063_v9 = vld [vmem:[#allocation38_spill] sm:$0xff] }
 0x201   : > { %3477 = vmatmul.msk.f32.gmra.mxu3 %vm399_vm0, %v5060_v49 }
 0x202   : > { %v2896_v26 = vadd.f32 %v4632_v30, %v2860_v46  ;;  %v1761_v46 = vadd.f32 %v5063_v9, %v5062_v48  ;;  %v2086_v48 = vld [vmem:[#allocation2 + $0x138] sm:$0xff] }
 0x203   : > { %v2223_v43 = vpop.f32.mrf.mxu2  ;;  %v2361_v9 = vld [vmem:[#allocation2 + $0x139] sm:$0xff] }
 0x204   : > { %v2311_v28 = vadd.f32 %v2223_v43, %v2035_v41  ;;  %v1950_v39 = vpop.f32.mrf.mxu1  ;;  %v2498_v32 = vpop.f32.mrf.mxu3  ;;  %2928 = vst.msk [vmem:[%s4642_s12 + $0x18] sm:$0xff] %vm399_vm0, %v2896_v26  ;;  %v2962_v62 = vsel %vm399_vm0, %v2896_v26, 0.0  ;;  %v3029_v11 = vmul.f32 %v2896_v26, %v2896_v26  ;;  %v5064_v41 = vld [vmem:[#allocation45_spill] sm:$0xff] }
 0x205   : > { %v2963_v25 = vadd.f32 %v2962_v62, %v2961_v61  ;;  %v2773_v49 = vpop.f32.mrf.mxu0  ;;  %v2634_v43 = vld [vmem:[#allocation2 + $0x122] sm:$0xff]  ;;  %v2036_v10 = vadd.f32 %v1950_v39, %v1761_v46  ;;  %v5065_v39 = vld [vmem:[#allocation40_spill] sm:$0xff] }
 0x206   : > { %v2586_v14 = vadd.f32 %v2498_v32, %v2311_v28  ;;  %v3063_v19 = vsel %vm399_vm0, %v3029_v11, 0.0 }
 0x207   : > { %3412 = vmatmul.msk.f32.gmra.mxu1 %vm399_vm0, %v1809_v8  ;;  %v3064_v42 = vadd.f32 %v3063_v19, %v3062_v44  ;;  %3510 = vmatmul.msk.f32.gmra.mxu0 %vm399_vm0, %v2634_v43 }
 0x208   : > { %3445 = vmatmul.msk.f32.gmra.mxu2 %vm399_vm0, %v2085_v27  ;;  %v2861_v26 = vadd.f32 %v2773_v49, %v2586_v14  ;;  %v5066_v14 = vld [vmem:[#allocation41_spill] sm:$0xff] }
 0x209   : > { %3478 = vmatmul.msk.f32.gmra.mxu3 %vm399_vm0, %v5064_v41  ;;  %v1762_v46 = vadd.f32 %v5066_v14, %v5065_v39  ;;  %v2087_v39 = vld [vmem:[#allocation2 + $0x140] sm:$0xff] }
 0x20a   : > { %v2897_v61 = vadd.f32 %v4632_v30, %v2861_v26  ;;  %v2635_v26 = vld [vmem:[#allocation2 + $0x12a] sm:$0xff]  ;;  %v2362_v14 = vld [vmem:[#allocation2 + $0x141] sm:$0xff] }
 0x20b   : > { %v2226_v28 = vpop.f32.mrf.mxu2 }
 0x20c   : > { %v2312_v32 = vadd.f32 %v2226_v28, %v2036_v10  ;;  %v1953_v8 = vpop.f32.mrf.mxu1  ;;  %v2501_v62 = vpop.f32.mrf.mxu3  ;;  %2929 = vst.msk [vmem:[%s4642_s12 + $0x20] sm:$0xff] %vm399_vm0, %v2897_v61  ;;  %v2964_v44 = vsel %vm399_vm0, %v2897_v61, 0.0  ;;  %v3030_v27 = vmul.f32 %v2897_v61, %v2897_v61 }
 0x20d   : > { %v2965_v19 = vadd.f32 %v2964_v44, %v2963_v25  ;;  %v2776_v10 = vpop.f32.mrf.mxu0  ;;  %v2037_v28 = vadd.f32 %v1953_v8, %v1762_v46  ;;  %v5067_v8 = vld [vmem:[#allocation43_spill] sm:$0xff] }
 0x20e   : > { %v2587_v11 = vadd.f32 %v2501_v62, %v2312_v32  ;;  %v3065_v49 = vsel %vm399_vm0, %v3030_v27, 0.0 }
 0x20f   : > { %3413 = vmatmul.msk.f32.gmra.mxu1 %vm399_vm0, %v2634_v43  ;;  %v3066_v41 = vadd.f32 %v3065_v49, %v3064_v42  ;;  %3511 = vmatmul.msk.f32.gmra.mxu0 %vm399_vm0, %v2635_v26 }
 0x210   : > { %3446 = vmatmul.msk.f32.gmra.mxu2 %vm399_vm0, %v2086_v48  ;;  %v2862_v61 = vadd.f32 %v2776_v10, %v2587_v11  ;;  %v5068_v11 = vld [vmem:[#allocation44_spill] sm:$0xff] }
 0x211   : > { %3479 = vmatmul.msk.f32.gmra.mxu3 %vm399_vm0, %v2361_v9  ;;  %v1763_v46 = vadd.f32 %v5068_v11, %v5067_v8  ;;  %v2088_v8 = vld [vmem:[#allocation2 + $0x150] sm:$0xff] }
 0x212   : > { %v2898_v25 = vadd.f32 %v4632_v30, %v2862_v61  ;;  %v2636_v61 = vld [vmem:[#allocation2 + $0x13a] sm:$0xff]  ;;  %v2363_v11 = vld [vmem:[#allocation2 + $0x151] sm:$0xff] }
 0x213   : > { %v2229_v32 = vpop.f32.mrf.mxu2 }
 0x214   : > { %v2313_v43 = vadd.f32 %v2229_v32, %v2037_v28  ;;  %v1956_v62 = vpop.f32.mrf.mxu1  ;;  %v2504_v44 = vpop.f32.mrf.mxu3  ;;  %2930 = vst.msk [vmem:[%s4642_s12 + $0x28] sm:$0xff] %vm399_vm0, %v2898_v25  ;;  %v2966_v48 = vsel %vm399_vm0, %v2898_v25, 0.0  ;;  %v3031_v42 = vmul.f32 %v2898_v25, %v2898_v25 }
 0x215   : > { %v2967_v9 = vadd.f32 %v2966_v48, %v2965_v19  ;;  %v2779_v28 = vpop.f32.mrf.mxu0  ;;  %v2038_v32 = vadd.f32 %v1956_v62, %v1763_v46  ;;  %v5069_v62 = vld [vmem:[#allocation46_spill] sm:$0xff] }
 0x216   : > { %v2588_v27 = vadd.f32 %v2504_v44, %v2313_v43  ;;  %v3067_v49 = vsel %vm399_vm0, %v3031_v42, 0.0 }
 0x217   : > { %3414 = vmatmul.msk.f32.gmra.mxu1 %vm399_vm0, %v2635_v26  ;;  %v3068_v10 = vadd.f32 %v3067_v49, %v3066_v41  ;;  %3512 = vmatmul.msk.f32.gmra.mxu0 %vm399_vm0, %v2636_v61 }
 0x218   : > { %3447 = vmatmul.msk.f32.gmra.mxu2 %vm399_vm0, %v2087_v39  ;;  %v2863_v25 = vadd.f32 %v2779_v28, %v2588_v27  ;;  %v5070_v27 = vld [vmem:[#allocation47_spill] sm:$0xff] }
 0x219   : > { %3480 = vmatmul.msk.f32.gmra.mxu3 %vm399_vm0, %v2362_v14  ;;  %v1764_v46 = vadd.f32 %v5070_v27, %v5069_v62  ;;  %v2089_v62 = vld [vmem:[#allocation2 + $0x158] sm:$0xff] }
 0x21a   : > { %v2899_v19 = vadd.f32 %v4632_v30, %v2863_v25  ;;  %v2637_v25 = vld [vmem:[#allocation2 + $0x142] sm:$0xff]  ;;  %v2364_v27 = vld [vmem:[#allocation2 + $0x159] sm:$0xff] }
 0x21b   : > { %v2232_v43 = vpop.f32.mrf.mxu2 }
 0x21c   : > { %v2314_v26 = vadd.f32 %v2232_v43, %v2038_v32  ;;  %v1959_v44 = vpop.f32.mrf.mxu1  ;;  %v2507_v48 = vpop.f32.mrf.mxu3  ;;  %2931 = vst.msk [vmem:[%s4642_s12 + $0x30] sm:$0xff] %vm399_vm0, %v2899_v19  ;;  %v2968_v39 = vsel %vm399_vm0, %v2899_v19, 0.0  ;;  %v3032_v41 = vmul.f32 %v2899_v19, %v2899_v19 }
 0x21d   : > { %v2969_v14 = vadd.f32 %v2968_v39, %v2967_v9  ;;  %v2782_v32 = vpop.f32.mrf.mxu0  ;;  %v2039_v43 = vadd.f32 %v1959_v44, %v1764_v46  ;;  %v1765_v44 = vadd.f32 %v4364_v34, %v4360_v24  ;;  %v2090_v34 = vld [vmem:[#allocation2 + $0x168] sm:$0xff] }
 0x21e   : > { %v2589_v42 = vadd.f32 %v2507_v48, %v2314_v26  ;;  %v3069_v49 = vsel %vm399_vm0, %v3032_v41, 0.0 }
 0x21f   : > { %3415 = vmatmul.msk.f32.gmra.mxu1 %vm399_vm0, %v2636_v61  ;;  %v3070_v28 = vadd.f32 %v3069_v49, %v3068_v10  ;;  %3513 = vmatmul.msk.f32.gmra.mxu0 %vm399_vm0, %v2637_v25 }
 0x220   : > { %3448 = vmatmul.msk.f32.gmra.mxu2 %vm399_vm0, %v2088_v8  ;;  %v2864_v19 = vadd.f32 %v2782_v32, %v2589_v42  ;;  %v2638_v32 = vld [vmem:[#allocation2 + $0x152] sm:$0xff] }
 0x221   : > { %3481 = vmatmul.msk.f32.gmra.mxu3 %vm399_vm0, %v2363_v11 }
 0x222   : > { %v2900_v9 = vadd.f32 %v4632_v30, %v2864_v19 }
 0x223   : > { %v2235_v26 = vpop.f32.mrf.mxu2 }
 0x224   : > { %v2315_v61 = vadd.f32 %v2235_v26, %v2039_v43  ;;  %v1962_v48 = vpop.f32.mrf.mxu1  ;;  %v2510_v39 = vpop.f32.mrf.mxu3  ;;  %2932 = vst.msk [vmem:[%s4642_s12 + $0x38] sm:$0xff] %vm399_vm0, %v2900_v9  ;;  %v2970_v8 = vsel %vm399_vm0, %v2900_v9, 0.0  ;;  %v3033_v10 = vmul.f32 %v2900_v9, %v2900_v9 }
 0x225   : > { %v2971_v11 = vadd.f32 %v2970_v8, %v2969_v14  ;;  %v2785_v49 = vpop.f32.mrf.mxu0  ;;  %v2040_v43 = vadd.f32 %v1962_v48, %v1765_v44  ;;  %v1766_v48 = vadd.f32 %v4375_v63, %v4371_v22  ;;  %v2639_v44 = vld [vmem:[#allocation2 + $0x15a] sm:$0xff]  ;;  %v2091_v63 = vld [vmem:[#allocation2 + $0x170] sm:$0xff] }
 0x226   : > { %v2590_v41 = vadd.f32 %v2510_v39, %v2315_v61  ;;  %v3071_v42 = vsel %vm399_vm0, %v3033_v10, 0.0 }
 0x227   : > { %3416 = vmatmul.msk.f32.gmra.mxu1 %vm399_vm0, %v2637_v25  ;;  %v3072_v46 = vadd.f32 %v3071_v42, %v3070_v28  ;;  %3514 = vmatmul.msk.f32.gmra.mxu0 %vm399_vm0, %v2638_v32 }
 0x228   : > { %3449 = vmatmul.msk.f32.gmra.mxu2 %vm399_vm0, %v2089_v62  ;;  %v2865_v19 = vadd.f32 %v2785_v49, %v2590_v41  ;;  %v2365_v62 = vld [vmem:[#allocation2 + $0x169] sm:$0xff] }
 0x229   : > { %3482 = vmatmul.msk.f32.gmra.mxu3 %vm399_vm0, %v2364_v27 }
 0x22a   : > { %v2901_v14 = vadd.f32 %v4632_v30, %v2865_v19 }
 0x22b   : > { %v2238_v26 = vpop.f32.mrf.mxu2 }
 0x22c   : > { %v2316_v25 = vadd.f32 %v2238_v26, %v2040_v43  ;;  %v1965_v9 = vpop.f32.mrf.mxu1  ;;  %v2513_v24 = vpop.f32.mrf.mxu3  ;;  %2933 = vst.msk [vmem:[%s4642_s12 + $0x40] sm:$0xff] %vm399_vm0, %v2901_v14  ;;  %v2972_v61 = vsel %vm399_vm0, %v2901_v14, 0.0  ;;  %v3034_v28 = vmul.f32 %v2901_v14, %v2901_v14 }
 0x22d   : > { %v2973_v8 = vadd.f32 %v2972_v61, %v2971_v11  ;;  %v2788_v27 = vpop.f32.mrf.mxu0  ;;  %v2041_v42 = vadd.f32 %v1965_v9, %v1766_v48  ;;  %v1767_v9 = vadd.f32 %v4385_v20, %v4381_v15  ;;  %v2092_v20 = vld [vmem:[#allocation2 + $0x180] sm:$0xff] }
 0x22e   : > { %v2591_v39 = vadd.f32 %v2513_v24, %v2316_v25  ;;  %v3073_v10 = vsel %vm399_vm0, %v3034_v28, 0.0  ;;  %v2366_v25 = vld [vmem:[#allocation2 + $0x171] sm:$0xff] }
 0x22f   : > { %3417 = vmatmul.msk.f32.gmra.mxu1 %vm399_vm0, %v2638_v32  ;;  %v3074_v41 = vadd.f32 %v3073_v10, %v3072_v46  ;;  %3515 = vmatmul.msk.f32.gmra.mxu0 %vm399_vm0, %v2639_v44 }
 0x230   : > { %3450 = vmatmul.msk.f32.gmra.mxu2 %vm399_vm0, %v2090_v34  ;;  %v2866_v49 = vadd.f32 %v2788_v27, %v2591_v39  ;;  %v2640_v39 = vld [vmem:[#allocation2 + $0x16a] sm:$0xff] }
 0x231   : > { %3483 = vmatmul.msk.f32.gmra.mxu3 %vm399_vm0, %v2365_v62 }
 0x232   : > { %v2902_v11 = vadd.f32 %v4632_v30, %v2866_v49 }
 0x233   : > { %v2241_v43 = vpop.f32.mrf.mxu2 }
 0x234   : > { %v2317_v32 = vadd.f32 %v2241_v43, %v2041_v42  ;;  %v1968_v19 = vpop.f32.mrf.mxu1  ;;  %v2516_v22 = vpop.f32.mrf.mxu3  ;;  %2934 = vst.msk [vmem:[%s4642_s12 + $0x48] sm:$0xff] %vm399_vm0, %v2902_v11  ;;  %v2974_v26 = vsel %vm399_vm0, %v2902_v11, 0.0  ;;  %v3035_v46 = vmul.f32 %v2902_v11, %v2902_v11  ;;  %v2367_v43 = vld [vmem:[#allocation2 + $0x181] sm:$0xff] }
 0x235   : > { %v2975_v24 = vadd.f32 %v2974_v26, %v2973_v8  ;;  %v2791_v28 = vpop.f32.mrf.mxu0  ;;  %v2042_v62 = vadd.f32 %v1968_v19, %v1767_v9  ;;  %v2641_v26 = vld [vmem:[#allocation2 + $0x172] sm:$0xff] }
 0x236   : > { %v2592_v14 = vadd.f32 %v2516_v22, %v2317_v32  ;;  %v3075_v34 = vsel %vm399_vm0, %v3035_v46, 0.0  ;;  %v1768_v32 = vadd.f32 %v4395_v3, %v4391_v47  ;;  %v2093_v3 = vld [vmem:[#allocation2 + $0x188] sm:$0xff] }
 0x237   : > { %3418 = vmatmul.msk.f32.gmra.mxu1 %vm399_vm0, %v2639_v44  ;;  %v3076_v61 = vadd.f32 %v3075_v34, %v3074_v41  ;;  %3516 = vmatmul.msk.f32.gmra.mxu0 %vm399_vm0, %v2640_v39 }
 0x238   : > { %3451 = vmatmul.msk.f32.gmra.mxu2 %vm399_vm0, %v2091_v63  ;;  %v2867_v48 = vadd.f32 %v2791_v28, %v2592_v14 }
 0x239   : > { %3484 = vmatmul.msk.f32.gmra.mxu3 %vm399_vm0, %v2366_v25 }
 0x23a   : > { %v2903_v8 = vadd.f32 %v4632_v30, %v2867_v48 }
 0x23b   : > { %v2244_v10 = vpop.f32.mrf.mxu2 }
 0x23c   : > { %v2318_v27 = vadd.f32 %v2244_v10, %v2042_v62  ;;  %v1971_v44 = vpop.f32.mrf.mxu1  ;;  %v2519_v15 = vpop.f32.mrf.mxu3  ;;  %2935 = vst.msk [vmem:[%s4642_s12 + $0x50] sm:$0xff] %vm399_vm0, %v2903_v8  ;;  %v2976_v42 = vsel %vm399_vm0, %v2903_v8, 0.0  ;;  %v3036_v41 = vmul.f32 %v2903_v8, %v2903_v8  ;;  %v2368_v62 = vld [vmem:[#allocation2 + $0x189] sm:$0xff]  ;;  %v1769_v10 = vadd.f32 %v4405_v13, %v4401_v40  ;;  %v2094_v13 = vld [vmem:[#allocation2 + $0x198] sm:$0xff] }
 0x23d   : > { %v2977_v11 = vadd.f32 %v2976_v42, %v2975_v24  ;;  %v2794_v63 = vpop.f32.mrf.mxu0  ;;  %v2043_v46 = vadd.f32 %v1971_v44, %v1768_v32 }
 0x23e   : > { %v2593_v49 = vadd.f32 %v2519_v15, %v2318_v27  ;;  %v3077_v19 = vsel %vm399_vm0, %v3036_v41, 0.0  ;;  %v2642_v15 = vld [vmem:[#allocation2 + $0x182] sm:$0xff] }
 0x23f   : > { %3419 = vmatmul.msk.f32.gmra.mxu1 %vm399_vm0, %v2640_v39  ;;  %v3078_v22 = vadd.f32 %v3077_v19, %v3076_v61  ;;  %3517 = vmatmul.msk.f32.gmra.mxu0 %vm399_vm0, %v2641_v26 }
 0x240   : > { %3452 = vmatmul.msk.f32.gmra.mxu2 %vm399_vm0, %v2092_v20  ;;  %v2868_v14 = vadd.f32 %v2794_v63, %v2593_v49  ;;  %v2369_v63 = vld [vmem:[#allocation2 + $0x199] sm:$0xff] }
 0x241   : > { %3485 = vmatmul.msk.f32.gmra.mxu3 %vm399_vm0, %v2367_v43 }
 0x242   : > { %v2904_v24 = vadd.f32 %v4632_v30, %v2868_v14 }
 0x243   : > { %v2247_v25 = vpop.f32.mrf.mxu2 }
 0x244   : > { %v2319_v9 = vadd.f32 %v2247_v25, %v2043_v46  ;;  %v1974_v34 = vpop.f32.mrf.mxu1  ;;  %v2522_v47 = vpop.f32.mrf.mxu3  ;;  %2936 = vst.msk [vmem:[%s4642_s12 + $0x58] sm:$0xff] %vm399_vm0, %v2904_v24  ;;  %v2978_v28 = vsel %vm399_vm0, %v2904_v24, 0.0  ;;  %v3037_v61 = vmul.f32 %v2904_v24, %v2904_v24  ;;  %v1770_v46 = vadd.f32 %v4415_v4, %v4411_v33  ;;  %v2095_v4 = vld [vmem:[#allocation2 + $0x1a0] sm:$0xff] }
 0x245   : > { %v2979_v48 = vadd.f32 %v2978_v28, %v2977_v11  ;;  %v2797_v44 = vpop.f32.mrf.mxu0  ;;  %v2044_v20 = vadd.f32 %v1974_v34, %v1769_v10 }
 0x246   : > { %v2594_v39 = vadd.f32 %v2522_v47, %v2319_v9  ;;  %v3079_v8 = vsel %vm399_vm0, %v3037_v61, 0.0  ;;  %v2643_v9 = vld [vmem:[#allocation2 + $0x18a] sm:$0xff] }
 0x247   : > { %3420 = vmatmul.msk.f32.gmra.mxu1 %vm399_vm0, %v2641_v26  ;;  %v3080_v27 = vadd.f32 %v3079_v8, %v3078_v22  ;;  %3518 = vmatmul.msk.f32.gmra.mxu0 %vm399_vm0, %v2642_v15  ;;  %v2370_v8 = vld [vmem:[#allocation2 + $0x1a1] sm:$0xff] }
 0x248   : > { %3453 = vmatmul.msk.f32.gmra.mxu2 %vm399_vm0, %v2093_v3  ;;  %v2869_v42 = vadd.f32 %v2797_v44, %v2594_v39  ;;  %v1771_v44 = vadd.f32 %v4426_v21, %v4420_v29 }
 0x249   : > { %3486 = vmatmul.msk.f32.gmra.mxu3 %vm399_vm0, %v2368_v62 }
 0x24a   : > { %v2905_v49 = vadd.f32 %v4632_v30, %v2869_v42 }
 0x24b   : > { %v2250_v41 = vpop.f32.mrf.mxu2 }
 0x24c   : > { %v2320_v43 = vadd.f32 %v2250_v41, %v2044_v20  ;;  %v1977_v11 = vpop.f32.mrf.mxu1  ;;  %v2525_v40 = vpop.f32.mrf.mxu3  ;;  %2937 = vst.msk [vmem:[%s4642_s12 + $0x60] sm:$0xff] %vm399_vm0, %v2905_v49  ;;  %v2980_v32 = vsel %vm399_vm0, %v2905_v49, 0.0  ;;  %v3038_v19 = vmul.f32 %v2905_v49, %v2905_v49  ;;  %v2644_v41 = vld [vmem:[#allocation2 + $0x19a] sm:$0xff] }
 0x24d   : > { %v2981_v26 = vadd.f32 %v2980_v32, %v2979_v48  ;;  %v2800_v24 = vpop.f32.mrf.mxu0  ;;  %v2045_v34 = vadd.f32 %v1977_v11, %v1770_v46 }
 0x24e   : > { %v2595_v22 = vadd.f32 %v2525_v40, %v2320_v43  ;;  %v3081_v14 = vsel %vm399_vm0, %v3038_v19, 0.0 }
 0x24f   : > { %3421 = vmatmul.msk.f32.gmra.mxu1 %vm399_vm0, %v2642_v15  ;;  %v3082_v25 = vadd.f32 %v3081_v14, %v3080_v27  ;;  %3519 = vmatmul.msk.f32.gmra.mxu0 %vm399_vm0, %v2643_v9 }
 0x250   : > { %3454 = vmatmul.msk.f32.gmra.mxu2 %vm399_vm0, %v2094_v13  ;;  %v2870_v47 = vadd.f32 %v2800_v24, %v2595_v22  ;;  %v2645_v24 = vld [vmem:[#allocation2 + $0x1a2] sm:$0xff] }
 0x251   : > { %3487 = vmatmul.msk.f32.gmra.mxu3 %vm399_vm0, %v2369_v63 }
 0x252   : > { %v2906_v28 = vadd.f32 %v4632_v30, %v2870_v47 }
 0x253   : > { %v2253_v3 = vpop.f32.mrf.mxu2 }
 0x254   : > { %v2321_v61 = vadd.f32 %v2253_v3, %v2045_v34  ;;  %v1980_v39 = vpop.f32.mrf.mxu1  ;;  %v2528_v33 = vpop.f32.mrf.mxu3  ;;  %2938 = vst.msk [vmem:[%s4642_s12 + $0x68] sm:$0xff] %vm399_vm0, %v2906_v28  ;;  %v2982_v62 = vsel %vm399_vm0, %v2906_v28, 0.0  ;;  %v3039_v48 = vmul.f32 %v2906_v28, %v2906_v28 }
 0x255   : > { %v2983_v27 = vadd.f32 %v2982_v62, %v2981_v26  ;;  %v2803_v42 = vpop.f32.mrf.mxu0  ;;  %v2046_v49 = vadd.f32 %v1980_v39, %v1771_v44  ;;  %v1772_v26 = vadd.f32 %v4437_v6, %v4431_v23  ;;  %v1773_v62 = vadd.f32 %v4449_v51, %v4443_v12 }
 0x256   : > { %v2596_v10 = vadd.f32 %v2528_v33, %v2321_v61  ;;  %v3083_v15 = vsel %vm399_vm0, %v3039_v48, 0.0  ;;  %v1774_v51 = vadd.f32 %v4461_v52, %v4455_v17  ;;  %v1775_v52 = vadd.f32 %v4474_v56, %v4468_v36 }
 0x257   : > { %3422 = vmatmul.msk.f32.gmra.mxu1 %vm399_vm0, %v2643_v9  ;;  %v3084_v20 = vadd.f32 %v3083_v15, %v3082_v25  ;;  %3520 = vmatmul.msk.f32.gmra.mxu0 %vm399_vm0, %v2644_v41  ;;  %v1776_v56 = vadd.f32 %v4486_v57, %v4480_v2  ;;  %v1777_v57 = vadd.f32 %v4498_v59, %v4492_v53 }
 0x258   : > { %3455 = vmatmul.msk.f32.gmra.mxu2 %vm399_vm0, %v2095_v4  ;;  %v2871_v43 = vadd.f32 %v2803_v42, %v2596_v10  ;;  %v1778_v59 = vadd.f32 %v4510_v1, %v4504_v54  ;;  %v1779_v1 = vadd.f32 %v4522_v50, %v4516_v37  ;;  %v1780_v50 = vadd.f32 %v4534_v18, %v4528_v60 }
 0x259   : > { %3488 = vmatmul.msk.f32.gmra.mxu3 %vm399_vm0, %v2370_v8  ;;  %v1781_v18 = vadd.f32 %v4546_v5, %v4540_v55  ;;  %v1782_v5 = vadd.f32 %v4558_v7, %v4552_v38  ;;  %v1783_v7 = vadd.f32 %v4570_v58, %v4564_v16 }
 0x25a   : > { %v2907_v40 = vadd.f32 %v4632_v30, %v2871_v43 }
 0x25b   : > { %v2256_v11 = vpop.f32.mrf.mxu2 }
 0x25c   : > { %v2322_v13 = vadd.f32 %v2256_v11, %v2046_v49  ;;  %v1983_v32 = vpop.f32.mrf.mxu1  ;;  %v2531_v19 = vpop.f32.mrf.mxu3  ;;  %2939 = vst.msk [vmem:[%s4642_s12 + $0x70] sm:$0xff] %vm399_vm0, %v2907_v40  ;;  %v2984_v29 = vsel %vm399_vm0, %v2907_v40, 0.0  ;;  %v3040_v21 = vmul.f32 %v2907_v40, %v2907_v40 }
 0x25d   : > { %v2985_v63 = vadd.f32 %v2984_v29, %v2983_v27  ;;  %v2806_v25 = vpop.f32.mrf.mxu0  ;;  %v2047_v9 = vadd.f32 %v1983_v32, %v1772_v26 }
 0x25e   : > { %v2597_v22 = vadd.f32 %v2531_v19, %v2322_v13  ;;  %v3085_v46 = vsel %vm399_vm0, %v3040_v21, 0.0 }
 0x25f   : > { %v3086_v14 = vadd.f32 %v3085_v46, %v3084_v20  ;;  %3521 = vmatmul.msk.f32.gmra.mxu0 %vm399_vm0, %v2645_v24 }
 0x260   : > { %v2872_v34 = vadd.f32 %v2806_v25, %v2597_v22 }
 0x262   : > { %v2908_v3 = vadd.f32 %v4632_v30, %v2872_v34 }
 0x263   : > { %v2259_v47 = vpop.f32.mrf.mxu2 }
 0x264   : > { %v2323_v28 = vadd.f32 %v2259_v47, %v2047_v9  ;;  %v1986_v61 = vpop.f32.mrf.mxu1  ;;  %v2534_v39 = vpop.f32.mrf.mxu3  ;;  %2940 = vst.msk [vmem:[%s4642_s12 + $0x78] sm:$0xff] %vm399_vm0, %v2908_v3  ;;  %v2986_v23 = vsel %vm399_vm0, %v2908_v3, 0.0  ;;  %v3041_v6 = vmul.f32 %v2908_v3, %v2908_v3 }
 0x265   : > { %v2987_v4 = vadd.f32 %v2986_v23, %v2985_v63  ;;  %v2809_v8 = vpop.f32.mrf.mxu0  ;;  %v2048_v27 = vadd.f32 %v1986_v61, %v1773_v62 }
 0x266   : > { %v2598_v33 = vadd.f32 %v2534_v39, %v2323_v28  ;;  %v3087_v48 = vsel %vm399_vm0, %v3041_v6, 0.0 }
 0x267   : > { %v3088_v10 = vadd.f32 %v3087_v48, %v3086_v14 }
 0x268   : > { %v2873_v44 = vadd.f32 %v2809_v8, %v2598_v33 }
 0x26a   : > { %v2909_v20 = vadd.f32 %v4632_v30, %v2873_v44 }
 0x26b   : > { %v2262_v15 = vpop.f32.mrf.mxu2 }
 0x26c   : > { %v2324_v42 = vadd.f32 %v2262_v15, %v2048_v27  ;;  %v1989_v41 = vpop.f32.mrf.mxu1  ;;  %v2537_v49 = vpop.f32.mrf.mxu3  ;;  %2941 = vst.msk [vmem:[%s4642_s12 + $0x80] sm:$0xff] %vm399_vm0, %v2909_v20  ;;  %v2988_v43 = vsel %vm399_vm0, %v2909_v20, 0.0  ;;  %v3042_v11 = vmul.f32 %v2909_v20, %v2909_v20 }
 0x26d   : > { %v2989_v12 = vadd.f32 %v2988_v43, %v2987_v4  ;;  %v2812_v19 = vpop.f32.mrf.mxu0  ;;  %v2049_v29 = vadd.f32 %v1989_v41, %v1774_v51 }
 0x26e   : > { %v2599_v40 = vadd.f32 %v2537_v49, %v2324_v42  ;;  %v3089_v13 = vsel %vm399_vm0, %v3042_v11, 0.0 }
 0x26f   : > { %v3090_v32 = vadd.f32 %v3089_v13, %v3088_v10 }
 0x270   : > { %v2874_v21 = vadd.f32 %v2812_v19, %v2599_v40 }
 0x272   : > { %v2910_v63 = vadd.f32 %v4632_v30, %v2874_v21 }
 0x273   : > { %v2265_v22 = vpop.f32.mrf.mxu2 }
 0x274   : > { %v2325_v26 = vadd.f32 %v2265_v22, %v2049_v29  ;;  %v1992_v46 = vpop.f32.mrf.mxu1  ;;  %v2540_v14 = vpop.f32.mrf.mxu3  ;;  %2942 = vst.msk [vmem:[%s4642_s12 + $0x88] sm:$0xff] %vm399_vm0, %v2910_v63  ;;  %v2990_v25 = vsel %vm399_vm0, %v2910_v63, 0.0  ;;  %v3043_v24 = vmul.f32 %v2910_v63, %v2910_v63 }
 0x275   : > { %v2991_v17 = vadd.f32 %v2990_v25, %v2989_v12  ;;  %v2815_v3 = vpop.f32.mrf.mxu0  ;;  %v2050_v28 = vadd.f32 %v1992_v46, %v1775_v52 }
 0x276   : > { %v2600_v9 = vadd.f32 %v2540_v14, %v2325_v26  ;;  %v3091_v34 = vsel %vm399_vm0, %v3043_v24, 0.0 }
 0x277   : > { %v3092_v47 = vadd.f32 %v3091_v34, %v3090_v32 }
 0x278   : > { %v2875_v61 = vadd.f32 %v2815_v3, %v2600_v9 }
 0x27a   : > { %v2911_v23 = vadd.f32 %v4632_v30, %v2875_v61 }
 0x27b   : > { %v2268_v39 = vpop.f32.mrf.mxu2 }
 0x27c   : > { %v2326_v6 = vadd.f32 %v2268_v39, %v2050_v28  ;;  %v1995_v33 = vpop.f32.mrf.mxu1  ;;  %v2543_v4 = vpop.f32.mrf.mxu3  ;;  %2943 = vst.msk [vmem:[%s4642_s12 + $0x90] sm:$0xff] %vm399_vm0, %v2911_v23  ;;  %v2992_v62 = vsel %vm399_vm0, %v2911_v23, 0.0  ;;  %v3044_v48 = vmul.f32 %v2911_v23, %v2911_v23 }
 0x27d   : > { %v2993_v36 = vadd.f32 %v2992_v62, %v2991_v17  ;;  %v2818_v44 = vpop.f32.mrf.mxu0  ;;  %v2051_v15 = vadd.f32 %v1995_v33, %v1776_v56 }
 0x27e   : > { %v2601_v10 = vadd.f32 %v2543_v4, %v2326_v6  ;;  %v3093_v8 = vsel %vm399_vm0, %v3044_v48, 0.0 }
 0x27f   : > { %v3094_v27 = vadd.f32 %v3093_v8, %v3092_v47 }
 0x280   : > { %v2876_v20 = vadd.f32 %v2818_v44, %v2601_v10 }
 0x282   : > { %v2912_v41 = vadd.f32 %v4632_v30, %v2876_v20 }
 0x283   : > { %v2271_v42 = vpop.f32.mrf.mxu2 }
 0x284   : > { %v2327_v49 = vadd.f32 %v2271_v42, %v2051_v15  ;;  %v1998_v43 = vpop.f32.mrf.mxu1  ;;  %v2546_v11 = vpop.f32.mrf.mxu3  ;;  %2944 = vst.msk [vmem:[%s4642_s12 + $0x98] sm:$0xff] %vm399_vm0, %v2912_v41  ;;  %v2994_v40 = vsel %vm399_vm0, %v2912_v41, 0.0  ;;  %v3045_v12 = vmul.f32 %v2912_v41, %v2912_v41 }
 0x285   : > { %v2995_v2 = vadd.f32 %v2994_v40, %v2993_v36  ;;  %v2821_v19 = vpop.f32.mrf.mxu0  ;;  %v2052_v29 = vadd.f32 %v1998_v43, %v1777_v57 }
 0x286   : > { %v2602_v51 = vadd.f32 %v2546_v11, %v2327_v49  ;;  %v3095_v13 = vsel %vm399_vm0, %v3045_v12, 0.0 }
 0x287   : > { %v3096_v32 = vadd.f32 %v3095_v13, %v3094_v27 }
 0x288   : > { %v2877_v21 = vadd.f32 %v2821_v19, %v2602_v51 }
 0x28a   : > { %v2913_v63 = vadd.f32 %v4632_v30, %v2877_v21 }
 0x28b   : > { %v2274_v22 = vpop.f32.mrf.mxu2 }
 0x28c   : > { %v2328_v26 = vadd.f32 %v2274_v22, %v2052_v29  ;;  %v2001_v46 = vpop.f32.mrf.mxu1  ;;  %v2549_v14 = vpop.f32.mrf.mxu3  ;;  %2945 = vst.msk [vmem:[%s4642_s12 + $0xa0] sm:$0xff] %vm399_vm0, %v2913_v63  ;;  %v2996_v25 = vsel %vm399_vm0, %v2913_v63, 0.0  ;;  %v3046_v24 = vmul.f32 %v2913_v63, %v2913_v63 }
 0x28d   : > { %v2997_v53 = vadd.f32 %v2996_v25, %v2995_v2  ;;  %v2824_v34 = vpop.f32.mrf.mxu0  ;;  %v2053_v47 = vadd.f32 %v2001_v46, %v1778_v59 }
 0x28e   : > { %v2603_v9 = vadd.f32 %v2549_v14, %v2328_v26  ;;  %v3097_v17 = vsel %vm399_vm0, %v3046_v24, 0.0 }
 0x28f   : > { %v3098_v52 = vadd.f32 %v3097_v17, %v3096_v32 }
 0x290   : > { %v2878_v3 = vadd.f32 %v2824_v34, %v2603_v9 }
 0x292   : > { %v2914_v61 = vadd.f32 %v4632_v30, %v2878_v3 }
 0x293   : > { %v2277_v28 = vpop.f32.mrf.mxu2 }
 0x294   : > { %v2329_v39 = vadd.f32 %v2277_v28, %v2053_v47  ;;  %v2004_v23 = vpop.f32.mrf.mxu1  ;;  %v2552_v6 = vpop.f32.mrf.mxu3  ;;  %2946 = vst.msk [vmem:[%s4642_s12 + $0xa8] sm:$0xff] %vm399_vm0, %v2914_v61  ;;  %v2998_v33 = vsel %vm399_vm0, %v2914_v61, 0.0  ;;  %v3047_v4 = vmul.f32 %v2914_v61, %v2914_v61 }
 0x295   : > { %v2999_v54 = vadd.f32 %v2998_v33, %v2997_v53  ;;  %v2827_v36 = vpop.f32.mrf.mxu0  ;;  %v2054_v56 = vadd.f32 %v2004_v23, %v1779_v1 }
 0x296   : > { %v2604_v62 = vadd.f32 %v2552_v6, %v2329_v39  ;;  %v3099_v48 = vsel %vm399_vm0, %v3047_v4, 0.0 }
 0x297   : > { %v3100_v10 = vadd.f32 %v3099_v48, %v3098_v52 }
 0x298   : > { %v2879_v8 = vadd.f32 %v2827_v36, %v2604_v62 }
 0x29a   : > { %v2915_v44 = vadd.f32 %v4632_v30, %v2879_v8 }
 0x29b   : > { %v2280_v27 = vpop.f32.mrf.mxu2 }
 0x29c   : > { %v2330_v15 = vadd.f32 %v2280_v27, %v2054_v56  ;;  %v2007_v20 = vpop.f32.mrf.mxu1  ;;  %v2555_v42 = vpop.f32.mrf.mxu3  ;;  %2947 = vst.msk [vmem:[%s4642_s12 + $0xb0] sm:$0xff] %vm399_vm0, %v2915_v44  ;;  %v3000_v41 = vsel %vm399_vm0, %v2915_v44, 0.0  ;;  %v3048_v49 = vmul.f32 %v2915_v44, %v2915_v44 }
 0x29d   : > { %v3001_v37 = vadd.f32 %v3000_v41, %v2999_v54  ;;  %v2830_v12 = vpop.f32.mrf.mxu0  ;;  %v2055_v51 = vadd.f32 %v2007_v20, %v1780_v50  ;;  %v4897_v20 = vld [vmem:[%s4949_s4] ss:$0 sm:$0xff] }
 0x29e   : > { %v2605_v43 = vadd.f32 %v2555_v42, %v2330_v15  ;;  %v3101_v11 = vsel %vm399_vm0, %v3048_v49, 0.0 }
 0x29f   : > { %v3102_v40 = vadd.f32 %v3101_v11, %v3100_v10  ;;  %v1784_v11 = vadd.f32 %v4582_v45, %v4576_v0  ;;  %v1785_v45 = vadd.f32 %v4594_v31, %v4588_v35  ;;  %v5071_v31 = vld [vmem:[#allocation4_spill] sm:$0xff] }
 0x2a0   : > { %v2880_v2 = vadd.f32 %v2830_v12, %v2605_v43 }
 0x2a2   : > { %v2916_v13 = vadd.f32 %v4632_v30, %v2880_v2 }
 0x2a3   : > { %v2283_v57 = vpop.f32.mrf.mxu2 }
 0x2a4   : > { %v2331_v32 = vadd.f32 %v2283_v57, %v2055_v51  ;;  %v2010_v19 = vpop.f32.mrf.mxu1  ;;  %v2558_v29 = vpop.f32.mrf.mxu3  ;;  %2948 = vst.msk [vmem:[%s4642_s12 + $0xb8] sm:$0xff] %vm399_vm0, %v2916_v13  ;;  %v3002_v21 = vsel %vm399_vm0, %v2916_v13, 0.0  ;;  %v3049_v22 = vmul.f32 %v2916_v13, %v2916_v13 }
 0x2a5   : > { %v3003_v60 = vadd.f32 %v3002_v21, %v3001_v37  ;;  %v2833_v14 = vpop.f32.mrf.mxu0  ;;  %v2056_v25 = vadd.f32 %v2010_v19, %v1781_v18 }
 0x2a6   : > { %v2606_v63 = vadd.f32 %v2558_v29, %v2331_v32  ;;  %v3103_v26 = vsel %vm399_vm0, %v3049_v22, 0.0 }
 0x2a7   : > { %v3104_v46 = vadd.f32 %v3103_v26, %v3102_v40 }
 0x2a8   : > { %v2881_v24 = vadd.f32 %v2833_v14, %v2606_v63 }
 0x2aa   : > { %v2917_v53 = vadd.f32 %v4632_v30, %v2881_v24 }
 0x2ab   : > { %v2286_v9 = vpop.f32.mrf.mxu2 }
 0x2ac   : > { %v2332_v59 = vadd.f32 %v2286_v9, %v2056_v25  ;;  %v2013_v17 = vpop.f32.mrf.mxu1  ;;  %v2561_v52 = vpop.f32.mrf.mxu3  ;;  %2949 = vst.msk [vmem:[%s4642_s12 + $0xc0] sm:$0xff] %vm399_vm0, %v2917_v53  ;;  %v3004_v34 = vsel %vm399_vm0, %v2917_v53, 0.0  ;;  %v3050_v47 = vmul.f32 %v2917_v53, %v2917_v53 }
 0x2ad   : > { %v3005_v55 = vadd.f32 %v3004_v34, %v3003_v60  ;;  %v2836_v39 = vpop.f32.mrf.mxu0  ;;  %v2057_v23 = vadd.f32 %v2013_v17, %v1782_v5 }
 0x2ae   : > { %v2607_v3 = vadd.f32 %v2561_v52, %v2332_v59  ;;  %v3105_v28 = vsel %vm399_vm0, %v3050_v47, 0.0 }
 0x2af   : > { %v3106_v61 = vadd.f32 %v3105_v28, %v3104_v46 }
 0x2b0   : > { %v2882_v6 = vadd.f32 %v2836_v39, %v2607_v3  ;;  %v5072_v3 = vld [vmem:[#allocation22_spill] sm:$0xff] }
 0x2b2   : > { %v2918_v4 = vadd.f32 %v4632_v30, %v2882_v6 }
 0x2b3   : > { %v2289_v33 = vpop.f32.mrf.mxu2 }
 0x2b4   : > { %v2333_v62 = vadd.f32 %v2289_v33, %v2057_v23  ;;  %v2016_v54 = vpop.f32.mrf.mxu1  ;;  %v2564_v1 = vpop.f32.mrf.mxu3  ;;  %2950 = vst.msk [vmem:[%s4642_s12 + $0xc8] sm:$0xff] %vm399_vm0, %v2918_v4  ;;  %v3006_v48 = vsel %vm399_vm0, %v2918_v4, 0.0  ;;  %v3051_v10 = vmul.f32 %v2918_v4, %v2918_v4 }
 0x2b5   : > { %v3007_v38 = vadd.f32 %v3006_v48, %v3005_v55  ;;  %v2839_v27 = vpop.f32.mrf.mxu0  ;;  %v2058_v44 = vadd.f32 %v2016_v54, %v1783_v7  ;;  %v1786_v55 = vadd.f32 %v5072_v3, %v5071_v31  ;;  %v5074_v7 = vld [vmem:[#allocation7_spill] sm:$0xff] }
 0x2b6   : > { %v2608_v36 = vadd.f32 %v2564_v1, %v2333_v62  ;;  %v3107_v56 = vsel %vm399_vm0, %v3051_v10, 0.0 }
 0x2b7   : > { %v3108_v8 = vadd.f32 %v3107_v56, %v3106_v61 }
 0x2b8   : > { %v2883_v30 = vadd.f32 %v2839_v27, %v2608_v36 }
 0x2ba   : > { %v2919_v42 = vadd.f32 %v4897_v20, %v2883_v30 }
 0x2bb   : > { %v2292_v15 = vpop.f32.mrf.mxu2 }
 0x2bc   : > { %v2334_v41 = vadd.f32 %v2292_v15, %v2058_v44  ;;  %v2019_v49 = vpop.f32.mrf.mxu1  ;;  %v2567_v43 = vpop.f32.mrf.mxu3  ;;  %2951 = vst.msk [vmem:[%s4642_s12 + $0xd0] sm:$0xff] %vm399_vm0, %v2919_v42  ;;  %v3008_v16 = vsel %vm399_vm0, %v2919_v42, 0.0  ;;  %v3052_v58 = vmul.f32 %v2919_v42, %v2919_v42 }
 0x2bd   : > { %v3009_v50 = vadd.f32 %v3008_v16, %v3007_v38  ;;  %v2842_v51 = vpop.f32.mrf.mxu0  ;;  %v2059_v2 = vadd.f32 %v2019_v49, %v1784_v11  ;;  %v5073_v38 = vld [vmem:[#allocation6_spill] sm:$0xff] }
 0x2be   : > { %v2609_v37 = vadd.f32 %v2567_v43, %v2334_v41  ;;  %v3109_v40 = vsel %vm399_vm0, %v3052_v58, 0.0  ;;  %v1787_v56 = vadd.f32 %v5074_v7, %v5073_v38 }
 0x2bf   : > { %v3110_v12 = vadd.f32 %v3109_v40, %v3108_v8 }
 0x2c0   : > { %v2884_v57 = vadd.f32 %v2842_v51, %v2609_v37 }
 0x2c2   : > { %v2920_v32 = vadd.f32 %v4897_v20, %v2884_v57 }
 0x2c3   : > { %v2295_v13 = vpop.f32.mrf.mxu2 }
 0x2c4   : > { %v2335_v19 = vadd.f32 %v2295_v13, %v2059_v2  ;;  %v2022_v29 = vpop.f32.mrf.mxu1  ;;  %v2570_v21 = vpop.f32.mrf.mxu3  ;;  %2952 = vst.msk [vmem:[%s4642_s12 + $0xd8] sm:$0xff] %vm399_vm0, %v2920_v32  ;;  %v3010_v22 = vsel %vm399_vm0, %v2920_v32, 0.0  ;;  %v3053_v63 = vmul.f32 %v2920_v32, %v2920_v32 }
 0x2c5   : > { %v3011_v0 = vadd.f32 %v3010_v22, %v3009_v50  ;;  %v2845_v46 = vpop.f32.mrf.mxu0  ;;  %v2060_v14 = vadd.f32 %v2022_v29, %v1785_v45 }
 0x2c6   : > { %v2610_v60 = vadd.f32 %v2570_v21, %v2335_v19  ;;  %v3111_v18 = vsel %vm399_vm0, %v3053_v63, 0.0 }
 0x2c7   : > { %v3112_v26 = vadd.f32 %v3111_v18, %v3110_v12 }
 0x2c8   : > { %v2885_v25 = vadd.f32 %v2845_v46, %v2610_v60 }
 0x2ca   : > { %v2921_v9 = vadd.f32 %v4897_v20, %v2885_v25 }
 0x2cb   : > { %v2298_v24 = vpop.f32.mrf.mxu2 }
 0x2cc   : > { %v2336_v53 = vadd.f32 %v2298_v24, %v2060_v14  ;;  %v2573_v59 = vpop.f32.mrf.mxu3  ;;  %v2025_v17 = vpop.f32.mrf.mxu1  ;;  %2953 = vst.msk [vmem:[%s4642_s12 + $0xe0] sm:$0xff] %vm399_vm0, %v2921_v9  ;;  %v3012_v52 = vsel %vm399_vm0, %v2921_v9, 0.0  ;;  %v3054_v34 = vmul.f32 %v2921_v9, %v2921_v9 }
 0x2cd   : > { %v3013_v35 = vadd.f32 %v3012_v52, %v3011_v0  ;;  %v2848_v61 = vpop.f32.mrf.mxu0  ;;  %v2061_v39 = vadd.f32 %v2025_v17, %v1786_v55 }
 0x2ce   : > { %v2611_v47 = vadd.f32 %v2573_v59, %v2336_v53  ;;  %v3113_v5 = vsel %vm399_vm0, %v3054_v34, 0.0 }
 0x2cf   : > { %v3114_v28 = vadd.f32 %v3113_v5, %v3112_v26 }
 0x2d0   : > { %v2886_v23 = vadd.f32 %v2848_v61, %v2611_v47 }
 0x2d2   : > { %v2922_v33 = vadd.f32 %v4897_v20, %v2886_v23 }
 0x2d3   : > { %v2301_v6 = vpop.f32.mrf.mxu2 }
 0x2d4   : > { %v2337_v4 = vadd.f32 %v2301_v6, %v2061_v39  ;;  %v2576_v62 = vpop.f32.mrf.mxu3  ;;  %2954 = vst.msk [vmem:[%s4642_s12 + $0xe8] sm:$0xff] %vm399_vm0, %v2922_v33  ;;  %v3014_v54 = vsel %vm399_vm0, %v2922_v33, 0.0  ;;  %v3055_v1 = vmul.f32 %v2922_v33, %v2922_v33  ;;  %v2028_v36 = vpop.f32.mrf.mxu1 }
 0x2d5   : > { %v3015_v10 = vadd.f32 %v3014_v54, %v3013_v35  ;;  %v2851_v44 = vpop.f32.mrf.mxu0  ;;  %v2062_v30 = vadd.f32 %v2028_v36, %v1787_v56 }
 0x2d6   : > { %v2612_v48 = vadd.f32 %v2576_v62, %v2337_v4  ;;  %v3115_v8 = vsel %vm399_vm0, %v3055_v1, 0.0 }
 0x2d7   : > { %v3116_v27 = vadd.f32 %v3115_v8, %v3114_v28 }
 0x2d8   : > { %v2887_v15 = vadd.f32 %v2851_v44, %v2612_v48 }
 0x2da   : > { %v2923_v41 = vadd.f32 %v4897_v20, %v2887_v15 }
 0x2db   : > { %v2304_v42 = vpop.f32.mrf.mxu2 }
 0x2dc   : > { %v2338_v49 = vadd.f32 %v2304_v42, %v2062_v30  ;;  %v2579_v43 = vpop.f32.mrf.mxu3  ;;  %2955 = vst.msk [vmem:[%s4642_s12 + $0xf0] sm:$0xff] %vm399_vm0, %v2923_v41  ;;  %v3016_v16 = vsel %vm399_vm0, %v2923_v41, 0.0  ;;  %v3056_v58 = vmul.f32 %v2923_v41, %v2923_v41 }
 0x2dd   : > { %v3017_v50 = vadd.f32 %v3016_v16, %v3015_v10  ;;  %v2854_v12 = vpop.f32.mrf.mxu0 }
 0x2de   : > { %v2613_v37 = vadd.f32 %v2579_v43, %v2338_v49  ;;  %v3117_v11 = vsel %vm399_vm0, %v3056_v58, 0.0 }
 0x2df   : > { %v3118_v40 = vadd.f32 %v3117_v11, %v3116_v27 }
 0x2e0   : > { %v2888_v51 = vadd.f32 %v2854_v12, %v2613_v37 }
 0x2e2   : > { %v2924_v2 = vadd.f32 %v4897_v20, %v2888_v51 }
 0x2e4   : > { %2956 = vst.msk [vmem:[%s4642_s12 + $0xf8] sm:$0xff] %vm399_vm0, %v2924_v2  ;;  %v3018_v57 = vsel %vm399_vm0, %v2924_v2, 0.0  ;;  %v3057_v13 = vmul.f32 %v2924_v2, %v2924_v2 }
 0x2e5   : > { %v3019_v32 = vadd.f32 %v3018_v57, %v3017_v50 }
 0x2e6   : > { %v3119_v19 = vsel %vm399_vm0, %v3057_v13, 0.0 }
 0x2e7   : > { %v3020_v29 = vrot.slane %v3019_v32, 4  ;;  %v3120_v21 = vadd.f32 %v3119_v19, %v3118_v40 }
 0x2e9   : > { %v3021_v22 = vadd.f32 %v3020_v29, %v3019_v32  ;;  %v3121_v63 = vrot.slane %v3120_v21, 4 }
 0x2eb   : > { %v3022_v60 = vrot.slane %v3021_v22, 2  ;;  %v3122_v0 = vadd.f32 %v3121_v63, %v3120_v21 }
 0x2ed   : > { %v3023_v45 = vadd.f32 %v3022_v60, %v3021_v22  ;;  %v3123_v18 = vrot.slane %v3122_v0, 2 }
 0x2ef   : > { %v3024_v26 = vrot.slane %v3023_v45, 1  ;;  %v3124_v46 = vadd.f32 %v3123_v18, %v3122_v0 }
 0x2f1   : > { %v3125_v20 = vrot.slane %v3124_v46, 1  ;;  %v3025_v14 = vadd.f32 %v3024_v26, %v3023_v45 }
 0x2f3   : > { %v3126_v25 = vadd.f32 %v3125_v20, %v3124_v46 }
 0x2f5   : > { %v3128_v24 = vsel %vm3127_vm3, %v3025_v14, %v3126_v25 }
 0x2f6   : > { %3129 = vst.msk [vmem:[%s262_s17] sm:$0x3] %vm402_vm1, %v3128_v24 }
 0x2f7 PF: > { %s17_s21 = sadd.s32 1, %s3550_s21  }
 0x2f8   : > { %p14_p4 = scmp.ge.s32.totalorder %s17_s21, 4  }
 0x2fa   :  { %16 = sbr.rel (!%p14_p4) target bundleno = 1 (0x1), region = 93 }

</bundles_post_ra>
